<compile_context>
chip_gen: v7x
topology: tpu7x:2x2x1
jax: 0.10.0
libtpu: 0.0.40
codegen_flags: <defaults>
</compile_context>

<pallas_src>
from functools import partial

import jax
import jax.numpy as jnp
from jax.experimental import pallas as pl
from jax.experimental.pallas import tpu as pltpu


# ----------------------------------------------------------------------------
# Chip-aware knobs
# ----------------------------------------------------------------------------
_TPU_INFO_CACHE = []


def _vmem_capacity_bytes():
    if not _TPU_INFO_CACHE:
        cap = None
        try:
            cap = getattr(pltpu.get_tpu_info(), "vmem_capacity_bytes", None)
        except Exception:
            cap = None
        _TPU_INFO_CACHE.append(cap)
    return _TPU_INFO_CACHE[0]


def _vmem_limit_bytes():
    cap = _vmem_capacity_bytes()
    if not cap:
        return 48 * 1024 * 1024          # safe on every generation (v7x: 64 MiB phys)
    # Leave headroom for double buffers / compiler-internal scratch.
    return int(min(cap - 16 * 1024 * 1024, 64 * 1024 * 1024))


def _default_pw_rows():
    cap = _vmem_capacity_bytes()
    if cap is not None and cap <= 64 * 1024 * 1024:
        return 512                        # v7x: smaller VMEM, keep 512-row tiles
    return 1024                           # v5e / v6e: 128 MiB VMEM, bigger tiles


def _round_up_128(v):
    return -(-v // 128) * 128


def _pad_last(x, n):
    c = x.shape[-1]
    if c == n:
        return x
    pad_width = [(0, 0)] * (x.ndim - 1) + [(0, n - c)]
    return jnp.pad(x, pad_width)


def _pad_w(w, cout_p, cin_p):
    return jnp.pad(w, ((0, cout_p - w.shape[0]), (0, cin_p - w.shape[1])))


def _pad_vec(v, n):
    return jnp.pad(v, (0, n - v.shape[0]))


# ----------------------------------------------------------------------------
# Pointwise (1x1) conv (possibly fused over several inputs) + BN + activation
# (+ optional fused residual add, + optional multiple lane-aligned outputs)
# ----------------------------------------------------------------------------
def _pw_kernel(*refs, n_in, has_res, out_splits, act):
    x_refs = refs[:n_in]
    w_refs = refs[n_in:2 * n_in]
    scale_ref = refs[2 * n_in]
    bias_ref = refs[2 * n_in + 1]
    pos = 2 * n_in + 2
    res_ref = refs[pos] if has_res else None
    pos += 1 if has_res else 0
    o_refs = refs[pos:]

    acc = None
    for xr, wr in zip(x_refs, w_refs):
        # bf16 operands feed the MXU at full rate; accumulate in f32.
        y = jnp.dot(xr[...], wr[...], preferred_element_type=jnp.float32)
        acc = y if acc is None else acc + y

    y = acc * scale_ref[...] + bias_ref[...]     # folded BN (f32 on the VPU)
    if act == "silu":
        y = y * jax.nn.sigmoid(y)
    elif act == "relu":
        y = jnp.maximum(y, 0.0)
    if has_res:                                  # fused residual add (RepLKBlock)
        y = y + res_ref[...].astype(jnp.float32)

    off = 0
    for o_ref, c in zip(o_refs, out_splits):     # splits are 128-multiples -> lane aligned
        o_ref[...] = y[:, off:off + c].astype(o_ref.dtype)
        off += c


def pointwise_conv_bn_act(xs, ws, scale, bias, act, *, res=None, out_splits=None,
                          out_dtype=jnp.bfloat16, tm=None):
    """sum_i conv1x1(x_i; w_i) + BN(scale, bias) + act [+ res].

    xs: NHWC array or list of them (same N,H,W).  ws: (Cout, Cin_i) each.
    Channel dims are expected to be 128-multiples (padded by the caller)."""
    if not isinstance(xs, (list, tuple)):
        xs, ws = [xs], [ws]
    N, H, W, _ = xs[0].shape
    Cout = ws[0].shape[0]
    if out_splits is None:
        out_splits = [Cout]
    assert sum(out_splits) == Cout
    M = N * H * W

    if tm is None:
        tm = _default_pw_rows()
    TM = tm if M > tm else M                     # full extent if the array is small
    grid = (pl.cdiv(M, TM),)                     # ragged last block handled by Pallas

    # bf16 activations / weights host-side: half the HBM DMA bytes per tile.
    x2s = [x.reshape(M, x.shape[-1]).astype(jnp.bfloat16) for x in xs]
    wts = [jnp.transpose(w).astype(jnp.bfloat16) for w in ws]      # (Cin_i, Cout)
    scale2 = scale.reshape(1, Cout).astype(jnp.float32)
    bias2 = bias.reshape(1, Cout).astype(jnp.float32)
    n_in = len(x2s)

    operands = list(x2s) + list(wts) + [scale2, bias2]
    in_specs = (
        [pl.BlockSpec((TM, x2.shape[-1]), lambda i: (i, 0)) for x2 in x2s]
        + [pl.BlockSpec((wt.shape[0], Cout), lambda i: (0, 0)) for wt in wts]
        + [pl.BlockSpec((1, Cout), lambda i: (0, 0)),
           pl.BlockSpec((1, Cout), lambda i: (0, 0))]
    )
    has_res = res is not None
    if has_res:
        operands.append(res.reshape(M, Cout).astype(jnp.bfloat16))
        in_specs.append(pl.BlockSpec((TM, Cout), lambda i: (i, 0)))

    out_shapes = [jax.ShapeDtypeStruct((M, c), out_dtype) for c in out_splits]
    out_specs = [pl.BlockSpec((TM, c), lambda i: (i, 0)) for c in out_splits]
    single = len(out_splits) == 1

    outs = pl.pallas_call(
        partial(_pw_kernel, n_in=n_in, has_res=has_res,
                out_splits=tuple(out_splits), act=act),
        out_shape=out_shapes[0] if single else out_shapes,
        grid_spec=pltpu.PrefetchScalarGridSpec(
            num_scalar_prefetch=0,
            grid=grid,
            in_specs=in_specs,
            out_specs=out_specs[0] if single else out_specs,
        ),
        compiler_params=pltpu.CompilerParams(
            dimension_semantics=("parallel",),
            vmem_limit_bytes=_vmem_limit_bytes(),
        ),
    )(*operands)

    if single:
        return outs.reshape(N, H, W, Cout)
    return [o.reshape(N, H, W, c) for o, c in zip(outs, out_splits)]


# ----------------------------------------------------------------------------
# Re-param large-kernel depthwise conv (27x27 with 5x5 merged in) + ReLU
# ----------------------------------------------------------------------------
def _pick_row_strip(H, W, TC, budget_bytes=64 * 1024):
    """Largest divisor of H whose f32 strip (RS, W, TC) stays ~16 vregs."""
    max_rows = max(1, budget_bytes // (W * TC * 4))
    rs = 1
    for d in range(1, H + 1):
        if H % d == 0 and d <= max_rows:
            rs = d
    return rs


def _dw_lk_kernel(x_ref, w_ref, bias_ref, o_ref, xp_ref, *, KB, H, W, pad, RS):
    # x_ref   : (H, W, TC) bf16  unpadded input (one image, one 128-lane block)
    # w_ref   : (KB, KB, TC) f32 merged DW weights (BN scales + 5x5 folded in)
    # bias_ref: (1, TC)  f32     combined folded BN biases
    # xp_ref  : (Hp, Wp, TC) f32 VMEM scratch: zero-padded window
    TC = x_ref.shape[-1]
    Hp, Wp = H + 2 * pad, W + 2 * pad

    # Build the padded window: zero only the halo bands, copy the interior once.
    xp_ref[pl.ds(0, pad), :, :] = jnp.zeros((pad, Wp, TC), xp_ref.dtype)
    xp_ref[pl.ds(pad + H, pad), :, :] = jnp.zeros((pad, Wp, TC), xp_ref.dtype)
    xp_ref[pl.ds(pad, H), pl.ds(0, pad), :] = jnp.zeros((H, pad, TC), xp_ref.dtype)
    xp_ref[pl.ds(pad, H), pl.ds(pad + W, pad), :] = jnp.zeros((H, pad, TC), xp_ref.dtype)
    xp_ref[pl.ds(pad, H), pl.ds(pad, W), :] = x_ref[...].astype(xp_ref.dtype)

    bias = bias_ref[...].reshape(1, 1, TC)
    n_strips = H // RS                      # RS divides H by construction

    @pl.loop(0, n_strips)
    def _(s):
        r0 = s * RS

        def kh_body(kh, acc):
            # One clean weight-row load per kh (dynamic index on the leading axis).
            wrow = w_ref[kh]                                   # (KB, TC) f32
            for kw in range(KB):                               # static unroll
                # Dynamic offset only on the leading (untiled) axis; the sublane
                # (W) offset kw is static, and each tap touches just RS rows.
                win = xp_ref[pl.ds(r0 + kh, RS), pl.ds(kw, W), :]
                acc = acc + win * wrow[kw:kw + 1, :]
            return acc

        # Strip accumulator lives in vregs (fori_loop carry), not VMEM scratch.
        acc = jax.lax.fori_loop(0, KB, kh_body,
                                jnp.zeros((RS, W, TC), jnp.float32))
        y = jnp.maximum(acc + bias, 0.0)                       # lk_nonlinear (ReLU)
        o_ref[pl.ds(r0, RS), :, :] = y.astype(o_ref.dtype)     # one store per strip


def dw_reparam_lk_relu(x_nhwc, w_merged, bias, KB, *, out_dtype=jnp.bfloat16):
    """Depthwise 'same' KBxKB conv (5x5 already merged into weights), + ReLU."""
    N, H, W, C = x_nhwc.shape
    pad = KB // 2
    Hp, Wp = H + 2 * pad, W + 2 * pad

    TC = 128 if C % 128 == 0 else C          # caller pads C to a 128-multiple
    CB = C // TC
    RS = _pick_row_strip(H, W, TC)
    # TODO(synk): for very large feature maps (>= ~224^2 per 128-lane block) add
    # an H-stripe grid axis with a pad-row halo so the padded window + blocks
    # stay inside v7x's 64 MiB VMEM.

    out = pl.pallas_call(
        partial(_dw_lk_kernel, KB=KB, H=H, W=W, pad=pad, RS=RS),
        out_shape=jax.ShapeDtypeStruct((N, H, W, C), out_dtype),
        grid_spec=pltpu.PrefetchScalarGridSpec(
            num_scalar_prefetch=0,
            # Channel block outermost: the (KB,KB,TC) weights / bias stay
            # resident across images instead of being re-DMA'd per image.
            grid=(CB, N),
            in_specs=[
                pl.BlockSpec((pl.Squeezed(), H, W, TC), lambda c, n: (n, 0, 0, c)),
                pl.BlockSpec((KB, KB, TC), lambda c, n: (0, 0, c)),
                pl.BlockSpec((1, TC), lambda c, n: (0, c)),
            ],
            out_specs=pl.BlockSpec((pl.Squeezed(), H, W, TC),
                                   lambda c, n: (n, 0, 0, c)),
            scratch_shapes=[
                pltpu.VMEM((Hp, Wp, TC), jnp.float32),   # padded window only
            ],
        ),
        compiler_params=pltpu.CompilerParams(
            dimension_semantics=("parallel", "parallel"),
            vmem_limit_bytes=_vmem_limit_bytes(),
        ),
    )(x_nhwc.astype(jnp.bfloat16),
      w_merged.astype(jnp.float32),
      bias.reshape(1, C).astype(jnp.float32))
    return out


# ----------------------------------------------------------------------------
# Parameter setup (deterministic, synthetic) and module forward
# ----------------------------------------------------------------------------
def fold_bn(gamma, beta, mean, var, eps=1e-5):
    scale = gamma / jnp.sqrt(var + eps)
    shift = beta - mean * scale
    return scale, shift


def init_params(key, c1, c2, e=0.5, block_lk_size=27, small_kernel=5):
    c_ = int(c2 * e)
    keys = iter(jax.random.split(key, 64))

    def conv_w(cout, cin, s=0.2):
        return jax.random.normal(next(keys), (cout, cin), jnp.float32) * s

    def bn(c):
        g = 1.0 + 0.1 * jax.random.normal(next(keys), (c,), jnp.float32)
        b = 0.1 * jax.random.normal(next(keys), (c,), jnp.float32)
        m = 0.1 * jax.random.normal(next(keys), (c,), jnp.float32)
        v = 0.5 + 0.1 * jnp.abs(jax.random.normal(next(keys), (c,), jnp.float32))
        return (g, b, m, v)

    return {
        "c_": c_,
        "cv1_w": conv_w(c_, c1), "cv1_bn": bn(c_),
        "cv2_w": conv_w(c_, c1), "cv2_bn": bn(c_),
        "cv3_w": conv_w(c_, c_), "cv3_bn": bn(c_),
        "cv4_w": conv_w(c2, 2 * c_), "cv4_bn": bn(c2),
        # RepLKBlock(c_, c_)
        "pre_bn": bn(c_),
        "pw1_w": conv_w(c_, c_), "pw1_bn": bn(c_),
        "pw2_w": conv_w(c_, c_), "pw2_bn": bn(c_),
        "lk_big_w": jax.random.normal(
            next(keys), (block_lk_size, block_lk_size, c_), jnp.float32) * 0.05,
        "lk_big_bn": bn(c_),
        "lk_small_w": jax.random.normal(
            next(keys), (small_kernel, small_kernel, c_), jnp.float32) * 0.1,
        "lk_small_bn": bn(c_),
        "KB": block_lk_size,
        "KS": small_kernel,
    }


def csc_replk_forward(x_nchw, p):
    """CSCRepLKBlock.forward:  cv4(cat(cv3(m(cv1(x))), cv2(x)))"""
    x = jnp.transpose(x_nchw, (0, 2, 3, 1))  # NCHW -> NHWC
    c_ = p["c_"]
    c1 = x.shape[-1]
    c2 = p["cv4_w"].shape[0]
    c1p, c_p, c2p = _round_up_128(c1), _round_up_128(c_), _round_up_128(c2)

    # Lane-dense 128-multiple channels everywhere (zero-padded weights/affines
    # keep the padded lanes exactly zero through the whole block).
    xh = _pad_last(x, c1p).astype(jnp.bfloat16)

    # cv1 + cv2 fused: x read once, two lane-aligned outputs (no channel slice).
    s1, b1 = fold_bn(*p["cv1_bn"])
    s2, b2 = fold_bn(*p["cv2_bn"])
    w12 = jnp.concatenate([_pad_w(p["cv1_w"], c_p, c1p),
                           _pad_w(p["cv2_w"], c_p, c1p)], axis=0)
    t1, y2 = pointwise_conv_bn_act(
        xh, w12,
        jnp.concatenate([_pad_vec(s1, c_p), _pad_vec(s2, c_p)]),
        jnp.concatenate([_pad_vec(b1, c_p), _pad_vec(b2, c_p)]),
        "silu", out_splits=[c_p, c_p])

    # ---- RepLKBlock(c_, c_) ----
    # prelkb_bn (per-channel affine) folded exactly into pw1's 1x1 conv.
    s0, b0 = fold_bn(*p["pre_bn"])
    sp1, bp1 = fold_bn(*p["pw1_bn"])
    w1_eff = _pad_w(p["pw1_w"] * s0[None, :], c_p, c_p)
    bias1 = _pad_vec(sp1 * (p["pw1_w"] @ b0) + bp1, c_p)
    p1 = pointwise_conv_bn_act(t1, w1_eff, _pad_vec(sp1, c_p), bias1, "relu")

    # large_kernel: DW 27x27 conv+BN + DW 5x5 conv+BN, merged host-side
    # (exact RepLK re-parameterization), then ReLU.
    sb, bb = fold_bn(*p["lk_big_bn"])
    ss, bs = fold_bn(*p["lk_small_bn"])
    KB, KS = p["KB"], p["KS"]
    off = (KB - KS) // 2
    wb = p["lk_big_w"] * sb[None, None, :]
    ws_ = p["lk_small_w"] * ss[None, None, :]
    w_merged = _pad_last(wb.at[off:off + KS, off:off + KS, :].add(ws_), c_p)
    lk = dw_reparam_lk_relu(p1, w_merged, _pad_vec(bb + bs, c_p), KB)

    # pw2: 1x1 conv + BN (no act); residual add (drop_path(0)=Identity) fused
    # into the kernel's store -> no separate plain-JAX add pass.
    sp2, bp2 = fold_bn(*p["pw2_bn"])
    r = pointwise_conv_bn_act(lk, _pad_w(p["pw2_w"], c_p, c_p),
                              _pad_vec(sp2, c_p), _pad_vec(bp2, c_p), "none",
                              res=t1)

    # cv3 on the RepLK branch
    s3, b3 = fold_bn(*p["cv3_bn"])
    y1 = pointwise_conv_bn_act(r, _pad_w(p["cv3_w"], c_p, c_p),
                               _pad_vec(s3, c_p), _pad_vec(b3, c_p), "silu")

    # cv4(cat(y1, y2)) expressed as two matmuls summed: no narrow concat store.
    s4, b4 = fold_bn(*p["cv4_bn"])
    out = pointwise_conv_bn_act(
        [y1, y2],
        [_pad_w(p["cv4_w"][:, :c_], c2p, c_p), _pad_w(p["cv4_w"][:, c_:], c2p, c_p)],
        _pad_vec(s4, c2p), _pad_vec(b4, c2p), "silu",
        out_dtype=jnp.float32)

    out = out[..., :c2]
    return jnp.transpose(out, (0, 3, 1, 2))  # NHWC -> NCHW


# ----------------------------------------------------------------------------
# Pure-JAX (f32) reference for tolerance checking (bf16 kernels vs f32 math)
# ----------------------------------------------------------------------------
def ref_forward(x_nchw, p):
    f = jnp.float32
    x = jnp.transpose(x_nchw, (0, 2, 3, 1)).astype(f)

    def pw(x, w, bn, act):
        s, b = fold_bn(*bn)
        y = jnp.einsum("nhwc,oc->nhwo", x, w.astype(f)) * s + b
        if act == "silu":
            y = y * jax.nn.sigmoid(y)
        elif act == "relu":
            y = jnp.maximum(y, 0.0)
        return y

    def dw(x, w, bn):
        K, _, C = w.shape
        s, b = fold_bn(*bn)
        y = jax.lax.conv_general_dilated(
            x, w.reshape(K, K, 1, C), (1, 1), "SAME",
            dimension_numbers=("NHWC", "HWIO", "NHWC"), feature_group_count=C)
        return y * s + b

    t1 = pw(x, p["cv1_w"], p["cv1_bn"], "silu")
    y2 = pw(x, p["cv2_w"], p["cv2_bn"], "silu")
    s0, b0 = fold_bn(*p["pre_bn"])
    o = t1 * s0 + b0
    o = pw(o, p["pw1_w"], p["pw1_bn"], "relu")
    lk = dw(o, p["lk_big_w"], p["lk_big_bn"]) + dw(o, p["lk_small_w"], p["lk_small_bn"])
    lk = jnp.maximum(lk, 0.0)
    p2 = pw(lk, p["pw2_w"], p["pw2_bn"], "none")
    r = t1 + p2
    y1 = pw(r, p["cv3_w"], p["cv3_bn"], "silu")
    out = pw(jnp.concatenate([y1, y2], axis=-1), p["cv4_w"], p["cv4_bn"], "silu")
    return jnp.transpose(out, (0, 3, 1, 2))


if __name__ == "__main__":
    key = jax.random.PRNGKey(0)
    kx, kp = jax.random.split(key)

    c1, c2 = 8, 8
    N, H, W = 2, 16, 16

    x = jax.random.normal(kx, (N, c1, H, W), jnp.float32)
    params = init_params(kp, c1, c2)

    fwd = jax.jit(lambda inp: csc_replk_forward(inp, params))
    out = fwd(x)
    jax.block_until_ready(out)

    assert out.shape == (N, c2, H, W), out.shape
    assert bool(jnp.all(jnp.isfinite(out)))

    # Tolerance check vs the pure-JAX f32 reference (bf16 intermediates).
    ref = jax.jit(lambda inp: ref_forward(inp, params))(x)
    jax.block_until_ready(ref)
    err = float(jnp.max(jnp.abs(out.astype(jnp.float32) - ref))) / \
        (float(jnp.max(jnp.abs(ref))) + 1e-6)
    assert err < 0.08, f"mismatch vs pure-JAX reference: normalized max err = {err:.4f}"

    print("KERNEL_OK")
</pallas_src>

<mosaic_0001>
module attributes {stable_mosaic.version = 11 : i64} {
  func.func @_pw_kernel(%arg0: i32, %arg1: memref<512x128xbf16, #tpu.memory_space<vmem>>, %arg2: memref<128x128xbf16, #tpu.memory_space<vmem>>, %arg3: memref<1x128xf32, #tpu.memory_space<vmem>>, %arg4: memref<1x128xf32, #tpu.memory_space<vmem>>, %arg5: memref<512x128xbf16, #tpu.memory_space<vmem>>) attributes {dimension_semantics = [#tpu.dimension_semantics<parallel>], iteration_bounds = array<i64: 1>, scalar_prefetch = 0 : i64, scratch_operands = 0 : i64, tpu.core_type = #tpu.core_type<tc>, window_params = [{transform_indices = @transform_0, window_bounds = array<i64: 512, 128>}, {pipeline_mode = #tpu.pipeline_mode<synchronous>, transform_indices = @transform_1, window_bounds = array<i64: 128, 128>}, {pipeline_mode = #tpu.pipeline_mode<synchronous>, transform_indices = @transform_2, window_bounds = array<i64: 1, 128>}, {pipeline_mode = #tpu.pipeline_mode<synchronous>, transform_indices = @transform_3, window_bounds = array<i64: 1, 128>}, {transform_indices = @transform_4, window_bounds = array<i64: 512, 128>}]} {
    %c0 = arith.constant 0 : index
    %c0_0 = arith.constant 0 : index
    %0 = vector.load %arg1[%c0, %c0_0] : memref<512x128xbf16, #tpu.memory_space<vmem>>, vector<512x128xbf16>
    %c0_1 = arith.constant 0 : index
    %c0_2 = arith.constant 0 : index
    %1 = vector.load %arg2[%c0_1, %c0_2] : memref<128x128xbf16, #tpu.memory_space<vmem>>, vector<128x128xbf16>
    %cst = arith.constant dense<0.000000e+00> : vector<512x128xf32>
    %2 = tpu.matmul %0, %1, %cst {dimension_numbers = #tpu.dot_dimension_numbers<[1], [0], [0], [1], [0, 0, 1, 1], [], []>} : vector<512x128xbf16>, vector<128x128xbf16>, vector<512x128xf32> -> vector<512x128xf32>
    %c0_3 = arith.constant 0 : index
    %c0_4 = arith.constant 0 : index
    %3 = vector.load %arg3[%c0_3, %c0_4] : memref<1x128xf32, #tpu.memory_space<vmem>>, vector<1x128xf32>
    %4 = vector.broadcast %3 : vector<1x128xf32> to vector<512x128xf32>
    %5 = arith.mulf %2, %4 : vector<512x128xf32>
    %c0_5 = arith.constant 0 : index
    %c0_6 = arith.constant 0 : index
    %6 = vector.load %arg4[%c0_5, %c0_6] : memref<1x128xf32, #tpu.memory_space<vmem>>, vector<1x128xf32>
    %7 = vector.broadcast %6 : vector<1x128xf32> to vector<512x128xf32>
    %8 = arith.addf %5, %7 : vector<512x128xf32>
    %cst_7 = arith.constant 0.000000e+00 : f32
    %9 = vector.broadcast %cst_7 : f32 to vector<512x128xf32>
    %10 = arith.maximumf %8, %9 : vector<512x128xf32>
    %11 = arith.truncf %10 : vector<512x128xf32> to vector<512x128xbf16>
    %c0_8 = arith.constant 0 : index
    %c0_9 = arith.constant 0 : index
    %12 = vector.load %arg5[%c0_8, %c0_9] : memref<512x128xbf16, #tpu.memory_space<vmem>>, vector<512x128xbf16>
    tpu.vector_store %arg5[%c0_8, %c0_9], %11 {strides = array<i32>} : memref<512x128xbf16, #tpu.memory_space<vmem>>, vector<512x128xbf16>,
    return
  }
  func.func @transform_0(%arg0: i32) -> (i32, i32) {
    %c0_i32 = arith.constant 0 : i32
    %c0_i32_0 = arith.constant 0 : i32
    return %arg0, %c0_i32 : i32, i32
  }
  func.func @transform_1(%arg0: i32) -> (i32, i32) {
    %c0_i32 = arith.constant 0 : i32
    %c0_i32_0 = arith.constant 0 : i32
    %c0_i32_1 = arith.constant 0 : i32
    return %c0_i32, %c0_i32_0 : i32, i32
  }
  func.func @transform_2(%arg0: i32) -> (i32, i32) {
    %c0_i32 = arith.constant 0 : i32
    %c0_i32_0 = arith.constant 0 : i32
    %c0_i32_1 = arith.constant 0 : i32
    return %c0_i32, %c0_i32_0 : i32, i32
  }
  func.func @transform_3(%arg0: i32) -> (i32, i32) {
    %c0_i32 = arith.constant 0 : i32
    %c0_i32_0 = arith.constant 0 : i32
    %c0_i32_1 = arith.constant 0 : i32
    return %c0_i32, %c0_i32_0 : i32, i32
  }
  func.func @transform_4(%arg0: i32) -> (i32, i32) {
    %c0_i32 = arith.constant 0 : i32
    %c0_i32_0 = arith.constant 0 : i32
    return %arg0, %c0_i32 : i32, i32
  }
}

module attributes {stable_mosaic.version = 11 : i64} {
  func.func @_pw_kernel(%arg0: i32, %arg1: memref<512x128xbf16, #tpu.memory_space<vmem>>, %arg2: memref<128x256xbf16, #tpu.memory_space<vmem>>, %arg3: memref<1x256xf32, #tpu.memory_space<vmem>>, %arg4: memref<1x256xf32, #tpu.memory_space<vmem>>, %arg5: memref<512x128xbf16, #tpu.memory_space<vmem>>, %arg6: memref<512x128xbf16, #tpu.memory_space<vmem>>) attributes {dimension_semantics = [#tpu.dimension_semantics<parallel>], iteration_bounds = array<i64: 1>, scalar_prefetch = 0 : i64, scratch_operands = 0 : i64, tpu.core_type = #tpu.core_type<tc>, window_params = [{transform_indices = @transform_0, window_bounds = array<i64: 512, 128>}, {pipeline_mode = #tpu.pipeline_mode<synchronous>, transform_indices = @transform_1, window_bounds = array<i64: 128, 256>}, {pipeline_mode = #tpu.pipeline_mode<synchronous>, transform_indices = @transform_2, window_bounds = array<i64: 1, 256>}, {pipeline_mode = #tpu.pipeline_mode<synchronous>, transform_indices = @transform_3, window_bounds = array<i64: 1, 256>}, {transform_indices = @transform_4, window_bounds = array<i64: 512, 128>}, {transform_indices = @transform_5, window_bounds = array<i64: 512, 128>}]} {
    %c0 = arith.constant 0 : index
    %c0_0 = arith.constant 0 : index
    %0 = vector.load %arg1[%c0, %c0_0] : memref<512x128xbf16, #tpu.memory_space<vmem>>, vector<512x128xbf16>
    %c0_1 = arith.constant 0 : index
    %c0_2 = arith.constant 0 : index
    %1 = vector.load %arg2[%c0_1, %c0_2] : memref<128x256xbf16, #tpu.memory_space<vmem>>, vector<128x256xbf16>
    %cst = arith.constant dense<0.000000e+00> : vector<512x256xf32>
    %2 = tpu.matmul %0, %1, %cst {dimension_numbers = #tpu.dot_dimension_numbers<[1], [0], [0], [1], [0, 0, 1, 1], [], []>} : vector<512x128xbf16>, vector<128x256xbf16>, vector<512x256xf32> -> vector<512x256xf32>
    %c0_3 = arith.constant 0 : index
    %c0_4 = arith.constant 0 : index
    %3 = vector.load %arg3[%c0_3, %c0_4] : memref<1x256xf32, #tpu.memory_space<vmem>>, vector<1x256xf32>
    %4 = vector.broadcast %3 : vector<1x256xf32> to vector<512x256xf32>
    %5 = arith.mulf %2, %4 : vector<512x256xf32>
    %c0_5 = arith.constant 0 : index
    %c0_6 = arith.constant 0 : index
    %6 = vector.load %arg4[%c0_5, %c0_6] : memref<1x256xf32, #tpu.memory_space<vmem>>, vector<1x256xf32>
    %7 = vector.broadcast %6 : vector<1x256xf32> to vector<512x256xf32>
    %8 = arith.addf %5, %7 : vector<512x256xf32>
    %9 = arith.negf %8 : vector<512x256xf32>
    %10 = math.exp %9 : vector<512x256xf32>
    %cst_7 = arith.constant 1.000000e+00 : f32
    %11 = vector.broadcast %cst_7 : f32 to vector<512x256xf32>
    %12 = arith.addf %11, %10 : vector<512x256xf32>
    %13 = arith.divf %11, %12 : vector<512x256xf32>
    %14 = arith.mulf %8, %13 : vector<512x256xf32>
    %15 = vector.extract_strided_slice %14 {offsets = [0, 0], sizes = [512, 128], strides = [1, 1]} : vector<512x256xf32> to vector<512x128xf32>
    %16 = arith.truncf %15 : vector<512x128xf32> to vector<512x128xbf16>
    %c0_8 = arith.constant 0 : index
    %c0_9 = arith.constant 0 : index
    %17 = vector.load %arg5[%c0_8, %c0_9] : memref<512x128xbf16, #tpu.memory_space<vmem>>, vector<512x128xbf16>
    tpu.vector_store %arg5[%c0_8, %c0_9], %16 {strides = array<i32>} : memref<512x128xbf16, #tpu.memory_space<vmem>>, vector<512x128xbf16>,
    %18 = vector.extract_strided_slice %14 {offsets = [0, 128], sizes = [512, 128], strides = [1, 1]} : vector<512x256xf32> to vector<512x128xf32>
    %19 = arith.truncf %18 : vector<512x128xf32> to vector<512x128xbf16>
    %c0_10 = arith.constant 0 : index
    %c0_11 = arith.constant 0 : index
    %20 = vector.load %arg6[%c0_10, %c0_11] : memref<512x128xbf16, #tpu.memory_space<vmem>>, vector<512x128xbf16>
    tpu.vector_store %arg6[%c0_10, %c0_11], %19 {strides = array<i32>} : memref<512x128xbf16, #tpu.memory_space<vmem>>, vector<512x128xbf16>,
    return
  }
  func.func @transform_0(%arg0: i32) -> (i32, i32) {
    %c0_i32 = arith.constant 0 : i32
    %c0_i32_0 = arith.constant 0 : i32
    return %arg0, %c0_i32 : i32, i32
  }
  func.func @transform_1(%arg0: i32) -> (i32, i32) {
    %c0_i32 = arith.constant 0 : i32
    %c0_i32_0 = arith.constant 0 : i32
    %c0_i32_1 = arith.constant 0 : i32
    return %c0_i32, %c0_i32_0 : i32, i32
  }
  func.func @transform_2(%arg0: i32) -> (i32, i32) {
    %c0_i32 = arith.constant 0 : i32
    %c0_i32_0 = arith.constant 0 : i32
    %c0_i32_1 = arith.constant 0 : i32
    return %c0_i32, %c0_i32_0 : i32, i32
  }
  func.func @transform_3(%arg0: i32) -> (i32, i32) {
    %c0_i32 = arith.constant 0 : i32
    %c0_i32_0 = arith.constant 0 : i32
    %c0_i32_1 = arith.constant 0 : i32
    return %c0_i32, %c0_i32_0 : i32, i32
  }
  func.func @transform_4(%arg0: i32) -> (i32, i32) {
    %c0_i32 = arith.constant 0 : i32
    %c0_i32_0 = arith.constant 0 : i32
    return %arg0, %c0_i32 : i32, i32
  }
  func.func @transform_5(%arg0: i32) -> (i32, i32) {
    %c0_i32 = arith.constant 0 : i32
    %c0_i32_0 = arith.constant 0 : i32
    return %arg0, %c0_i32 : i32, i32
  }
}

module attributes {stable_mosaic.version = 11 : i64} {
  func.func @_pw_kernel(%arg0: i32, %arg1: memref<512x128xbf16, #tpu.memory_space<vmem>>, %arg2: memref<128x128xbf16, #tpu.memory_space<vmem>>, %arg3: memref<1x128xf32, #tpu.memory_space<vmem>>, %arg4: memref<1x128xf32, #tpu.memory_space<vmem>>, %arg5: memref<512x128xbf16, #tpu.memory_space<vmem>>, %arg6: memref<512x128xbf16, #tpu.memory_space<vmem>>) attributes {dimension_semantics = [#tpu.dimension_semantics<parallel>], iteration_bounds = array<i64: 1>, scalar_prefetch = 0 : i64, scratch_operands = 0 : i64, tpu.core_type = #tpu.core_type<tc>, window_params = [{transform_indices = @transform_0, window_bounds = array<i64: 512, 128>}, {pipeline_mode = #tpu.pipeline_mode<synchronous>, transform_indices = @transform_1, window_bounds = array<i64: 128, 128>}, {pipeline_mode = #tpu.pipeline_mode<synchronous>, transform_indices = @transform_2, window_bounds = array<i64: 1, 128>}, {pipeline_mode = #tpu.pipeline_mode<synchronous>, transform_indices = @transform_3, window_bounds = array<i64: 1, 128>}, {transform_indices = @transform_4, window_bounds = array<i64: 512, 128>}, {transform_indices = @transform_5, window_bounds = array<i64: 512, 128>}]} {
    %c0 = arith.constant 0 : index
    %c0_0 = arith.constant 0 : index
    %0 = vector.load %arg1[%c0, %c0_0] : memref<512x128xbf16, #tpu.memory_space<vmem>>, vector<512x128xbf16>
    %c0_1 = arith.constant 0 : index
    %c0_2 = arith.constant 0 : index
    %1 = vector.load %arg2[%c0_1, %c0_2] : memref<128x128xbf16, #tpu.memory_space<vmem>>, vector<128x128xbf16>
    %cst = arith.constant dense<0.000000e+00> : vector<512x128xf32>
    %2 = tpu.matmul %0, %1, %cst {dimension_numbers = #tpu.dot_dimension_numbers<[1], [0], [0], [1], [0, 0, 1, 1], [], []>} : vector<512x128xbf16>, vector<128x128xbf16>, vector<512x128xf32> -> vector<512x128xf32>
    %c0_3 = arith.constant 0 : index
    %c0_4 = arith.constant 0 : index
    %3 = vector.load %arg3[%c0_3, %c0_4] : memref<1x128xf32, #tpu.memory_space<vmem>>, vector<1x128xf32>
    %4 = vector.broadcast %3 : vector<1x128xf32> to vector<512x128xf32>
    %5 = arith.mulf %2, %4 : vector<512x128xf32>
    %c0_5 = arith.constant 0 : index
    %c0_6 = arith.constant 0 : index
    %6 = vector.load %arg4[%c0_5, %c0_6] : memref<1x128xf32, #tpu.memory_space<vmem>>, vector<1x128xf32>
    %7 = vector.broadcast %6 : vector<1x128xf32> to vector<512x128xf32>
    %8 = arith.addf %5, %7 : vector<512x128xf32>
    %c0_7 = arith.constant 0 : index
    %c0_8 = arith.constant 0 : index
    %9 = vector.load %arg5[%c0_7, %c0_8] : memref<512x128xbf16, #tpu.memory_space<vmem>>, vector<512x128xbf16>
    %10 = arith.extf %9 : vector<512x128xbf16> to vector<512x128xf32>
    %11 = arith.addf %8, %10 : vector<512x128xf32>
    %12 = arith.truncf %11 : vector<512x128xf32> to vector<512x128xbf16>
    %c0_9 = arith.constant 0 : index
    %c0_10 = arith.constant 0 : index
    %13 = vector.load %arg6[%c0_9, %c0_10] : memref<512x128xbf16, #tpu.memory_space<vmem>>, vector<512x128xbf16>
    tpu.vector_store %arg6[%c0_9, %c0_10], %12 {strides = array<i32>} : memref<512x128xbf16, #tpu.memory_space<vmem>>, vector<512x128xbf16>,
    return
  }
  func.func @transform_0(%arg0: i32) -> (i32, i32) {
    %c0_i32 = arith.constant 0 : i32
    %c0_i32_0 = arith.constant 0 : i32
    return %arg0, %c0_i32 : i32, i32
  }
  func.func @transform_1(%arg0: i32) -> (i32, i32) {
    %c0_i32 = arith.constant 0 : i32
    %c0_i32_0 = arith.constant 0 : i32
    %c0_i32_1 = arith.constant 0 : i32
    return %c0_i32, %c0_i32_0 : i32, i32
  }
  func.func @transform_2(%arg0: i32) -> (i32, i32) {
    %c0_i32 = arith.constant 0 : i32
    %c0_i32_0 = arith.constant 0 : i32
    %c0_i32_1 = arith.constant 0 : i32
    return %c0_i32, %c0_i32_0 : i32, i32
  }
  func.func @transform_3(%arg0: i32) -> (i32, i32) {
    %c0_i32 = arith.constant 0 : i32
    %c0_i32_0 = arith.constant 0 : i32
    %c0_i32_1 = arith.constant 0 : i32
    return %c0_i32, %c0_i32_0 : i32, i32
  }
  func.func @transform_4(%arg0: i32) -> (i32, i32) {
    %c0_i32 = arith.constant 0 : i32
    %c0_i32_0 = arith.constant 0 : i32
    return %arg0, %c0_i32 : i32, i32
  }
  func.func @transform_5(%arg0: i32) -> (i32, i32) {
    %c0_i32 = arith.constant 0 : i32
    %c0_i32_0 = arith.constant 0 : i32
    return %arg0, %c0_i32 : i32, i32
  }
}

module attributes {stable_mosaic.version = 11 : i64} {
  func.func @_dw_lk_kernel(%arg0: i32, %arg1: i32, %arg2: memref<1x16x16x128xbf16, #tpu.memory_space<vmem>>, %arg3: memref<27x27x128xf32, #tpu.memory_space<vmem>>, %arg4: memref<1x128xf32, #tpu.memory_space<vmem>>, %arg5: memref<1x16x16x128xbf16, #tpu.memory_space<vmem>>, %arg6: memref<42x42x128xf32, #tpu.memory_space<vmem>>) attributes {dimension_semantics = [#tpu.dimension_semantics<parallel>, #tpu.dimension_semantics<parallel>], iteration_bounds = array<i64: 1, 2>, scalar_prefetch = 0 : i64, scratch_operands = 1 : i64, tpu.core_type = #tpu.core_type<tc>, window_params = [{transform_indices = @transform_0, window_bounds = array<i64: 1, 16, 16, 128>}, {transform_indices = @transform_1, window_bounds = array<i64: 27, 27, 128>}, {transform_indices = @transform_2, window_bounds = array<i64: 1, 128>}, {transform_indices = @transform_3, window_bounds = array<i64: 1, 16, 16, 128>}]} {
    %cst = arith.constant 0.000000e+00 : f32
    %0 = vector.broadcast %cst : f32 to vector<13x42x128xf32>
    %c0 = arith.constant 0 : index
    %c0_0 = arith.constant 0 : index
    %c0_1 = arith.constant 0 : index
    %1 = vector.load %arg6[%c0, %c0_0, %c0_1] : memref<42x42x128xf32, #tpu.memory_space<vmem>>, vector<13x42x128xf32>
    tpu.vector_store %arg6[%c0, %c0_0, %c0_1], %0 {strides = array<i32>} : memref<42x42x128xf32, #tpu.memory_space<vmem>>, vector<13x42x128xf32>,
    %cst_2 = arith.constant 0.000000e+00 : f32
    %2 = vector.broadcast %cst_2 : f32 to vector<13x42x128xf32>
    %c29 = arith.constant 29 : index
    %c0_3 = arith.constant 0 : index
    %c0_4 = arith.constant 0 : index
    %3 = vector.load %arg6[%c29, %c0_3, %c0_4] : memref<42x42x128xf32, #tpu.memory_space<vmem>>, vector<13x42x128xf32>
    tpu.vector_store %arg6[%c29, %c0_3, %c0_4], %2 {strides = array<i32>} : memref<42x42x128xf32, #tpu.memory_space<vmem>>, vector<13x42x128xf32>,
    %cst_5 = arith.constant 0.000000e+00 : f32
    %4 = vector.broadcast %cst_5 : f32 to vector<16x13x128xf32>
    %c13 = arith.constant 13 : index
    %c0_6 = arith.constant 0 : index
    %c0_7 = arith.constant 0 : index
    %5 = vector.load %arg6[%c13, %c0_6, %c0_7] : memref<42x42x128xf32, #tpu.memory_space<vmem>>, vector<16x13x128xf32>
    tpu.vector_store %arg6[%c13, %c0_6, %c0_7], %4 {strides = array<i32>} : memref<42x42x128xf32, #tpu.memory_space<vmem>>, vector<16x13x128xf32>,
    %cst_8 = arith.constant 0.000000e+00 : f32
    %6 = vector.broadcast %cst_8 : f32 to vector<16x13x128xf32>
    %c13_9 = arith.constant 13 : index
    %c29_10 = arith.constant 29 : index
    %c0_11 = arith.constant 0 : index
    %7 = vector.load %arg6[%c13_9, %c29_10, %c0_11] : memref<42x42x128xf32, #tpu.memory_space<vmem>>, vector<16x13x128xf32>
    tpu.vector_store %arg6[%c13_9, %c29_10, %c0_11], %6 {strides = array<i32>} : memref<42x42x128xf32, #tpu.memory_space<vmem>>, vector<16x13x128xf32>,
    %c0_12 = arith.constant 0 : index
    %c0_13 = arith.constant 0 : index
    %c0_14 = arith.constant 0 : index
    %c0_15 = arith.constant 0 : index
    %8 = vector.load %arg2[%c0_12, %c0_13, %c0_14, %c0_15] : memref<1x16x16x128xbf16, #tpu.memory_space<vmem>>, vector<1x16x16x128xbf16>
    %9 = vector.shape_cast %8 : vector<1x16x16x128xbf16> to vector<16x16x128xbf16>
    %10 = arith.extf %9 : vector<16x16x128xbf16> to vector<16x16x128xf32>
    %c13_16 = arith.constant 13 : index
    %c13_17 = arith.constant 13 : index
    %c0_18 = arith.constant 0 : index
    %11 = vector.load %arg6[%c13_16, %c13_17, %c0_18] : memref<42x42x128xf32, #tpu.memory_space<vmem>>, vector<16x16x128xf32>
    tpu.vector_store %arg6[%c13_16, %c13_17, %c0_18], %10 {strides = array<i32>} : memref<42x42x128xf32, #tpu.memory_space<vmem>>, vector<16x16x128xf32>,
    %c0_19 = arith.constant 0 : index
    %c0_20 = arith.constant 0 : index
    %12 = vector.load %arg4[%c0_19, %c0_20] : memref<1x128xf32, #tpu.memory_space<vmem>>, vector<1x128xf32>
    %13 = vector.shape_cast %12 : vector<1x128xf32> to vector<1x1x128xf32>
    %c0_i32 = arith.constant 0 : i32
    %c2_i32 = arith.constant 2 : i32
    %14 = arith.addi %c0_i32, %c2_i32 : i32
    %c1_i32 = arith.constant 1 : i32
    scf.for %arg7 = %c0_i32 to %14 step %c1_i32  : i32 {
      %c1_i32_22 = arith.constant 1 : i32
      %15 = arith.muli %arg7, %c1_i32_22 : i32
      %c0_i32_23 = arith.constant 0 : i32
      %16 = arith.addi %c0_i32_23, %15 : i32
      %c8_i32 = arith.constant 8 : i32
      %17 = arith.muli %16, %c8_i32 : i32
      %cst_24 = arith.constant 0.000000e+00 : f32
      %18 = vector.broadcast %cst_24 : f32 to vector<8x16x128xf32>
      %c0_i32_25 = arith.constant 0 : i32
      %c27_i32 = arith.constant 27 : i32
      %19 = arith.addi %c0_i32_25, %c27_i32 : i32
      %c1_i32_26 = arith.constant 1 : i32
      %20 = scf.for %arg8 = %c0_i32_25 to %19 step %c1_i32_26 iter_args(%arg9 = %18) -> (vector<8x16x128xf32>)  : i32 {
        %30 = arith.index_cast %arg8 : i32 to index
        %c0_32 = arith.constant 0 : index
        %c0_33 = arith.constant 0 : index
        %31 = vector.load %arg3[%30, %c0_32, %c0_33] : memref<27x27x128xf32, #tpu.memory_space<vmem>>, vector<1x27x128xf32>
        %32 = vector.shape_cast %31 : vector<1x27x128xf32> to vector<27x128xf32>
        %33 = arith.addi %17, %arg8 : i32
        %34 = arith.index_cast %33 : i32 to index
        %c0_34 = arith.constant 0 : index
        %c0_35 = arith.constant 0 : index
        %35 = vector.load %arg6[%34, %c0_34, %c0_35] : memref<42x42x128xf32, #tpu.memory_space<vmem>>, vector<8x16x128xf32>
        %36 = vector.extract_strided_slice %32 {offsets = [0, 0], sizes = [1, 128], strides = [1, 1]} : vector<27x128xf32> to vector<1x128xf32>
        %37 = vector.shape_cast %36 : vector<1x128xf32> to vector<1x1x128xf32>
        %38 = vector.broadcast %37 : vector<1x1x128xf32> to vector<8x16x128xf32>
        %39 = arith.mulf %35, %38 : vector<8x16x128xf32>
        %40 = arith.addf %arg9, %39 : vector<8x16x128xf32>
        %41 = arith.addi %17, %arg8 : i32
        %42 = arith.index_cast %41 : i32 to index
        %c1 = arith.constant 1 : index
        %c0_36 = arith.constant 0 : index
        %43 = vector.load %arg6[%42, %c1, %c0_36] : memref<42x42x128xf32, #tpu.memory_space<vmem>>, vector<8x16x128xf32>
        %44 = vector.extract_strided_slice %32 {offsets = [1, 0], sizes = [1, 128], strides = [1, 1]} : vector<27x128xf32> to vector<1x128xf32>
        %45 = vector.shape_cast %44 : vector<1x128xf32> to vector<1x1x128xf32>
        %46 = vector.broadcast %45 : vector<1x1x128xf32> to vector<8x16x128xf32>
        %47 = arith.mulf %43, %46 : vector<8x16x128xf32>
        %48 = arith.addf %40, %47 : vector<8x16x128xf32>
        %49 = arith.addi %17, %arg8 : i32
        %50 = arith.index_cast %49 : i32 to index
        %c2 = arith.constant 2 : index
        %c0_37 = arith.constant 0 : index
        %51 = vector.load %arg6[%50, %c2, %c0_37] : memref<42x42x128xf32, #tpu.memory_space<vmem>>, vector<8x16x128xf32>
        %52 = vector.extract_strided_slice %32 {offsets = [2, 0], sizes = [1, 128], strides = [1, 1]} : vector<27x128xf32> to vector<1x128xf32>
        %53 = vector.shape_cast %52 : vector<1x128xf32> to vector<1x1x128xf32>
        %54 = vector.broadcast %53 : vector<1x1x128xf32> to vector<8x16x128xf32>
        %55 = arith.mulf %51, %54 : vector<8x16x128xf32>
        %56 = arith.addf %48, %55 : vector<8x16x128xf32>
        %57 = arith.addi %17, %arg8 : i32
        %58 = arith.index_cast %57 : i32 to index
        %c3 = arith.constant 3 : index
        %c0_38 = arith.constant 0 : index
        %59 = vector.load %arg6[%58, %c3, %c0_38] : memref<42x42x128xf32, #tpu.memory_space<vmem>>, vector<8x16x128xf32>
        %60 = vector.extract_strided_slice %32 {offsets = [3, 0], sizes = [1, 128], strides = [1, 1]} : vector<27x128xf32> to vector<1x128xf32>
        %61 = vector.shape_cast %60 : vector<1x128xf32> to vector<1x1x128xf32>
        %62 = vector.broadcast %61 : vector<1x1x128xf32> to vector<8x16x128xf32>
        %63 = arith.mulf %59, %62 : vector<8x16x128xf32>
        %64 = arith.addf %56, %63 : vector<8x16x128xf32>
        %65 = arith.addi %17, %arg8 : i32
        %66 = arith.index_cast %65 : i32 to index
        %c4 = arith.constant 4 : index
        %c0_39 = arith.constant 0 : index
        %67 = vector.load %arg6[%66, %c4, %c0_39] : memref<42x42x128xf32, #tpu.memory_space<vmem>>, vector<8x16x128xf32>
        %68 = vector.extract_strided_slice %32 {offsets = [4, 0], sizes = [1, 128], strides = [1, 1]} : vector<27x128xf32> to vector<1x128xf32>
        %69 = vector.shape_cast %68 : vector<1x128xf32> to vector<1x1x128xf32>
        %70 = vector.broadcast %69 : vector<1x1x128xf32> to vector<8x16x128xf32>
        %71 = arith.mulf %67, %70 : vector<8x16x128xf32>
        %72 = arith.addf %64, %71 : vector<8x16x128xf32>
        %73 = arith.addi %17, %arg8 : i32
        %74 = arith.index_cast %73 : i32 to index
        %c5 = arith.constant 5 : index
        %c0_40 = arith.constant 0 : index
        %75 = vector.load %arg6[%74, %c5, %c0_40] : memref<42x42x128xf32, #tpu.memory_space<vmem>>, vector<8x16x128xf32>
        %76 = vector.extract_strided_slice %32 {offsets = [5, 0], sizes = [1, 128], strides = [1, 1]} : vector<27x128xf32> to vector<1x128xf32>
        %77 = vector.shape_cast %76 : vector<1x128xf32> to vector<1x1x128xf32>
        %78 = vector.broadcast %77 : vector<1x1x128xf32> to vector<8x16x128xf32>
        %79 = arith.mulf %75, %78 : vector<8x16x128xf32>
        %80 = arith.addf %72, %79 : vector<8x16x128xf32>
        %81 = arith.addi %17, %arg8 : i32
        %82 = arith.index_cast %81 : i32 to index
        %c6 = arith.constant 6 : index
        %c0_41 = arith.constant 0 : index
        %83 = vector.load %arg6[%82, %c6, %c0_41] : memref<42x42x128xf32, #tpu.memory_space<vmem>>, vector<8x16x128xf32>
        %84 = vector.extract_strided_slice %32 {offsets = [6, 0], sizes = [1, 128], strides = [1, 1]} : vector<27x128xf32> to vector<1x128xf32>
        %85 = vector.shape_cast %84 : vector<1x128xf32> to vector<1x1x128xf32>
        %86 = vector.broadcast %85 : vector<1x1x128xf32> to vector<8x16x128xf32>
        %87 = arith.mulf %83, %86 : vector<8x16x128xf32>
        %88 = arith.addf %80, %87 : vector<8x16x128xf32>
        %89 = arith.addi %17, %arg8 : i32
        %90 = arith.index_cast %89 : i32 to index
        %c7 = arith.constant 7 : index
        %c0_42 = arith.constant 0 : index
        %91 = vector.load %arg6[%90, %c7, %c0_42] : memref<42x42x128xf32, #tpu.memory_space<vmem>>, vector<8x16x128xf32>
        %92 = vector.extract_strided_slice %32 {offsets = [7, 0], sizes = [1, 128], strides = [1, 1]} : vector<27x128xf32> to vector<1x128xf32>
        %93 = vector.shape_cast %92 : vector<1x128xf32> to vector<1x1x128xf32>
        %94 = vector.broadcast %93 : vector<1x1x128xf32> to vector<8x16x128xf32>
        %95 = arith.mulf %91, %94 : vector<8x16x128xf32>
        %96 = arith.addf %88, %95 : vector<8x16x128xf32>
        %97 = arith.addi %17, %arg8 : i32
        %98 = arith.index_cast %97 : i32 to index
        %c8 = arith.constant 8 : index
        %c0_43 = arith.constant 0 : index
        %99 = vector.load %arg6[%98, %c8, %c0_43] : memref<42x42x128xf32, #tpu.memory_space<vmem>>, vector<8x16x128xf32>
        %100 = vector.extract_strided_slice %32 {offsets = [8, 0], sizes = [1, 128], strides = [1, 1]} : vector<27x128xf32> to vector<1x128xf32>
        %101 = vector.shape_cast %100 : vector<1x128xf32> to vector<1x1x128xf32>
        %102 = vector.broadcast %101 : vector<1x1x128xf32> to vector<8x16x128xf32>
        %103 = arith.mulf %99, %102 : vector<8x16x128xf32>
        %104 = arith.addf %96, %103 : vector<8x16x128xf32>
        %105 = arith.addi %17, %arg8 : i32
        %106 = arith.index_cast %105 : i32 to index
        %c9 = arith.constant 9 : index
        %c0_44 = arith.constant 0 : index
        %107 = vector.load %arg6[%106, %c9, %c0_44] : memref<42x42x128xf32, #tpu.memory_space<vmem>>, vector<8x16x128xf32>
        %108 = vector.extract_strided_slice %32 {offsets = [9, 0], sizes = [1, 128], strides = [1, 1]} : vector<27x128xf32> to vector<1x128xf32>
        %109 = vector.shape_cast %108 : vector<1x128xf32> to vector<1x1x128xf32>
        %110 = vector.broadcast %109 : vector<1x1x128xf32> to vector<8x16x128xf32>
        %111 = arith.mulf %107, %110 : vector<8x16x128xf32>
        %112 = arith.addf %104, %111 : vector<8x16x128xf32>
        %113 = arith.addi %17, %arg8 : i32
        %114 = arith.index_cast %113 : i32 to index
        %c10 = arith.constant 10 : index
        %c0_45 = arith.constant 0 : index
        %115 = vector.load %arg6[%114, %c10, %c0_45] : memref<42x42x128xf32, #tpu.memory_space<vmem>>, vector<8x16x128xf32>
        %116 = vector.extract_strided_slice %32 {offsets = [10, 0], sizes = [1, 128], strides = [1, 1]} : vector<27x128xf32> to vector<1x128xf32>
        %117 = vector.shape_cast %116 : vector<1x128xf32> to vector<1x1x128xf32>
        %118 = vector.broadcast %117 : vector<1x1x128xf32> to vector<8x16x128xf32>
        %119 = arith.mulf %115, %118 : vector<8x16x128xf32>
        %120 = arith.addf %112, %119 : vector<8x16x128xf32>
        %121 = arith.addi %17, %arg8 : i32
        %122 = arith.index_cast %121 : i32 to index
        %c11 = arith.constant 11 : index
        %c0_46 = arith.constant 0 : index
        %123 = vector.load %arg6[%122, %c11, %c0_46] : memref<42x42x128xf32, #tpu.memory_space<vmem>>, vector<8x16x128xf32>
        %124 = vector.extract_strided_slice %32 {offsets = [11, 0], sizes = [1, 128], strides = [1, 1]} : vector<27x128xf32> to vector<1x128xf32>
        %125 = vector.shape_cast %124 : vector<1x128xf32> to vector<1x1x128xf32>
        %126 = vector.broadcast %125 : vector<1x1x128xf32> to vector<8x16x128xf32>
        %127 = arith.mulf %123, %126 : vector<8x16x128xf32>
        %128 = arith.addf %120, %127 : vector<8x16x128xf32>
        %129 = arith.addi %17, %arg8 : i32
        %130 = arith.index_cast %129 : i32 to index
        %c12 = arith.constant 12 : index
        %c0_47 = arith.constant 0 : index
        %131 = vector.load %arg6[%130, %c12, %c0_47] : memref<42x42x128xf32, #tpu.memory_space<vmem>>, vector<8x16x128xf32>
        %132 = vector.extract_strided_slice %32 {offsets = [12, 0], sizes = [1, 128], strides = [1, 1]} : vector<27x128xf32> to vector<1x128xf32>
        %133 = vector.shape_cast %132 : vector<1x128xf32> to vector<1x1x128xf32>
        %134 = vector.broadcast %133 : vector<1x1x128xf32> to vector<8x16x128xf32>
        %135 = arith.mulf %131, %134 : vector<8x16x128xf32>
        %136 = arith.addf %128, %135 : vector<8x16x128xf32>
        %137 = arith.addi %17, %arg8 : i32
        %138 = arith.index_cast %137 : i32 to index
        %c13_48 = arith.constant 13 : index
        %c0_49 = arith.constant 0 : index
        %139 = vector.load %arg6[%138, %c13_48, %c0_49] : memref<42x42x128xf32, #tpu.memory_space<vmem>>, vector<8x16x128xf32>
        %140 = vector.extract_strided_slice %32 {offsets = [13, 0], sizes = [1, 128], strides = [1, 1]} : vector<27x128xf32> to vector<1x128xf32>
        %141 = vector.shape_cast %140 : vector<1x128xf32> to vector<1x1x128xf32>
        %142 = vector.broadcast %141 : vector<1x1x128xf32> to vector<8x16x128xf32>
        %143 = arith.mulf %139, %142 : vector<8x16x128xf32>
        %144 = arith.addf %136, %143 : vector<8x16x128xf32>
        %145 = arith.addi %17, %arg8 : i32
        %146 = arith.index_cast %145 : i32 to index
        %c14 = arith.constant 14 : index
        %c0_50 = arith.constant 0 : index
        %147 = vector.load %arg6[%146, %c14, %c0_50] : memref<42x42x128xf32, #tpu.memory_space<vmem>>, vector<8x16x128xf32>
        %148 = vector.extract_strided_slice %32 {offsets = [14, 0], sizes = [1, 128], strides = [1, 1]} : vector<27x128xf32> to vector<1x128xf32>
        %149 = vector.shape_cast %148 : vector<1x128xf32> to vector<1x1x128xf32>
        %150 = vector.broadcast %149 : vector<1x1x128xf32> to vector<8x16x128xf32>
        %151 = arith.mulf %147, %150 : vector<8x16x128xf32>
        %152 = arith.addf %144, %151 : vector<8x16x128xf32>
        %153 = arith.addi %17, %arg8 : i32
        %154 = arith.index_cast %153 : i32 to index
        %c15 = arith.constant 15 : index
        %c0_51 = arith.constant 0 : index
        %155 = vector.load %arg6[%154, %c15, %c0_51] : memref<42x42x128xf32, #tpu.memory_space<vmem>>, vector<8x16x128xf32>
        %156 = vector.extract_strided_slice %32 {offsets = [15, 0], sizes = [1, 128], strides = [1, 1]} : vector<27x128xf32> to vector<1x128xf32>
        %157 = vector.shape_cast %156 : vector<1x128xf32> to vector<1x1x128xf32>
        %158 = vector.broadcast %157 : vector<1x1x128xf32> to vector<8x16x128xf32>
        %159 = arith.mulf %155, %158 : vector<8x16x128xf32>
        %160 = arith.addf %152, %159 : vector<8x16x128xf32>
        %161 = arith.addi %17, %arg8 : i32
        %162 = arith.index_cast %161 : i32 to index
        %c16 = arith.constant 16 : index
        %c0_52 = arith.constant 0 : index
        %163 = vector.load %arg6[%162, %c16, %c0_52] : memref<42x42x128xf32, #tpu.memory_space<vmem>>, vector<8x16x128xf32>
        %164 = vector.extract_strided_slice %32 {offsets = [16, 0], sizes = [1, 128], strides = [1, 1]} : vector<27x128xf32> to vector<1x128xf32>
        %165 = vector.shape_cast %164 : vector<1x128xf32> to vector<1x1x128xf32>
        %166 = vector.broadcast %165 : vector<1x1x128xf32> to vector<8x16x128xf32>
        %167 = arith.mulf %163, %166 : vector<8x16x128xf32>
        %168 = arith.addf %160, %167 : vector<8x16x128xf32>
        %169 = arith.addi %17, %arg8 : i32
        %170 = arith.index_cast %169 : i32 to index
        %c17 = arith.constant 17 : index
        %c0_53 = arith.constant 0 : index
        %171 = vector.load %arg6[%170, %c17, %c0_53] : memref<42x42x128xf32, #tpu.memory_space<vmem>>, vector<8x16x128xf32>
        %172 = vector.extract_strided_slice %32 {offsets = [17, 0], sizes = [1, 128], strides = [1, 1]} : vector<27x128xf32> to vector<1x128xf32>
        %173 = vector.shape_cast %172 : vector<1x128xf32> to vector<1x1x128xf32>
        %174 = vector.broadcast %173 : vector<1x1x128xf32> to vector<8x16x128xf32>
        %175 = arith.mulf %171, %174 : vector<8x16x128xf32>
        %176 = arith.addf %168, %175 : vector<8x16x128xf32>
        %177 = arith.addi %17, %arg8 : i32
        %178 = arith.index_cast %177 : i32 to index
        %c18 = arith.constant 18 : index
        %c0_54 = arith.constant 0 : index
        %179 = vector.load %arg6[%178, %c18, %c0_54] : memref<42x42x128xf32, #tpu.memory_space<vmem>>, vector<8x16x128xf32>
        %180 = vector.extract_strided_slice %32 {offsets = [18, 0], sizes = [1, 128], strides = [1, 1]} : vector<27x128xf32> to vector<1x128xf32>
        %181 = vector.shape_cast %180 : vector<1x128xf32> to vector<1x1x128xf32>
        %182 = vector.broadcast %181 : vector<1x1x128xf32> to vector<8x16x128xf32>
        %183 = arith.mulf %179, %182 : vector<8x16x128xf32>
        %184 = arith.addf %176, %183 : vector<8x16x128xf32>
        %185 = arith.addi %17, %arg8 : i32
        %186 = arith.index_cast %185 : i32 to index
        %c19 = arith.constant 19 : index
        %c0_55 = arith.constant 0 : index
        %187 = vector.load %arg6[%186, %c19, %c0_55] : memref<42x42x128xf32, #tpu.memory_space<vmem>>, vector<8x16x128xf32>
        %188 = vector.extract_strided_slice %32 {offsets = [19, 0], sizes = [1, 128], strides = [1, 1]} : vector<27x128xf32> to vector<1x128xf32>
        %189 = vector.shape_cast %188 : vector<1x128xf32> to vector<1x1x128xf32>
        %190 = vector.broadcast %189 : vector<1x1x128xf32> to vector<8x16x128xf32>
        %191 = arith.mulf %187, %190 : vector<8x16x128xf32>
        %192 = arith.addf %184, %191 : vector<8x16x128xf32>
        %193 = arith.addi %17, %arg8 : i32
        %194 = arith.index_cast %193 : i32 to index
        %c20 = arith.constant 20 : index
        %c0_56 = arith.constant 0 : index
        %195 = vector.load %arg6[%194, %c20, %c0_56] : memref<42x42x128xf32, #tpu.memory_space<vmem>>, vector<8x16x128xf32>
        %196 = vector.extract_strided_slice %32 {offsets = [20, 0], sizes = [1, 128], strides = [1, 1]} : vector<27x128xf32> to vector<1x128xf32>
        %197 = vector.shape_cast %196 : vector<1x128xf32> to vector<1x1x128xf32>
        %198 = vector.broadcast %197 : vector<1x1x128xf32> to vector<8x16x128xf32>
        %199 = arith.mulf %195, %198 : vector<8x16x128xf32>
        %200 = arith.addf %192, %199 : vector<8x16x128xf32>
        %201 = arith.addi %17, %arg8 : i32
        %202 = arith.index_cast %201 : i32 to index
        %c21 = arith.constant 21 : index
        %c0_57 = arith.constant 0 : index
        %203 = vector.load %arg6[%202, %c21, %c0_57] : memref<42x42x128xf32, #tpu.memory_space<vmem>>, vector<8x16x128xf32>
        %204 = vector.extract_strided_slice %32 {offsets = [21, 0], sizes = [1, 128], strides = [1, 1]} : vector<27x128xf32> to vector<1x128xf32>
        %205 = vector.shape_cast %204 : vector<1x128xf32> to vector<1x1x128xf32>
        %206 = vector.broadcast %205 : vector<1x1x128xf32> to vector<8x16x128xf32>
        %207 = arith.mulf %203, %206 : vector<8x16x128xf32>
        %208 = arith.addf %200, %207 : vector<8x16x128xf32>
        %209 = arith.addi %17, %arg8 : i32
        %210 = arith.index_cast %209 : i32 to index
        %c22 = arith.constant 22 : index
        %c0_58 = arith.constant 0 : index
        %211 = vector.load %arg6[%210, %c22, %c0_58] : memref<42x42x128xf32, #tpu.memory_space<vmem>>, vector<8x16x128xf32>
        %212 = vector.extract_strided_slice %32 {offsets = [22, 0], sizes = [1, 128], strides = [1, 1]} : vector<27x128xf32> to vector<1x128xf32>
        %213 = vector.shape_cast %212 : vector<1x128xf32> to vector<1x1x128xf32>
        %214 = vector.broadcast %213 : vector<1x1x128xf32> to vector<8x16x128xf32>
        %215 = arith.mulf %211, %214 : vector<8x16x128xf32>
        %216 = arith.addf %208, %215 : vector<8x16x128xf32>
        %217 = arith.addi %17, %arg8 : i32
        %218 = arith.index_cast %217 : i32 to index
        %c23 = arith.constant 23 : index
        %c0_59 = arith.constant 0 : index
        %219 = vector.load %arg6[%218, %c23, %c0_59] : memref<42x42x128xf32, #tpu.memory_space<vmem>>, vector<8x16x128xf32>
        %220 = vector.extract_strided_slice %32 {offsets = [23, 0], sizes = [1, 128], strides = [1, 1]} : vector<27x128xf32> to vector<1x128xf32>
        %221 = vector.shape_cast %220 : vector<1x128xf32> to vector<1x1x128xf32>
        %222 = vector.broadcast %221 : vector<1x1x128xf32> to vector<8x16x128xf32>
        %223 = arith.mulf %219, %222 : vector<8x16x128xf32>
        %224 = arith.addf %216, %223 : vector<8x16x128xf32>
        %225 = arith.addi %17, %arg8 : i32
        %226 = arith.index_cast %225 : i32 to index
        %c24 = arith.constant 24 : index
        %c0_60 = arith.constant 0 : index
        %227 = vector.load %arg6[%226, %c24, %c0_60] : memref<42x42x128xf32, #tpu.memory_space<vmem>>, vector<8x16x128xf32>
        %228 = vector.extract_strided_slice %32 {offsets = [24, 0], sizes = [1, 128], strides = [1, 1]} : vector<27x128xf32> to vector<1x128xf32>
        %229 = vector.shape_cast %228 : vector<1x128xf32> to vector<1x1x128xf32>
        %230 = vector.broadcast %229 : vector<1x1x128xf32> to vector<8x16x128xf32>
        %231 = arith.mulf %227, %230 : vector<8x16x128xf32>
        %232 = arith.addf %224, %231 : vector<8x16x128xf32>
        %233 = arith.addi %17, %arg8 : i32
        %234 = arith.index_cast %233 : i32 to index
        %c25 = arith.constant 25 : index
        %c0_61 = arith.constant 0 : index
        %235 = vector.load %arg6[%234, %c25, %c0_61] : memref<42x42x128xf32, #tpu.memory_space<vmem>>, vector<8x16x128xf32>
        %236 = vector.extract_strided_slice %32 {offsets = [25, 0], sizes = [1, 128], strides = [1, 1]} : vector<27x128xf32> to vector<1x128xf32>
        %237 = vector.shape_cast %236 : vector<1x128xf32> to vector<1x1x128xf32>
        %238 = vector.broadcast %237 : vector<1x1x128xf32> to vector<8x16x128xf32>
        %239 = arith.mulf %235, %238 : vector<8x16x128xf32>
        %240 = arith.addf %232, %239 : vector<8x16x128xf32>
        %241 = arith.addi %17, %arg8 : i32
        %242 = arith.index_cast %241 : i32 to index
        %c26 = arith.constant 26 : index
        %c0_62 = arith.constant 0 : index
        %243 = vector.load %arg6[%242, %c26, %c0_62] : memref<42x42x128xf32, #tpu.memory_space<vmem>>, vector<8x16x128xf32>
        %244 = vector.extract_strided_slice %32 {offsets = [26, 0], sizes = [1, 128], strides = [1, 1]} : vector<27x128xf32> to vector<1x128xf32>
        %245 = vector.shape_cast %244 : vector<1x128xf32> to vector<1x1x128xf32>
        %246 = vector.broadcast %245 : vector<1x1x128xf32> to vector<8x16x128xf32>
        %247 = arith.mulf %243, %246 : vector<8x16x128xf32>
        %248 = arith.addf %240, %247 : vector<8x16x128xf32>
        scf.yield %248 : vector<8x16x128xf32>
      }
      %c27_i32_27 = arith.constant 27 : i32
      %21 = vector.broadcast %13 : vector<1x1x128xf32> to vector<8x16x128xf32>
      %22 = arith.addf %20, %21 : vector<8x16x128xf32>
      %cst_28 = arith.constant 0.000000e+00 : f32
      %23 = vector.broadcast %cst_28 : f32 to vector<8x16x128xf32>
      %24 = arith.maximumf %22, %23 : vector<8x16x128xf32>
      %25 = arith.truncf %24 : vector<8x16x128xf32> to vector<8x16x128xbf16>
      %c0_29 = arith.constant 0 : index
      %26 = arith.index_cast %17 : i32 to index
      %c0_30 = arith.constant 0 : index
      %c0_31 = arith.constant 0 : index
      %27 = vector.load %arg5[%c0_29, %26, %c0_30, %c0_31] : memref<1x16x16x128xbf16, #tpu.memory_space<vmem>>, vector<1x8x16x128xbf16>
      %28 = vector.shape_cast %27 : vector<1x8x16x128xbf16> to vector<8x16x128xbf16>
      %29 = vector.shape_cast %25 : vector<8x16x128xbf16> to vector<1x8x16x128xbf16>
      tpu.vector_store %arg5[%c0_29, %26, %c0_30, %c0_31], %29 {strides = array<i32>} : memref<1x16x16x128xbf16, #tpu.memory_space<vmem>>, vector<1x8x16x128xbf16>,
    }
    %c2_i32_21 = arith.constant 2 : i32
    return
  }
  func.func @transform_0(%arg0: i32, %arg1: i32) -> (i32, i32, i32, i32) {
    %c0_i32 = arith.constant 0 : i32
    %c0_i32_0 = arith.constant 0 : i32
    %c0_i32_1 = arith.constant 0 : i32
    return %arg1, %c0_i32, %c0_i32_0, %arg0 : i32, i32, i32, i32
  }
  func.func @transform_1(%arg0: i32, %arg1: i32) -> (i32, i32, i32) {
    %c0_i32 = arith.constant 0 : i32
    %c0_i32_0 = arith.constant 0 : i32
    %c0_i32_1 = arith.constant 0 : i32
    return %c0_i32, %c0_i32_0, %arg0 : i32, i32, i32
  }
  func.func @transform_2(%arg0: i32, %arg1: i32) -> (i32, i32) {
    %c0_i32 = arith.constant 0 : i32
    %c0_i32_0 = arith.constant 0 : i32
    return %c0_i32, %arg0 : i32, i32
  }
  func.func @transform_3(%arg0: i32, %arg1: i32) -> (i32, i32, i32, i32) {
    %c0_i32 = arith.constant 0 : i32
    %c0_i32_0 = arith.constant 0 : i32
    %c0_i32_1 = arith.constant 0 : i32
    return %arg1, %c0_i32, %c0_i32_0, %arg0 : i32, i32, i32, i32
  }
}

module attributes {stable_mosaic.version = 11 : i64} {
  func.func @_pw_kernel(%arg0: i32, %arg1: memref<512x128xbf16, #tpu.memory_space<vmem>>, %arg2: memref<128x128xbf16, #tpu.memory_space<vmem>>, %arg3: memref<1x128xf32, #tpu.memory_space<vmem>>, %arg4: memref<1x128xf32, #tpu.memory_space<vmem>>, %arg5: memref<512x128xbf16, #tpu.memory_space<vmem>>) attributes {dimension_semantics = [#tpu.dimension_semantics<parallel>], iteration_bounds = array<i64: 1>, scalar_prefetch = 0 : i64, scratch_operands = 0 : i64, tpu.core_type = #tpu.core_type<tc>, window_params = [{transform_indices = @transform_0, window_bounds = array<i64: 512, 128>}, {pipeline_mode = #tpu.pipeline_mode<synchronous>, transform_indices = @transform_1, window_bounds = array<i64: 128, 128>}, {pipeline_mode = #tpu.pipeline_mode<synchronous>, transform_indices = @transform_2, window_bounds = array<i64: 1, 128>}, {pipeline_mode = #tpu.pipeline_mode<synchronous>, transform_indices = @transform_3, window_bounds = array<i64: 1, 128>}, {transform_indices = @transform_4, window_bounds = array<i64: 512, 128>}]} {
    %c0 = arith.constant 0 : index
    %c0_0 = arith.constant 0 : index
    %0 = vector.load %arg1[%c0, %c0_0] : memref<512x128xbf16, #tpu.memory_space<vmem>>, vector<512x128xbf16>
    %c0_1 = arith.constant 0 : index
    %c0_2 = arith.constant 0 : index
    %1 = vector.load %arg2[%c0_1, %c0_2] : memref<128x128xbf16, #tpu.memory_space<vmem>>, vector<128x128xbf16>
    %cst = arith.constant dense<0.000000e+00> : vector<512x128xf32>
    %2 = tpu.matmul %0, %1, %cst {dimension_numbers = #tpu.dot_dimension_numbers<[1], [0], [0], [1], [0, 0, 1, 1], [], []>} : vector<512x128xbf16>, vector<128x128xbf16>, vector<512x128xf32> -> vector<512x128xf32>
    %c0_3 = arith.constant 0 : index
    %c0_4 = arith.constant 0 : index
    %3 = vector.load %arg3[%c0_3, %c0_4] : memref<1x128xf32, #tpu.memory_space<vmem>>, vector<1x128xf32>
    %4 = vector.broadcast %3 : vector<1x128xf32> to vector<512x128xf32>
    %5 = arith.mulf %2, %4 : vector<512x128xf32>
    %c0_5 = arith.constant 0 : index
    %c0_6 = arith.constant 0 : index
    %6 = vector.load %arg4[%c0_5, %c0_6] : memref<1x128xf32, #tpu.memory_space<vmem>>, vector<1x128xf32>
    %7 = vector.broadcast %6 : vector<1x128xf32> to vector<512x128xf32>
    %8 = arith.addf %5, %7 : vector<512x128xf32>
    %9 = arith.negf %8 : vector<512x128xf32>
    %10 = math.exp %9 : vector<512x128xf32>
    %cst_7 = arith.constant 1.000000e+00 : f32
    %11 = vector.broadcast %cst_7 : f32 to vector<512x128xf32>
    %12 = arith.addf %11, %10 : vector<512x128xf32>
    %13 = arith.divf %11, %12 : vector<512x128xf32>
    %14 = arith.mulf %8, %13 : vector<512x128xf32>
    %15 = arith.truncf %14 : vector<512x128xf32> to vector<512x128xbf16>
    %c0_8 = arith.constant 0 : index
    %c0_9 = arith.constant 0 : index
    %16 = vector.load %arg5[%c0_8, %c0_9] : memref<512x128xbf16, #tpu.memory_space<vmem>>, vector<512x128xbf16>
    tpu.vector_store %arg5[%c0_8, %c0_9], %15 {strides = array<i32>} : memref<512x128xbf16, #tpu.memory_space<vmem>>, vector<512x128xbf16>,
    return
  }
  func.func @transform_0(%arg0: i32) -> (i32, i32) {
    %c0_i32 = arith.constant 0 : i32
    %c0_i32_0 = arith.constant 0 : i32
    return %arg0, %c0_i32 : i32, i32
  }
  func.func @transform_1(%arg0: i32) -> (i32, i32) {
    %c0_i32 = arith.constant 0 : i32
    %c0_i32_0 = arith.constant 0 : i32
    %c0_i32_1 = arith.constant 0 : i32
    return %c0_i32, %c0_i32_0 : i32, i32
  }
  func.func @transform_2(%arg0: i32) -> (i32, i32) {
    %c0_i32 = arith.constant 0 : i32
    %c0_i32_0 = arith.constant 0 : i32
    %c0_i32_1 = arith.constant 0 : i32
    return %c0_i32, %c0_i32_0 : i32, i32
  }
  func.func @transform_3(%arg0: i32) -> (i32, i32) {
    %c0_i32 = arith.constant 0 : i32
    %c0_i32_0 = arith.constant 0 : i32
    %c0_i32_1 = arith.constant 0 : i32
    return %c0_i32, %c0_i32_0 : i32, i32
  }
  func.func @transform_4(%arg0: i32) -> (i32, i32) {
    %c0_i32 = arith.constant 0 : i32
    %c0_i32_0 = arith.constant 0 : i32
    return %arg0, %c0_i32 : i32, i32
  }
}

module attributes {stable_mosaic.version = 11 : i64} {
  func.func @_pw_kernel(%arg0: i32, %arg1: memref<512x128xbf16, #tpu.memory_space<vmem>>, %arg2: memref<512x128xbf16, #tpu.memory_space<vmem>>, %arg3: memref<128x128xbf16, #tpu.memory_space<vmem>>, %arg4: memref<128x128xbf16, #tpu.memory_space<vmem>>, %arg5: memref<1x128xf32, #tpu.memory_space<vmem>>, %arg6: memref<1x128xf32, #tpu.memory_space<vmem>>, %arg7: memref<512x128xf32, #tpu.memory_space<vmem>>) attributes {dimension_semantics = [#tpu.dimension_semantics<parallel>], iteration_bounds = array<i64: 1>, scalar_prefetch = 0 : i64, scratch_operands = 0 : i64, tpu.core_type = #tpu.core_type<tc>, window_params = [{transform_indices = @transform_0, window_bounds = array<i64: 512, 128>}, {transform_indices = @transform_1, window_bounds = array<i64: 512, 128>}, {pipeline_mode = #tpu.pipeline_mode<synchronous>, transform_indices = @transform_2, window_bounds = array<i64: 128, 128>}, {pipeline_mode = #tpu.pipeline_mode<synchronous>, transform_indices = @transform_3, window_bounds = array<i64: 128, 128>}, {pipeline_mode = #tpu.pipeline_mode<synchronous>, transform_indices = @transform_4, window_bounds = array<i64: 1, 128>}, {pipeline_mode = #tpu.pipeline_mode<synchronous>, transform_indices = @transform_5, window_bounds = array<i64: 1, 128>}, {transform_indices = @transform_6, window_bounds = array<i64: 512, 128>}]} {
    %c0 = arith.constant 0 : index
    %c0_0 = arith.constant 0 : index
    %0 = vector.load %arg1[%c0, %c0_0] : memref<512x128xbf16, #tpu.memory_space<vmem>>, vector<512x128xbf16>
    %c0_1 = arith.constant 0 : index
    %c0_2 = arith.constant 0 : index
    %1 = vector.load %arg3[%c0_1, %c0_2] : memref<128x128xbf16, #tpu.memory_space<vmem>>, vector<128x128xbf16>
    %cst = arith.constant dense<0.000000e+00> : vector<512x128xf32>
    %2 = tpu.matmul %0, %1, %cst {dimension_numbers = #tpu.dot_dimension_numbers<[1], [0], [0], [1], [0, 0, 1, 1], [], []>} : vector<512x128xbf16>, vector<128x128xbf16>, vector<512x128xf32> -> vector<512x128xf32>
    %c0_3 = arith.constant 0 : index
    %c0_4 = arith.constant 0 : index
    %3 = vector.load %arg2[%c0_3, %c0_4] : memref<512x128xbf16, #tpu.memory_space<vmem>>, vector<512x128xbf16>
    %c0_5 = arith.constant 0 : index
    %c0_6 = arith.constant 0 : index
    %4 = vector.load %arg4[%c0_5, %c0_6] : memref<128x128xbf16, #tpu.memory_space<vmem>>, vector<128x128xbf16>
    %cst_7 = arith.constant dense<0.000000e+00> : vector<512x128xf32>
    %5 = tpu.matmul %3, %4, %cst_7 {dimension_numbers = #tpu.dot_dimension_numbers<[1], [0], [0], [1], [0, 0, 1, 1], [], []>} : vector<512x128xbf16>, vector<128x128xbf16>, vector<512x128xf32> -> vector<512x128xf32>
    %6 = arith.addf %2, %5 : vector<512x128xf32>
    %c0_8 = arith.constant 0 : index
    %c0_9 = arith.constant 0 : index
    %7 = vector.load %arg5[%c0_8, %c0_9] : memref<1x128xf32, #tpu.memory_space<vmem>>, vector<1x128xf32>
    %8 = vector.broadcast %7 : vector<1x128xf32> to vector<512x128xf32>
    %9 = arith.mulf %6, %8 : vector<512x128xf32>
    %c0_10 = arith.constant 0 : index
    %c0_11 = arith.constant 0 : index
    %10 = vector.load %arg6[%c0_10, %c0_11] : memref<1x128xf32, #tpu.memory_space<vmem>>, vector<1x128xf32>
    %11 = vector.broadcast %10 : vector<1x128xf32> to vector<512x128xf32>
    %12 = arith.addf %9, %11 : vector<512x128xf32>
    %13 = arith.negf %12 : vector<512x128xf32>
    %14 = math.exp %13 : vector<512x128xf32>
    %cst_12 = arith.constant 1.000000e+00 : f32
    %15 = vector.broadcast %cst_12 : f32 to vector<512x128xf32>
    %16 = arith.addf %15, %14 : vector<512x128xf32>
    %17 = arith.divf %15, %16 : vector<512x128xf32>
    %18 = arith.mulf %12, %17 : vector<512x128xf32>
    %c0_13 = arith.constant 0 : index
    %c0_14 = arith.constant 0 : index
    %19 = vector.load %arg7[%c0_13, %c0_14] : memref<512x128xf32, #tpu.memory_space<vmem>>, vector<512x128xf32>
    tpu.vector_store %arg7[%c0_13, %c0_14], %18 {strides = array<i32>} : memref<512x128xf32, #tpu.memory_space<vmem>>, vector<512x128xf32>,
    return
  }
  func.func @transform_0(%arg0: i32) -> (i32, i32) {
    %c0_i32 = arith.constant 0 : i32
    %c0_i32_0 = arith.constant 0 : i32
    return %arg0, %c0_i32 : i32, i32
  }
  func.func @transform_1(%arg0: i32) -> (i32, i32) {
    %c0_i32 = arith.constant 0 : i32
    %c0_i32_0 = arith.constant 0 : i32
    return %arg0, %c0_i32 : i32, i32
  }
  func.func @transform_2(%arg0: i32) -> (i32, i32) {
    %c0_i32 = arith.constant 0 : i32
    %c0_i32_0 = arith.constant 0 : i32
    %c0_i32_1 = arith.constant 0 : i32
    return %c0_i32, %c0_i32_0 : i32, i32
  }
  func.func @transform_3(%arg0: i32) -> (i32, i32) {
    %c0_i32 = arith.constant 0 : i32
    %c0_i32_0 = arith.constant 0 : i32
    %c0_i32_1 = arith.constant 0 : i32
    return %c0_i32, %c0_i32_0 : i32, i32
  }
  func.func @transform_4(%arg0: i32) -> (i32, i32) {
    %c0_i32 = arith.constant 0 : i32
    %c0_i32_0 = arith.constant 0 : i32
    %c0_i32_1 = arith.constant 0 : i32
    return %c0_i32, %c0_i32_0 : i32, i32
  }
  func.func @transform_5(%arg0: i32) -> (i32, i32) {
    %c0_i32 = arith.constant 0 : i32
    %c0_i32_0 = arith.constant 0 : i32
    %c0_i32_1 = arith.constant 0 : i32
    return %c0_i32, %c0_i32_0 : i32, i32
  }
  func.func @transform_6(%arg0: i32) -> (i32, i32) {
    %c0_i32 = arith.constant 0 : i32
    %c0_i32_0 = arith.constant 0 : i32
    return %arg0, %c0_i32 : i32, i32
  }
}

</mosaic_0001>

<bundles_post_ra>
// kernel: _lambda_.7
= control target key start
LH: loop header
LB: loop body
LE: loop exit
PB: predicated region body
PF: predicated region fallthrough
CT: control target
= control target key end

     0   :  { %s2073_s1 = inlined_call_operand.vmem [shape: bf16[128,128], index: 1, kind: input, shape index: {}]   ;;  %s2074_s0 = inlined_call_operand.vmem [shape: bf16[512,128], index: 0, kind: input, shape index: {}]   ;;  %s2075_s2 = inlined_call_operand.vmem [shape: f32[1,128], index: 2, kind: input, shape index: {}]   ;;  %s2076_s3 = inlined_call_operand.vmem [shape: f32[1,128], index: 3, kind: input, shape index: {}]   ;;  %s2077_s4 = inlined_call_operand.vmem [shape: bf16[512,128], index: 4, kind: output, shape index: {}]  }
   0x1   :  { %v1654_v0 = vld [vmem:[%s2073_s1] sm:$0xff]   ;;  %v1655_v1 = vld [vmem:[%s2073_s1 + $0x8] sm:$0xff]   ;;  %v1656_v2 = vld [vmem:[%s2073_s1 + $0x10] sm:$0xff]  }
   0x2   :  { %1558 = vmatprep.subr.bf16.mxu0 %v1654_v0  ;;  %1638 = vmatprep.subr.bf16.mxu1 %v1654_v0  ;;  %v1657_v3 = vld [vmem:[%s2073_s1 + $0x18] sm:$0xff]   ;;  %v1662_v4 = vld [vmem:[%s2074_s0] sm:$0xff]   ;;  %v1659_v7 = vld [vmem:[%s2073_s1 + $0x28] sm:$0xff]  }
   0x3   :  { %1559 = vmatpush3.bf16.msra.mxu0 %v1654_v0  ;;  %1646 = vmatpush3.bf16.msra.mxu1 %v1654_v0  ;;  %v1663_v5 = vld [vmem:[%s2074_s0 + $0x80] sm:$0xff]   ;;  %v1660_v8 = vld [vmem:[%s2073_s1 + $0x30] sm:$0xff]   ;;  %v1661_v9 = vld [vmem:[%s2073_s1 + $0x38] sm:$0xff]  }
   0x4   :  { %1560 = vmatprep.subr.bf16.mxu0 %v1655_v1  ;;  %1639 = vmatprep.subr.bf16.mxu1 %v1655_v1  ;;  %v1658_v6 = vld [vmem:[%s2073_s1 + $0x20] sm:$0xff]   ;;  %v1664_v10 = vld [vmem:[%s2074_s0 + $0x8] sm:$0xff]   ;;  %v1666_v12 = vld [vmem:[%s2074_s0 + $0x10] sm:$0xff]  }
   0x5   :  { %1574 = vmatprep.mubr.bf16.mxu0 %v1662_v4  ;;  %1606 = vmatprep.mubr.bf16.mxu1 %v1663_v5  ;;  %v1665_v11 = vld [vmem:[%s2074_s0 + $0x88] sm:$0xff]   ;;  %v1667_v13 = vld [vmem:[%s2074_s0 + $0x90] sm:$0xff]   ;;  %v1668_v14 = vld [vmem:[%s2074_s0 + $0x18] sm:$0xff]  }
   0x6   :  { %v1669_v15 = vld [vmem:[%s2074_s0 + $0x98] sm:$0xff]   ;;  %v1670_v16 = vld [vmem:[%s2074_s0 + $0x20] sm:$0xff]   ;;  %v1672_v18 = vld [vmem:[%s2074_s0 + $0x28] sm:$0xff]  }
   0x7   :  { %1561 = vmatpush3.bf16.msra.mxu0 %v1655_v1  ;;  %1647 = vmatpush3.bf16.msra.mxu1 %v1655_v1  ;;  %v1671_v17 = vld [vmem:[%s2074_s0 + $0xa0] sm:$0xff]   ;;  %v1673_v19 = vld [vmem:[%s2074_s0 + $0xa8] sm:$0xff]   ;;  %v1674_v20 = vld [vmem:[%s2074_s0 + $0x30] sm:$0xff]  }
   0x8   :  { %1562 = vmatprep.subr.bf16.mxu0 %v1656_v2  ;;  %1640 = vmatprep.subr.bf16.mxu1 %v1656_v2  ;;  %v1675_v21 = vld [vmem:[%s2074_s0 + $0xb0] sm:$0xff]   ;;  %v1676_v22 = vld [vmem:[%s2074_s0 + $0x38] sm:$0xff]   ;;  %v1678_v24 = vld [vmem:[%s2074_s0 + $0x40] sm:$0xff]  }
   0x9   :  { %v1677_v23 = vld [vmem:[%s2074_s0 + $0xb8] sm:$0xff]   ;;  %v1679_v25 = vld [vmem:[%s2074_s0 + $0xc0] sm:$0xff]   ;;  %v1680_v26 = vld [vmem:[%s2074_s0 + $0x48] sm:$0xff]  }
   0xa   :  { %v1681_v27 = vld [vmem:[%s2074_s0 + $0xc8] sm:$0xff]   ;;  %v1682_v28 = vld [vmem:[%s2074_s0 + $0x50] sm:$0xff]   ;;  %v1684_v30 = vld [vmem:[%s2074_s0 + $0x58] sm:$0xff]  }
   0xb   :  { %1563 = vmatpush3.bf16.msra.mxu0 %v1656_v2  ;;  %1648 = vmatpush3.bf16.msra.mxu1 %v1656_v2  ;;  %v1683_v29 = vld [vmem:[%s2074_s0 + $0xd0] sm:$0xff]   ;;  %v1685_v31 = vld [vmem:[%s2074_s0 + $0xd8] sm:$0xff]   ;;  %v1686_v32 = vld [vmem:[%s2074_s0 + $0x60] sm:$0xff]  }
   0xc   :  { %1564 = vmatprep.subr.bf16.mxu0 %v1657_v3  ;;  %1641 = vmatprep.subr.bf16.mxu1 %v1657_v3  ;;  %v1687_v33 = vld [vmem:[%s2074_s0 + $0xe0] sm:$0xff]   ;;  %v1688_v34 = vld [vmem:[%s2074_s0 + $0x68] sm:$0xff]   ;;  %v1690_v36 = vld [vmem:[%s2074_s0 + $0x70] sm:$0xff]  }
   0xd   :  { %v1689_v35 = vld [vmem:[%s2074_s0 + $0xe8] sm:$0xff]   ;;  %v1691_v37 = vld [vmem:[%s2074_s0 + $0xf0] sm:$0xff]   ;;  %v1692_v38 = vld [vmem:[%s2074_s0 + $0x78] sm:$0xff]  }
   0xe   :  { %v1693_v39 = vld [vmem:[%s2074_s0 + $0xf8] sm:$0xff]   ;;  %v1842_v40 = vld [vmem:[%s2075_s2] ss:$0 sm:$0xff] }
   0xf   :  { %1565 = vmatpush3.bf16.msra.mxu0 %v1657_v3  ;;  %1649 = vmatpush3.bf16.msra.mxu1 %v1657_v3  ;;  %v1847_v42 = vld [vmem:[%s2076_s3] ss:$0 sm:$0xff] }
  0x10   :  { %1566 = vmatprep.subr.bf16.mxu0 %v1658_v6  ;;  %1642 = vmatprep.subr.bf16.mxu1 %v1658_v6 }
  0x13   :  { %1567 = vmatpush3.bf16.msra.mxu0 %v1658_v6  ;;  %1650 = vmatpush3.bf16.msra.mxu1 %v1658_v6 }
  0x14   :  { %1568 = vmatprep.subr.bf16.mxu0 %v1659_v7  ;;  %1643 = vmatprep.subr.bf16.mxu1 %v1659_v7 }
  0x17   :  { %1569 = vmatpush3.bf16.msra.mxu0 %v1659_v7  ;;  %1651 = vmatpush3.bf16.msra.mxu1 %v1659_v7 }
  0x18   :  { %1570 = vmatprep.subr.bf16.mxu0 %v1660_v8  ;;  %1644 = vmatprep.subr.bf16.mxu1 %v1660_v8 }
  0x1b   :  { %1571 = vmatpush3.bf16.msra.mxu0 %v1660_v8  ;;  %1652 = vmatpush3.bf16.msra.mxu1 %v1660_v8 }
  0x1c   :  { %1572 = vmatprep.subr.bf16.mxu0 %v1661_v9  ;;  %1645 = vmatprep.subr.bf16.mxu1 %v1661_v9 }
  0x1f   :  { %1573 = vmatpush3.bf16.msra.mxu0 %v1661_v9  ;;  %1653 = vmatpush3.bf16.msra.mxu1 %v1661_v9 }
  0x22   :  { %1575 = vmatmul.mubr.bf16.vlgmr.msra.gmra.mrb[0].mxu0 %v1664_v10  ;;  %1607 = vmatmul.mubr.bf16.vlgmr.msra.gmra.mrb[0].mxu1 %v1665_v11 }
  0x23   :  { %1578 = vmatprep.mubr.bf16.mxu0 %v1666_v12  ;;  %1610 = vmatprep.mubr.bf16.mxu1 %v1667_v13 }
  0x2a   :  { %1579 = vmatmul.mubr.bf16.gmra.mrb[4].mxu0 %v1668_v14  ;;  %1611 = vmatmul.mubr.bf16.gmra.mrb[4].mxu1 %v1669_v15 }
  0x2b   :  { %1582 = vmatprep.mubr.bf16.mxu0 %v1670_v16  ;;  %1614 = vmatprep.mubr.bf16.mxu1 %v1671_v17 }
  0x32   :  { %1583 = vmatmul.mubr.bf16.gmra.mrb[8].mxu0 %v1672_v18  ;;  %1615 = vmatmul.mubr.bf16.gmra.mrb[8].mxu1 %v1673_v19 }
  0x33   :  { %1586 = vmatprep.mubr.bf16.mxu0 %v1674_v20  ;;  %1618 = vmatprep.mubr.bf16.mxu1 %v1675_v21 }
  0x3a   :  { %1587 = vmatmul.mubr.bf16.gmra.mrb[12].mxu0 %v1676_v22  ;;  %1619 = vmatmul.mubr.bf16.gmra.mrb[12].mxu1 %v1677_v23 }
  0x3b   :  { %1590 = vmatprep.mubr.bf16.mxu0 %v1678_v24  ;;  %1622 = vmatprep.mubr.bf16.mxu1 %v1679_v25 }
  0x42   :  { %1591 = vmatmul.mubr.bf16.gmra.mrb[16].mxu0 %v1680_v26  ;;  %1623 = vmatmul.mubr.bf16.gmra.mrb[16].mxu1 %v1681_v27 }
  0x43   :  { %1594 = vmatprep.mubr.bf16.mxu0 %v1682_v28  ;;  %1626 = vmatprep.mubr.bf16.mxu1 %v1683_v29 }
  0x4a   :  { %1595 = vmatmul.mubr.bf16.gmra.mrb[20].mxu0 %v1684_v30  ;;  %1627 = vmatmul.mubr.bf16.gmra.mrb[20].mxu1 %v1685_v31 }
  0x4b   :  { %1598 = vmatprep.mubr.bf16.mxu0 %v1686_v32  ;;  %1630 = vmatprep.mubr.bf16.mxu1 %v1687_v33 }
  0x52   :  { %1599 = vmatmul.mubr.bf16.gmra.mrb[24].mxu0 %v1688_v34  ;;  %1631 = vmatmul.mubr.bf16.gmra.mrb[24].mxu1 %v1689_v35 }
  0x53   :  { %1602 = vmatprep.mubr.bf16.mxu0 %v1690_v36  ;;  %1634 = vmatprep.mubr.bf16.mxu1 %v1691_v37 }
  0x5a   :  { %1603 = vmatmul.mubr.bf16.gmra.mrb[28].mxu0 %v1692_v38  ;;  %1635 = vmatmul.mubr.bf16.gmra.mrb[28].mxu1 %v1693_v39 }
  0xf5   :  { %v1576_v41 = vpop.f32.mrb[0].mxu0  ;;  %v1608_v43 = vpop.f32.mrb[0].mxu1 }
  0xf6   :  { %v636_v44 = vmul.f32 %v1576_v41, %v1842_v40  ;;  %v668_v45 = vmul.f32 %v1608_v43, %v1842_v40  ;;  %v372_v46 = vpop.f32.mrb[1].mxu0  ;;  %v500_v47 = vpop.f32.mrb[1].mxu1 }
  0xf7   :  { %v634_v48 = vmul.f32 %v1842_v40, %v372_v46  ;;  %v666_v49 = vmul.f32 %v1842_v40, %v500_v47  ;;  %v1577_v50 = vpop.f32.mrb[2].mxu0  ;;  %v1609_v51 = vpop.f32.mrb[2].mxu1 }
  0xf8   :  { %v707_v52 = vadd.f32 %v1847_v42, %v636_v44  ;;  %v739_v53 = vadd.f32 %v1847_v42, %v668_v45  ;;  %v637_v54 = vmul.f32 %v1577_v50, %v1842_v40  ;;  %v669_v55 = vmul.f32 %v1609_v51, %v1842_v40  ;;  %v375_v56 = vpop.f32.mrb[3].mxu0  ;;  %v503_v57 = vpop.f32.mrb[3].mxu1 }
  0xf9   :  { %v705_v58 = vadd.f32 %v1847_v42, %v634_v48  ;;  %v737_v59 = vadd.f32 %v1847_v42, %v666_v49  ;;  %v635_v60 = vmul.f32 %v1842_v40, %v375_v56  ;;  %v667_v61 = vmul.f32 %v1842_v40, %v503_v57 }
  0xfa   :  { %v708_v62 = vadd.f32 %v1847_v42, %v637_v54  ;;  %v740_v63 = vadd.f32 %v1847_v42, %v669_v55  ;;  %v771_v2 = vmax.f32 %v707_v52, 0.0  ;;  %v803_v3 = vmax.f32 %v739_v53, 0.0 }
  0xfb   :  { %v706_v0 = vadd.f32 %v1847_v42, %v635_v60  ;;  %v738_v1 = vadd.f32 %v1847_v42, %v667_v61  ;;  %v769_v6 = vmax.f32 %v705_v58, 0.0  ;;  %v801_v7 = vmax.f32 %v737_v59, 0.0 }
  0xfc   :  { %v772_v4 = vmax.f32 %v708_v62, 0.0  ;;  %v804_v5 = vmax.f32 %v740_v63, 0.0 }
  0xfd   :  { %v770_v8 = vmax.f32 %v706_v0, 0.0  ;;  %v802_v9 = vmax.f32 %v738_v1, 0.0  ;;  %v1580_v10 = vpop.f32.mrb[4].mxu0  ;;  %v1612_v11 = vpop.f32.mrb[4].mxu1 }
  0xfe   :  { %v1335_v12 = vpack.c.bf16 %v772_v4, %v771_v2  ;;  %v1415_v13 = vpack.c.bf16 %v804_v5, %v803_v3  ;;  %v640_v14 = vmul.f32 %v1580_v10, %v1842_v40  ;;  %v672_v15 = vmul.f32 %v1612_v11, %v1842_v40  ;;  %v388_v16 = vpop.f32.mrb[5].mxu0  ;;  %v516_v17 = vpop.f32.mrb[5].mxu1 }
  0xff   :  { %v1330_v18 = vpack.c.bf16 %v770_v8, %v769_v6  ;;  %v1410_v19 = vpack.c.bf16 %v802_v9, %v801_v7  ;;  %v638_v20 = vmul.f32 %v1842_v40, %v388_v16  ;;  %v670_v21 = vmul.f32 %v1842_v40, %v516_v17  ;;  %v1581_v22 = vpop.f32.mrb[6].mxu0  ;;  %v1613_v23 = vpop.f32.mrb[6].mxu1 }
 0x100   :  { %1487 = vst [vmem:[%s2077_s4 + $0x8] sm:$0xff] %v1335_v12   ;;  %1503 = vst [vmem:[%s2077_s4 + $0x88] sm:$0xff] %v1415_v13   ;;  %v711_v24 = vadd.f32 %v1847_v42, %v640_v14  ;;  %v743_v25 = vadd.f32 %v1847_v42, %v672_v15  ;;  %v641_v26 = vmul.f32 %v1581_v22, %v1842_v40  ;;  %v391_v28 = vpop.f32.mrb[7].mxu0  ;;  %v519_v29 = vpop.f32.mrb[7].mxu1 }
 0x101   :  { %v673_v27 = vmul.f32 %v1613_v23, %v1842_v40  ;;  %1331 = vst [vmem:[%s2077_s4] sm:$0xff] %v1330_v18   ;;  %1502 = vst [vmem:[%s2077_s4 + $0x80] sm:$0xff] %v1410_v19   ;;  %v709_v30 = vadd.f32 %v1847_v42, %v638_v20  ;;  %v741_v31 = vadd.f32 %v1847_v42, %v670_v21 }
 0x102   :  { %v639_v32 = vmul.f32 %v1842_v40, %v391_v28  ;;  %v671_v33 = vmul.f32 %v1842_v40, %v519_v29  ;;  %v712_v34 = vadd.f32 %v1847_v42, %v641_v26  ;;  %v775_v38 = vmax.f32 %v711_v24, 0.0 }
 0x103   :  { %v744_v35 = vadd.f32 %v1847_v42, %v673_v27  ;;  %v807_v39 = vmax.f32 %v743_v25, 0.0  ;;  %v773_v44 = vmax.f32 %v709_v30, 0.0  ;;  %v805_v45 = vmax.f32 %v741_v31, 0.0 }
 0x104   :  { %v710_v36 = vadd.f32 %v1847_v42, %v639_v32  ;;  %v742_v37 = vadd.f32 %v1847_v42, %v671_v33  ;;  %v776_v41 = vmax.f32 %v712_v34, 0.0 }
 0x105   :  { %v808_v43 = vmax.f32 %v744_v35, 0.0  ;;  %v1584_v48 = vpop.f32.mrb[8].mxu0  ;;  %v1616_v49 = vpop.f32.mrb[8].mxu1 }
 0x106   :  { %v774_v46 = vmax.f32 %v710_v36, 0.0  ;;  %v806_v47 = vmax.f32 %v742_v37, 0.0  ;;  %v1345_v50 = vpack.c.bf16 %v776_v41, %v775_v38  ;;  %v644_v52 = vmul.f32 %v1584_v48, %v1842_v40  ;;  %v404_v54 = vpop.f32.mrb[9].mxu0  ;;  %v532_v55 = vpop.f32.mrb[9].mxu1 }
 0x107   :  { %v1425_v51 = vpack.c.bf16 %v808_v43, %v807_v39  ;;  %v676_v53 = vmul.f32 %v1616_v49, %v1842_v40  ;;  %v642_v58 = vmul.f32 %v1842_v40, %v404_v54  ;;  %v674_v59 = vmul.f32 %v1842_v40, %v532_v55  ;;  %v1585_v60 = vpop.f32.mrb[10].mxu0  ;;  %v1617_v61 = vpop.f32.mrb[10].mxu1 }
 0x108   :  { %v1340_v56 = vpack.c.bf16 %v774_v46, %v773_v44  ;;  %v1420_v57 = vpack.c.bf16 %v806_v47, %v805_v45  ;;  %1489 = vst [vmem:[%s2077_s4 + $0x18] sm:$0xff] %v1345_v50   ;;  %v715_v62 = vadd.f32 %v1847_v42, %v644_v52  ;;  %v645_v0 = vmul.f32 %v1585_v60, %v1842_v40  ;;  %v407_v2 = vpop.f32.mrb[11].mxu0  ;;  %v535_v3 = vpop.f32.mrb[11].mxu1 }
 0x109   :  { %1505 = vst [vmem:[%s2077_s4 + $0x98] sm:$0xff] %v1425_v51   ;;  %v747_v63 = vadd.f32 %v1847_v42, %v676_v53  ;;  %v677_v1 = vmul.f32 %v1617_v61, %v1842_v40  ;;  %v713_v4 = vadd.f32 %v1847_v42, %v642_v58  ;;  %v745_v5 = vadd.f32 %v1847_v42, %v674_v59 }
 0x10a   :  { %1488 = vst [vmem:[%s2077_s4 + $0x10] sm:$0xff] %v1340_v56   ;;  %1504 = vst [vmem:[%s2077_s4 + $0x90] sm:$0xff] %v1420_v57   ;;  %v643_v6 = vmul.f32 %v1842_v40, %v407_v2  ;;  %v675_v7 = vmul.f32 %v1842_v40, %v535_v3  ;;  %v716_v8 = vadd.f32 %v1847_v42, %v645_v0  ;;  %v779_v12 = vmax.f32 %v715_v62, 0.0 }
 0x10b   :  { %v748_v9 = vadd.f32 %v1847_v42, %v677_v1  ;;  %v811_v13 = vmax.f32 %v747_v63, 0.0  ;;  %v777_v16 = vmax.f32 %v713_v4, 0.0  ;;  %v809_v17 = vmax.f32 %v745_v5, 0.0 }
 0x10c   :  { %v714_v10 = vadd.f32 %v1847_v42, %v643_v6  ;;  %v746_v11 = vadd.f32 %v1847_v42, %v675_v7  ;;  %v780_v14 = vmax.f32 %v716_v8, 0.0 }
 0x10d   :  { %v812_v15 = vmax.f32 %v748_v9, 0.0  ;;  %v1588_v20 = vpop.f32.mrb[12].mxu0  ;;  %v1620_v21 = vpop.f32.mrb[12].mxu1 }
 0x10e   :  { %v778_v18 = vmax.f32 %v714_v10, 0.0  ;;  %v810_v19 = vmax.f32 %v746_v11, 0.0  ;;  %v1355_v22 = vpack.c.bf16 %v780_v14, %v779_v12  ;;  %v648_v24 = vmul.f32 %v1588_v20, %v1842_v40  ;;  %v420_v26 = vpop.f32.mrb[13].mxu0  ;;  %v548_v27 = vpop.f32.mrb[13].mxu1 }
 0x10f   :  { %v1435_v23 = vpack.c.bf16 %v812_v15, %v811_v13  ;;  %v680_v25 = vmul.f32 %v1620_v21, %v1842_v40  ;;  %v646_v30 = vmul.f32 %v1842_v40, %v420_v26  ;;  %v678_v31 = vmul.f32 %v1842_v40, %v548_v27  ;;  %v1589_v32 = vpop.f32.mrb[14].mxu0  ;;  %v1621_v33 = vpop.f32.mrb[14].mxu1 }
 0x110   :  { %v1350_v28 = vpack.c.bf16 %v778_v18, %v777_v16  ;;  %v1430_v29 = vpack.c.bf16 %v810_v19, %v809_v17  ;;  %1491 = vst [vmem:[%s2077_s4 + $0x28] sm:$0xff] %v1355_v22   ;;  %v719_v34 = vadd.f32 %v1847_v42, %v648_v24  ;;  %v649_v36 = vmul.f32 %v1589_v32, %v1842_v40  ;;  %v423_v38 = vpop.f32.mrb[15].mxu0  ;;  %v551_v39 = vpop.f32.mrb[15].mxu1 }
 0x111   :  { %1507 = vst [vmem:[%s2077_s4 + $0xa8] sm:$0xff] %v1435_v23   ;;  %v751_v35 = vadd.f32 %v1847_v42, %v680_v25  ;;  %v681_v37 = vmul.f32 %v1621_v33, %v1842_v40  ;;  %v717_v41 = vadd.f32 %v1847_v42, %v646_v30  ;;  %v749_v43 = vadd.f32 %v1847_v42, %v678_v31 }
 0x112   :  { %1490 = vst [vmem:[%s2077_s4 + $0x20] sm:$0xff] %v1350_v28   ;;  %1506 = vst [vmem:[%s2077_s4 + $0xa0] sm:$0xff] %v1430_v29   ;;  %v647_v44 = vmul.f32 %v1842_v40, %v423_v38  ;;  %v679_v45 = vmul.f32 %v1842_v40, %v551_v39  ;;  %v720_v46 = vadd.f32 %v1847_v42, %v649_v36  ;;  %v783_v50 = vmax.f32 %v719_v34, 0.0 }
 0x113   :  { %v752_v47 = vadd.f32 %v1847_v42, %v681_v37  ;;  %v815_v51 = vmax.f32 %v751_v35, 0.0  ;;  %v781_v54 = vmax.f32 %v717_v41, 0.0  ;;  %v813_v55 = vmax.f32 %v749_v43, 0.0 }
 0x114   :  { %v718_v48 = vadd.f32 %v1847_v42, %v647_v44  ;;  %v750_v49 = vadd.f32 %v1847_v42, %v679_v45  ;;  %v784_v52 = vmax.f32 %v720_v46, 0.0 }
 0x115   :  { %v816_v53 = vmax.f32 %v752_v47, 0.0  ;;  %v1592_v58 = vpop.f32.mrb[16].mxu0  ;;  %v1624_v59 = vpop.f32.mrb[16].mxu1 }
 0x116   :  { %v782_v56 = vmax.f32 %v718_v48, 0.0  ;;  %v814_v57 = vmax.f32 %v750_v49, 0.0  ;;  %v1365_v60 = vpack.c.bf16 %v784_v52, %v783_v50  ;;  %v652_v62 = vmul.f32 %v1592_v58, %v1842_v40  ;;  %v436_v0 = vpop.f32.mrb[17].mxu0  ;;  %v564_v1 = vpop.f32.mrb[17].mxu1 }
 0x117   :  { %v1445_v61 = vpack.c.bf16 %v816_v53, %v815_v51  ;;  %v684_v63 = vmul.f32 %v1624_v59, %v1842_v40  ;;  %v650_v4 = vmul.f32 %v1842_v40, %v436_v0  ;;  %v682_v5 = vmul.f32 %v1842_v40, %v564_v1  ;;  %v1593_v6 = vpop.f32.mrb[18].mxu0  ;;  %v1625_v7 = vpop.f32.mrb[18].mxu1 }
 0x118   :  { %v1360_v2 = vpack.c.bf16 %v782_v56, %v781_v54  ;;  %v1440_v3 = vpack.c.bf16 %v814_v57, %v813_v55  ;;  %1493 = vst [vmem:[%s2077_s4 + $0x38] sm:$0xff] %v1365_v60   ;;  %v723_v8 = vadd.f32 %v1847_v42, %v652_v62  ;;  %v653_v10 = vmul.f32 %v1593_v6, %v1842_v40  ;;  %v439_v12 = vpop.f32.mrb[19].mxu0  ;;  %v567_v13 = vpop.f32.mrb[19].mxu1 }
 0x119   :  { %1509 = vst [vmem:[%s2077_s4 + $0xb8] sm:$0xff] %v1445_v61   ;;  %v755_v9 = vadd.f32 %v1847_v42, %v684_v63  ;;  %v685_v11 = vmul.f32 %v1625_v7, %v1842_v40  ;;  %v721_v14 = vadd.f32 %v1847_v42, %v650_v4  ;;  %v753_v15 = vadd.f32 %v1847_v42, %v682_v5 }
 0x11a   :  { %1492 = vst [vmem:[%s2077_s4 + $0x30] sm:$0xff] %v1360_v2   ;;  %1508 = vst [vmem:[%s2077_s4 + $0xb0] sm:$0xff] %v1440_v3   ;;  %v651_v16 = vmul.f32 %v1842_v40, %v439_v12  ;;  %v683_v17 = vmul.f32 %v1842_v40, %v567_v13  ;;  %v724_v18 = vadd.f32 %v1847_v42, %v653_v10  ;;  %v787_v22 = vmax.f32 %v723_v8, 0.0 }
 0x11b   :  { %v756_v19 = vadd.f32 %v1847_v42, %v685_v11  ;;  %v819_v23 = vmax.f32 %v755_v9, 0.0  ;;  %v785_v26 = vmax.f32 %v721_v14, 0.0  ;;  %v817_v27 = vmax.f32 %v753_v15, 0.0 }
 0x11c   :  { %v722_v20 = vadd.f32 %v1847_v42, %v651_v16  ;;  %v754_v21 = vadd.f32 %v1847_v42, %v683_v17  ;;  %v788_v24 = vmax.f32 %v724_v18, 0.0 }
 0x11d   :  { %v820_v25 = vmax.f32 %v756_v19, 0.0  ;;  %v1596_v30 = vpop.f32.mrb[20].mxu0  ;;  %v1628_v31 = vpop.f32.mrb[20].mxu1 }
 0x11e   :  { %v786_v28 = vmax.f32 %v722_v20, 0.0  ;;  %v818_v29 = vmax.f32 %v754_v21, 0.0  ;;  %v1375_v32 = vpack.c.bf16 %v788_v24, %v787_v22  ;;  %v656_v34 = vmul.f32 %v1596_v30, %v1842_v40  ;;  %v452_v36 = vpop.f32.mrb[21].mxu0  ;;  %v580_v37 = vpop.f32.mrb[21].mxu1 }
 0x11f   :  { %v1455_v33 = vpack.c.bf16 %v820_v25, %v819_v23  ;;  %v688_v35 = vmul.f32 %v1628_v31, %v1842_v40  ;;  %v654_v41 = vmul.f32 %v1842_v40, %v452_v36  ;;  %v686_v43 = vmul.f32 %v1842_v40, %v580_v37  ;;  %v1597_v44 = vpop.f32.mrb[22].mxu0  ;;  %v1629_v45 = vpop.f32.mrb[22].mxu1 }
 0x120   :  { %v1370_v38 = vpack.c.bf16 %v786_v28, %v785_v26  ;;  %v1450_v39 = vpack.c.bf16 %v818_v29, %v817_v27  ;;  %1495 = vst [vmem:[%s2077_s4 + $0x48] sm:$0xff] %v1375_v32   ;;  %v727_v46 = vadd.f32 %v1847_v42, %v656_v34  ;;  %v657_v48 = vmul.f32 %v1597_v44, %v1842_v40  ;;  %v455_v50 = vpop.f32.mrb[23].mxu0  ;;  %v583_v51 = vpop.f32.mrb[23].mxu1 }
 0x121   :  { %1511 = vst [vmem:[%s2077_s4 + $0xc8] sm:$0xff] %v1455_v33   ;;  %v759_v47 = vadd.f32 %v1847_v42, %v688_v35  ;;  %v689_v49 = vmul.f32 %v1629_v45, %v1842_v40  ;;  %v725_v52 = vadd.f32 %v1847_v42, %v654_v41  ;;  %v757_v53 = vadd.f32 %v1847_v42, %v686_v43 }
 0x122   :  { %1494 = vst [vmem:[%s2077_s4 + $0x40] sm:$0xff] %v1370_v38   ;;  %1510 = vst [vmem:[%s2077_s4 + $0xc0] sm:$0xff] %v1450_v39   ;;  %v655_v54 = vmul.f32 %v1842_v40, %v455_v50  ;;  %v687_v55 = vmul.f32 %v1842_v40, %v583_v51  ;;  %v728_v56 = vadd.f32 %v1847_v42, %v657_v48  ;;  %v791_v60 = vmax.f32 %v727_v46, 0.0 }
 0x123   :  { %v760_v57 = vadd.f32 %v1847_v42, %v689_v49  ;;  %v823_v61 = vmax.f32 %v759_v47, 0.0  ;;  %v789_v0 = vmax.f32 %v725_v52, 0.0  ;;  %v821_v1 = vmax.f32 %v757_v53, 0.0 }
 0x124   :  { %v726_v58 = vadd.f32 %v1847_v42, %v655_v54  ;;  %v758_v59 = vadd.f32 %v1847_v42, %v687_v55  ;;  %v792_v62 = vmax.f32 %v728_v56, 0.0 }
 0x125   :  { %v824_v63 = vmax.f32 %v760_v57, 0.0  ;;  %v1600_v4 = vpop.f32.mrb[24].mxu0  ;;  %v1632_v5 = vpop.f32.mrb[24].mxu1 }
 0x126   :  { %v790_v2 = vmax.f32 %v726_v58, 0.0  ;;  %v822_v3 = vmax.f32 %v758_v59, 0.0  ;;  %v1385_v6 = vpack.c.bf16 %v792_v62, %v791_v60  ;;  %v660_v8 = vmul.f32 %v1600_v4, %v1842_v40  ;;  %v468_v10 = vpop.f32.mrb[25].mxu0  ;;  %v596_v11 = vpop.f32.mrb[25].mxu1 }
 0x127   :  { %v1465_v7 = vpack.c.bf16 %v824_v63, %v823_v61  ;;  %v692_v9 = vmul.f32 %v1632_v5, %v1842_v40  ;;  %v658_v14 = vmul.f32 %v1842_v40, %v468_v10  ;;  %v690_v15 = vmul.f32 %v1842_v40, %v596_v11  ;;  %v1601_v16 = vpop.f32.mrb[26].mxu0  ;;  %v1633_v17 = vpop.f32.mrb[26].mxu1 }
 0x128   :  { %v1380_v12 = vpack.c.bf16 %v790_v2, %v789_v0  ;;  %v1460_v13 = vpack.c.bf16 %v822_v3, %v821_v1  ;;  %1497 = vst [vmem:[%s2077_s4 + $0x58] sm:$0xff] %v1385_v6   ;;  %v731_v18 = vadd.f32 %v1847_v42, %v660_v8  ;;  %v661_v20 = vmul.f32 %v1601_v16, %v1842_v40  ;;  %v471_v22 = vpop.f32.mrb[27].mxu0  ;;  %v599_v23 = vpop.f32.mrb[27].mxu1 }
 0x129   :  { %1513 = vst [vmem:[%s2077_s4 + $0xd8] sm:$0xff] %v1465_v7   ;;  %v763_v19 = vadd.f32 %v1847_v42, %v692_v9  ;;  %v693_v21 = vmul.f32 %v1633_v17, %v1842_v40  ;;  %v729_v24 = vadd.f32 %v1847_v42, %v658_v14  ;;  %v761_v25 = vadd.f32 %v1847_v42, %v690_v15 }
 0x12a   :  { %1496 = vst [vmem:[%s2077_s4 + $0x50] sm:$0xff] %v1380_v12   ;;  %1512 = vst [vmem:[%s2077_s4 + $0xd0] sm:$0xff] %v1460_v13   ;;  %v659_v26 = vmul.f32 %v1842_v40, %v471_v22  ;;  %v691_v27 = vmul.f32 %v1842_v40, %v599_v23  ;;  %v732_v28 = vadd.f32 %v1847_v42, %v661_v20  ;;  %v795_v32 = vmax.f32 %v731_v18, 0.0 }
 0x12b   :  { %v764_v29 = vadd.f32 %v1847_v42, %v693_v21  ;;  %v827_v33 = vmax.f32 %v763_v19, 0.0  ;;  %v793_v36 = vmax.f32 %v729_v24, 0.0  ;;  %v825_v37 = vmax.f32 %v761_v25, 0.0 }
 0x12c   :  { %v730_v30 = vadd.f32 %v1847_v42, %v659_v26  ;;  %v762_v31 = vadd.f32 %v1847_v42, %v691_v27  ;;  %v796_v34 = vmax.f32 %v732_v28, 0.0 }
 0x12d   :  { %v828_v35 = vmax.f32 %v764_v29, 0.0  ;;  %v1604_v41 = vpop.f32.mrb[28].mxu0  ;;  %v1636_v43 = vpop.f32.mrb[28].mxu1 }
 0x12e   :  { %v794_v38 = vmax.f32 %v730_v30, 0.0  ;;  %v826_v39 = vmax.f32 %v762_v31, 0.0  ;;  %v1395_v44 = vpack.c.bf16 %v796_v34, %v795_v32  ;;  %v664_v46 = vmul.f32 %v1604_v41, %v1842_v40  ;;  %v484_v48 = vpop.f32.mrb[29].mxu0  ;;  %v612_v49 = vpop.f32.mrb[29].mxu1 }
 0x12f   :  { %v1475_v45 = vpack.c.bf16 %v828_v35, %v827_v33  ;;  %v696_v47 = vmul.f32 %v1636_v43, %v1842_v40  ;;  %v662_v52 = vmul.f32 %v1842_v40, %v484_v48  ;;  %v694_v53 = vmul.f32 %v1842_v40, %v612_v49  ;;  %v1605_v54 = vpop.f32.mrb[30].mxu0  ;;  %v1637_v55 = vpop.f32.mrb[30].mxu1 }
 0x130   :  { %v1390_v50 = vpack.c.bf16 %v794_v38, %v793_v36  ;;  %v1470_v51 = vpack.c.bf16 %v826_v39, %v825_v37  ;;  %1499 = vst [vmem:[%s2077_s4 + $0x68] sm:$0xff] %v1395_v44   ;;  %v735_v56 = vadd.f32 %v1847_v42, %v664_v46  ;;  %v665_v58 = vmul.f32 %v1605_v54, %v1842_v40  ;;  %v487_v60 = vpop.f32.mrb[31].mxu0  ;;  %v615_v61 = vpop.f32.mrb[31].mxu1 }
 0x131   :  { %1515 = vst [vmem:[%s2077_s4 + $0xe8] sm:$0xff] %v1475_v45   ;;  %v767_v57 = vadd.f32 %v1847_v42, %v696_v47  ;;  %v697_v59 = vmul.f32 %v1637_v55, %v1842_v40  ;;  %v733_v62 = vadd.f32 %v1847_v42, %v662_v52  ;;  %v765_v63 = vadd.f32 %v1847_v42, %v694_v53 }
 0x132   :  { %1498 = vst [vmem:[%s2077_s4 + $0x60] sm:$0xff] %v1390_v50   ;;  %1514 = vst [vmem:[%s2077_s4 + $0xe0] sm:$0xff] %v1470_v51   ;;  %v663_v0 = vmul.f32 %v1842_v40, %v487_v60  ;;  %v695_v1 = vmul.f32 %v1842_v40, %v615_v61  ;;  %v736_v2 = vadd.f32 %v1847_v42, %v665_v58  ;;  %v799_v6 = vmax.f32 %v735_v56, 0.0 }
 0x133   :  { %v768_v3 = vadd.f32 %v1847_v42, %v697_v59  ;;  %v831_v7 = vmax.f32 %v767_v57, 0.0  ;;  %v797_v10 = vmax.f32 %v733_v62, 0.0  ;;  %v829_v11 = vmax.f32 %v765_v63, 0.0 }
 0x134   :  { %v734_v4 = vadd.f32 %v1847_v42, %v663_v0  ;;  %v766_v5 = vadd.f32 %v1847_v42, %v695_v1  ;;  %v800_v8 = vmax.f32 %v736_v2, 0.0 }
 0x135   :  { %v832_v9 = vmax.f32 %v768_v3, 0.0 }
 0x136   :  { %v798_v12 = vmax.f32 %v734_v4, 0.0  ;;  %v830_v13 = vmax.f32 %v766_v5, 0.0  ;;  %v1405_v14 = vpack.c.bf16 %v800_v8, %v799_v6 }
 0x137   :  { %v1485_v15 = vpack.c.bf16 %v832_v9, %v831_v7 }
 0x138   :  { %v1400_v16 = vpack.c.bf16 %v798_v12, %v797_v10  ;;  %v1480_v40 = vpack.c.bf16 %v830_v13, %v829_v11  ;;  %1501 = vst [vmem:[%s2077_s4 + $0x78] sm:$0xff] %v1405_v14  }
 0x139   :  { %1517 = vst [vmem:[%s2077_s4 + $0xf8] sm:$0xff] %v1485_v15  }
 0x13a   :  { %1500 = vst [vmem:[%s2077_s4 + $0x70] sm:$0xff] %v1400_v16   ;;  %1516 = vst [vmem:[%s2077_s4 + $0xf0] sm:$0xff] %v1480_v40  }

// kernel: _lambda_.9
= control target key start
LH: loop header
LB: loop body
LE: loop exit
PB: predicated region body
PF: predicated region fallthrough
CT: control target
= control target key end

     0   :  { %s2712_s1 = inlined_call_operand.vmem [shape: bf16[128,128], index: 1, kind: input, shape index: {}]   ;;  %s2713_s0 = inlined_call_operand.vmem [shape: bf16[512,128], index: 0, kind: input, shape index: {}]   ;;  %s2714_s4 = inlined_call_operand.vmem [shape: bf16[512,128], index: 4, kind: input, shape index: {}]   ;;  %s2715_s2 = inlined_call_operand.vmem [shape: f32[1,128], index: 2, kind: input, shape index: {}]   ;;  %s2716_s3 = inlined_call_operand.vmem [shape: f32[1,128], index: 3, kind: input, shape index: {}]   ;;  %s2717_s5 = inlined_call_operand.vmem [shape: bf16[512,128], index: 5, kind: output, shape index: {}]  }
   0x1   :  { %v1944_v0 = vld [vmem:[%s2712_s1] sm:$0xff]   ;;  %v1945_v1 = vld [vmem:[%s2712_s1 + $0x8] sm:$0xff]   ;;  %v1946_v2 = vld [vmem:[%s2712_s1 + $0x10] sm:$0xff]  }
   0x2   :  { %1848 = vmatprep.subr.bf16.mxu0 %v1944_v0  ;;  %1928 = vmatprep.subr.bf16.mxu1 %v1944_v0  ;;  %v1947_v3 = vld [vmem:[%s2712_s1 + $0x18] sm:$0xff]   ;;  %v1952_v4 = vld [vmem:[%s2713_s0] sm:$0xff]   ;;  %v1949_v7 = vld [vmem:[%s2712_s1 + $0x28] sm:$0xff]  }
   0x3   :  { %1849 = vmatpush3.bf16.msra.mxu0 %v1944_v0  ;;  %1936 = vmatpush3.bf16.msra.mxu1 %v1944_v0  ;;  %v1953_v5 = vld [vmem:[%s2713_s0 + $0x80] sm:$0xff]   ;;  %v1950_v8 = vld [vmem:[%s2712_s1 + $0x30] sm:$0xff]   ;;  %v1951_v9 = vld [vmem:[%s2712_s1 + $0x38] sm:$0xff]  }
   0x4   :  { %1850 = vmatprep.subr.bf16.mxu0 %v1945_v1  ;;  %1929 = vmatprep.subr.bf16.mxu1 %v1945_v1  ;;  %v1948_v6 = vld [vmem:[%s2712_s1 + $0x20] sm:$0xff]   ;;  %v1954_v10 = vld [vmem:[%s2713_s0 + $0x8] sm:$0xff]   ;;  %v1956_v12 = vld [vmem:[%s2713_s0 + $0x10] sm:$0xff]  }
   0x5   :  { %1864 = vmatprep.mubr.bf16.mxu0 %v1952_v4  ;;  %1896 = vmatprep.mubr.bf16.mxu1 %v1953_v5  ;;  %v1955_v11 = vld [vmem:[%s2713_s0 + $0x88] sm:$0xff]   ;;  %v1957_v13 = vld [vmem:[%s2713_s0 + $0x90] sm:$0xff]   ;;  %v1958_v14 = vld [vmem:[%s2713_s0 + $0x18] sm:$0xff]  }
   0x6   :  { %v1959_v15 = vld [vmem:[%s2713_s0 + $0x98] sm:$0xff]   ;;  %v1960_v16 = vld [vmem:[%s2713_s0 + $0x20] sm:$0xff]   ;;  %v1962_v18 = vld [vmem:[%s2713_s0 + $0x28] sm:$0xff]  }
   0x7   :  { %1851 = vmatpush3.bf16.msra.mxu0 %v1945_v1  ;;  %1937 = vmatpush3.bf16.msra.mxu1 %v1945_v1  ;;  %v1961_v17 = vld [vmem:[%s2713_s0 + $0xa0] sm:$0xff]   ;;  %v1963_v19 = vld [vmem:[%s2713_s0 + $0xa8] sm:$0xff]   ;;  %v1964_v20 = vld [vmem:[%s2713_s0 + $0x30] sm:$0xff]  }
   0x8   :  { %1852 = vmatprep.subr.bf16.mxu0 %v1946_v2  ;;  %1930 = vmatprep.subr.bf16.mxu1 %v1946_v2  ;;  %v1965_v21 = vld [vmem:[%s2713_s0 + $0xb0] sm:$0xff]   ;;  %v1966_v22 = vld [vmem:[%s2713_s0 + $0x38] sm:$0xff]   ;;  %v1968_v24 = vld [vmem:[%s2713_s0 + $0x40] sm:$0xff]  }
   0x9   :  { %v1967_v23 = vld [vmem:[%s2713_s0 + $0xb8] sm:$0xff]   ;;  %v1969_v25 = vld [vmem:[%s2713_s0 + $0xc0] sm:$0xff]   ;;  %v1970_v26 = vld [vmem:[%s2713_s0 + $0x48] sm:$0xff]  }
   0xa   :  { %v1971_v27 = vld [vmem:[%s2713_s0 + $0xc8] sm:$0xff]   ;;  %v1972_v28 = vld [vmem:[%s2713_s0 + $0x50] sm:$0xff]   ;;  %v1974_v30 = vld [vmem:[%s2713_s0 + $0x58] sm:$0xff]  }
   0xb   :  { %1853 = vmatpush3.bf16.msra.mxu0 %v1946_v2  ;;  %1938 = vmatpush3.bf16.msra.mxu1 %v1946_v2  ;;  %v1973_v29 = vld [vmem:[%s2713_s0 + $0xd0] sm:$0xff]   ;;  %v1975_v31 = vld [vmem:[%s2713_s0 + $0xd8] sm:$0xff]   ;;  %v1976_v32 = vld [vmem:[%s2713_s0 + $0x60] sm:$0xff]  }
   0xc   :  { %1854 = vmatprep.subr.bf16.mxu0 %v1947_v3  ;;  %1931 = vmatprep.subr.bf16.mxu1 %v1947_v3  ;;  %v1977_v33 = vld [vmem:[%s2713_s0 + $0xe0] sm:$0xff]   ;;  %v1978_v34 = vld [vmem:[%s2713_s0 + $0x68] sm:$0xff]   ;;  %v1980_v36 = vld [vmem:[%s2713_s0 + $0x70] sm:$0xff]  }
   0xd   :  { %v1979_v35 = vld [vmem:[%s2713_s0 + $0xe8] sm:$0xff]   ;;  %v1981_v37 = vld [vmem:[%s2713_s0 + $0xf0] sm:$0xff]   ;;  %v1982_v38 = vld [vmem:[%s2713_s0 + $0x78] sm:$0xff]  }
   0xe   :  { %v1983_v39 = vld [vmem:[%s2713_s0 + $0xf8] sm:$0xff]   ;;  %v2137_v40 = vld [vmem:[%s2714_s4 + $0x8] sm:$0xff]   ;;  %v2147_v42 = vld [vmem:[%s2714_s4] sm:$0xff]  }
   0xf   :  { %1855 = vmatpush3.bf16.msra.mxu0 %v1947_v3  ;;  %1939 = vmatpush3.bf16.msra.mxu1 %v1947_v3  ;;  %v2142_v41 = vld [vmem:[%s2714_s4 + $0x88] sm:$0xff]   ;;  %v2152_v43 = vld [vmem:[%s2714_s4 + $0x80] sm:$0xff]   ;;  %v2157_v44 = vld [vmem:[%s2714_s4 + $0x18] sm:$0xff]   ;;  %v1464_v48 = vunpack.c.l.bf16 %v2137_v40  ;;  %v1460_v50 = vunpack.c.l.bf16 %v2147_v42  ;;  %v1465_v53 = vunpack.c.h.bf16 %v2137_v40  ;;  %v1461_v55 = vunpack.c.h.bf16 %v2147_v42 }
  0x10   :  { %1856 = vmatprep.subr.bf16.mxu0 %v1948_v6  ;;  %1932 = vmatprep.subr.bf16.mxu1 %v1948_v6  ;;  %v2162_v45 = vld [vmem:[%s2714_s4 + $0x98] sm:$0xff]   ;;  %v2167_v46 = vld [vmem:[%s2714_s4 + $0x10] sm:$0xff]   ;;  %v1528_v49 = vunpack.c.l.bf16 %v2142_v41  ;;  %v1524_v51 = vunpack.c.l.bf16 %v2152_v43  ;;  %v2181_v52 = vld [vmem:[%s2714_s4 + $0x28] sm:$0xff]   ;;  %v1529_v54 = vunpack.c.h.bf16 %v2142_v41  ;;  %v1525_v56 = vunpack.c.h.bf16 %v2152_v43 }
  0x11   :  { %v2172_v47 = vld [vmem:[%s2714_s4 + $0x90] sm:$0xff]   ;;  %v2190_v57 = vld [vmem:[%s2714_s4 + $0xa8] sm:$0xff]   ;;  %v2195_v58 = vld [vmem:[%s2714_s4 + $0x20] sm:$0xff]   ;;  %v1472_v60 = vunpack.c.l.bf16 %v2157_v44  ;;  %v1536_v61 = vunpack.c.l.bf16 %v2162_v45  ;;  %v1468_v62 = vunpack.c.l.bf16 %v2167_v46  ;;  %v1473_v1 = vunpack.c.h.bf16 %v2157_v44 }
  0x12   :  { %v2200_v59 = vld [vmem:[%s2714_s4 + $0xa0] sm:$0xff]   ;;  %v1532_v63 = vunpack.c.l.bf16 %v2172_v47  ;;  %v2209_v0 = vld [vmem:[%s2714_s4 + $0x38] sm:$0xff]   ;;  %v1537_v2 = vunpack.c.h.bf16 %v2162_v45  ;;  %v1469_v3 = vunpack.c.h.bf16 %v2167_v46  ;;  %v1533_v4 = vunpack.c.h.bf16 %v2172_v47 }
  0x13   :  { %1857 = vmatpush3.bf16.msra.mxu0 %v1948_v6  ;;  %1940 = vmatpush3.bf16.msra.mxu1 %v1948_v6  ;;  %v2218_v5 = vld [vmem:[%s2714_s4 + $0xb8] sm:$0xff]   ;;  %v2223_v6 = vld [vmem:[%s2714_s4 + $0x30] sm:$0xff]  }
  0x14   :  { %1858 = vmatprep.subr.bf16.mxu0 %v1949_v7  ;;  %1933 = vmatprep.subr.bf16.mxu1 %v1949_v7  ;;  %v2323_v43 = vld [vmem:[%s2714_s4 + $0x58] sm:$0xff]  }
  0x17   :  { %1859 = vmatpush3.bf16.msra.mxu0 %v1949_v7  ;;  %1941 = vmatpush3.bf16.msra.mxu1 %v1949_v7  ;;  %v2228_v7 = vld [vmem:[%s2714_s4 + $0xb0] sm:$0xff]  }
  0x18   :  { %1860 = vmatprep.subr.bf16.mxu0 %v1950_v8  ;;  %1934 = vmatprep.subr.bf16.mxu1 %v1950_v8 }
  0x1b   :  { %1861 = vmatpush3.bf16.msra.mxu0 %v1950_v8  ;;  %1942 = vmatpush3.bf16.msra.mxu1 %v1950_v8  ;;  %v1480_v8 = vunpack.c.l.bf16 %v2181_v52 }
  0x1c   :  { %1862 = vmatprep.subr.bf16.mxu0 %v1951_v9  ;;  %1935 = vmatprep.subr.bf16.mxu1 %v1951_v9 }
  0x1f   :  { %1863 = vmatpush3.bf16.msra.mxu0 %v1951_v9  ;;  %1943 = vmatpush3.bf16.msra.mxu1 %v1951_v9  ;;  %v1544_v9 = vunpack.c.l.bf16 %v2190_v57 }
  0x22   :  { %1865 = vmatmul.mubr.bf16.vlgmr.msra.gmra.mrb[0].mxu0 %v1954_v10  ;;  %1897 = vmatmul.mubr.bf16.vlgmr.msra.gmra.mrb[0].mxu1 %v1955_v11  ;;  %v1476_v10 = vunpack.c.l.bf16 %v2195_v58  ;;  %v1540_v11 = vunpack.c.l.bf16 %v2200_v59 }
  0x23   :  { %1868 = vmatprep.mubr.bf16.mxu0 %v1956_v12  ;;  %1900 = vmatprep.mubr.bf16.mxu1 %v1957_v13  ;;  %v2237_v12 = vld [vmem:[%s2715_s2] ss:$0 sm:$0xff]  ;;  %v1481_v13 = vunpack.c.h.bf16 %v2181_v52 }
  0x2a   :  { %1869 = vmatmul.mubr.bf16.gmra.mrb[4].mxu0 %v1958_v14  ;;  %1901 = vmatmul.mubr.bf16.gmra.mrb[4].mxu1 %v1959_v15  ;;  %v1545_v14 = vunpack.c.h.bf16 %v2190_v57  ;;  %v1477_v15 = vunpack.c.h.bf16 %v2195_v58 }
  0x2b   :  { %1872 = vmatprep.mubr.bf16.mxu0 %v1960_v16  ;;  %1904 = vmatprep.mubr.bf16.mxu1 %v1961_v17  ;;  %v1541_v16 = vunpack.c.h.bf16 %v2200_v59  ;;  %v2246_v17 = vld [vmem:[%s2714_s4 + $0x48] sm:$0xff]  }
  0x2c   :  { %v2439_v59 = vld [vmem:[%s2714_s4 + $0x68] sm:$0xff]  }
  0x32   :  { %1873 = vmatmul.mubr.bf16.gmra.mrb[8].mxu0 %v1962_v18  ;;  %1905 = vmatmul.mubr.bf16.gmra.mrb[8].mxu1 %v1963_v19  ;;  %v2251_v18 = vld [vmem:[%s2714_s4 + $0xc8] sm:$0xff]  }
  0x33   :  { %1876 = vmatprep.mubr.bf16.mxu0 %v1964_v20  ;;  %1908 = vmatprep.mubr.bf16.mxu1 %v1965_v21 }
  0x3a   :  { %1877 = vmatmul.mubr.bf16.gmra.mrb[12].mxu0 %v1966_v22  ;;  %1909 = vmatmul.mubr.bf16.gmra.mrb[12].mxu1 %v1967_v23  ;;  %v2260_v23 = vld [vmem:[%s2714_s4 + $0x40] sm:$0xff]  }
  0x3b   :  { %1880 = vmatprep.mubr.bf16.mxu0 %v1968_v24  ;;  %1912 = vmatprep.mubr.bf16.mxu1 %v1969_v25  ;;  %v2265_v24 = vld [vmem:[%s2714_s4 + $0xc0] sm:$0xff]  }
  0x42   :  { %1881 = vmatmul.mubr.bf16.gmra.mrb[16].mxu0 %v1970_v26  ;;  %1913 = vmatmul.mubr.bf16.gmra.mrb[16].mxu1 %v1971_v27  ;;  %v2270_v26 = vld [vmem:[%s2716_s3] ss:$0 sm:$0xff] }
  0x43   :  { %1884 = vmatprep.mubr.bf16.mxu0 %v1972_v28  ;;  %1916 = vmatprep.mubr.bf16.mxu1 %v1973_v29 }
  0x4a   :  { %1885 = vmatmul.mubr.bf16.gmra.mrb[20].mxu0 %v1974_v30  ;;  %1917 = vmatmul.mubr.bf16.gmra.mrb[20].mxu1 %v1975_v31 }
  0x4b   :  { %1888 = vmatprep.mubr.bf16.mxu0 %v1976_v32  ;;  %1920 = vmatprep.mubr.bf16.mxu1 %v1977_v33 }
  0x52   :  { %1889 = vmatmul.mubr.bf16.gmra.mrb[24].mxu0 %v1978_v34  ;;  %1921 = vmatmul.mubr.bf16.gmra.mrb[24].mxu1 %v1979_v35 }
  0x53   :  { %1892 = vmatprep.mubr.bf16.mxu0 %v1980_v36  ;;  %1924 = vmatprep.mubr.bf16.mxu1 %v1981_v37 }
  0x5a   :  { %1893 = vmatmul.mubr.bf16.gmra.mrb[28].mxu0 %v1982_v38  ;;  %1925 = vmatmul.mubr.bf16.gmra.mrb[28].mxu1 %v1983_v39 }
  0xf5   :  { %v1866_v25 = vpop.f32.mrb[0].mxu0  ;;  %v1898_v27 = vpop.f32.mrb[0].mxu1 }
  0xf6   :  { %v639_v32 = vmul.f32 %v1866_v25, %v2237_v12  ;;  %v671_v33 = vmul.f32 %v1898_v27, %v2237_v12  ;;  %v375_v34 = vpop.f32.mrb[1].mxu0  ;;  %v503_v35 = vpop.f32.mrb[1].mxu1 }
  0xf7   :  { %v637_v38 = vmul.f32 %v2237_v12, %v375_v34  ;;  %v669_v39 = vmul.f32 %v2237_v12, %v503_v35  ;;  %v1867_v22 = vpop.f32.mrb[2].mxu0  ;;  %v1899_v21 = vpop.f32.mrb[2].mxu1 }
  0xf8   :  { %v710_v25 = vadd.f32 %v2270_v26, %v639_v32  ;;  %v742_v27 = vadd.f32 %v2270_v26, %v671_v33  ;;  %v640_v29 = vmul.f32 %v1867_v22, %v2237_v12  ;;  %v672_v36 = vmul.f32 %v1899_v21, %v2237_v12  ;;  %v378_v28 = vpop.f32.mrb[3].mxu0  ;;  %v506_v37 = vpop.f32.mrb[3].mxu1 }
  0xf9   :  { %v708_v34 = vadd.f32 %v2270_v26, %v637_v38  ;;  %v740_v35 = vadd.f32 %v2270_v26, %v669_v39  ;;  %v638_v20 = vmul.f32 %v2237_v12, %v378_v28  ;;  %v670_v30 = vmul.f32 %v2237_v12, %v506_v37 }
  0xfa   :  { %v711_v31 = vadd.f32 %v2270_v26, %v640_v29  ;;  %v743_v32 = vadd.f32 %v2270_v26, %v672_v36  ;;  %v1497_v33 = vunpack.c.h.bf16 %v2246_v17  ;;  %v1561_v22 = vunpack.c.h.bf16 %v2251_v18 }
  0xfb   :  { %v709_v21 = vadd.f32 %v2270_v26, %v638_v20  ;;  %v741_v19 = vadd.f32 %v2270_v26, %v670_v30  ;;  %v1493_v38 = vunpack.c.h.bf16 %v2260_v23  ;;  %v902_v28 = vadd.f32 %v1464_v48, %v710_v25 }
  0xfc   :  { %v934_v29 = vadd.f32 %v1528_v49, %v742_v27  ;;  %v903_v36 = vadd.f32 %v1465_v53, %v711_v31  ;;  %v935_v37 = vadd.f32 %v1529_v54, %v743_v32  ;;  %v900_v20 = vadd.f32 %v1460_v50, %v708_v34 }
  0xfd   :  { %v932_v30 = vadd.f32 %v1524_v51, %v740_v35  ;;  %v901_v39 = vadd.f32 %v1461_v55, %v709_v21  ;;  %v933_v48 = vadd.f32 %v1525_v56, %v741_v19  ;;  %v1870_v25 = vpop.f32.mrb[4].mxu0  ;;  %v1902_v49 = vpop.f32.mrb[4].mxu1  ;;  %v2328_v56 = vld [vmem:[%s2714_s4 + $0xd8] sm:$0xff]  }
  0xfe   :  { %v1594_v27 = vpack.c.bf16 %v903_v36, %v902_v28  ;;  %v1674_v40 = vpack.c.bf16 %v935_v37, %v934_v29  ;;  %v643_v53 = vmul.f32 %v1870_v25, %v2237_v12  ;;  %v675_v41 = vmul.f32 %v1902_v49, %v2237_v12  ;;  %v391_v54 = vpop.f32.mrb[5].mxu0  ;;  %v519_v31 = vpop.f32.mrb[5].mxu1  ;;  %v2343_v36 = vld [vmem:[%s2714_s4 + $0x50] sm:$0xff]  }
  0xff   :  { %v1589_v50 = vpack.c.bf16 %v901_v39, %v900_v20  ;;  %v1669_v34 = vpack.c.bf16 %v933_v48, %v932_v30  ;;  %v641_v51 = vmul.f32 %v2237_v12, %v391_v54  ;;  %v673_v42 = vmul.f32 %v2237_v12, %v519_v31  ;;  %v1871_v55 = vpop.f32.mrb[6].mxu0  ;;  %v1903_v35 = vpop.f32.mrb[6].mxu1  ;;  %v2348_v37 = vld [vmem:[%s2714_s4 + $0xd0] sm:$0xff]  }
 0x100   :  { %1777 = vst [vmem:[%s2717_s5 + $0x8] sm:$0xff] %v1594_v27   ;;  %1793 = vst [vmem:[%s2717_s5 + $0x88] sm:$0xff] %v1674_v40   ;;  %v714_v19 = vadd.f32 %v2270_v26, %v643_v53  ;;  %v746_v32 = vadd.f32 %v2270_v26, %v675_v41  ;;  %v644_v21 = vmul.f32 %v1871_v55, %v2237_v12  ;;  %v394_v28 = vpop.f32.mrb[7].mxu0  ;;  %v522_v29 = vpop.f32.mrb[7].mxu1  ;;  %v1504_v40 = vunpack.c.l.bf16 %v2323_v43 }
 0x101   :  { %v676_v39 = vmul.f32 %v1903_v35, %v2237_v12  ;;  %1590 = vst [vmem:[%s2717_s5] sm:$0xff] %v1589_v50   ;;  %1792 = vst [vmem:[%s2717_s5 + $0x80] sm:$0xff] %v1669_v34   ;;  %v712_v20 = vadd.f32 %v2270_v26, %v641_v51  ;;  %v744_v30 = vadd.f32 %v2270_v26, %v673_v42  ;;  %v1568_v53 = vunpack.c.l.bf16 %v2328_v56 }
 0x102   :  { %v642_v48 = vmul.f32 %v2237_v12, %v394_v28  ;;  %v674_v25 = vmul.f32 %v2237_v12, %v522_v29  ;;  %v715_v49 = vadd.f32 %v2270_v26, %v644_v21  ;;  %v1500_v31 = vunpack.c.l.bf16 %v2343_v36 }
 0x103   :  { %v747_v27 = vadd.f32 %v2270_v26, %v676_v39  ;;  %v1564_v50 = vunpack.c.l.bf16 %v2348_v37  ;;  %v906_v34 = vadd.f32 %v1472_v60, %v714_v19  ;;  %v938_v51 = vadd.f32 %v1536_v61, %v746_v32 }
 0x104   :  { %v713_v41 = vadd.f32 %v2270_v26, %v642_v48  ;;  %v745_v54 = vadd.f32 %v2270_v26, %v674_v25  ;;  %v907_v42 = vadd.f32 %v1473_v1, %v715_v49  ;;  %v904_v35 = vadd.f32 %v1468_v62, %v712_v20 }
 0x105   :  { %v939_v55 = vadd.f32 %v1537_v2, %v747_v27  ;;  %v936_v21 = vadd.f32 %v1532_v63, %v744_v30  ;;  %v1874_v19 = vpop.f32.mrb[8].mxu0  ;;  %v1906_v61 = vpop.f32.mrb[8].mxu1 }
 0x106   :  { %v905_v39 = vadd.f32 %v1469_v3, %v713_v41  ;;  %v937_v60 = vadd.f32 %v1533_v4, %v745_v54  ;;  %v1604_v32 = vpack.c.bf16 %v907_v42, %v906_v34  ;;  %v647_v1 = vmul.f32 %v1874_v19, %v2237_v12  ;;  %v407_v2 = vpop.f32.mrb[9].mxu0  ;;  %v535_v28 = vpop.f32.mrb[9].mxu1 }
 0x107   :  { %v1684_v44 = vpack.c.bf16 %v939_v55, %v938_v51  ;;  %v679_v45 = vmul.f32 %v1906_v61, %v2237_v12  ;;  %v645_v63 = vmul.f32 %v2237_v12, %v407_v2  ;;  %v677_v46 = vmul.f32 %v2237_v12, %v535_v28  ;;  %v1875_v3 = vpop.f32.mrb[10].mxu0  ;;  %v1907_v20 = vpop.f32.mrb[10].mxu1 }
 0x108   :  { %v1599_v62 = vpack.c.bf16 %v905_v39, %v904_v35  ;;  %v1679_v29 = vpack.c.bf16 %v937_v60, %v936_v21  ;;  %1779 = vst [vmem:[%s2717_s5 + $0x18] sm:$0xff] %v1604_v32   ;;  %v718_v47 = vadd.f32 %v2270_v26, %v647_v1  ;;  %v648_v30 = vmul.f32 %v1875_v3, %v2237_v12  ;;  %v410_v25 = vpop.f32.mrb[11].mxu0  ;;  %v538_v49 = vpop.f32.mrb[11].mxu1 }
 0x109   :  { %1795 = vst [vmem:[%s2717_s5 + $0x98] sm:$0xff] %v1684_v44   ;;  %v750_v4 = vadd.f32 %v2270_v26, %v679_v45  ;;  %v680_v48 = vmul.f32 %v1907_v20, %v2237_v12  ;;  %v716_v27 = vadd.f32 %v2270_v26, %v645_v63  ;;  %v748_v41 = vadd.f32 %v2270_v26, %v677_v46 }
 0x10a   :  { %1778 = vst [vmem:[%s2717_s5 + $0x10] sm:$0xff] %v1599_v62   ;;  %1794 = vst [vmem:[%s2717_s5 + $0x90] sm:$0xff] %v1679_v29   ;;  %v646_v54 = vmul.f32 %v2237_v12, %v410_v25  ;;  %v678_v34 = vmul.f32 %v2237_v12, %v538_v49  ;;  %v719_v51 = vadd.f32 %v2270_v26, %v648_v30  ;;  %v1505_v55 = vunpack.c.h.bf16 %v2323_v43  ;;  %v2459_v49 = vld [vmem:[%s2714_s4 + $0x60] sm:$0xff]  }
 0x10b   :  { %v751_v42 = vadd.f32 %v2270_v26, %v680_v48  ;;  %v1569_v35 = vunpack.c.h.bf16 %v2328_v56  ;;  %v1501_v60 = vunpack.c.h.bf16 %v2343_v36  ;;  %v1565_v19 = vunpack.c.h.bf16 %v2348_v37 }
 0x10c   :  { %v717_v21 = vadd.f32 %v2270_v26, %v646_v54  ;;  %v749_v39 = vadd.f32 %v2270_v26, %v678_v34  ;;  %v910_v61 = vadd.f32 %v1480_v8, %v718_v47  ;;  %v942_v32 = vadd.f32 %v1544_v9, %v750_v4 }
 0x10d   :  { %v911_v44 = vadd.f32 %v1481_v13, %v719_v51  ;;  %v943_v1 = vadd.f32 %v1545_v14, %v751_v42  ;;  %v908_v45 = vadd.f32 %v1476_v10, %v716_v27  ;;  %v940_v2 = vadd.f32 %v1540_v11, %v748_v41  ;;  %v1878_v62 = vpop.f32.mrb[12].mxu0  ;;  %v1910_v9 = vpop.f32.mrb[12].mxu1  ;;  %v2464_v27 = vld [vmem:[%s2714_s4 + $0xe0] sm:$0xff]  }
 0x10e   :  { %v909_v28 = vadd.f32 %v1477_v15, %v717_v21  ;;  %v941_v8 = vadd.f32 %v1541_v16, %v749_v39  ;;  %v651_v13 = vmul.f32 %v1878_v62, %v2237_v12  ;;  %v683_v57 = vmul.f32 %v1910_v9, %v2237_v12  ;;  %v423_v14 = vpop.f32.mrb[13].mxu0  ;;  %v551_v63 = vpop.f32.mrb[13].mxu1  ;;  %v2444_v16 = vld [vmem:[%s2714_s4 + $0xe8] sm:$0xff]  }
 0x10f   :  { %v1614_v29 = vpack.c.bf16 %v911_v44, %v910_v61  ;;  %v1694_v52 = vpack.c.bf16 %v943_v1, %v942_v32  ;;  %v649_v11 = vmul.f32 %v2237_v12, %v423_v14  ;;  %v681_v58 = vmul.f32 %v2237_v12, %v551_v63  ;;  %v1879_v15 = vpop.f32.mrb[14].mxu0  ;;  %v1911_v3 = vpop.f32.mrb[14].mxu1 }
 0x110   :  { %v1609_v10 = vpack.c.bf16 %v909_v28, %v908_v45  ;;  %v1689_v46 = vpack.c.bf16 %v941_v8, %v940_v2  ;;  %v722_v20 = vadd.f32 %v2270_v26, %v651_v13  ;;  %v754_v47 = vadd.f32 %v2270_v26, %v683_v57  ;;  %v426_v48 = vpop.f32.mrb[15].mxu0  ;;  %v554_v25 = vpop.f32.mrb[15].mxu1 }
 0x111   :  { %1781 = vst [vmem:[%s2717_s5 + $0x28] sm:$0xff] %v1614_v29   ;;  %1797 = vst [vmem:[%s2717_s5 + $0xa8] sm:$0xff] %v1694_v52   ;;  %v652_v4 = vmul.f32 %v1879_v15, %v2237_v12  ;;  %v684_v30 = vmul.f32 %v1911_v3, %v2237_v12  ;;  %v720_v41 = vadd.f32 %v2270_v26, %v649_v11  ;;  %v1512_v39 = vunpack.c.l.bf16 %v2439_v59 }
 0x112   :  { %1780 = vst [vmem:[%s2717_s5 + $0x20] sm:$0xff] %v1609_v10   ;;  %1796 = vst [vmem:[%s2717_s5 + $0xa0] sm:$0xff] %v1689_v46   ;;  %v752_v54 = vadd.f32 %v2270_v26, %v681_v58  ;;  %v650_v34 = vmul.f32 %v2237_v12, %v426_v48  ;;  %v682_v51 = vmul.f32 %v2237_v12, %v554_v25  ;;  %v1576_v61 = vunpack.c.l.bf16 %v2444_v16 }
 0x113   :  { %v723_v42 = vadd.f32 %v2270_v26, %v652_v4  ;;  %v755_v21 = vadd.f32 %v2270_v26, %v684_v30  ;;  %v1508_v1 = vunpack.c.l.bf16 %v2459_v49  ;;  %v1572_v45 = vunpack.c.l.bf16 %v2464_v27 }
 0x114   :  { %v721_v32 = vadd.f32 %v2270_v26, %v650_v34  ;;  %v753_v44 = vadd.f32 %v2270_v26, %v682_v51  ;;  %v2718_v2 = vunpack.c.l.bf16 %v2209_v0  ;;  %v2719_v8 = vunpack.c.l.bf16 %v2218_v5 }
 0x115   :  { %v2720_v9 = vunpack.c.h.bf16 %v2209_v0  ;;  %v2721_v52 = vunpack.c.h.bf16 %v2218_v5  ;;  %v2722_v57 = vunpack.c.l.bf16 %v2223_v6  ;;  %v2723_v63 = vunpack.c.l.bf16 %v2228_v7  ;;  %v1882_v3 = vpop.f32.mrb[16].mxu0 }
 0x116   :  { %v914_v28 = vadd.f32 %v2718_v2, %v722_v20  ;;  %v946_v62 = vadd.f32 %v2719_v8, %v754_v47  ;;  %v2724_v46 = vunpack.c.h.bf16 %v2223_v6  ;;  %v2725_v58 = vunpack.c.h.bf16 %v2228_v7  ;;  %v1914_v20 = vpop.f32.mrb[16].mxu1  ;;  %v439_v30 = vpop.f32.mrb[17].mxu0 }
 0x117   :  { %v915_v29 = vadd.f32 %v2720_v9, %v723_v42  ;;  %v947_v13 = vadd.f32 %v2721_v52, %v755_v21  ;;  %v912_v14 = vadd.f32 %v2722_v57, %v720_v41  ;;  %v944_v10 = vadd.f32 %v2723_v63, %v752_v54  ;;  %v567_v48 = vpop.f32.mrb[17].mxu1  ;;  %v1883_v34 = vpop.f32.mrb[18].mxu0 }
 0x118   :  { %v913_v11 = vadd.f32 %v2724_v46, %v721_v32  ;;  %v945_v15 = vadd.f32 %v2725_v58, %v753_v44  ;;  %v655_v4 = vmul.f32 %v1882_v3, %v2237_v12  ;;  %v687_v5 = vmul.f32 %v1914_v20, %v2237_v12  ;;  %v1915_v51 = vpop.f32.mrb[18].mxu1  ;;  %v442_v44 = vpop.f32.mrb[19].mxu0 }
 0x119   :  { %v1624_v47 = vpack.c.bf16 %v915_v29, %v914_v28  ;;  %v1704_v0 = vpack.c.bf16 %v947_v13, %v946_v62  ;;  %v653_v54 = vmul.f32 %v2237_v12, %v439_v30  ;;  %v685_v6 = vmul.f32 %v2237_v12, %v567_v48  ;;  %v570_v2 = vpop.f32.mrb[19].mxu1 }
 0x11a   :  { %v1619_v25 = vpack.c.bf16 %v913_v11, %v912_v14  ;;  %v1699_v41 = vpack.c.bf16 %v945_v15, %v944_v10  ;;  %v726_v7 = vadd.f32 %v2270_v26, %v655_v4  ;;  %v758_v42 = vadd.f32 %v2270_v26, %v687_v5 }
 0x11b   :  { %1783 = vst [vmem:[%s2717_s5 + $0x38] sm:$0xff] %v1624_v47   ;;  %1799 = vst [vmem:[%s2717_s5 + $0xb8] sm:$0xff] %v1704_v0   ;;  %v656_v21 = vmul.f32 %v1883_v34, %v2237_v12  ;;  %v688_v32 = vmul.f32 %v1915_v51, %v2237_v12  ;;  %v724_v28 = vadd.f32 %v2270_v26, %v653_v54  ;;  %v1513_v13 = vunpack.c.h.bf16 %v2439_v59 }
 0x11c   :  { %1782 = vst [vmem:[%s2717_s5 + $0x30] sm:$0xff] %v1619_v25   ;;  %1798 = vst [vmem:[%s2717_s5 + $0xb0] sm:$0xff] %v1699_v41   ;;  %v756_v8 = vadd.f32 %v2270_v26, %v685_v6  ;;  %v654_v62 = vmul.f32 %v2237_v12, %v442_v44  ;;  %v686_v9 = vmul.f32 %v2237_v12, %v570_v2  ;;  %v1577_v57 = vunpack.c.h.bf16 %v2444_v16  ;;  %v2560_v44 = vld [vmem:[%s2714_s4 + $0xf8] sm:$0xff]  }
 0x11d   :  { %v727_v29 = vadd.f32 %v2270_v26, %v656_v21  ;;  %v759_v52 = vadd.f32 %v2270_v26, %v688_v32  ;;  %v1509_v10 = vunpack.c.h.bf16 %v2459_v49  ;;  %v1573_v46 = vunpack.c.h.bf16 %v2464_v27  ;;  %v1886_v54 = vpop.f32.mrb[20].mxu0  ;;  %v1918_v6 = vpop.f32.mrb[20].mxu1 }
 0x11e   :  { %v725_v14 = vadd.f32 %v2270_v26, %v654_v62  ;;  %v757_v63 = vadd.f32 %v2270_v26, %v686_v9  ;;  %v2726_v11 = vunpack.c.l.bf16 %v2246_v17  ;;  %v2727_v15 = vunpack.c.l.bf16 %v2251_v18  ;;  %v583_v51 = vpop.f32.mrb[21].mxu1 }
 0x11f   :  { %v919_v20 = vadd.f32 %v1497_v33, %v727_v29  ;;  %v951_v47 = vadd.f32 %v1561_v22, %v759_v52  ;;  %v2728_v0 = vunpack.c.l.bf16 %v2260_v23  ;;  %v2729_v5 = vunpack.c.l.bf16 %v2265_v24  ;;  %v455_v22 = vpop.f32.mrb[21].mxu0  ;;  %v1919_v32 = vpop.f32.mrb[22].mxu1  ;;  %v2575_v52 = vld [vmem:[%s2714_s4 + $0x70] sm:$0xff]  }
 0x120   :  { %v918_v58 = vadd.f32 %v2726_v11, %v726_v7  ;;  %v950_v3 = vadd.f32 %v2727_v15, %v758_v42  ;;  %v917_v48 = vadd.f32 %v1493_v38, %v725_v14  ;;  %v2730_v25 = vunpack.c.h.bf16 %v2265_v24  ;;  %v1887_v38 = vpop.f32.mrb[22].mxu0  ;;  %v2555_v24 = vld [vmem:[%s2714_s4 + $0x78] sm:$0xff]   ;;  %v586_v29 = vpop.f32.mrb[23].mxu1  ;;  %v2580_v14 = vld [vmem:[%s2714_s4 + $0xf0] sm:$0xff]  }
 0x121   :  { %v916_v4 = vadd.f32 %v2728_v0, %v724_v28  ;;  %v948_v30 = vadd.f32 %v2729_v5, %v756_v8  ;;  %v659_v33 = vmul.f32 %v1886_v54, %v2237_v12  ;;  %v691_v18 = vmul.f32 %v1918_v6, %v2237_v12  ;;  %v458_v9 = vpop.f32.mrb[23].mxu0 }
 0x122   :  { %v949_v41 = vadd.f32 %v2730_v25, %v757_v63  ;;  %v1634_v34 = vpack.c.bf16 %v919_v20, %v918_v58  ;;  %v1714_v17 = vpack.c.bf16 %v951_v47, %v950_v3  ;;  %v657_v21 = vmul.f32 %v2237_v12, %v455_v22 }
 0x123   :  { %v1629_v7 = vpack.c.bf16 %v917_v48, %v916_v4  ;;  %v689_v23 = vmul.f32 %v2237_v12, %v583_v51  ;;  %v730_v2 = vadd.f32 %v2270_v26, %v659_v33  ;;  %v762_v28 = vadd.f32 %v2270_v26, %v691_v18 }
 0x124   :  { %v1709_v42 = vpack.c.bf16 %v949_v41, %v948_v30  ;;  %1785 = vst [vmem:[%s2717_s5 + $0x48] sm:$0xff] %v1634_v34   ;;  %1801 = vst [vmem:[%s2717_s5 + $0xc8] sm:$0xff] %v1714_v17   ;;  %v660_v8 = vmul.f32 %v1887_v38, %v2237_v12  ;;  %v692_v62 = vmul.f32 %v1919_v32, %v2237_v12  ;;  %v1520_v47 = vunpack.c.l.bf16 %v2555_v24 }
 0x125   :  { %1784 = vst [vmem:[%s2717_s5 + $0x40] sm:$0xff] %v1629_v7   ;;  %v728_v63 = vadd.f32 %v2270_v26, %v657_v21  ;;  %v760_v11 = vadd.f32 %v2270_v26, %v689_v23  ;;  %v658_v58 = vmul.f32 %v2237_v12, %v458_v9  ;;  %v690_v15 = vmul.f32 %v2237_v12, %v586_v29  ;;  %v1890_v18 = vpop.f32.mrb[24].mxu0 }
 0x126   :  { %1800 = vst [vmem:[%s2717_s5 + $0xc0] sm:$0xff] %v1709_v42   ;;  %v731_v3 = vadd.f32 %v2270_v26, %v660_v8  ;;  %v763_v20 = vadd.f32 %v2270_v26, %v692_v62  ;;  %v1584_v0 = vunpack.c.l.bf16 %v2560_v44  ;;  %v1516_v30 = vunpack.c.l.bf16 %v2575_v52 }
 0x127   :  { %v729_v4 = vadd.f32 %v2270_v26, %v658_v58  ;;  %v761_v5 = vadd.f32 %v2270_v26, %v690_v15  ;;  %v1580_v48 = vunpack.c.l.bf16 %v2580_v14  ;;  %v922_v25 = vadd.f32 %v1504_v40, %v730_v2 }
 0x128   :  { %v954_v41 = vadd.f32 %v1568_v53, %v762_v28  ;;  %v923_v54 = vadd.f32 %v1505_v55, %v731_v3  ;;  %v955_v6 = vadd.f32 %v1569_v35, %v763_v20  ;;  %v920_v34 = vadd.f32 %v1500_v31, %v728_v63  ;;  %v1922_v53 = vpop.f32.mrb[24].mxu1  ;;  %v471_v35 = vpop.f32.mrb[25].mxu0 }
 0x129   :  { %v952_v17 = vadd.f32 %v1564_v50, %v760_v11  ;;  %v921_v33 = vadd.f32 %v1501_v60, %v729_v4  ;;  %v953_v40 = vadd.f32 %v1565_v19, %v761_v5  ;;  %v663_v55 = vmul.f32 %v1890_v18, %v2237_v12  ;;  %v599_v51 = vpop.f32.mrb[25].mxu1  ;;  %v1891_v60 = vpop.f32.mrb[26].mxu0 }
 0x12a   :  { %v1644_v22 = vpack.c.bf16 %v923_v54, %v922_v25  ;;  %v1724_v43 = vpack.c.bf16 %v955_v6, %v954_v41  ;;  %v695_v56 = vmul.f32 %v1922_v53, %v2237_v12  ;;  %v661_v50 = vmul.f32 %v2237_v12, %v471_v35  ;;  %v1923_v42 = vpop.f32.mrb[26].mxu1  ;;  %v474_v38 = vpop.f32.mrb[27].mxu0 }
 0x12b   :  { %v1639_v31 = vpack.c.bf16 %v921_v33, %v920_v34  ;;  %v1719_v7 = vpack.c.bf16 %v953_v40, %v952_v17  ;;  %v693_v36 = vmul.f32 %v2237_v12, %v599_v51  ;;  %v734_v37 = vadd.f32 %v2270_v26, %v663_v55  ;;  %v602_v32 = vpop.f32.mrb[27].mxu1 }
 0x12c   :  { %1787 = vst [vmem:[%s2717_s5 + $0x58] sm:$0xff] %v1644_v22   ;;  %1803 = vst [vmem:[%s2717_s5 + $0xd8] sm:$0xff] %v1724_v43   ;;  %v766_v19 = vadd.f32 %v2270_v26, %v695_v56  ;;  %v664_v21 = vmul.f32 %v1891_v60, %v2237_v12  ;;  %v696_v23 = vmul.f32 %v1923_v42, %v2237_v12  ;;  %v1521_v63 = vunpack.c.h.bf16 %v2555_v24 }
 0x12d   :  { %1786 = vst [vmem:[%s2717_s5 + $0x50] sm:$0xff] %v1639_v31   ;;  %1802 = vst [vmem:[%s2717_s5 + $0xd0] sm:$0xff] %v1719_v7   ;;  %v732_v2 = vadd.f32 %v2270_v26, %v661_v50  ;;  %v764_v28 = vadd.f32 %v2270_v26, %v693_v36  ;;  %v662_v8 = vmul.f32 %v2237_v12, %v474_v38  ;;  %v1585_v11 = vunpack.c.h.bf16 %v2560_v44  ;;  %v1894_v17 = vpop.f32.mrb[28].mxu0 }
 0x12e   :  { %v694_v62 = vmul.f32 %v2237_v12, %v602_v32  ;;  %v735_v9 = vadd.f32 %v2270_v26, %v664_v21  ;;  %v767_v29 = vadd.f32 %v2270_v26, %v696_v23  ;;  %v1517_v3 = vunpack.c.h.bf16 %v2575_v52 }
 0x12f   :  { %v733_v58 = vadd.f32 %v2270_v26, %v662_v8  ;;  %v1581_v20 = vunpack.c.h.bf16 %v2580_v14  ;;  %v926_v4 = vadd.f32 %v1512_v39, %v734_v37  ;;  %v958_v5 = vadd.f32 %v1576_v61, %v766_v19  ;;  %v1926_v61 = vpop.f32.mrb[28].mxu1 }
 0x130   :  { %v765_v15 = vadd.f32 %v2270_v26, %v694_v62  ;;  %v927_v25 = vadd.f32 %v1513_v13, %v735_v9  ;;  %v959_v41 = vadd.f32 %v1577_v57, %v767_v29  ;;  %v924_v54 = vadd.f32 %v1508_v1, %v732_v2  ;;  %v487_v57 = vpop.f32.mrb[29].mxu0  ;;  %v615_v40 = vpop.f32.mrb[29].mxu1 }
 0x131   :  { %v956_v6 = vadd.f32 %v1572_v45, %v764_v28  ;;  %v925_v34 = vadd.f32 %v1509_v10, %v733_v58  ;;  %v667_v13 = vmul.f32 %v1894_v17, %v2237_v12  ;;  %v699_v16 = vmul.f32 %v1926_v61, %v2237_v12  ;;  %v1895_v10 = vpop.f32.mrb[30].mxu0  ;;  %v1927_v53 = vpop.f32.mrb[30].mxu1 }
 0x132   :  { %v957_v39 = vadd.f32 %v1573_v46, %v765_v15  ;;  %v1654_v33 = vpack.c.bf16 %v927_v25, %v926_v4  ;;  %v1734_v59 = vpack.c.bf16 %v959_v41, %v958_v5  ;;  %v665_v45 = vmul.f32 %v2237_v12, %v487_v57  ;;  %v490_v55 = vpop.f32.mrb[31].mxu0  ;;  %v618_v56 = vpop.f32.mrb[31].mxu1 }
 0x133   :  { %v1649_v1 = vpack.c.bf16 %v925_v34, %v924_v54  ;;  %v697_v49 = vmul.f32 %v2237_v12, %v615_v40  ;;  %v738_v27 = vadd.f32 %v2270_v26, %v667_v13  ;;  %v770_v46 = vadd.f32 %v2270_v26, %v699_v16 }
 0x134   :  { %v1729_v18 = vpack.c.bf16 %v957_v39, %v956_v6  ;;  %1789 = vst [vmem:[%s2717_s5 + $0x68] sm:$0xff] %v1654_v33   ;;  %1805 = vst [vmem:[%s2717_s5 + $0xe8] sm:$0xff] %v1734_v59   ;;  %v668_v22 = vmul.f32 %v1895_v10, %v2237_v12  ;;  %v700_v43 = vmul.f32 %v1927_v53, %v2237_v12 }
 0x135   :  { %1788 = vst [vmem:[%s2717_s5 + $0x60] sm:$0xff] %v1649_v1   ;;  %v736_v35 = vadd.f32 %v2270_v26, %v665_v45  ;;  %v768_v51 = vadd.f32 %v2270_v26, %v697_v49  ;;  %v666_v31 = vmul.f32 %v2237_v12, %v490_v55  ;;  %v698_v7 = vmul.f32 %v2237_v12, %v618_v56 }
 0x136   :  { %1804 = vst [vmem:[%s2717_s5 + $0xe0] sm:$0xff] %v1729_v18   ;;  %v739_v50 = vadd.f32 %v2270_v26, %v668_v22  ;;  %v771_v36 = vadd.f32 %v2270_v26, %v700_v43  ;;  %v930_v37 = vadd.f32 %v1520_v47, %v738_v27  ;;  %v962_v19 = vadd.f32 %v1584_v0, %v770_v46 }
 0x137   :  { %v737_v60 = vadd.f32 %v2270_v26, %v666_v31  ;;  %v769_v42 = vadd.f32 %v2270_v26, %v698_v7  ;;  %v928_v38 = vadd.f32 %v1516_v30, %v736_v35  ;;  %v960_v12 = vadd.f32 %v1580_v48, %v768_v51 }
 0x138   :  { %v931_v21 = vadd.f32 %v1521_v63, %v739_v50  ;;  %v963_v23 = vadd.f32 %v1585_v11, %v771_v36 }
 0x139   :  { %v929_v32 = vadd.f32 %v1517_v3, %v737_v60  ;;  %v961_v2 = vadd.f32 %v1581_v20, %v769_v42 }
 0x13a   :  { %v1664_v28 = vpack.c.bf16 %v931_v21, %v930_v37  ;;  %v1744_v8 = vpack.c.bf16 %v963_v23, %v962_v19 }
 0x13b   :  { %v1659_v62 = vpack.c.bf16 %v929_v32, %v928_v38  ;;  %v1739_v26 = vpack.c.bf16 %v961_v2, %v960_v12 }
 0x13c   :  { %1791 = vst [vmem:[%s2717_s5 + $0x78] sm:$0xff] %v1664_v28   ;;  %1807 = vst [vmem:[%s2717_s5 + $0xf8] sm:$0xff] %v1744_v8  }
 0x13d   :  { %1790 = vst [vmem:[%s2717_s5 + $0x70] sm:$0xff] %v1659_v62   ;;  %1806 = vst [vmem:[%s2717_s5 + $0xf0] sm:$0xff] %v1739_v26  }

// kernel: _lambda_.6
= control target key start
LH: loop header
LB: loop body
LE: loop exit
PB: predicated region body
PF: predicated region fallthrough
CT: control target
= control target key end

     0   :  { %v3948_v1 = vmov 0   ;;  %v727_v49 = vlaneseq  ;;  %s5504_s1 = inlined_call_operand.vmem [shape: bf16[128,256], index: 1, kind: input, shape index: {}]   ;;  %s5505_s0 = inlined_call_operand.vmem [shape: bf16[512,128], index: 0, kind: input, shape index: {}]   ;;  %s5506_s2 = inlined_call_operand.vmem [shape: f32[1,256], index: 2, kind: input, shape index: {}]   ;;  %s5507_s3 = inlined_call_operand.vmem [shape: f32[1,256], index: 3, kind: input, shape index: {}]   ;;  %s5508_s4 = inlined_call_operand.vmem [shape: bf16[512,128], index: 4, kind: output, shape index: {0}]   ;;  %s5509_s5 = inlined_call_operand.vmem [shape: bf16[512,128], index: 5, kind: output, shape index: {1}]  }
   0x1   :  { %v3380_v0 = vld [vmem:[%s5504_s1 + $0x4] ss:$8 sps:$4 sm:$0xff]   ;;  %404 = vmatprep.mubr.bf16.mxu0 %v3948_v1  ;;  %564 = vmatprep.mubr.bf16.mxu1 %v3948_v1  ;;  %v3382_v2 = vld [vmem:[%s5504_s1] ss:$8 sps:$4 sm:$0xff]   ;;  %v3383_v3 = vld [vmem:[%s5504_s1 + $0x14] ss:$8 sps:$4 sm:$0xff]  }
   0x2   :  { %372 = vmatprep.subr.bf16.mxu0 %v3380_v0  ;;  %3363 = vmatprep.subr.bf16.mxu1 %v3380_v0  ;;  %v3385_v4 = vld [vmem:[%s5504_s1 + $0x10] ss:$8 sps:$4 sm:$0xff]   ;;  %v3386_v5 = vld [vmem:[%s5504_s1 + $0x24] ss:$8 sps:$4 sm:$0xff]   ;;  %v3388_v6 = vld [vmem:[%s5504_s1 + $0x20] ss:$8 sps:$4 sm:$0xff]  }
   0x3   :  { %373 = vmatpush1.bf16.msra.mxu0 %v3382_v2  ;;  %3371 = vmatpush1.bf16.msra.mxu1 %v3382_v2  ;;  %v3389_v7 = vld [vmem:[%s5504_s1 + $0x34] ss:$8 sps:$4 sm:$0xff]   ;;  %v3391_v8 = vld [vmem:[%s5504_s1 + $0x30] ss:$8 sps:$4 sm:$0xff]   ;;  %v3392_v9 = vld [vmem:[%s5504_s1 + $0x44] ss:$8 sps:$4 sm:$0xff]  }
   0x4   :  { %374 = vmatprep.subr.bf16.mxu0 %v3383_v3  ;;  %3364 = vmatprep.subr.bf16.mxu1 %v3383_v3  ;;  %v3394_v10 = vld [vmem:[%s5504_s1 + $0x40] ss:$8 sps:$4 sm:$0xff]   ;;  %v3395_v11 = vld [vmem:[%s5504_s1 + $0x54] ss:$8 sps:$4 sm:$0xff]   ;;  %v3397_v12 = vld [vmem:[%s5504_s1 + $0x50] ss:$8 sps:$4 sm:$0xff]  }
   0x5   :  { %v3398_v13 = vld [vmem:[%s5504_s1 + $0x64] ss:$8 sps:$4 sm:$0xff]   ;;  %v3400_v14 = vld [vmem:[%s5504_s1 + $0x60] ss:$8 sps:$4 sm:$0xff]   ;;  %v3401_v15 = vld [vmem:[%s5504_s1 + $0x74] ss:$8 sps:$4 sm:$0xff]  }
   0x6   :  { %v3403_v16 = vld [vmem:[%s5504_s1 + $0x70] ss:$8 sps:$4 sm:$0xff]   ;;  %v3404_v17 = vld [vmem:[%s5505_s0] sm:$0xff]   ;;  %v3406_v19 = vld [vmem:[%s5505_s0 + $0x8] sm:$0xff]   ;;  %v728_v50 = vshrl.u32 %v727_v49, 7 }
   0x7   :  { %375 = vmatpush1.bf16.msra.mxu0 %v3385_v4  ;;  %3372 = vmatpush1.bf16.msra.mxu1 %v3385_v4  ;;  %v3405_v18 = vld [vmem:[%s5505_s0 + $0x80] sm:$0xff]   ;;  %v3407_v20 = vld [vmem:[%s5505_s0 + $0x88] sm:$0xff]   ;;  %v3408_v21 = vld [vmem:[%s5505_s0 + $0x10] sm:$0xff]  }
   0x8   :  { %376 = vmatprep.subr.bf16.mxu0 %v3386_v5  ;;  %3365 = vmatprep.subr.bf16.mxu1 %v3386_v5  ;;  %v3409_v22 = vld [vmem:[%s5505_s0 + $0x90] sm:$0xff]   ;;  %v3410_v23 = vld [vmem:[%s5505_s0 + $0x18] sm:$0xff]   ;;  %v3412_v25 = vld [vmem:[%s5505_s0 + $0x20] sm:$0xff]   ;;  %v729_v51 = vsub.s32 0, %v728_v50  ;;  %v733_v53 = vsub.s32 1, %v728_v50 }
   0x9   :  { %v3411_v24 = vld [vmem:[%s5505_s0 + $0x98] sm:$0xff]   ;;  %v3413_v26 = vld [vmem:[%s5505_s0 + $0xa0] sm:$0xff]   ;;  %v3414_v27 = vld [vmem:[%s5505_s0 + $0x28] sm:$0xff]  }
   0xa   :  { %v3415_v28 = vld [vmem:[%s5505_s0 + $0xa8] sm:$0xff]   ;;  %v3416_v29 = vld [vmem:[%s5505_s0 + $0x30] sm:$0xff]   ;;  %v3418_v31 = vld [vmem:[%s5505_s0 + $0x38] sm:$0xff]  }
   0xb   :  { %377 = vmatpush1.bf16.msra.mxu0 %v3388_v6  ;;  %3373 = vmatpush1.bf16.msra.mxu1 %v3388_v6  ;;  %v3417_v30 = vld [vmem:[%s5505_s0 + $0xb0] sm:$0xff]   ;;  %v3419_v32 = vld [vmem:[%s5505_s0 + $0xb8] sm:$0xff]   ;;  %v3420_v33 = vld [vmem:[%s5505_s0 + $0x40] sm:$0xff]  }
   0xc   :  { %378 = vmatprep.subr.bf16.mxu0 %v3389_v7  ;;  %3366 = vmatprep.subr.bf16.mxu1 %v3389_v7  ;;  %v3421_v34 = vld [vmem:[%s5505_s0 + $0xc0] sm:$0xff]   ;;  %v3422_v35 = vld [vmem:[%s5505_s0 + $0x48] sm:$0xff]   ;;  %v3424_v37 = vld [vmem:[%s5505_s0 + $0x50] sm:$0xff]  }
   0xd   :  { %v3423_v36 = vld [vmem:[%s5505_s0 + $0xc8] sm:$0xff]   ;;  %v3425_v38 = vld [vmem:[%s5505_s0 + $0xd0] sm:$0xff]   ;;  %v3426_v39 = vld [vmem:[%s5505_s0 + $0x58] sm:$0xff]  }
   0xe   :  { %v3427_v40 = vld [vmem:[%s5505_s0 + $0xd8] sm:$0xff]   ;;  %v3428_v41 = vld [vmem:[%s5505_s0 + $0x60] sm:$0xff]   ;;  %v3430_v43 = vld [vmem:[%s5505_s0 + $0x68] sm:$0xff]  }
   0xf   :  { %379 = vmatpush1.bf16.msra.mxu0 %v3391_v8  ;;  %3374 = vmatpush1.bf16.msra.mxu1 %v3391_v8  ;;  %v3429_v42 = vld [vmem:[%s5505_s0 + $0xe0] sm:$0xff]   ;;  %v3431_v44 = vld [vmem:[%s5505_s0 + $0xe8] sm:$0xff]   ;;  %v3432_v45 = vld [vmem:[%s5505_s0 + $0x70] sm:$0xff]  }
  0x10   :  { %380 = vmatprep.subr.bf16.mxu0 %v3392_v9  ;;  %3367 = vmatprep.subr.bf16.mxu1 %v3392_v9  ;;  %v3433_v46 = vld [vmem:[%s5505_s0 + $0xf0] sm:$0xff]   ;;  %v3434_v47 = vld [vmem:[%s5505_s0 + $0x78] sm:$0xff]   ;;  %v725_v52 = vld [vmem:[%s5506_s2] sm:$0x3] }
  0x11   :  { %v3435_v48 = vld [vmem:[%s5505_s0 + $0xf8] sm:$0xff]   ;;  %v865_v54 = vld [vmem:[%s5507_s3] sm:$0x3]  ;;  %v4161_v55 = vrot.slane %v725_v52, %v729_v51  ;;  %v4163_v56 = vrot.slane %v725_v52, %v733_v53 }
  0x12   :  { %v4165_v57 = vrot.slane %v865_v54, %v729_v51  ;;  %v4167_v60 = vrot.slane %v865_v54, %v733_v53 }
  0x13   :  { %381 = vmatpush1.bf16.msra.mxu0 %v3394_v10  ;;  %3375 = vmatpush1.bf16.msra.mxu1 %v3394_v10 }
  0x14   :  { %382 = vmatprep.subr.bf16.mxu0 %v3395_v11  ;;  %3368 = vmatprep.subr.bf16.mxu1 %v3395_v11 }
  0x17   :  { %383 = vmatpush1.bf16.msra.mxu0 %v3397_v12  ;;  %3376 = vmatpush1.bf16.msra.mxu1 %v3397_v12 }
  0x18   :  { %384 = vmatprep.subr.bf16.mxu0 %v3398_v13  ;;  %3369 = vmatprep.subr.bf16.mxu1 %v3398_v13 }
  0x1b   :  { %385 = vmatpush1.bf16.msra.mxu0 %v3400_v14  ;;  %3377 = vmatpush1.bf16.msra.mxu1 %v3400_v14 }
  0x1c   :  { %386 = vmatprep.subr.bf16.mxu0 %v3401_v15  ;;  %3370 = vmatprep.subr.bf16.mxu1 %v3401_v15 }
  0x1f   :  { %387 = vmatpush1.bf16.msra.mxu0 %v3403_v16  ;;  %3378 = vmatpush1.bf16.msra.mxu1 %v3403_v16 }
  0x22   :  { %405 = vmatmul.mubr.bf16.vlgmr.msra.gmra.mrb[0].mxu0 %v3404_v17  ;;  %565 = vmatmul.mubr.bf16.vlgmr.msra.gmra.mrb[0].mxu1 %v3405_v18 }
  0x23   :  { %414 = vmatprep.mubr.bf16.mxu0 %v3948_v1  ;;  %574 = vmatprep.mubr.bf16.mxu1 %v3948_v1 }
  0x2a   :  { %415 = vmatmul.mubr.bf16.gmra.mrb[4].mxu0 %v3406_v19  ;;  %575 = vmatmul.mubr.bf16.gmra.mrb[4].mxu1 %v3407_v20 }
  0x2b   :  { %424 = vmatprep.mubr.bf16.mxu0 %v3948_v1  ;;  %584 = vmatprep.mubr.bf16.mxu1 %v3948_v1 }
  0x32   :  { %425 = vmatmul.mubr.bf16.gmra.mrb[8].mxu0 %v3408_v21  ;;  %585 = vmatmul.mubr.bf16.gmra.mrb[8].mxu1 %v3409_v22 }
  0x33   :  { %434 = vmatprep.mubr.bf16.mxu0 %v3948_v1  ;;  %594 = vmatprep.mubr.bf16.mxu1 %v3948_v1 }
  0x3a   :  { %435 = vmatmul.mubr.bf16.gmra.mrb[12].mxu0 %v3410_v23  ;;  %595 = vmatmul.mubr.bf16.gmra.mrb[12].mxu1 %v3411_v24 }
  0x3b   :  { %444 = vmatprep.mubr.bf16.mxu0 %v3948_v1  ;;  %604 = vmatprep.mubr.bf16.mxu1 %v3948_v1 }
  0x42   :  { %445 = vmatmul.mubr.bf16.gmra.mrb[16].mxu0 %v3412_v25  ;;  %605 = vmatmul.mubr.bf16.gmra.mrb[16].mxu1 %v3413_v26 }
  0x43   :  { %454 = vmatprep.mubr.bf16.mxu0 %v3948_v1  ;;  %614 = vmatprep.mubr.bf16.mxu1 %v3948_v1 }
  0x4a   :  { %455 = vmatmul.mubr.bf16.gmra.mrb[20].mxu0 %v3414_v27  ;;  %615 = vmatmul.mubr.bf16.gmra.mrb[20].mxu1 %v3415_v28 }
  0x4b   :  { %464 = vmatprep.mubr.bf16.mxu0 %v3948_v1  ;;  %624 = vmatprep.mubr.bf16.mxu1 %v3948_v1 }
  0x52   :  { %465 = vmatmul.mubr.bf16.gmra.mrb[24].mxu0 %v3416_v29  ;;  %625 = vmatmul.mubr.bf16.gmra.mrb[24].mxu1 %v3417_v30 }
  0x53   :  { %474 = vmatprep.mubr.bf16.mxu0 %v3948_v1  ;;  %634 = vmatprep.mubr.bf16.mxu1 %v3948_v1 }
  0x5a   :  { %475 = vmatmul.mubr.bf16.gmra.mrb[28].mxu0 %v3418_v31  ;;  %635 = vmatmul.mubr.bf16.gmra.mrb[28].mxu1 %v3419_v32 }
  0x5b   :  { %484 = vmatprep.mubr.bf16.mxu0 %v3948_v1  ;;  %644 = vmatprep.mubr.bf16.mxu1 %v3948_v1 }
  0x62   :  { %485 = vmatmul.mubr.bf16.gmra.mrb[32].mxu0 %v3420_v33  ;;  %645 = vmatmul.mubr.bf16.gmra.mrb[32].mxu1 %v3421_v34 }
  0x63   :  { %494 = vmatprep.mubr.bf16.mxu0 %v3948_v1  ;;  %654 = vmatprep.mubr.bf16.mxu1 %v3948_v1 }
  0x6a   :  { %495 = vmatmul.mubr.bf16.gmra.mrb[36].mxu0 %v3422_v35  ;;  %655 = vmatmul.mubr.bf16.gmra.mrb[36].mxu1 %v3423_v36 }
  0x6b   :  { %504 = vmatprep.mubr.bf16.mxu0 %v3948_v1  ;;  %664 = vmatprep.mubr.bf16.mxu1 %v3948_v1 }
  0x72   :  { %505 = vmatmul.mubr.bf16.gmra.mrb[40].mxu0 %v3424_v37  ;;  %665 = vmatmul.mubr.bf16.gmra.mrb[40].mxu1 %v3425_v38 }
  0x73   :  { %514 = vmatprep.mubr.bf16.mxu0 %v3948_v1  ;;  %674 = vmatprep.mubr.bf16.mxu1 %v3948_v1 }
  0x7a   :  { %515 = vmatmul.mubr.bf16.gmra.mrb[44].mxu0 %v3426_v39  ;;  %675 = vmatmul.mubr.bf16.gmra.mrb[44].mxu1 %v3427_v40 }
  0x7b   :  { %524 = vmatprep.mubr.bf16.mxu0 %v3948_v1  ;;  %684 = vmatprep.mubr.bf16.mxu1 %v3948_v1 }
  0x82   :  { %525 = vmatmul.mubr.bf16.gmra.mrb[48].mxu0 %v3428_v41  ;;  %685 = vmatmul.mubr.bf16.gmra.mrb[48].mxu1 %v3429_v42 }
  0x83   :  { %534 = vmatprep.mubr.bf16.mxu0 %v3948_v1  ;;  %694 = vmatprep.mubr.bf16.mxu1 %v3948_v1 }
  0x8a   :  { %535 = vmatmul.mubr.bf16.gmra.mrb[52].mxu0 %v3430_v43  ;;  %695 = vmatmul.mubr.bf16.gmra.mrb[52].mxu1 %v3431_v44 }
  0x8b   :  { %544 = vmatprep.mubr.bf16.mxu0 %v3948_v1  ;;  %704 = vmatprep.mubr.bf16.mxu1 %v3948_v1 }
  0x92   :  { %545 = vmatmul.mubr.bf16.gmra.mrb[56].mxu0 %v3432_v45  ;;  %705 = vmatmul.mubr.bf16.gmra.mrb[56].mxu1 %v3433_v46 }
  0x93   :  { %554 = vmatprep.mubr.bf16.mxu0 %v3948_v1  ;;  %714 = vmatprep.mubr.bf16.mxu1 %v3948_v1 }
  0x9a   :  { %555 = vmatmul.mubr.bf16.gmra.mrb[60].mxu0 %v3434_v47  ;;  %715 = vmatmul.mubr.bf16.gmra.mrb[60].mxu1 %v3435_v48 }
  0xf5   :  { %v406_v58 = vpop.f32.mrb[0].mxu0  ;;  %v566_v59 = vpop.f32.mrb[0].mxu1 }
  0xf6   :  { %v737_v61 = vmul.f32 %v4161_v55, %v406_v58  ;;  %v801_v62 = vmul.f32 %v4161_v55, %v566_v59  ;;  %v408_v63 = vpop.f32.mrb[1].mxu0  ;;  %v568_v0 = vpop.f32.mrb[1].mxu1 }
  0xf7   :  { %v738_v1 = vmul.f32 %v4163_v56, %v408_v63  ;;  %v802_v2 = vmul.f32 %v4163_v56, %v568_v0  ;;  %v410_v3 = vpop.f32.mrb[2].mxu0  ;;  %v570_v4 = vpop.f32.mrb[2].mxu1 }
  0xf8   :  { %v4174_v5 = vadd.f32 %v4165_v57, %v737_v61  ;;  %v4177_v6 = vadd.f32 %v4165_v57, %v801_v62  ;;  %v739_v7 = vmul.f32 %v4161_v55, %v410_v3  ;;  %v803_v8 = vmul.f32 %v4161_v55, %v570_v4  ;;  %v412_v9 = vpop.f32.mrb[3].mxu0  ;;  %v572_v10 = vpop.f32.mrb[3].mxu1 }
  0xf9   :  { %v4182_v11 = vadd.f32 %v4167_v60, %v738_v1  ;;  %v4185_v12 = vadd.f32 %v4167_v60, %v802_v2  ;;  %v740_v13 = vmul.f32 %v4163_v56, %v412_v9  ;;  %v804_v14 = vmul.f32 %v4163_v56, %v572_v10 }
  0xfa   :  { %v2597_v15 = vmul.f32 -1.442695, %v4174_v5  ;;  %v2661_v16 = vmul.f32 -1.442695, %v4177_v6  ;;  %v4192_v17 = vadd.f32 %v4165_v57, %v739_v7  ;;  %v4195_v18 = vadd.f32 %v4165_v57, %v803_v8 }
  0xfb   :  { %v2598_v19 = vmul.f32 -1.442695, %v4182_v11  ;;  %v2662_v20 = vmul.f32 -1.442695, %v4185_v12  ;;  %v4200_v21 = vadd.f32 %v4167_v60, %v740_v13  ;;  %v4203_v22 = vadd.f32 %v4167_v60, %v804_v14 }
  0xfc   :  { %3436 = vpow2.f32 %v2597_v15  ;;  %v2599_v23 = vmul.f32 -1.442695, %v4192_v17  ;;  %v2663_v24 = vmul.f32 -1.442695, %v4195_v18 }
  0xfd   :  { %3438 = vpow2.f32 %v2661_v16  ;;  %v416_v25 = vpop.f32.mrb[4].mxu0  ;;  %v576_v26 = vpop.f32.mrb[4].mxu1  ;;  %v2600_v27 = vmul.f32 -1.442695, %v4200_v21  ;;  %v2664_v32 = vmul.f32 -1.442695, %v4203_v22 }
  0xfe   :  { %3440 = vpow2.f32 %v2598_v19  ;;  %v741_v28 = vmul.f32 %v4161_v55, %v416_v25  ;;  %v805_v29 = vmul.f32 %v4161_v55, %v576_v26  ;;  %v418_v30 = vpop.f32.mrb[5].mxu0  ;;  %v578_v31 = vpop.f32.mrb[5].mxu1 }
  0xff   :  { %3442 = vpow2.f32 %v2662_v20  ;;  %v742_v33 = vmul.f32 %v4163_v56, %v418_v30  ;;  %v806_v34 = vmul.f32 %v4163_v56, %v578_v31  ;;  %v420_v35 = vpop.f32.mrb[6].mxu0  ;;  %v580_v36 = vpop.f32.mrb[6].mxu1 }
 0x100   :  { %3444 = vpow2.f32 %v2599_v23  ;;  %v4214_v37 = vadd.f32 %v4165_v57, %v741_v28  ;;  %v4217_v38 = vadd.f32 %v4165_v57, %v805_v29  ;;  %v743_v39 = vmul.f32 %v4161_v55, %v420_v35  ;;  %v422_v40 = vpop.f32.mrb[7].mxu0  ;;  %v582_v41 = vpop.f32.mrb[7].mxu1 }
 0x101   :  { %3446 = vpow2.f32 %v2663_v24  ;;  %v4221_v42 = vadd.f32 %v4167_v60, %v742_v33  ;;  %v4224_v43 = vadd.f32 %v4167_v60, %v806_v34  ;;  %v807_v44 = vmul.f32 %v4161_v55, %v580_v36 }
 0x102   :  { %3448 = vpow2.f32 %v2600_v27  ;;  %v2601_v45 = vmul.f32 -1.442695, %v4214_v37  ;;  %v2665_v46 = vmul.f32 -1.442695, %v4217_v38  ;;  %v4230_v47 = vadd.f32 %v4165_v57, %v743_v39 }
 0x103   :  { %3450 = vpow2.f32 %v2664_v32  ;;  %v2602_v48 = vmul.f32 -1.442695, %v4221_v42  ;;  %v2666_v49 = vmul.f32 -1.442695, %v4224_v43  ;;  %v744_v51 = vmul.f32 %v4163_v56, %v422_v40 }
 0x104   :  { %3452 = vpow2.f32 %v2601_v45  ;;  %v2603_v50 = vmul.f32 -1.442695, %v4230_v47  ;;  %v4237_v58 = vadd.f32 %v4165_v57, %v807_v44  ;;  %v808_v0 = vmul.f32 %v4163_v56, %v582_v41 }
 0x105   :  { %3454 = vpow2.f32 %v2665_v46  ;;  %v426_v52 = vpop.f32.mrb[8].mxu0  ;;  %v586_v53 = vpop.f32.mrb[8].mxu1  ;;  %v4241_v10 = vadd.f32 %v4167_v60, %v744_v51 }
 0x106   :  { %v3437_v54 = vpop.eup %3436  ;;  %3456 = vpow2.f32 %v2602_v48  ;;  %v428_v59 = vpop.f32.mrb[9].mxu0  ;;  %v4244_v16 = vmul.f32 -1.442695, %v4237_v58  ;;  %v4247_v23 = vadd.f32 %v4167_v60, %v808_v0  ;;  %v745_v24 = vmul.f32 %v4161_v55, %v426_v52 }
 0x107   :  { %v588_v61 = vpop.f32.mrb[9].mxu1  ;;  %v3439_v62 = vpop.eup %3438  ;;  %v1389_v63 = vadd.f32 1.0, %v3437_v54  ;;  %3458 = vpow2.f32 %v2666_v49  ;;  %v809_v27 = vmul.f32 %v4161_v55, %v586_v53  ;;  %v746_v28 = vmul.f32 %v4163_v56, %v428_v59 }
 0x108   :  { %v430_v1 = vpop.f32.mrb[10].mxu0  ;;  %v590_v2 = vpop.f32.mrb[10].mxu1  ;;  %v1453_v4 = vadd.f32 1.0, %v3439_v62  ;;  %3460 = vpow2.f32 %v2603_v50  ;;  %v2604_v31 = vmul.f32 -1.442695, %v4241_v10  ;;  %v810_v32 = vmul.f32 %v4163_v56, %v588_v61 }
 0x109   :  { %v3441_v3 = vpop.eup %3440  ;;  %v432_v7 = vpop.f32.mrb[11].mxu0  ;;  %3462 = vrcp.f32 %v1389_v63  ;;  %v747_v39 = vmul.f32 %v4161_v55, %v430_v1  ;;  %v811_v40 = vmul.f32 %v4161_v55, %v590_v2  ;;  %v4259_v48 = vadd.f32 %v4165_v57, %v745_v24 }
 0x10a   :  { %v3443_v8 = vpop.eup %3442  ;;  %v1390_v9 = vadd.f32 1.0, %v3441_v3  ;;  %v592_v13 = vpop.f32.mrb[11].mxu1  ;;  %3464 = vrcp.f32 %v1453_v4  ;;  %v748_v49 = vmul.f32 %v4163_v56, %v432_v7  ;;  %v4267_v54 = vadd.f32 %v4165_v57, %v809_v27 }
 0x10b   :  { %v3445_v14 = vpop.eup %3444  ;;  %v1454_v15 = vadd.f32 1.0, %v3443_v8  ;;  %v4270_v59 = vadd.f32 %v4167_v60, %v746_v28  ;;  %v2668_v1 = vmul.f32 -1.442695, %v4247_v23  ;;  %v4278_v2 = vadd.f32 %v4167_v60, %v810_v32 }
 0x10c   :  { %v3447_v19 = vpop.eup %3446  ;;  %3466 = vrcp.f32 %v1390_v9  ;;  %v1391_v20 = vadd.f32 1.0, %v3445_v14  ;;  %v4281_v7 = vadd.f32 %v4165_v57, %v747_v39  ;;  %v4284_v8 = vadd.f32 %v4165_v57, %v811_v40 }
 0x10d   :  { %v3449_v25 = vpop.eup %3448  ;;  %3468 = vrcp.f32 %v1454_v15  ;;  %v1455_v26 = vadd.f32 1.0, %v3447_v19  ;;  %v436_v33 = vpop.f32.mrb[12].mxu0  ;;  %5512 = vst [vmem:[#allocation2_spill] sm:$0xff] %v4278_v2  ;;  %v4287_v15 = vadd.f32 %v4167_v60, %v748_v49  ;;  %v812_v19 = vmul.f32 %v4163_v56, %v592_v13 }
 0x10e   :  { %v3451_v29 = vpop.eup %3450  ;;  %3470 = vrcp.f32 %v1391_v20  ;;  %v1392_v30 = vadd.f32 1.0, %v3449_v25  ;;  %v596_v34 = vpop.f32.mrb[12].mxu1  ;;  %v2605_v24 = vmul.f32 -1.442695, %v4259_v48  ;;  %v2669_v25 = vmul.f32 -1.442695, %v4267_v54 }
 0x10f   :  { %v3453_v35 = vpop.eup %3452  ;;  %3472 = vrcp.f32 %v1455_v26  ;;  %v1456_v36 = vadd.f32 1.0, %v3451_v29  ;;  %v438_v41 = vpop.f32.mrb[13].mxu0  ;;  %v2606_v26 = vmul.f32 -1.442695, %v4270_v59  ;;  %v2670_v28 = vmul.f32 -1.442695, %v4278_v2 }
 0x110   :  { %v4256_v44 = vpop.f32.mrb[13].mxu1  ;;  %v3455_v45 = vpop.eup %3454  ;;  %3474 = vrcp.f32 %v1392_v30  ;;  %v1393_v46 = vadd.f32 1.0, %v3453_v35  ;;  %v749_v29 = vmul.f32 %v4161_v55, %v436_v33  ;;  %v813_v30 = vmul.f32 %v4161_v55, %v596_v34 }
 0x111   :  { %v4262_v50 = vpop.f32.mrb[14].mxu0  ;;  %v4264_v51 = vpop.f32.mrb[14].mxu1  ;;  %3476 = vrcp.f32 %v1456_v36  ;;  %v1457_v53 = vadd.f32 1.0, %v3455_v45  ;;  %v2607_v36 = vmul.f32 -1.442695, %v4281_v7  ;;  %v4310_v49 = vadd.f32 %v4167_v60, %v812_v19 }
 0x112   :  { %v3457_v52 = vpop.eup %3456  ;;  %v4272_v61 = vpop.f32.mrb[15].mxu0  ;;  %3478 = vrcp.f32 %v1393_v46  ;;  %v2671_v39 = vmul.f32 -1.442695, %v4284_v8  ;;  %v2608_v34 = vmul.f32 -1.442695, %v4287_v15  ;;  %v4328_v19 = vadd.f32 %v4165_v57, %v813_v30 }
 0x113   :  { %v4274_v62 = vpop.f32.mrb[15].mxu1  ;;  %v3459_v63 = vpop.eup %3458  ;;  %v1394_v0 = vadd.f32 1.0, %v3457_v52  ;;  %3480 = vrcp.f32 %v1457_v53 }
 0x114   :  { %v3461_v3 = vpop.eup %3460  ;;  %v1458_v4 = vadd.f32 1.0, %v3459_v63 }
 0x115   :  { %v3463_v9 = vpop.eup %3462  ;;  %3482 = vrcp.f32 %v1394_v0  ;;  %v1395_v14 = vadd.f32 1.0, %v3461_v3  ;;  %v4296_v32 = vpop.f32.mrb[16].mxu0  ;;  %v750_v3 = vmul.f32 %v4163_v56, %v438_v41 }
 0x116   :  { %v3465_v20 = vpop.eup %3464  ;;  %3484 = vrcp.f32 %v1458_v4  ;;  %v4298_v35 = vpop.f32.mrb[16].mxu1  ;;  %v1773_v33 = vmul.f32 %v3463_v9, %v4174_v5 }
 0x117   :  { %v3467_v27 = vpop.eup %3466  ;;  %3486 = vrcp.f32 %v1395_v14  ;;  %v4303_v40 = vpop.f32.mrb[17].mxu0  ;;  %v1837_v63 = vmul.f32 %v3465_v20, %v4177_v6  ;;  %v4325_v14 = vadd.f32 %v4165_v57, %v749_v29 }
 0x118   :  { %v3469_v13 = vpop.eup %3468  ;;  %3488 = vpow2.f32 %v4244_v16  ;;  %v4305_v45 = vpop.f32.mrb[17].mxu1 }
 0x119   :  { %v3471_v46 = vpop.eup %3470  ;;  %3490 = vpow2.f32 %v2604_v31  ;;  %v4312_v52 = vpop.f32.mrb[18].mxu0 }
 0x11a   :  { %v4314_v16 = vpop.f32.mrb[18].mxu1  ;;  %v3473_v53 = vpop.eup %3472  ;;  %v1775_v0 = vmul.f32 %v3471_v46, %v4192_v17  ;;  %3492 = vpow2.f32 %v2668_v1  ;;  %v1774_v17 = vmul.f32 %v3467_v27, %v4182_v11  ;;  %v1838_v46 = vmul.f32 %v3469_v13, %v4185_v12 }
 0x11b   :  { %v4319_v4 = vpop.f32.mrb[19].mxu0  ;;  %v4321_v5 = vpop.f32.mrb[19].mxu1  ;;  %v1839_v9 = vmul.f32 %v3473_v53, %v4195_v18  ;;  %3494 = vpow2.f32 %v2605_v24  ;;  %v2672_v11 = vmul.f32 -1.442695, %v4310_v49  ;;  %v2609_v12 = vmul.f32 -1.442695, %v4325_v14 }
 0x11c   :  { %v3475_v31 = vpop.eup %3474  ;;  %v2984_v1 = vpack.c.bf16 %v1775_v0, %v1773_v33  ;;  %3496 = vpow2.f32 %v2669_v25  ;;  %v751_v33 = vmul.f32 %v4161_v55, %v4262_v50 }
 0x11d   :  { %v3477_v6 = vpop.eup %3476  ;;  %v1776_v41 = vmul.f32 %v3475_v31, %v4200_v21  ;;  %v3064_v2 = vpack.c.bf16 %v1839_v9, %v1837_v63  ;;  %3498 = vpow2.f32 %v2606_v26  ;;  %v4344_v25 = vpop.f32.mrb[20].mxu0  ;;  %v815_v9 = vmul.f32 %v4161_v55, %v4264_v51 }
 0x11e   :  { %v3479_v20 = vpop.eup %3478  ;;  %v1840_v18 = vmul.f32 %v3477_v6, %v4203_v22  ;;  %2985 = vst [vmem:[%s5508_s4] sm:$0xff] %v2984_v1   ;;  %3500 = vpow2.f32 %v2670_v28  ;;  %v814_v22 = vmul.f32 %v4163_v56, %v4256_v44  ;;  %v4346_v26 = vpop.f32.mrb[20].mxu1  ;;  %v4362_v44 = vadd.f32 %v4167_v60, %v750_v3 }
 0x11f   :  { %v3481_v24 = vpop.eup %3480  ;;  %v3144_v29 = vpack.c.bf16 %v1776_v41, %v1774_v17  ;;  %3316 = vst [vmem:[%s5508_s4 + $0x80] sm:$0xff] %v3064_v2   ;;  %3502 = vpow2.f32 %v2607_v36  ;;  %v2673_v2 = vmul.f32 -1.442695, %v4328_v19  ;;  %v4354_v28 = vpop.f32.mrb[21].mxu0  ;;  %v1777_v0 = vmul.f32 %v3479_v20, %v4214_v37 }
 0x120   :  { %v3483_v27 = vpop.eup %3482  ;;  %v3224_v21 = vpack.c.bf16 %v1840_v18, %v1838_v46  ;;  %3504 = vpow2.f32 %v2671_v39  ;;  %v4356_v13 = vpop.f32.mrb[21].mxu1  ;;  %v4379_v50 = vadd.f32 %v4167_v60, %v814_v22  ;;  %v4382_v20 = vadd.f32 %v4165_v57, %v751_v33 }
 0x121   :  { %v4348_v30 = vpop.eup %3484  ;;  %3145 = vst [vmem:[%s5509_s5] sm:$0xff] %v3144_v29   ;;  %3506 = vpow2.f32 %v2608_v34  ;;  %v4366_v53 = vpop.f32.mrb[22].mxu0  ;;  %v4388_v29 = vmul.f32 -1.442695, %v4362_v44 }
 0x122   :  { %v3487_v36 = vpop.eup %3486  ;;  %3347 = vst [vmem:[%s5509_s5 + $0x80] sm:$0xff] %v3224_v21   ;;  %v4368_v39 = vpop.f32.mrb[22].mxu1  ;;  %3508 = vpow2.f32 %v2672_v11  ;;  %v4391_v11 = vadd.f32 %v4165_v57, %v815_v9  ;;  %v4394_v22 = vmul.f32 -1.442695, %v4379_v50  ;;  %v816_v9 = vmul.f32 %v4163_v56, %v4274_v62 }
 0x123   :  { %v3489_v63 = vpop.eup %3488  ;;  %v1779_v31 = vmul.f32 %v3487_v36, %v4230_v47  ;;  %v4374_v34 = vpop.f32.mrb[23].mxu0  ;;  %3510 = vpow2.f32 %v2609_v12 }
 0x124   :  { %v4376_v3 = vpop.f32.mrb[23].mxu1  ;;  %v3491_v6 = vpop.eup %3490  ;;  %v1459_v17 = vadd.f32 1.0, %v3489_v63  ;;  %3512 = vpow2.f32 %v2673_v2  ;;  %v752_v2 = vmul.f32 %v4163_v56, %v4272_v61  ;;  %v4412_v61 = vmul.f32 %v3483_v27, %v4221_v42 }
 0x125   :  { %v3493_v1 = vpop.eup %3492  ;;  %v2989_v41 = vpack.c.bf16 %v1779_v31, %v1777_v0  ;;  %v1396_v46 = vadd.f32 1.0, %v3491_v6  ;;  %v4398_v36 = vpop.f32.mrb[24].mxu0  ;;  %v4403_v0 = vmul.f32 %v3481_v24, %v4217_v38 }
 0x126   :  { %v3495_v37 = vpop.eup %3494  ;;  %3514 = vrcp.f32 %v1459_v17  ;;  %v1460_v47 = vadd.f32 1.0, %v3493_v1  ;;  %v4400_v33 = vpop.f32.mrb[24].mxu1 }
 0x127   :  { %v3497_v51 = vpop.eup %3496  ;;  %3301 = vst [vmem:[%s5508_s4 + $0x8] sm:$0xff] %v2989_v41   ;;  %3516 = vrcp.f32 %v1396_v46  ;;  %v1397_v18 = vadd.f32 1.0, %v3495_v37  ;;  %v4407_v6 = vpop.f32.mrb[25].mxu0  ;;  %v4415_v46 = vmul.f32 -1.442695, %v4382_v20 }
 0x128   :  { %v3499_v21 = vpop.eup %3498  ;;  %3518 = vrcp.f32 %v1460_v47  ;;  %v1461_v12 = vadd.f32 1.0, %v3497_v51  ;;  %v4409_v17 = vpop.f32.mrb[25].mxu1  ;;  %v4422_v47 = vmul.f32 -1.442695, %v4391_v11  ;;  %v753_v51 = vmul.f32 %v4161_v55, %v4296_v32 }
 0x129   :  { %v3501_v63 = vpop.eup %3500  ;;  %3520 = vrcp.f32 %v1397_v18  ;;  %v1398_v31 = vadd.f32 1.0, %v3499_v21  ;;  %v4417_v38 = vpop.f32.mrb[26].mxu0  ;;  %v4432_v21 = vmul.f32 %v4348_v30, %v4224_v43  ;;  %v817_v32 = vmul.f32 %v4161_v55, %v4298_v35 }
 0x12a   :  { %v3503_v1 = vpop.eup %3502  ;;  %3522 = vrcp.f32 %v1461_v12  ;;  %v1462_v41 = vadd.f32 1.0, %v3501_v63  ;;  %v4419_v24 = vpop.f32.mrb[26].mxu1  ;;  %v4435_v63 = vadd.f32 %v4167_v60, %v752_v2  ;;  %v754_v43 = vmul.f32 %v4163_v56, %v4303_v40 }
 0x12b   :  { %5513 = vst [vmem:[#allocation3_spill] sm:$0xff] %v4419_v24  ;;  %v3505_v37 = vpop.eup %3504  ;;  %3524 = vrcp.f32 %v1398_v31  ;;  %v1399_v62 = vadd.f32 1.0, %v3503_v1  ;;  %v4426_v42 = vpop.f32.mrb[27].mxu0  ;;  %v4438_v24 = vadd.f32 %v4167_v60, %v816_v9  ;;  %v818_v30 = vmul.f32 %v4163_v56, %v4305_v45 }
 0x12c   :  { %5514 = vst [vmem:[#allocation4_spill] sm:$0xff] %v4426_v42  ;;  %v4428_v27 = vpop.f32.mrb[27].mxu1  ;;  %v3507_v18 = vpop.eup %3506  ;;  %3526 = vrcp.f32 %v1462_v41  ;;  %v1463_v12 = vadd.f32 1.0, %v3505_v37  ;;  %v4447_v37 = vadd.f32 %v4165_v57, %v753_v51  ;;  %v755_v9 = vmul.f32 %v4161_v55, %v4312_v52 }
 0x12d   :  { %5515 = vst [vmem:[#allocation5_spill] sm:$0xff] %v4428_v27  ;;  %v3509_v31 = vpop.eup %3508  ;;  %3528 = vrcp.f32 %v1399_v62  ;;  %v1400_v1 = vadd.f32 1.0, %v3507_v18  ;;  %v2612_v18 = vmul.f32 -1.442695, %v4435_v63  ;;  %v819_v40 = vmul.f32 %v4161_v55, %v4314_v16  ;;  %v4456_v45 = vpop.f32.mrb[28].mxu1 }
 0x12e   :  { %v3511_v27 = vpop.eup %3510  ;;  %3530 = vrcp.f32 %v1463_v12  ;;  %v1464_v42 = vadd.f32 1.0, %v3509_v31  ;;  %v4454_v12 = vpop.f32.mrb[28].mxu0  ;;  %5516 = vst [vmem:[#allocation6_spill] sm:$0xff] %v4456_v45  ;;  %v4460_v51 = vadd.f32 %v4165_v57, %v817_v32  ;;  %v756_v52 = vmul.f32 %v4163_v56, %v4319_v4 }
 0x12f   :  { %v3513_v2 = vpop.eup %3512  ;;  %3532 = vrcp.f32 %v1400_v1  ;;  %v1401_v41 = vadd.f32 1.0, %v3511_v27  ;;  %v4466_v1 = vpop.f32.mrb[29].mxu1  ;;  %v4470_v45 = vadd.f32 %v4167_v60, %v754_v43 }
 0x130   :  { %v3515_v62 = vpop.eup %3514  ;;  %3534 = vrcp.f32 %v1464_v42  ;;  %v1465_v35 = vadd.f32 1.0, %v3513_v2  ;;  %v4464_v42 = vpop.f32.mrb[29].mxu0 }
 0x131   :  { %v3517_v31 = vpop.eup %3516  ;;  %v1843_v27 = vmul.f32 %v3515_v62, %v4237_v58  ;;  %3536 = vrcp.f32 %v1401_v41  ;;  %5517 = vst [vmem:[#allocation7_spill] sm:$0xff] %v4464_v42  ;;  %v4473_v58 = vadd.f32 %v4167_v60, %v818_v30  ;;  %v4475_v41 = vpop.f32.mrb[30].mxu0 }
 0x132   :  { %v3519_v2 = vpop.eup %3518  ;;  %v1780_v16 = vmul.f32 %v3517_v31, %v4241_v10  ;;  %3538 = vrcp.f32 %v1465_v35  ;;  %v4477_v32 = vpop.f32.mrb[30].mxu1  ;;  %v4483_v10 = vadd.f32 %v4165_v57, %v755_v9  ;;  %v2613_v9 = vmul.f32 -1.442695, %v4447_v37 }
 0x133   :  { %5518 = vst [vmem:[#allocation8_spill] sm:$0xff] %v4473_v58  ;;  %5519 = vst [vmem:[#allocation9_spill] sm:$0xff] %v4477_v32  ;;  %v3521_v62 = vpop.eup %3520  ;;  %v3069_v4 = vpack.c.bf16 %v1843_v27, %v4403_v0  ;;  %v1844_v42 = vmul.f32 %v3519_v2, %v4247_v23  ;;  %3540 = vpow2.f32 %v4388_v29  ;;  %v4485_v35 = vpop.f32.mrb[31].mxu0  ;;  %v2676_v32 = vmul.f32 -1.442695, %v4438_v24 }
 0x134   :  { %5520 = vst [vmem:[#allocation10_spill] sm:$0xff] %v4485_v35  ;;  %v4487_v43 = vpop.f32.mrb[31].mxu1  ;;  %v3523_v30 = vpop.eup %3522  ;;  %v3149_v31 = vpack.c.bf16 %v1780_v16, %v4412_v61  ;;  %3542 = vpow2.f32 %v4394_v22  ;;  %v4493_v0 = vadd.f32 %v4165_v57, %v819_v40  ;;  %v4502_v61 = vadd.f32 %v4167_v60, %v756_v52 }
 0x135   :  { %5521 = vst [vmem:[#allocation11_spill] sm:$0xff] %v4487_v43  ;;  %v3525_v23 = vpop.eup %3524  ;;  %3317 = vst [vmem:[%s5508_s4 + $0x88] sm:$0xff] %v3069_v4   ;;  %v3229_v29 = vpack.c.bf16 %v1844_v42, %v4432_v21  ;;  %3544 = vpow2.f32 %v4415_v46  ;;  %v2677_v40 = vmul.f32 -1.442695, %v4460_v51  ;;  %v2614_v27 = vmul.f32 -1.442695, %v4470_v45 }
 0x136   :  { %v3527_v22 = vpop.eup %3526  ;;  %3332 = vst [vmem:[%s5509_s5 + $0x8] sm:$0xff] %v3149_v31   ;;  %3546 = vpow2.f32 %v4422_v47  ;;  %v2678_v46 = vmul.f32 -1.442695, %v4473_v58  ;;  %v2615_v21 = vmul.f32 -1.442695, %v4483_v10  ;;  %v820_v52 = vmul.f32 %v4163_v56, %v4321_v5  ;;  %v4520_v31 = vpop.f32.mrb[32].mxu0 }
 0x137   :  { %v3529_v2 = vpop.eup %3528  ;;  %3348 = vst [vmem:[%s5509_s5 + $0x88] sm:$0xff] %v3229_v29   ;;  %3548 = vpow2.f32 %v2612_v18  ;;  %v1781_v47 = vmul.f32 %v3521_v62, %v4259_v48  ;;  %v2679_v4 = vmul.f32 -1.442695, %v4493_v0  ;;  %5522 = vst [vmem:[#allocation12_spill] sm:$0xff] %v4520_v31  ;;  %v4522_v43 = vpop.f32.mrb[32].mxu1  ;;  %v1845_v29 = vmul.f32 %v3523_v30, %v4267_v54 }
 0x138   :  { %v3531_v42 = vpop.eup %3530  ;;  %v1783_v16 = vmul.f32 %v3529_v2, %v4281_v7  ;;  %3550 = vpow2.f32 %v2676_v32  ;;  %5523 = vst [vmem:[#allocation13_spill] sm:$0xff] %v4522_v43  ;;  %v2616_v5 = vmul.f32 -1.442695, %v4502_v61  ;;  %v4527_v35 = vpop.f32.mrb[33].mxu0  ;;  %v1782_v32 = vmul.f32 %v3525_v23, %v4270_v59 }
 0x139   :  { %v3533_v18 = vpop.eup %3532  ;;  %v1847_v58 = vmul.f32 %v3531_v42, %v4284_v8  ;;  %3552 = vpow2.f32 %v2613_v9  ;;  %5524 = vst [vmem:[#allocation14_spill] sm:$0xff] %v4527_v35  ;;  %v4529_v48 = vpop.f32.mrb[33].mxu1  ;;  %v5526_v8 = vld [vmem:[#allocation2_spill] sm:$0xff]  ;;  %v757_v23 = vmul.f32 %v4161_v55, %v4344_v25  ;;  %v758_v25 = vmul.f32 %v4163_v56, %v4354_v28 }
 0x13a   :  { %5525 = vst [vmem:[#allocation15_spill] sm:$0xff] %v4529_v48  ;;  %v3535_v7 = vpop.eup %3534  ;;  %v2994_v62 = vpack.c.bf16 %v1783_v16, %v1781_v47  ;;  %v1784_v2 = vmul.f32 %v3533_v18, %v4287_v15  ;;  %3554 = vpow2.f32 %v2677_v40  ;;  %v4533_v43 = vpop.f32.mrb[34].mxu0  ;;  %v1846_v30 = vmul.f32 %v3527_v22, %v5526_v8 }
 0x13b   :  { %v4535_v31 = vpop.f32.mrb[34].mxu1  ;;  %v4537_v54 = vpop.eup %3536  ;;  %v3074_v9 = vpack.c.bf16 %v1847_v58, %v1845_v29  ;;  %v1848_v42 = vmul.f32 %v3535_v7, %v4310_v49  ;;  %3556 = vpow2.f32 %v2614_v27  ;;  %v821_v58 = vmul.f32 %v4161_v55, %v4346_v26 }
 0x13c   :  { %v4541_v48 = vpop.f32.mrb[35].mxu0  ;;  %v4543_v35 = vpop.f32.mrb[35].mxu1  ;;  %3302 = vst [vmem:[%s5508_s4 + $0x10] sm:$0xff] %v2994_v62   ;;  %v3154_v15 = vpack.c.bf16 %v1784_v2, %v1782_v32  ;;  %3558 = vpow2.f32 %v2678_v46  ;;  %v4569_v18 = vadd.f32 %v4165_v57, %v757_v23 }
 0x13d   :  { %v4545_v59 = vpop.eup %3538  ;;  %3318 = vst [vmem:[%s5508_s4 + $0x90] sm:$0xff] %v3074_v9   ;;  %v3234_v49 = vpack.c.bf16 %v1848_v42, %v1846_v30  ;;  %3560 = vpow2.f32 %v2615_v21  ;;  %v4566_v21 = vadd.f32 %v4167_v60, %v820_v52  ;;  %v4573_v29 = vpop.f32.mrb[36].mxu1  ;;  %v4576_v32 = vadd.f32 %v4165_v57, %v821_v58 }
 0x13e   :  { %v3541_v22 = vpop.eup %3540  ;;  %3333 = vst [vmem:[%s5509_s5 + $0x10] sm:$0xff] %v3154_v15   ;;  %3562 = vpow2.f32 %v2679_v4  ;;  %v4571_v4 = vpop.f32.mrb[36].mxu0  ;;  %v822_v52 = vmul.f32 %v4163_v56, %v4356_v13  ;;  %v4585_v30 = vadd.f32 %v4167_v60, %v758_v25  ;;  %v759_v9 = vmul.f32 %v4161_v55, %v4366_v53 }
 0x13f   :  { %v3543_v40 = vpop.eup %3542  ;;  %v1402_v27 = vadd.f32 1.0, %v3541_v22  ;;  %3349 = vst [vmem:[%s5509_s5 + $0x90] sm:$0xff] %v3234_v49   ;;  %3564 = vpow2.f32 %v2616_v5  ;;  %v4580_v5 = vpop.f32.mrb[37].mxu0  ;;  %v2680_v13 = vmul.f32 -1.442695, %v4566_v21  ;;  %v823_v22 = vmul.f32 %v4161_v55, %v4368_v39 }
 0x140   :  { %v3545_v46 = vpop.eup %3544  ;;  %v1466_v47 = vadd.f32 1.0, %v3543_v40  ;;  %v4582_v62 = vpop.f32.mrb[37].mxu1  ;;  %v2617_v25 = vmul.f32 -1.442695, %v4569_v18  ;;  %v760_v53 = vmul.f32 %v4163_v56, %v4374_v34  ;;  %v4605_v39 = vadd.f32 %v4167_v60, %v822_v52 }
 0x141   :  { %v3547_v26 = vpop.eup %3546  ;;  %3566 = vrcp.f32 %v1402_v27  ;;  %v1403_v16 = vadd.f32 1.0, %v3545_v46  ;;  %v4589_v42 = vpop.f32.mrb[38].mxu0 }
 0x142   :  { %v3549_v28 = vpop.eup %3548  ;;  %3568 = vrcp.f32 %v1466_v47  ;;  %v1467_v7 = vadd.f32 1.0, %v3547_v26  ;;  %5527 = vst [vmem:[#allocation2_spill] sm:$0xff] %v4589_v42  ;;  %v4594_v49 = vpop.f32.mrb[38].mxu1 }
 0x143   :  { %v3551_v2 = vpop.eup %3550  ;;  %3570 = vrcp.f32 %v1403_v16  ;;  %v1404_v8 = vadd.f32 1.0, %v3549_v28  ;;  %5528 = vst [vmem:[#allocation16_spill] sm:$0xff] %v4594_v49  ;;  %v4596_v58 = vpop.f32.mrb[39].mxu0  ;;  %v2681_v16 = vmul.f32 -1.442695, %v4576_v32 }
 0x144   :  { %v3553_v15 = vpop.eup %3552  ;;  %3572 = vrcp.f32 %v1467_v7  ;;  %v1468_v23 = vadd.f32 1.0, %v3551_v2  ;;  %5529 = vst [vmem:[#allocation17_spill] sm:$0xff] %v4596_v58  ;;  %v4601_v46 = vpop.f32.mrb[39].mxu1  ;;  %v2618_v2 = vmul.f32 -1.442695, %v4585_v30 }
 0x145   :  { %v3555_v40 = vpop.eup %3554  ;;  %3574 = vrcp.f32 %v1404_v8  ;;  %v1405_v27 = vadd.f32 1.0, %v3553_v15  ;;  %5530 = vst [vmem:[#allocation18_spill] sm:$0xff] %v4601_v46  ;;  %v4609_v8 = vadd.f32 %v4165_v57, %v759_v9  ;;  %v4612_v46 = vadd.f32 %v4165_v57, %v823_v22  ;;  %v4621_v9 = vpop.f32.mrb[40].mxu0 }
 0x146   :  { %v3557_v47 = vpop.eup %3556  ;;  %3576 = vrcp.f32 %v1468_v23  ;;  %v1469_v26 = vadd.f32 1.0, %v3555_v40  ;;  %v824_v23 = vmul.f32 %v4163_v56, %v4376_v3  ;;  %5531 = vst [vmem:[#allocation19_spill] sm:$0xff] %v4621_v9  ;;  %v2682_v22 = vmul.f32 -1.442695, %v4605_v39  ;;  %v4626_v3 = vpop.f32.mrb[40].mxu1 }
 0x147   :  { %v3559_v28 = vpop.eup %3558  ;;  %3578 = vrcp.f32 %v1405_v27  ;;  %v1406_v7 = vadd.f32 1.0, %v3557_v47  ;;  %v4617_v27 = vadd.f32 %v4167_v60, %v760_v53  ;;  %v761_v47 = vmul.f32 %v4161_v55, %v4398_v36  ;;  %5532 = vst [vmem:[#allocation20_spill] sm:$0xff] %v4626_v3  ;;  %v4633_v9 = vpop.f32.mrb[41].mxu1 }
 0x148   :  { %v3561_v15 = vpop.eup %3560  ;;  %3580 = vrcp.f32 %v1469_v26  ;;  %v1470_v34 = vadd.f32 1.0, %v3559_v28  ;;  %v825_v28 = vmul.f32 %v4161_v55, %v4400_v33  ;;  %v2619_v49 = vmul.f32 -1.442695, %v4609_v8  ;;  %5534 = vst [vmem:[#allocation22_spill] sm:$0xff] %v4633_v9 }
 0x149   :  { %v3563_v40 = vpop.eup %3562  ;;  %3582 = vrcp.f32 %v1406_v7  ;;  %v1407_v52 = vadd.f32 1.0, %v3561_v15  ;;  %v4628_v7 = vpop.f32.mrb[41].mxu0  ;;  %v762_v36 = vmul.f32 %v4163_v56, %v4407_v6  ;;  %v1785_v33 = vmul.f32 %v4537_v54, %v4325_v14 }
 0x14a   :  { %v3565_v58 = vpop.eup %3564  ;;  %3584 = vrcp.f32 %v1470_v34  ;;  %v1471_v26 = vadd.f32 1.0, %v3563_v40  ;;  %5533 = vst [vmem:[#allocation21_spill] sm:$0xff] %v4628_v7  ;;  %v4635_v34 = vpop.f32.mrb[42].mxu0  ;;  %v1849_v3 = vmul.f32 %v4545_v59, %v4328_v19  ;;  %v2620_v6 = vmul.f32 -1.442695, %v4617_v27 }
 0x14b   :  { %v3567_v15 = vpop.eup %3566  ;;  %3586 = vrcp.f32 %v1407_v52  ;;  %v1408_v53 = vadd.f32 1.0, %v3565_v58  ;;  %5535 = vst [vmem:[#allocation23_spill] sm:$0xff] %v4635_v34  ;;  %v2683_v52 = vmul.f32 -1.442695, %v4612_v46  ;;  %v4642_v58 = vpop.f32.mrb[42].mxu1  ;;  %v4648_v34 = vadd.f32 %v4167_v60, %v824_v23 }
 0x14c   :  { %v3569_v40 = vpop.eup %3568  ;;  %3588 = vrcp.f32 %v1471_v26  ;;  %5536 = vst [vmem:[#allocation24_spill] sm:$0xff] %v4642_v58  ;;  %v4644_v7 = vpop.f32.mrb[43].mxu0  ;;  %v4651_v9 = vadd.f32 %v4165_v57, %v761_v47  ;;  %v4657_v59 = vadd.f32 %v4165_v57, %v825_v28  ;;  %v826_v26 = vmul.f32 %v4163_v56, %v4409_v17 }
 0x14d   :  { %5537 = vst [vmem:[#allocation25_spill] sm:$0xff] %v4644_v7  ;;  %v3571_v42 = vpop.eup %3570  ;;  %3590 = vrcp.f32 %v1408_v53  ;;  %v4653_v14 = vpop.f32.mrb[43].mxu1  ;;  %v4663_v23 = vadd.f32 %v4167_v60, %v762_v36  ;;  %v763_v47 = vmul.f32 %v4161_v55, %v4417_v38  ;;  %v1850_v17 = vmul.f32 %v3569_v40, %v4379_v50 }
 0x14e   :  { %5538 = vst [vmem:[#allocation26_spill] sm:$0xff] %v4653_v14  ;;  %v3573_v19 = vpop.eup %3572  ;;  %v1787_v54 = vmul.f32 %v3571_v42, %v4382_v20  ;;  %3592 = vpow2.f32 %v2680_v13  ;;  %v1786_v20 = vmul.f32 %v3567_v15, %v4362_v44  ;;  %v4673_v36 = vpop.f32.mrb[44].mxu1  ;;  %v2684_v38 = vmul.f32 -1.442695, %v4648_v34 }
 0x14f   :  { %v3575_v53 = vpop.eup %3574  ;;  %v1851_v7 = vmul.f32 %v3573_v19, %v4391_v11  ;;  %3594 = vpow2.f32 %v2617_v25  ;;  %v4671_v25 = vpop.f32.mrb[44].mxu0  ;;  %v2685_v40 = vmul.f32 -1.442695, %v4657_v59 }
 0x150   :  { %v3577_v14 = vpop.eup %3576  ;;  %v2999_v42 = vpack.c.bf16 %v1787_v54, %v1785_v33  ;;  %v1788_v13 = vmul.f32 %v3575_v53, %v4435_v63  ;;  %3596 = vpow2.f32 %v2681_v16  ;;  %v4680_v63 = vadd.f32 %v4167_v60, %v826_v26  ;;  %v4682_v50 = vpop.f32.mrb[45].mxu0  ;;  %v5545_v26 = vld [vmem:[#allocation3_spill] sm:$0xff] }
 0x151   :  { %v3579_v28 = vpop.eup %3578  ;;  %v3079_v58 = vpack.c.bf16 %v1851_v7, %v1849_v3  ;;  %v1852_v11 = vmul.f32 %v3577_v14, %v4438_v24  ;;  %3598 = vpow2.f32 %v2618_v2  ;;  %5539 = vst [vmem:[#allocation27_spill] sm:$0xff] %v4682_v50  ;;  %v4684_v24 = vpop.f32.mrb[45].mxu1  ;;  %v2621_v3 = vmul.f32 -1.442695, %v4651_v9 }
 0x152   :  { %v3581_v19 = vpop.eup %3580  ;;  %3303 = vst [vmem:[%s5508_s4 + $0x18] sm:$0xff] %v2999_v42   ;;  %v3159_v44 = vpack.c.bf16 %v1788_v13, %v1786_v20  ;;  %3600 = vpow2.f32 %v2682_v22  ;;  %5540 = vst [vmem:[#allocation28_spill] sm:$0xff] %v4684_v24  ;;  %v4690_v7 = vpop.f32.mrb[46].mxu0  ;;  %v2622_v14 = vmul.f32 -1.442695, %v4663_v23  ;;  %v4709_v54 = vadd.f32 %v4165_v57, %v763_v47 }
 0x153   :  { %v3583_v16 = vpop.eup %3582  ;;  %3319 = vst [vmem:[%s5508_s4 + $0x98] sm:$0xff] %v3079_v58   ;;  %v3239_v2 = vpack.c.bf16 %v1852_v11, %v1850_v17  ;;  %3602 = vpow2.f32 %v2619_v49  ;;  %5541 = vst [vmem:[#allocation29_spill] sm:$0xff] %v4690_v7  ;;  %v4692_v22 = vpop.f32.mrb[46].mxu1  ;;  %v1789_v20 = vmul.f32 %v3579_v28, %v4447_v37  ;;  %v2686_v13 = vmul.f32 -1.442695, %v4680_v63 }
 0x154   :  { %5542 = vst [vmem:[#allocation30_spill] sm:$0xff] %v4692_v22  ;;  %v4694_v15 = vpop.eup %3584  ;;  %3334 = vst [vmem:[%s5509_s5 + $0x18] sm:$0xff] %v3159_v44   ;;  %3604 = vpow2.f32 %v2683_v52  ;;  %v4700_v33 = vpop.f32.mrb[47].mxu0  ;;  %v827_v52 = vmul.f32 %v4161_v55, %v5545_v26  ;;  %v1853_v11 = vmul.f32 %v3581_v19, %v4460_v51  ;;  %v5546_v44 = vld [vmem:[#allocation4_spill] sm:$0xff]  ;;  %v1790_v26 = vmul.f32 %v3583_v16, %v4470_v45 }
 0x155   :  { %5543 = vst [vmem:[#allocation31_spill] sm:$0xff] %v4700_v33  ;;  %v4702_v58 = vpop.f32.mrb[47].mxu1  ;;  %v3587_v49 = vpop.eup %3586  ;;  %3350 = vst [vmem:[%s5509_s5 + $0x98] sm:$0xff] %v3239_v2   ;;  %3606 = vpow2.f32 %v2620_v6  ;;  %v764_v47 = vmul.f32 %v4163_v56, %v5546_v44 }
 0x156   :  { %5544 = vst [vmem:[#allocation32_spill] sm:$0xff] %v4702_v58  ;;  %v3589_v53 = vpop.eup %3588  ;;  %v1791_v42 = vmul.f32 %v3587_v49, %v4483_v10  ;;  %3608 = vpow2.f32 %v2684_v38  ;;  %v4723_v49 = vadd.f32 %v4165_v57, %v827_v52  ;;  %v4725_v51 = vpop.f32.mrb[48].mxu0 }
 0x157   :  { %v3591_v17 = vpop.eup %3590  ;;  %v1855_v6 = vmul.f32 %v3589_v53, %v4493_v0  ;;  %3610 = vpow2.f32 %v2621_v3  ;;  %5547 = vst [vmem:[#allocation3_spill] sm:$0xff] %v4725_v51  ;;  %v4727_v0 = vpop.f32.mrb[48].mxu1 }
 0x158   :  { %v3593_v2 = vpop.eup %3592  ;;  %v3004_v58 = vpack.c.bf16 %v1791_v42, %v1789_v20  ;;  %v1792_v37 = vmul.f32 %v3591_v17, %v4502_v61  ;;  %3612 = vpow2.f32 %v2685_v40  ;;  %5548 = vst [vmem:[#allocation4_spill] sm:$0xff] %v4727_v0  ;;  %v5549_v61 = vld [vmem:[#allocation5_spill] sm:$0xff]  ;;  %v4734_v40 = vpop.f32.mrb[49].mxu0 }
 0x159   :  { %v3595_v10 = vpop.eup %3594  ;;  %v3084_v28 = vpack.c.bf16 %v1855_v6, %v1853_v11  ;;  %v1472_v38 = vadd.f32 1.0, %v3593_v2  ;;  %3614 = vpow2.f32 %v2622_v14  ;;  %v828_v3 = vmul.f32 %v4163_v56, %v5549_v61  ;;  %5550 = vst [vmem:[#allocation5_spill] sm:$0xff] %v4734_v40  ;;  %v4736_v14 = vpop.f32.mrb[49].mxu1 }
 0x15a   :  { %v3597_v19 = vpop.eup %3596  ;;  %3304 = vst [vmem:[%s5508_s4 + $0x20] sm:$0xff] %v3004_v58   ;;  %v3164_v45 = vpack.c.bf16 %v1792_v37, %v1790_v26  ;;  %v1409_v16 = vadd.f32 1.0, %v3595_v10  ;;  %3616 = vpow2.f32 %v2686_v13  ;;  %5551 = vst [vmem:[#allocation33_spill] sm:$0xff] %v4736_v14  ;;  %v765_v58 = vmul.f32 %v4161_v55, %v4454_v12  ;;  %v4743_v20 = vpop.f32.mrb[50].mxu0  ;;  %v5566_v14 = vld [vmem:[#allocation8_spill] sm:$0xff] }
 0x15b   :  { %v3599_v52 = vpop.eup %3598  ;;  %3320 = vst [vmem:[%s5508_s4 + $0xa0] sm:$0xff] %v3084_v28   ;;  %3618 = vrcp.f32 %v1472_v38  ;;  %v1473_v53 = vadd.f32 1.0, %v3597_v19  ;;  %5552 = vst [vmem:[#allocation34_spill] sm:$0xff] %v4743_v20  ;;  %v4745_v42 = vpop.f32.mrb[50].mxu1  ;;  %v4751_v11 = vadd.f32 %v4167_v60, %v764_v47  ;;  %v2623_v26 = vmul.f32 -1.442695, %v4709_v54 }
 0x15c   :  { %5553 = vst [vmem:[#allocation35_spill] sm:$0xff] %v4745_v42  ;;  %v3601_v13 = vpop.eup %3600  ;;  %3335 = vst [vmem:[%s5509_s5 + $0x20] sm:$0xff] %v3164_v45   ;;  %3620 = vrcp.f32 %v1409_v16  ;;  %v1410_v17 = vadd.f32 1.0, %v3599_v52  ;;  %v4753_v6 = vpop.f32.mrb[51].mxu0  ;;  %v4759_v37 = vmul.f32 -1.442695, %v4723_v49  ;;  %v4762_v38 = vadd.f32 %v4167_v60, %v828_v3 }
 0x15d   :  { %5554 = vst [vmem:[#allocation36_spill] sm:$0xff] %v4753_v6  ;;  %v4755_v44 = vpop.f32.mrb[51].mxu1  ;;  %v3603_v2 = vpop.eup %3602  ;;  %3622 = vrcp.f32 %v1473_v53  ;;  %v1474_v12 = vadd.f32 1.0, %v3601_v13  ;;  %v5556_v47 = vld [vmem:[#allocation6_spill] sm:$0xff]  ;;  %v4767_v61 = vadd.f32 %v4165_v57, %v765_v58  ;;  %v5557_v52 = vld [vmem:[#allocation7_spill] sm:$0xff]  ;;  %v830_v3 = vmul.f32 %v4163_v56, %v4466_v1 }
 0x15e   :  { %5555 = vst [vmem:[#allocation37_spill] sm:$0xff] %v4755_v44  ;;  %v3605_v10 = vpop.eup %3604  ;;  %3624 = vrcp.f32 %v1410_v17  ;;  %v1411_v28 = vadd.f32 1.0, %v3603_v2  ;;  %v829_v19 = vmul.f32 %v4161_v55, %v5556_v47  ;;  %v766_v53 = vmul.f32 %v4163_v56, %v5557_v52  ;;  %v4778_v6 = vpop.f32.mrb[52].mxu0  ;;  %v5561_v1 = vld [vmem:[#allocation10_spill] sm:$0xff] }
 0x15f   :  { %v3607_v45 = vpop.eup %3606  ;;  %3626 = vrcp.f32 %v1474_v12  ;;  %v1475_v16 = vadd.f32 1.0, %v3605_v10  ;;  %v2624_v17 = vmul.f32 -1.442695, %v4751_v11  ;;  %v767_v12 = vmul.f32 %v4161_v55, %v4475_v41  ;;  %v5558_v10 = vld [vmem:[#allocation9_spill] sm:$0xff]  ;;  %5559 = vst [vmem:[#allocation6_spill] sm:$0xff] %v4778_v6  ;;  %v4780_v52 = vpop.f32.mrb[52].mxu1 }
 0x160   :  { %v3609_v13 = vpop.eup %3608  ;;  %3628 = vrcp.f32 %v1411_v28  ;;  %v1412_v44 = vadd.f32 1.0, %v3607_v45  ;;  %v831_v58 = vmul.f32 %v4161_v55, %v5558_v10  ;;  %5560 = vst [vmem:[#allocation7_spill] sm:$0xff] %v4780_v52  ;;  %v4783_v42 = vadd.f32 %v4165_v57, %v829_v19  ;;  %v4789_v20 = vpop.f32.mrb[53].mxu1 }
 0x161   :  { %v3611_v2 = vpop.eup %3610  ;;  %3630 = vrcp.f32 %v1475_v16  ;;  %v1476_v47 = vadd.f32 1.0, %v3609_v13  ;;  %v768_v16 = vmul.f32 %v4163_v56, %v5561_v1  ;;  %v4787_v13 = vpop.f32.mrb[53].mxu0  ;;  %5563 = vst [vmem:[#allocation10_spill] sm:$0xff] %v4789_v20  ;;  %v2688_v6 = vmul.f32 -1.442695, %v4762_v38 }
 0x162   :  { %v3613_v28 = vpop.eup %3612  ;;  %3632 = vrcp.f32 %v1412_v44  ;;  %v1413_v45 = vadd.f32 1.0, %v3611_v2  ;;  %5562 = vst [vmem:[#allocation9_spill] sm:$0xff] %v4787_v13  ;;  %v4793_v52 = vadd.f32 %v4167_v60, %v766_v53  ;;  %v4795_v44 = vpop.f32.mrb[54].mxu0  ;;  %v1854_v1 = vmul.f32 %v4694_v15, %v5566_v14 }
 0x163   :  { %v3615_v41 = vpop.eup %3614  ;;  %3634 = vrcp.f32 %v1476_v47  ;;  %v1477_v10 = vadd.f32 1.0, %v3613_v28  ;;  %5564 = vst [vmem:[#allocation38_spill] sm:$0xff] %v4795_v44  ;;  %v4797_v2 = vpop.f32.mrb[54].mxu1  ;;  %v4802_v20 = vadd.f32 %v4167_v60, %v830_v3  ;;  %v4809_v44 = vadd.f32 %v4165_v57, %v767_v12  ;;  %v5569_v3 = vld [vmem:[#allocation11_spill] sm:$0xff] }
 0x164   :  { %5565 = vst [vmem:[#allocation39_spill] sm:$0xff] %v4797_v2  ;;  %v3617_v19 = vpop.eup %3616  ;;  %3636 = vrcp.f32 %v1413_v45  ;;  %v1414_v13 = vadd.f32 1.0, %v3615_v41  ;;  %v4804_v47 = vpop.f32.mrb[55].mxu0  ;;  %v4812_v2 = vadd.f32 %v4165_v57, %v831_v58  ;;  %v4816_v14 = vadd.f32 %v4167_v60, %v768_v16 }
 0x165   :  { %5567 = vst [vmem:[#allocation8_spill] sm:$0xff] %v4804_v47  ;;  %v4806_v28 = vpop.f32.mrb[55].mxu1  ;;  %v3619_v40 = vpop.eup %3618  ;;  %3638 = vrcp.f32 %v1477_v10  ;;  %v1478_v53 = vadd.f32 1.0, %v3617_v19  ;;  %v832_v45 = vmul.f32 %v4163_v56, %v5569_v3  ;;  %v2625_v10 = vmul.f32 -1.442695, %v4767_v61  ;;  %v5570_v19 = vld [vmem:[#allocation12_spill] sm:$0xff] }
 0x166   :  { %5568 = vst [vmem:[#allocation40_spill] sm:$0xff] %v4806_v28  ;;  %v3621_v0 = vpop.eup %3620  ;;  %v1856_v15 = vmul.f32 %v3619_v40, %v4566_v21  ;;  %3640 = vrcp.f32 %v1414_v13  ;;  %v2689_v12 = vmul.f32 -1.442695, %v4783_v42  ;;  %v769_v58 = vmul.f32 %v4161_v55, %v5570_v19  ;;  %v4829_v3 = vpop.f32.mrb[56].mxu0 }
 0x167   :  { %v3623_v41 = vpop.eup %3622  ;;  %3642 = vrcp.f32 %v1478_v53  ;;  %v2626_v21 = vmul.f32 -1.442695, %v4793_v52  ;;  %v2690_v40 = vmul.f32 -1.442695, %v4802_v20  ;;  %v2627_v13 = vmul.f32 -1.442695, %v4809_v44 }
 0x168   :  { %v3625_v28 = vpop.eup %3624  ;;  %v3244_v47 = vpack.c.bf16 %v1856_v15, %v1854_v1  ;;  %3644 = vpow2.f32 %v2623_v26  ;;  %v2691_v53 = vmul.f32 -1.442695, %v4812_v2  ;;  %5571 = vst [vmem:[#allocation11_spill] sm:$0xff] %v4829_v3  ;;  %v4831_v51 = vpop.f32.mrb[56].mxu1  ;;  %v2628_v26 = vmul.f32 -1.442695, %v4816_v14 }
 0x169   :  { %v3627_v16 = vpop.eup %3626  ;;  %3646 = vpow2.f32 %v4759_v37  ;;  %5572 = vst [vmem:[#allocation12_spill] sm:$0xff] %v4831_v51  ;;  %v4838_v1 = vadd.f32 %v4167_v60, %v832_v45  ;;  %v5573_v37 = vld [vmem:[#allocation13_spill] sm:$0xff]  ;;  %v4842_v19 = vpop.f32.mrb[57].mxu0  ;;  %v1793_v51 = vmul.f32 %v3621_v0, %v4569_v18  ;;  %v1794_v0 = vmul.f32 %v3625_v28, %v4585_v30 }
 0x16a   :  { %v3629_v33 = vpop.eup %3628  ;;  %3351 = vst [vmem:[%s5509_s5 + $0xa0] sm:$0xff] %v3244_v47   ;;  %3648 = vpow2.f32 %v2624_v17  ;;  %v833_v15 = vmul.f32 %v4161_v55, %v5573_v37  ;;  %5574 = vst [vmem:[#allocation13_spill] sm:$0xff] %v4842_v19  ;;  %v4844_v22 = vpop.f32.mrb[57].mxu1  ;;  %v4849_v17 = vadd.f32 %v4165_v57, %v769_v58  ;;  %v1857_v37 = vmul.f32 %v3623_v41, %v4576_v32 }
 0x16b   :  { %5575 = vst [vmem:[#allocation41_spill] sm:$0xff] %v4844_v22  ;;  %v3631_v3 = vpop.eup %3630  ;;  %v1795_v7 = vmul.f32 %v3629_v33, %v4609_v8  ;;  %3650 = vpow2.f32 %v2688_v6  ;;  %v4851_v47 = vpop.f32.mrb[58].mxu0  ;;  %v5577_v22 = vld [vmem:[#allocation14_spill] sm:$0xff]  ;;  %v1858_v32 = vmul.f32 %v3627_v16, %v4605_v39  ;;  %v2692_v30 = vmul.f32 -1.442695, %v4838_v1 }
 0x16c   :  { %v4853_v45 = vpop.f32.mrb[58].mxu1  ;;  %v3633_v24 = vpop.eup %3632  ;;  %v1859_v19 = vmul.f32 %v3631_v3, %v4612_v46  ;;  %3652 = vpow2.f32 %v2625_v10  ;;  %v770_v50 = vmul.f32 %v4163_v56, %v5577_v22 }
 0x16d   :  { %5576 = vst [vmem:[#allocation42_spill] sm:$0xff] %v4853_v45  ;;  %v4859_v18 = vpop.f32.mrb[59].mxu0  ;;  %v4861_v8 = vpop.f32.mrb[59].mxu1  ;;  %v3009_v6 = vpack.c.bf16 %v1795_v7, %v1793_v51  ;;  %v1796_v58 = vmul.f32 %v3633_v24, %v4617_v27  ;;  %3654 = vpow2.f32 %v2689_v12  ;;  %v5578_v24 = vld [vmem:[#allocation15_spill] sm:$0xff] }
 0x16e   :  { %v3635_v33 = vpop.eup %3634  ;;  %v3089_v46 = vpack.c.bf16 %v1859_v19, %v1857_v37  ;;  %3656 = vpow2.f32 %v2626_v21  ;;  %v834_v7 = vmul.f32 %v4163_v56, %v5578_v24  ;;  %v4888_v28 = vpop.f32.mrb[60].mxu0  ;;  %v4899_v16 = vadd.f32 %v4167_v60, %v770_v50 }
 0x16f   :  { %v4865_v45 = vpop.eup %3636  ;;  %v1860_v41 = vmul.f32 %v3635_v33, %v4648_v34  ;;  %3305 = vst [vmem:[%s5508_s4 + $0x28] sm:$0xff] %v3009_v6   ;;  %v3169_v10 = vpack.c.bf16 %v1796_v58, %v1794_v0  ;;  %3658 = vpow2.f32 %v2690_v40  ;;  %v2629_v34 = vmul.f32 -1.442695, %v4849_v17  ;;  %v4890_v12 = vpop.f32.mrb[60].mxu1 }
 0x170   :  { %v4869_v22 = vpop.eup %3638  ;;  %3321 = vst [vmem:[%s5508_s4 + $0xa8] sm:$0xff] %v3089_v46   ;;  %3660 = vpow2.f32 %v2627_v13  ;;  %v4896_v40 = vadd.f32 %v4165_v57, %v833_v15  ;;  %v4901_v13 = vpop.f32.mrb[61].mxu0  ;;  %v771_v37 = vmul.f32 %v4161_v55, %v4533_v43  ;;  %v835_v33 = vmul.f32 %v4161_v55, %v4535_v31 }
 0x171   :  { %v4875_v27 = vpop.eup %3640  ;;  %v3249_v39 = vpack.c.bf16 %v1860_v41, %v1858_v32  ;;  %3336 = vst [vmem:[%s5509_s5 + $0x28] sm:$0xff] %v3169_v10   ;;  %3662 = vpow2.f32 %v2691_v53  ;;  %v4903_v3 = vpop.f32.mrb[61].mxu1  ;;  %v4914_v6 = vadd.f32 %v4167_v60, %v834_v7  ;;  %v772_v58 = vmul.f32 %v4163_v56, %v4541_v48 }
 0x172   :  { %v4883_v51 = vpop.eup %3642  ;;  %3664 = vpow2.f32 %v2628_v26  ;;  %5579 = vst [vmem:[#allocation14_spill] sm:$0xff] %v4903_v3  ;;  %v4909_v26 = vpop.f32.mrb[62].mxu0  ;;  %v4927_v48 = vadd.f32 %v4165_v57, %v771_v37  ;;  %v4930_v7 = vadd.f32 %v4165_v57, %v835_v33  ;;  %v773_v37 = vmul.f32 %v4161_v55, %v4571_v4 }
 0x173   :  { %v3645_v21 = vpop.eup %3644  ;;  %3352 = vst [vmem:[%s5509_s5 + $0xa8] sm:$0xff] %v3249_v39   ;;  %3666 = vpow2.f32 %v2692_v30  ;;  %5580 = vst [vmem:[#allocation15_spill] sm:$0xff] %v4909_v26  ;;  %v4911_v15 = vpop.f32.mrb[62].mxu1  ;;  %v2693_v30 = vmul.f32 -1.442695, %v4896_v40  ;;  %v1798_v3 = vmul.f32 %v4875_v27, %v4663_v23  ;;  %v5586_v23 = vld [vmem:[#allocation17_spill] sm:$0xff] }
 0x174   :  { %v3647_v53 = vpop.eup %3646  ;;  %v1415_v19 = vadd.f32 1.0, %v3645_v21  ;;  %5581 = vst [vmem:[#allocation43_spill] sm:$0xff] %v4911_v15  ;;  %3668 = vpow2.f32 %v2629_v34  ;;  %v4918_v32 = vpop.f32.mrb[63].mxu0  ;;  %v4924_v39 = vmul.f32 -1.442695, %v4899_v16 }
 0x175   :  { %v3649_v0 = vpop.eup %3648  ;;  %v1479_v50 = vadd.f32 1.0, %v3647_v53  ;;  %5582 = vst [vmem:[#allocation44_spill] sm:$0xff] %v4918_v32  ;;  %v4920_v46 = vpop.f32.mrb[63].mxu1 }
 0x176   :  { %5583 = vst [vmem:[#allocation45_spill] sm:$0xff] %v4920_v46  ;;  %v3651_v43 = vpop.eup %3650  ;;  %3670 = vrcp.f32 %v1415_v19  ;;  %v1416_v31 = vadd.f32 1.0, %v3649_v0  ;;  %v2694_v19 = vmul.f32 -1.442695, %v4914_v6  ;;  %v4934_v0 = vadd.f32 %v4167_v60, %v772_v58 }
 0x177   :  { %v3653_v41 = vpop.eup %3652  ;;  %3672 = vrcp.f32 %v1479_v50  ;;  %v1480_v10 = vadd.f32 1.0, %v3651_v43 }
 0x178   :  { %v3655_v34 = vpop.eup %3654  ;;  %3674 = vrcp.f32 %v1416_v31  ;;  %v1417_v24 = vadd.f32 1.0, %v3653_v41  ;;  %v836_v31 = vmul.f32 %v4163_v56, %v4543_v35  ;;  %v2632_v4 = vmul.f32 -1.442695, %v4934_v0 }
 0x179   :  { %v3657_v21 = vpop.eup %3656  ;;  %3676 = vrcp.f32 %v1480_v10  ;;  %v1481_v53 = vadd.f32 1.0, %v3655_v34  ;;  %v837_v10 = vmul.f32 %v4161_v55, %v4573_v29  ;;  %v774_v34 = vmul.f32 %v4163_v56, %v4580_v5 }
 0x17a   :  { %v3659_v50 = vpop.eup %3658  ;;  %3678 = vrcp.f32 %v1417_v24  ;;  %v1418_v43 = vadd.f32 1.0, %v3657_v21  ;;  %v2631_v24 = vmul.f32 -1.442695, %v4927_v48  ;;  %v2695_v21 = vmul.f32 -1.442695, %v4930_v7 }
 0x17b   :  { %v3661_v41 = vpop.eup %3660  ;;  %3680 = vrcp.f32 %v1481_v53  ;;  %v1482_v33 = vadd.f32 1.0, %v3659_v50  ;;  %v838_v53 = vmul.f32 %v4163_v56, %v4582_v62  ;;  %v4950_v5 = vadd.f32 %v4167_v60, %v836_v31 }
 0x17c   :  { %v3663_v58 = vpop.eup %3662  ;;  %3682 = vrcp.f32 %v1418_v43  ;;  %v1419_v46 = vadd.f32 1.0, %v3661_v41  ;;  %v4953_v43 = vadd.f32 %v4165_v57, %v773_v37  ;;  %v1797_v62 = vmul.f32 %v4865_v45, %v4651_v9 }
 0x17d   :  { %v3665_v35 = vpop.eup %3664  ;;  %3684 = vrcp.f32 %v1482_v33  ;;  %v1483_v32 = vadd.f32 1.0, %v3663_v58  ;;  %v4956_v33 = vadd.f32 %v4165_v57, %v837_v10  ;;  %v4959_v58 = vadd.f32 %v4167_v60, %v774_v34  ;;  %v5584_v10 = vld [vmem:[#allocation2_spill] sm:$0xff] }
 0x17e   :  { %v3667_v50 = vpop.eup %3666  ;;  %3686 = vrcp.f32 %v1419_v46  ;;  %v1420_v29 = vadd.f32 1.0, %v3665_v35  ;;  %v1861_v46 = vmul.f32 %v4869_v22, %v4657_v59  ;;  %v775_v34 = vmul.f32 %v4161_v55, %v5584_v10  ;;  %v5585_v59 = vld [vmem:[#allocation16_spill] sm:$0xff] }
 0x17f   :  { %v3669_v41 = vpop.eup %3668  ;;  %3688 = vrcp.f32 %v1483_v32  ;;  %v1484_v15 = vadd.f32 1.0, %v3667_v50  ;;  %v4967_v32 = vadd.f32 %v4167_v60, %v838_v53  ;;  %v839_v45 = vmul.f32 %v4161_v55, %v5585_v59 }
 0x180   :  { %v3671_v26 = vpop.eup %3670  ;;  %3690 = vrcp.f32 %v1420_v29  ;;  %v1421_v31 = vadd.f32 1.0, %v3669_v41 }
 0x181   :  { %v3673_v37 = vpop.eup %3672  ;;  %v1799_v35 = vmul.f32 %v3671_v26, %v4709_v54  ;;  %3692 = vrcp.f32 %v1484_v15  ;;  %v1862_v54 = vmul.f32 %v4883_v51, %v4680_v63  ;;  %v2696_v63 = vmul.f32 -1.442695, %v4950_v5 }
 0x182   :  { %v3675_v50 = vpop.eup %3674  ;;  %v1863_v9 = vmul.f32 %v3673_v37, %v4723_v49  ;;  %3694 = vrcp.f32 %v1421_v31  ;;  %v776_v49 = vmul.f32 %v4163_v56, %v5586_v23 }
 0x183   :  { %v3677_v22 = vpop.eup %3676  ;;  %v3014_v26 = vpack.c.bf16 %v1799_v35, %v1797_v62  ;;  %v1800_v15 = vmul.f32 %v3675_v50, %v4751_v11  ;;  %3696 = vpow2.f32 %v2693_v30  ;;  %v4988_v11 = vadd.f32 %v4165_v57, %v775_v34 }
 0x184   :  { %v3679_v53 = vpop.eup %3678  ;;  %v3094_v29 = vpack.c.bf16 %v1863_v9, %v1861_v46  ;;  %v1864_v41 = vmul.f32 %v3677_v22, %v4762_v38  ;;  %3698 = vpow2.f32 %v4924_v39  ;;  %v2633_v30 = vmul.f32 -1.442695, %v4953_v43 }
 0x185   :  { %v3681_v27 = vpop.eup %3680  ;;  %3306 = vst [vmem:[%s5508_s4 + $0x30] sm:$0xff] %v3014_v26   ;;  %v3174_v31 = vpack.c.bf16 %v1800_v15, %v1798_v3  ;;  %3700 = vpow2.f32 %v2694_v19  ;;  %v4995_v39 = vadd.f32 %v4165_v57, %v839_v45  ;;  %v2697_v3 = vmul.f32 -1.442695, %v4956_v33 }
 0x186   :  { %v3683_v51 = vpop.eup %3682  ;;  %3322 = vst [vmem:[%s5508_s4 + $0xb0] sm:$0xff] %v3094_v29   ;;  %v3254_v38 = vpack.c.bf16 %v1864_v41, %v1862_v54  ;;  %3702 = vpow2.f32 %v2631_v24  ;;  %v2634_v24 = vmul.f32 -1.442695, %v4959_v58  ;;  %v2698_v46 = vmul.f32 -1.442695, %v4967_v32 }
 0x187   :  { %v3685_v62 = vpop.eup %3684  ;;  %3337 = vst [vmem:[%s5509_s5 + $0x30] sm:$0xff] %v3174_v31   ;;  %3704 = vpow2.f32 %v2695_v21  ;;  %v5007_v37 = vadd.f32 %v4167_v60, %v776_v49  ;;  %v1801_v10 = vmul.f32 %v3679_v53, %v4767_v61  ;;  %v2635_v34 = vmul.f32 -1.442695, %v4988_v11 }
 0x188   :  { %v3687_v19 = vpop.eup %3686  ;;  %3353 = vst [vmem:[%s5509_s5 + $0xb0] sm:$0xff] %v3254_v38   ;;  %3706 = vpow2.f32 %v2632_v4  ;;  %v1865_v9 = vmul.f32 %v3681_v27, %v4783_v42  ;;  %v2699_v59 = vmul.f32 -1.442695, %v4995_v39  ;;  %v1802_v22 = vmul.f32 %v3683_v51, %v4793_v52  ;;  %v5587_v52 = vld [vmem:[#allocation18_spill] sm:$0xff] }
 0x189   :  { %v3689_v35 = vpop.eup %3688  ;;  %v1803_v21 = vmul.f32 %v3687_v19, %v4809_v44  ;;  %3708 = vpow2.f32 %v2696_v63  ;;  %v1866_v44 = vmul.f32 %v3685_v62, %v4802_v20  ;;  %v840_v29 = vmul.f32 %v4163_v56, %v5587_v52 }
 0x18a   :  { %v3691_v50 = vpop.eup %3690  ;;  %v1867_v4 = vmul.f32 %v3689_v35, %v4812_v2  ;;  %3710 = vpow2.f32 %v2633_v30  ;;  %v2636_v31 = vmul.f32 -1.442695, %v5007_v37  ;;  %v5588_v30 = vld [vmem:[#allocation19_spill] sm:$0xff]  ;;  %v5590_v35 = vld [vmem:[#allocation21_spill] sm:$0xff] }
 0x18b   :  { %v3693_v45 = vpop.eup %3692  ;;  %v3019_v54 = vpack.c.bf16 %v1803_v21, %v1801_v10  ;;  %v1804_v26 = vmul.f32 %v3691_v50, %v4816_v14  ;;  %3712 = vpow2.f32 %v2697_v3  ;;  %v5037_v38 = vadd.f32 %v4167_v60, %v840_v29  ;;  %v5591_v50 = vld [vmem:[#allocation22_spill] sm:$0xff] }
 0x18c   :  { %v5017_v61 = vpop.eup %3694  ;;  %v3099_v15 = vpack.c.bf16 %v1867_v4, %v1865_v9  ;;  %v1868_v53 = vmul.f32 %v3693_v45, %v4838_v1  ;;  %3714 = vpow2.f32 %v2634_v24  ;;  %v777_v62 = vmul.f32 %v4161_v55, %v5588_v30  ;;  %v5589_v24 = vld [vmem:[#allocation20_spill] sm:$0xff]  ;;  %v5592_v4 = vld [vmem:[#allocation23_spill] sm:$0xff] }
 0x18d   :  { %v3697_v42 = vpop.eup %3696  ;;  %3307 = vst [vmem:[%s5508_s4 + $0x38] sm:$0xff] %v3019_v54   ;;  %v3179_v2 = vpack.c.bf16 %v1804_v26, %v1802_v22  ;;  %3716 = vpow2.f32 %v2698_v46  ;;  %v841_v46 = vmul.f32 %v4161_v55, %v5589_v24  ;;  %v778_v10 = vmul.f32 %v4163_v56, %v5590_v35  ;;  %v5593_v54 = vld [vmem:[#allocation24_spill] sm:$0xff]  ;;  %v5595_v24 = vld [vmem:[#allocation26_spill] sm:$0xff] }
 0x18e   :  { %v3699_v14 = vpop.eup %3698  ;;  %3323 = vst [vmem:[%s5508_s4 + $0xb8] sm:$0xff] %v3099_v15   ;;  %v3259_v20 = vpack.c.bf16 %v1868_v53, %v1866_v44  ;;  %v1485_v41 = vadd.f32 1.0, %v3697_v42  ;;  %3718 = vpow2.f32 %v2635_v34  ;;  %v842_v9 = vmul.f32 %v4163_v56, %v5591_v50  ;;  %v5594_v44 = vld [vmem:[#allocation25_spill] sm:$0xff] }
 0x18f   :  { %v3701_v1 = vpop.eup %3700  ;;  %3338 = vst [vmem:[%s5509_s5 + $0x38] sm:$0xff] %v3179_v2   ;;  %v1422_v23 = vadd.f32 1.0, %v3699_v14  ;;  %3720 = vpow2.f32 %v2699_v59  ;;  %v779_v59 = vmul.f32 %v4161_v55, %v5592_v4  ;;  %v843_v26 = vmul.f32 %v4161_v55, %v5593_v54 }
 0x190   :  { %v3703_v49 = vpop.eup %3702  ;;  %3354 = vst [vmem:[%s5509_s5 + $0xb8] sm:$0xff] %v3259_v20   ;;  %3722 = vrcp.f32 %v1485_v41  ;;  %v1486_v27 = vadd.f32 1.0, %v3701_v1  ;;  %v780_v15 = vmul.f32 %v4163_v56, %v5594_v44  ;;  %v2700_v2 = vmul.f32 -1.442695, %v5037_v38 }
 0x191   :  { %v3705_v63 = vpop.eup %3704  ;;  %3724 = vrcp.f32 %v1422_v23  ;;  %v1423_v51 = vadd.f32 1.0, %v3703_v49  ;;  %v5055_v52 = vadd.f32 %v4165_v57, %v777_v62  ;;  %v5058_v20 = vadd.f32 %v4165_v57, %v841_v46 }
 0x192   :  { %v3707_v3 = vpop.eup %3706  ;;  %3726 = vrcp.f32 %v1486_v27  ;;  %v1487_v19 = vadd.f32 1.0, %v3705_v63  ;;  %v5061_v41 = vadd.f32 %v4167_v60, %v778_v10  ;;  %v5064_v49 = vadd.f32 %v4167_v60, %v842_v9 }
 0x193   :  { %v3709_v21 = vpop.eup %3708  ;;  %3728 = vrcp.f32 %v1423_v51  ;;  %v1424_v34 = vadd.f32 1.0, %v3707_v3  ;;  %v5067_v27 = vadd.f32 %v4165_v57, %v779_v59  ;;  %v5070_v30 = vadd.f32 %v4165_v57, %v843_v26 }
 0x194   :  { %v3711_v45 = vpop.eup %3710  ;;  %3730 = vrcp.f32 %v1487_v19  ;;  %v1488_v22 = vadd.f32 1.0, %v3709_v21  ;;  %v5073_v62 = vadd.f32 %v4167_v60, %v780_v15  ;;  %v844_v46 = vmul.f32 %v4163_v56, %v5595_v24 }
 0x195   :  { %v3713_v53 = vpop.eup %3712  ;;  %3732 = vrcp.f32 %v1424_v34  ;;  %v1425_v42 = vadd.f32 1.0, %v3711_v45  ;;  %v781_v35 = vmul.f32 %v4161_v55, %v4671_v25  ;;  %v2637_v34 = vmul.f32 -1.442695, %v5055_v52  ;;  %v5596_v45 = vld [vmem:[#allocation27_spill] sm:$0xff] }
 0x196   :  { %v3715_v29 = vpop.eup %3714  ;;  %3734 = vrcp.f32 %v1488_v22  ;;  %v1489_v14 = vadd.f32 1.0, %v3713_v53  ;;  %v845_v50 = vmul.f32 %v4161_v55, %v4673_v36  ;;  %v2701_v4 = vmul.f32 -1.442695, %v5058_v20 }
 0x197   :  { %v3717_v1 = vpop.eup %3716  ;;  %3736 = vrcp.f32 %v1425_v42  ;;  %v1426_v23 = vadd.f32 1.0, %v3715_v29  ;;  %v2638_v59 = vmul.f32 -1.442695, %v5061_v41  ;;  %v782_v22 = vmul.f32 %v4163_v56, %v5596_v45 }
 0x198   :  { %v3719_v63 = vpop.eup %3718  ;;  %3738 = vrcp.f32 %v1489_v14  ;;  %v1490_v51 = vadd.f32 1.0, %v3717_v1  ;;  %v2702_v25 = vmul.f32 -1.442695, %v5064_v49  ;;  %v2639_v26 = vmul.f32 -1.442695, %v5067_v27 }
 0x199   :  { %v3721_v3 = vpop.eup %3720  ;;  %3740 = vrcp.f32 %v1426_v23  ;;  %v1427_v19 = vadd.f32 1.0, %v3719_v63  ;;  %v2703_v44 = vmul.f32 -1.442695, %v5070_v30  ;;  %v2640_v36 = vmul.f32 -1.442695, %v5073_v62 }
 0x19a   :  { %v3723_v10 = vpop.eup %3722  ;;  %3742 = vrcp.f32 %v1490_v51  ;;  %v1491_v21 = vadd.f32 1.0, %v3721_v3  ;;  %v5091_v53 = vadd.f32 %v4167_v60, %v844_v46  ;;  %v5094_v42 = vadd.f32 %v4165_v57, %v781_v35 }
 0x19b   :  { %v3725_v9 = vpop.eup %3724  ;;  %3744 = vrcp.f32 %v1427_v19  ;;  %v1805_v14 = vmul.f32 %v5017_v61, %v4849_v17  ;;  %v5100_v23 = vadd.f32 %v4165_v57, %v845_v50  ;;  %v5105_v3 = vadd.f32 %v4167_v60, %v782_v22 }
 0x19c   :  { %v3727_v54 = vpop.eup %3726  ;;  %3746 = vrcp.f32 %v1491_v21  ;;  %v1806_v24 = vmul.f32 %v3725_v9, %v4899_v16  ;;  %v2704_v16 = vmul.f32 -1.442695, %v5091_v53 }
 0x19d   :  { %v3729_v15 = vpop.eup %3728  ;;  %3748 = vpow2.f32 %v2636_v31  ;;  %v1869_v31 = vmul.f32 %v3723_v10, %v4896_v40  ;;  %v1870_v61 = vmul.f32 %v3727_v54, %v4914_v6  ;;  %v5597_v10 = vld [vmem:[#allocation28_spill] sm:$0xff]  ;;  %v2705_v50 = vmul.f32 -1.442695, %v5100_v23 }
 0x19e   :  { %v3731_v29 = vpop.eup %3730  ;;  %v1807_v1 = vmul.f32 %v3729_v15, %v4927_v48  ;;  %3750 = vpow2.f32 %v2700_v2 }
 0x19f   :  { %v3733_v63 = vpop.eup %3732  ;;  %v1871_v51 = vmul.f32 %v3731_v29, %v4930_v7  ;;  %3752 = vpow2.f32 %v2637_v34 }
 0x1a0   :  { %v3735_v19 = vpop.eup %3734  ;;  %v3024_v46 = vpack.c.bf16 %v1807_v1, %v1805_v14  ;;  %v1808_v17 = vmul.f32 %v3733_v63, %v4934_v0  ;;  %3754 = vpow2.f32 %v2701_v4  ;;  %v846_v0 = vmul.f32 %v4163_v56, %v5597_v10 }
 0x1a1   :  { %v3737_v48 = vpop.eup %3736  ;;  %v3104_v2 = vpack.c.bf16 %v1871_v51, %v1869_v31  ;;  %v1872_v35 = vmul.f32 %v3735_v19, %v4950_v5  ;;  %3756 = vpow2.f32 %v2638_v59  ;;  %v2641_v5 = vmul.f32 -1.442695, %v5094_v42  ;;  %v5598_v59 = vld [vmem:[#allocation29_spill] sm:$0xff] }
 0x1a2   :  { %v3739_v40 = vpop.eup %3738  ;;  %3308 = vst [vmem:[%s5508_s4 + $0x40] sm:$0xff] %v3024_v46   ;;  %v3184_v7 = vpack.c.bf16 %v1808_v17, %v1806_v24  ;;  %3758 = vpow2.f32 %v2702_v25  ;;  %v2642_v4 = vmul.f32 -1.442695, %v5105_v3  ;;  %v783_v45 = vmul.f32 %v4161_v55, %v5598_v59 }
 0x1a3   :  { %v5117_v21 = vpop.eup %3740  ;;  %3324 = vst [vmem:[%s5508_s4 + $0xc0] sm:$0xff] %v3104_v2   ;;  %v3264_v6 = vpack.c.bf16 %v1872_v35, %v1870_v61  ;;  %3760 = vpow2.f32 %v2639_v26  ;;  %v1809_v54 = vmul.f32 %v3737_v48, %v4953_v43  ;;  %v5138_v26 = vadd.f32 %v4167_v60, %v846_v0  ;;  %v5600_v43 = vld [vmem:[#allocation31_spill] sm:$0xff]  ;;  %v5601_v61 = vld [vmem:[#allocation32_spill] sm:$0xff] }
 0x1a4   :  { %v5123_v34 = vpop.eup %3742  ;;  %3339 = vst [vmem:[%s5509_s5 + $0x40] sm:$0xff] %v3184_v7   ;;  %3762 = vpow2.f32 %v2703_v44  ;;  %v1873_v15 = vmul.f32 %v3739_v40, %v4956_v33  ;;  %v5147_v46 = vadd.f32 %v4165_v57, %v783_v45  ;;  %v848_v2 = vmul.f32 %v4163_v56, %v5601_v61  ;;  %v5603_v45 = vld [vmem:[#allocation4_spill] sm:$0xff] }
 0x1a5   :  { %v3745_v9 = vpop.eup %3744  ;;  %3355 = vst [vmem:[%s5509_s5 + $0xc0] sm:$0xff] %v3264_v6   ;;  %3764 = vpow2.f32 %v2640_v36  ;;  %v5599_v36 = vld [vmem:[#allocation30_spill] sm:$0xff]  ;;  %v2706_v7 = vmul.f32 -1.442695, %v5138_v26 }
 0x1a6   :  { %v3747_v22 = vpop.eup %3746  ;;  %v1811_v25 = vmul.f32 %v3745_v9, %v4988_v11  ;;  %3766 = vpow2.f32 %v2704_v16  ;;  %v847_v14 = vmul.f32 %v4161_v55, %v5599_v36  ;;  %v784_v11 = vmul.f32 %v4163_v56, %v5600_v43 }
 0x1a7   :  { %v3749_v44 = vpop.eup %3748  ;;  %v1875_v29 = vmul.f32 %v3747_v22, %v4995_v39  ;;  %3768 = vpow2.f32 %v2641_v5  ;;  %v2643_v6 = vmul.f32 -1.442695, %v5147_v46  ;;  %v849_v22 = vmul.f32 %v4161_v55, %v5603_v45 }
 0x1a8   :  { %v3751_v1 = vpop.eup %3750  ;;  %v3029_v63 = vpack.c.bf16 %v1811_v25, %v1809_v54  ;;  %v1428_v31 = vadd.f32 1.0, %v3749_v44  ;;  %3770 = vpow2.f32 %v2705_v50  ;;  %v5159_v16 = vadd.f32 %v4165_v57, %v847_v14 }
 0x1a9   :  { %v3753_v51 = vpop.eup %3752  ;;  %v3109_v19 = vpack.c.bf16 %v1875_v29, %v1873_v15  ;;  %v1492_v24 = vadd.f32 1.0, %v3751_v1  ;;  %3772 = vpow2.f32 %v2642_v4  ;;  %v5163_v5 = vadd.f32 %v4167_v60, %v784_v11  ;;  %v5602_v4 = vld [vmem:[#allocation3_spill] sm:$0xff]  ;;  %v5604_v15 = vld [vmem:[#allocation5_spill] sm:$0xff] }
 0x1aa   :  { %v3755_v33 = vpop.eup %3754  ;;  %3309 = vst [vmem:[%s5508_s4 + $0x48] sm:$0xff] %v3029_v63   ;;  %3774 = vrcp.f32 %v1428_v31  ;;  %v1429_v39 = vadd.f32 1.0, %v3753_v51  ;;  %v785_v59 = vmul.f32 %v4161_v55, %v5602_v4  ;;  %v5170_v44 = vadd.f32 %v4167_v60, %v848_v2  ;;  %v5605_v63 = vld [vmem:[#allocation33_spill] sm:$0xff]  ;;  %v5608_v4 = vld [vmem:[#allocation36_spill] sm:$0xff] }
 0x1ab   :  { %v3757_v17 = vpop.eup %3756  ;;  %3325 = vst [vmem:[%s5508_s4 + $0xc8] sm:$0xff] %v3109_v19   ;;  %3776 = vrcp.f32 %v1492_v24  ;;  %v1493_v48 = vadd.f32 1.0, %v3755_v33  ;;  %v786_v29 = vmul.f32 %v4163_v56, %v5604_v15  ;;  %v2707_v1 = vmul.f32 -1.442695, %v5159_v16  ;;  %v5606_v19 = vld [vmem:[#allocation34_spill] sm:$0xff] }
 0x1ac   :  { %v3759_v35 = vpop.eup %3758  ;;  %3778 = vrcp.f32 %v1429_v39  ;;  %v1430_v40 = vadd.f32 1.0, %v3757_v17  ;;  %v850_v31 = vmul.f32 %v4163_v56, %v5605_v63  ;;  %v2644_v51 = vmul.f32 -1.442695, %v5163_v5 }
 0x1ad   :  { %v3761_v10 = vpop.eup %3760  ;;  %3780 = vrcp.f32 %v1493_v48  ;;  %v1494_v0 = vadd.f32 1.0, %v3759_v35  ;;  %v787_v24 = vmul.f32 %v4161_v55, %v5606_v19  ;;  %v5181_v17 = vadd.f32 %v4165_v57, %v785_v59 }
 0x1ae   :  { %v3763_v50 = vpop.eup %3762  ;;  %3782 = vrcp.f32 %v1430_v40  ;;  %v1431_v9 = vadd.f32 1.0, %v3761_v10  ;;  %v5184_v48 = vadd.f32 %v4165_v57, %v849_v22  ;;  %v5187_v35 = vadd.f32 %v4167_v60, %v786_v29  ;;  %v5607_v40 = vld [vmem:[#allocation35_spill] sm:$0xff] }
 0x1af   :  { %v3765_v54 = vpop.eup %3764  ;;  %3784 = vrcp.f32 %v1494_v0  ;;  %v1495_v25 = vadd.f32 1.0, %v3763_v50  ;;  %v851_v10 = vmul.f32 %v4161_v55, %v5607_v40  ;;  %v788_v59 = vmul.f32 %v4163_v56, %v5608_v4 }
 0x1b0   :  { %v3767_v36 = vpop.eup %3766  ;;  %3786 = vrcp.f32 %v1431_v9  ;;  %v1432_v14 = vadd.f32 1.0, %v3765_v54  ;;  %v5192_v9 = vadd.f32 %v4167_v60, %v850_v31  ;;  %v1810_v22 = vmul.f32 %v5117_v21, %v4959_v58 }
 0x1b1   :  { %v3769_v43 = vpop.eup %3768  ;;  %3788 = vrcp.f32 %v1495_v25  ;;  %v1496_v11 = vadd.f32 1.0, %v3767_v36  ;;  %v5200_v25 = vadd.f32 %v4165_v57, %v787_v24  ;;  %v1874_v29 = vmul.f32 %v5123_v34, %v4967_v32 }
 0x1b2   :  { %v3771_v33 = vpop.eup %3770  ;;  %3790 = vrcp.f32 %v1432_v14  ;;  %v1433_v39 = vadd.f32 1.0, %v3769_v43  ;;  %v5609_v14 = vld [vmem:[#allocation37_spill] sm:$0xff]  ;;  %v2708_v58 = vmul.f32 -1.442695, %v5170_v44  ;;  %v2645_v19 = vmul.f32 -1.442695, %v5181_v17 }
 0x1b3   :  { %v3773_v61 = vpop.eup %3772  ;;  %3792 = vrcp.f32 %v1496_v11  ;;  %v1497_v2 = vadd.f32 1.0, %v3771_v33  ;;  %v852_v63 = vmul.f32 %v4163_v56, %v5609_v14  ;;  %v5213_v32 = vadd.f32 %v4167_v60, %v788_v59 }
 0x1b4   :  { %v3775_v0 = vpop.eup %3774  ;;  %3794 = vrcp.f32 %v1433_v39  ;;  %v1434_v50 = vadd.f32 1.0, %v3773_v61  ;;  %v2709_v34 = vmul.f32 -1.442695, %v5184_v48  ;;  %v2647_v33 = vmul.f32 -1.442695, %v5200_v25 }
 0x1b5   :  { %v3777_v45 = vpop.eup %3776  ;;  %v1812_v54 = vmul.f32 %v3775_v0, %v5007_v37  ;;  %3796 = vrcp.f32 %v1497_v2  ;;  %v5209_v37 = vadd.f32 %v4165_v57, %v851_v10  ;;  %v5226_v39 = vadd.f32 %v4167_v60, %v852_v63 }
 0x1b6   :  { %v3779_v15 = vpop.eup %3778  ;;  %v1876_v36 = vmul.f32 %v3777_v45, %v5037_v38  ;;  %3798 = vrcp.f32 %v1434_v50  ;;  %v2648_v50 = vmul.f32 -1.442695, %v5213_v32 }
 0x1b7   :  { %v3781_v31 = vpop.eup %3780  ;;  %v3189_v43 = vpack.c.bf16 %v1812_v54, %v1810_v22  ;;  %3800 = vpow2.f32 %v2706_v7  ;;  %v2646_v7 = vmul.f32 -1.442695, %v5187_v35  ;;  %v2711_v40 = vmul.f32 -1.442695, %v5209_v37 }
 0x1b8   :  { %v3783_v21 = vpop.eup %3782  ;;  %v3269_v11 = vpack.c.bf16 %v1876_v36, %v1874_v29  ;;  %3802 = vpow2.f32 %v2643_v6  ;;  %v2710_v6 = vmul.f32 -1.442695, %v5192_v9  ;;  %v1877_v0 = vmul.f32 %v3781_v31, %v5058_v20 }
 0x1b9   :  { %v3785_v38 = vpop.eup %3784  ;;  %3340 = vst [vmem:[%s5509_s5 + $0x48] sm:$0xff] %v3189_v43   ;;  %3804 = vpow2.f32 %v2707_v1  ;;  %v1813_v1 = vmul.f32 %v3779_v15, %v5055_v52  ;;  %v1814_v59 = vmul.f32 %v3783_v21, %v5061_v41  ;;  %v2712_v41 = vmul.f32 -1.442695, %v5226_v39 }
 0x1ba   :  { %v3787_v24 = vpop.eup %3786  ;;  %3356 = vst [vmem:[%s5509_s5 + $0xc8] sm:$0xff] %v3269_v11   ;;  %3806 = vpow2.f32 %v2644_v51 }
 0x1bb   :  { %v3789_v61 = vpop.eup %3788  ;;  %v1815_v2 = vmul.f32 %v3787_v24, %v5067_v27  ;;  %3808 = vpow2.f32 %v2708_v58  ;;  %v1878_v27 = vmul.f32 %v3785_v38, %v5064_v49 }
 0x1bc   :  { %v3791_v10 = vpop.eup %3790  ;;  %v1879_v51 = vmul.f32 %v3789_v61, %v5070_v30  ;;  %3810 = vpow2.f32 %v2645_v19  ;;  %v5613_v61 = vld [vmem:[#allocation10_spill] sm:$0xff] }
 0x1bd   :  { %v3793_v4 = vpop.eup %3792  ;;  %v3034_v45 = vpack.c.bf16 %v1815_v2, %v1813_v1  ;;  %v1816_v22 = vmul.f32 %v3791_v10, %v5073_v62  ;;  %3812 = vpow2.f32 %v2709_v34  ;;  %v5610_v62 = vld [vmem:[#allocation6_spill] sm:$0xff]  ;;  %v854_v1 = vmul.f32 %v4163_v56, %v5613_v61 }
 0x1be   :  { %v5236_v52 = vpop.eup %3794  ;;  %v3114_v54 = vpack.c.bf16 %v1879_v51, %v1877_v0  ;;  %v1880_v15 = vmul.f32 %v3793_v4, %v5091_v53  ;;  %3814 = vpow2.f32 %v2646_v7  ;;  %v789_v29 = vmul.f32 %v4161_v55, %v5610_v62  ;;  %v5611_v53 = vld [vmem:[#allocation7_spill] sm:$0xff]  ;;  %v5612_v7 = vld [vmem:[#allocation9_spill] sm:$0xff]  ;;  %v5614_v2 = vld [vmem:[#allocation38_spill] sm:$0xff] }
 0x1bf   :  { %v5240_v20 = vpop.eup %3796  ;;  %3310 = vst [vmem:[%s5508_s4 + $0x50] sm:$0xff] %v3034_v45   ;;  %v3194_v30 = vpack.c.bf16 %v1816_v22, %v1814_v59  ;;  %3816 = vpow2.f32 %v2710_v6  ;;  %v853_v14 = vmul.f32 %v4161_v55, %v5611_v53  ;;  %v790_v24 = vmul.f32 %v4163_v56, %v5612_v7  ;;  %v5615_v51 = vld [vmem:[#allocation39_spill] sm:$0xff]  ;;  %v5616_v22 = vld [vmem:[#allocation8_spill] sm:$0xff] }
 0x1c0   :  { %v5248_v36 = vpop.eup %3798  ;;  %3326 = vst [vmem:[%s5508_s4 + $0xd0] sm:$0xff] %v3114_v54   ;;  %v3274_v49 = vpack.c.bf16 %v1880_v15, %v1878_v27  ;;  %3818 = vpow2.f32 %v2647_v33  ;;  %v5262_v11 = vadd.f32 %v4165_v57, %v789_v29  ;;  %v792_v27 = vmul.f32 %v4163_v56, %v5616_v22  ;;  %v5618_v7 = vld [vmem:[#allocation11_spill] sm:$0xff] }
 0x1c1   :  { %v3801_v63 = vpop.eup %3800  ;;  %3341 = vst [vmem:[%s5509_s5 + $0x50] sm:$0xff] %v3194_v30   ;;  %3820 = vpow2.f32 %v2711_v40  ;;  %v5265_v34 = vadd.f32 %v4165_v57, %v853_v14  ;;  %v791_v40 = vmul.f32 %v4161_v55, %v5614_v2 }
 0x1c2   :  { %v3803_v31 = vpop.eup %3802  ;;  %3357 = vst [vmem:[%s5509_s5 + $0xd0] sm:$0xff] %v3274_v49   ;;  %v1498_v43 = vadd.f32 1.0, %v3801_v63  ;;  %3822 = vpow2.f32 %v2648_v50  ;;  %v855_v50 = vmul.f32 %v4161_v55, %v5615_v51  ;;  %v2649_v45 = vmul.f32 -1.442695, %v5262_v11 }
 0x1c3   :  { %v3805_v58 = vpop.eup %3804  ;;  %v1435_v21 = vadd.f32 1.0, %v3803_v31  ;;  %3824 = vpow2.f32 %v2712_v41  ;;  %v2713_v30 = vmul.f32 -1.442695, %v5265_v34  ;;  %v5280_v41 = vadd.f32 %v4167_v60, %v790_v24 }
 0x1c4   :  { %v3807_v19 = vpop.eup %3806  ;;  %3826 = vrcp.f32 %v1498_v43  ;;  %v1499_v38 = vadd.f32 1.0, %v3805_v58  ;;  %v5283_v49 = vadd.f32 %v4167_v60, %v854_v1  ;;  %v5286_v53 = vadd.f32 %v4165_v57, %v791_v40  ;;  %v5617_v43 = vld [vmem:[#allocation40_spill] sm:$0xff] }
 0x1c5   :  { %v3809_v6 = vpop.eup %3808  ;;  %3828 = vrcp.f32 %v1435_v21  ;;  %v1436_v33 = vadd.f32 1.0, %v3807_v19  ;;  %v5289_v31 = vadd.f32 %v4165_v57, %v855_v50  ;;  %v856_v58 = vmul.f32 %v4163_v56, %v5617_v43  ;;  %v5619_v1 = vld [vmem:[#allocation12_spill] sm:$0xff] }
 0x1c6   :  { %v3811_v10 = vpop.eup %3810  ;;  %3830 = vrcp.f32 %v1499_v38  ;;  %v1500_v0 = vadd.f32 1.0, %v3809_v6  ;;  %v5294_v38 = vadd.f32 %v4167_v60, %v792_v27  ;;  %v793_v24 = vmul.f32 %v4161_v55, %v5618_v7 }
 0x1c7   :  { %v3813_v4 = vpop.eup %3812  ;;  %3832 = vrcp.f32 %v1436_v33  ;;  %v1437_v59 = vadd.f32 1.0, %v3811_v10  ;;  %v2650_v61 = vmul.f32 -1.442695, %v5280_v41  ;;  %v857_v2 = vmul.f32 %v4161_v55, %v5619_v1 }
 0x1c8   :  { %v3815_v54 = vpop.eup %3814  ;;  %3834 = vrcp.f32 %v1500_v0  ;;  %v1501_v15 = vadd.f32 1.0, %v3813_v4  ;;  %v2714_v0 = vmul.f32 -1.442695, %v5283_v49  ;;  %v2651_v51 = vmul.f32 -1.442695, %v5286_v53 }
 0x1c9   :  { %v3817_v62 = vpop.eup %3816  ;;  %3836 = vrcp.f32 %v1437_v59  ;;  %v1438_v29 = vadd.f32 1.0, %v3815_v54  ;;  %v2715_v59 = vmul.f32 -1.442695, %v5289_v31  ;;  %v5305_v22 = vadd.f32 %v4167_v60, %v856_v58 }
 0x1ca   :  { %v3819_v14 = vpop.eup %3818  ;;  %3838 = vrcp.f32 %v1501_v15  ;;  %v1502_v63 = vadd.f32 1.0, %v3817_v62  ;;  %v2652_v54 = vmul.f32 -1.442695, %v5294_v38  ;;  %v5309_v15 = vadd.f32 %v4165_v57, %v793_v24  ;;  %v5620_v62 = vld [vmem:[#allocation13_spill] sm:$0xff] }
 0x1cb   :  { %v3821_v21 = vpop.eup %3820  ;;  %3840 = vrcp.f32 %v1438_v29  ;;  %v1439_v19 = vadd.f32 1.0, %v3819_v14  ;;  %v794_v29 = vmul.f32 %v4163_v56, %v5620_v62  ;;  %v5317_v58 = vadd.f32 %v4165_v57, %v857_v2 }
 0x1cc   :  { %v3823_v6 = vpop.eup %3822  ;;  %3842 = vrcp.f32 %v1502_v63  ;;  %v1503_v33 = vadd.f32 1.0, %v3821_v21  ;;  %v1817_v63 = vmul.f32 %v5236_v52, %v5094_v42  ;;  %v795_v24 = vmul.f32 %v4161_v55, %v4851_v47 }
 0x1cd   :  { %v3825_v40 = vpop.eup %3824  ;;  %3844 = vrcp.f32 %v1439_v19  ;;  %v1440_v10 = vadd.f32 1.0, %v3823_v6  ;;  %v1881_v19 = vmul.f32 %v5240_v20, %v5100_v23  ;;  %v1818_v42 = vmul.f32 %v5248_v36, %v5105_v3 }
 0x1ce   :  { %v3827_v50 = vpop.eup %3826  ;;  %3846 = vrcp.f32 %v1503_v33  ;;  %v1504_v4 = vadd.f32 1.0, %v3825_v40  ;;  %v2716_v3 = vmul.f32 -1.442695, %v5305_v22  ;;  %v5334_v20 = vadd.f32 %v4167_v60, %v794_v29  ;;  %v5621_v40 = vld [vmem:[#allocation41_spill] sm:$0xff] }
 0x1cf   :  { %v3829_v27 = vpop.eup %3828  ;;  %3848 = vrcp.f32 %v1440_v10  ;;  %v1882_v1 = vmul.f32 %v3827_v50, %v5138_v26  ;;  %v5341_v36 = vadd.f32 %v4165_v57, %v795_v24  ;;  %v858_v10 = vmul.f32 %v4163_v56, %v5621_v40  ;;  %v5622_v24 = vld [vmem:[#allocation42_spill] sm:$0xff] }
 0x1d0   :  { %v3831_v14 = vpop.eup %3830  ;;  %v1819_v43 = vmul.f32 %v3829_v27, %v5147_v46  ;;  %3850 = vrcp.f32 %v1504_v4  ;;  %v2654_v4 = vmul.f32 -1.442695, %v5334_v20 }
 0x1d1   :  { %v3833_v21 = vpop.eup %3832  ;;  %v1883_v7 = vmul.f32 %v3831_v14, %v5159_v16  ;;  %3852 = vpow2.f32 %v2649_v45  ;;  %v2655_v29 = vmul.f32 -1.442695, %v5341_v36 }
 0x1d2   :  { %v3835_v6 = vpop.eup %3834  ;;  %v3039_v52 = vpack.c.bf16 %v1819_v43, %v1817_v63  ;;  %v1820_v46 = vmul.f32 %v3833_v21, %v5163_v5  ;;  %3854 = vpow2.f32 %v2713_v30  ;;  %v2717_v30 = vmul.f32 -1.442695, %v5317_v58 }
 0x1d3   :  { %v3837_v33 = vpop.eup %3836  ;;  %v3119_v2 = vpack.c.bf16 %v1883_v7, %v1881_v19  ;;  %v1884_v23 = vmul.f32 %v3835_v6, %v5170_v44  ;;  %3856 = vpow2.f32 %v2650_v61  ;;  %v2653_v44 = vmul.f32 -1.442695, %v5309_v15 }
 0x1d4   :  { %v3839_v16 = vpop.eup %3838  ;;  %3311 = vst [vmem:[%s5508_s4 + $0x58] sm:$0xff] %v3039_v52   ;;  %v3199_v47 = vpack.c.bf16 %v1820_v46, %v1818_v42  ;;  %3858 = vpow2.f32 %v2714_v0  ;;  %v796_v42 = vmul.f32 %v4163_v56, %v4859_v18 }
 0x1d5   :  { %v3841_v5 = vpop.eup %3840  ;;  %3327 = vst [vmem:[%s5508_s4 + $0xd8] sm:$0xff] %v3119_v2   ;;  %v3279_v26 = vpack.c.bf16 %v1884_v23, %v1882_v1  ;;  %3860 = vpow2.f32 %v2651_v51  ;;  %v1821_v51 = vmul.f32 %v3837_v33, %v5181_v17  ;;  %v1885_v27 = vmul.f32 %v3839_v16, %v5184_v48 }
 0x1d6   :  { %v3843_v45 = vpop.eup %3842  ;;  %3342 = vst [vmem:[%s5509_s5 + $0x58] sm:$0xff] %v3199_v47   ;;  %3862 = vpow2.f32 %v2715_v59  ;;  %v1822_v14 = vmul.f32 %v3841_v5, %v5187_v35  ;;  %v5363_v48 = vadd.f32 %v4167_v60, %v858_v10  ;;  %v5386_v5 = vadd.f32 %v4167_v60, %v796_v42 }
 0x1d7   :  { %v3845_v61 = vpop.eup %3844  ;;  %3358 = vst [vmem:[%s5509_s5 + $0xd8] sm:$0xff] %v3279_v26   ;;  %3864 = vpow2.f32 %v2652_v54  ;;  %v860_v26 = vmul.f32 %v4163_v56, %v4861_v8 }
 0x1d8   :  { %v3847_v0 = vpop.eup %3846  ;;  %v1823_v50 = vmul.f32 %v3845_v61, %v5200_v25  ;;  %3866 = vpow2.f32 %v2716_v3  ;;  %v1886_v25 = vmul.f32 %v3843_v45, %v5192_v9  ;;  %v2718_v16 = vmul.f32 -1.442695, %v5363_v48 }
 0x1d9   :  { %v3849_v59 = vpop.eup %3848  ;;  %v1887_v62 = vmul.f32 %v3847_v0, %v5209_v37  ;;  %3868 = vpow2.f32 %v2653_v44  ;;  %v861_v61 = vmul.f32 %v4161_v55, %v4890_v12  ;;  %v798_v0 = vmul.f32 %v4163_v56, %v4901_v13 }
 0x1da   :  { %v3851_v54 = vpop.eup %3850  ;;  %v3044_v63 = vpack.c.bf16 %v1823_v50, %v1821_v51  ;;  %v1824_v43 = vmul.f32 %v3849_v59, %v5213_v32  ;;  %3870 = vpow2.f32 %v2717_v30  ;;  %v859_v32 = vmul.f32 %v4161_v55, %v5622_v24  ;;  %v5623_v51 = vld [vmem:[#allocation14_spill] sm:$0xff]  ;;  %v5624_v59 = vld [vmem:[#allocation15_spill] sm:$0xff] }
 0x1db   :  { %v3853_v17 = vpop.eup %3852  ;;  %v3124_v21 = vpack.c.bf16 %v1887_v62, %v1885_v27  ;;  %v1888_v19 = vmul.f32 %v3851_v54, %v5226_v39  ;;  %3872 = vpow2.f32 %v2654_v4  ;;  %v797_v30 = vmul.f32 %v4161_v55, %v4888_v28  ;;  %v5625_v62 = vld [vmem:[#allocation43_spill] sm:$0xff] }
 0x1dc   :  { %v3855_v37 = vpop.eup %3854  ;;  %3312 = vst [vmem:[%s5508_s4 + $0x60] sm:$0xff] %v3044_v63   ;;  %v3204_v7 = vpack.c.bf16 %v1824_v43, %v1822_v14  ;;  %v1441_v35 = vadd.f32 1.0, %v3853_v17  ;;  %3874 = vpow2.f32 %v2655_v29  ;;  %v5383_v18 = vadd.f32 %v4165_v57, %v859_v32  ;;  %v5626_v63 = vld [vmem:[#allocation44_spill] sm:$0xff] }
 0x1dd   :  { %v3857_v6 = vpop.eup %3856  ;;  %3328 = vst [vmem:[%s5508_s4 + $0xe0] sm:$0xff] %v3124_v21   ;;  %v3284_v9 = vpack.c.bf16 %v1888_v19, %v1886_v25  ;;  %v1505_v39 = vadd.f32 1.0, %v3855_v37  ;;  %v862_v50 = vmul.f32 %v4163_v56, %v5623_v51  ;;  %v799_v27 = vmul.f32 %v4161_v55, %v5624_v59 }
 0x1de   :  { %v3859_v52 = vpop.eup %3858  ;;  %3343 = vst [vmem:[%s5509_s5 + $0x60] sm:$0xff] %v3204_v7   ;;  %3876 = vrcp.f32 %v1441_v35  ;;  %v1442_v46 = vadd.f32 1.0, %v3857_v6  ;;  %v863_v28 = vmul.f32 %v4161_v55, %v5625_v62  ;;  %v5403_v29 = vadd.f32 %v4167_v60, %v860_v26 }
 0x1df   :  { %v3861_v33 = vpop.eup %3860  ;;  %3359 = vst [vmem:[%s5509_s5 + $0xe0] sm:$0xff] %v3284_v9   ;;  %3878 = vrcp.f32 %v1505_v39  ;;  %v1506_v1 = vadd.f32 1.0, %v3859_v52  ;;  %v2719_v13 = vmul.f32 -1.442695, %v5383_v18  ;;  %v5407_v14 = vadd.f32 %v4165_v57, %v797_v30  ;;  %v5627_v9 = vld [vmem:[#allocation45_spill] sm:$0xff] }
 0x1e0   :  { %v3863_v2 = vpop.eup %3862  ;;  %3880 = vrcp.f32 %v1442_v46  ;;  %v1443_v23 = vadd.f32 1.0, %v3861_v33  ;;  %v800_v43 = vmul.f32 %v4163_v56, %v5626_v63  ;;  %v2656_v25 = vmul.f32 -1.442695, %v5386_v5 }
 0x1e1   :  { %v3865_v47 = vpop.eup %3864  ;;  %3882 = vrcp.f32 %v1506_v1  ;;  %v1507_v3 = vadd.f32 1.0, %v3863_v2  ;;  %v5413_v55 = vadd.f32 %v4165_v57, %v861_v61  ;;  %v5416_v21 = vadd.f32 %v4167_v60, %v798_v0 }
 0x1e2   :  { %v3867_v44 = vpop.eup %3866  ;;  %3884 = vrcp.f32 %v1443_v23  ;;  %v1444_v45 = vadd.f32 1.0, %v3865_v47  ;;  %v5419_v19 = vadd.f32 %v4167_v60, %v862_v50  ;;  %v5422_v35 = vadd.f32 %v4165_v57, %v799_v27 }
 0x1e3   :  { %v3869_v40 = vpop.eup %3868  ;;  %3886 = vrcp.f32 %v1507_v3  ;;  %v1508_v10 = vadd.f32 1.0, %v3867_v44  ;;  %v5425_v24 = vadd.f32 %v4165_v57, %v863_v28  ;;  %v2720_v6 = vmul.f32 -1.442695, %v5403_v29 }
 0x1e4   :  { %v3871_v4 = vpop.eup %3870  ;;  %3888 = vrcp.f32 %v1444_v45  ;;  %v1445_v8 = vadd.f32 1.0, %v3869_v40  ;;  %v864_v39 = vmul.f32 %v4163_v56, %v5627_v9  ;;  %v2657_v52 = vmul.f32 -1.442695, %v5407_v14 }
 0x1e5   :  { %3890 = vrcp.f32 %v1508_v10  ;;  %v1509_v12 = vadd.f32 1.0, %v3871_v4  ;;  %v3873_v54 = vpop.eup %3872  ;;  %v5432_v46 = vadd.f32 %v4167_v60, %v800_v43  ;;  %v2721_v1 = vmul.f32 -1.442695, %v5413_v55 }
 0x1e6   :  { %3892 = vpow2.f32 %v2718_v16  ;;  %v3875_v17 = vpop.eup %3874  ;;  %v2658_v57 = vmul.f32 -1.442695, %v5416_v21  ;;  %v2722_v23 = vmul.f32 -1.442695, %v5419_v19  ;;  %v2659_v16 = vmul.f32 -1.442695, %v5422_v35 }
 0x1e7   :  { %3894 = vrcp.f32 %v1445_v8  ;;  %v1447_v7 = vadd.f32 1.0, %v3875_v17  ;;  %v2723_v56 = vmul.f32 -1.442695, %v5425_v24  ;;  %v5442_v44 = vadd.f32 %v4167_v60, %v864_v39 }
 0x1e8   :  { %v3877_v37 = vpop.eup %3876  ;;  %3896 = vrcp.f32 %v1509_v12  ;;  %v2660_v40 = vmul.f32 -1.442695, %v5432_v46  ;;  %v1446_v8 = vadd.f32 1.0, %v3873_v54 }
 0x1e9   :  { %v3879_v32 = vpop.eup %3878  ;;  %3898 = vrcp.f32 %v1447_v7  ;;  %v1825_v3 = vmul.f32 %v3877_v37, %v5262_v11 }
 0x1ea   :  { %v3881_v42 = vpop.eup %3880  ;;  %3900 = vpow2.f32 %v2719_v13  ;;  %v1889_v30 = vmul.f32 %v3879_v32, %v5265_v34 }
 0x1eb   :  { %v3883_v33 = vpop.eup %3882  ;;  %3902 = vpow2.f32 %v2656_v25  ;;  %v1826_v0 = vmul.f32 %v3881_v42, %v5280_v41 }
 0x1ec   :  { %v3885_v2 = vpop.eup %3884  ;;  %3904 = vpow2.f32 %v2720_v6  ;;  %v1890_v50 = vmul.f32 %v3883_v33, %v5283_v49 }
 0x1ed   :  { %v3887_v47 = vpop.eup %3886  ;;  %v1827_v26 = vmul.f32 %v3885_v2, %v5286_v53  ;;  %3906 = vpow2.f32 %v2657_v52 }
 0x1ee   :  { %v3889_v45 = vpop.eup %3888  ;;  %v1891_v61 = vmul.f32 %v3887_v47, %v5289_v31  ;;  %3908 = vpow2.f32 %v2721_v1  ;;  %v2724_v31 = vmul.f32 -1.442695, %v5442_v44 }
 0x1ef   :  { %v3891_v10 = vpop.eup %3890  ;;  %v3049_v51 = vpack.c.bf16 %v1827_v26, %v1825_v3  ;;  %v1828_v11 = vmul.f32 %v3889_v45, %v5294_v38  ;;  %3910 = vpow2.f32 %v2658_v57 }
 0x1f0   :  { %v3893_v53 = vpop.eup %3892  ;;  %v3129_v60 = vpack.c.bf16 %v1891_v61, %v1889_v30  ;;  %v1892_v4 = vmul.f32 %v3891_v10, %v5305_v22  ;;  %3912 = vpow2.f32 %v2722_v23 }
 0x1f1   :  { %3313 = vst [vmem:[%s5508_s4 + $0x68] sm:$0xff] %v3049_v51   ;;  %v3209_v34 = vpack.c.bf16 %v1828_v11, %v1826_v0  ;;  %v3895_v41 = vpop.eup %3894  ;;  %3914 = vpow2.f32 %v2659_v16  ;;  %v1510_v22 = vadd.f32 1.0, %v3893_v53 }
 0x1f2   :  { %3329 = vst [vmem:[%s5508_s4 + $0xe8] sm:$0xff] %v3129_v60   ;;  %v3289_v38 = vpack.c.bf16 %v1892_v4, %v1890_v50  ;;  %v3897_v49 = vpop.eup %3896  ;;  %3916 = vpow2.f32 %v2723_v56  ;;  %v1829_v62 = vmul.f32 %v3895_v41, %v5309_v15 }
 0x1f3   :  { %3344 = vst [vmem:[%s5509_s5 + $0x68] sm:$0xff] %v3209_v34   ;;  %v3899_v59 = vpop.eup %3898  ;;  %3918 = vpow2.f32 %v2660_v40  ;;  %v1893_v26 = vmul.f32 %v3897_v49, %v5317_v58 }
 0x1f4   :  { %3360 = vst [vmem:[%s5509_s5 + $0xe8] sm:$0xff] %v3289_v38   ;;  %v3901_v27 = vpop.eup %3900  ;;  %v1831_v28 = vmul.f32 %v3899_v59, %v5341_v36  ;;  %3920 = vpow2.f32 %v2724_v31 }
 0x1f5   :  { %v3903_v12 = vpop.eup %3902  ;;  %3922 = vrcp.f32 %v1446_v8  ;;  %v1511_v54 = vadd.f32 1.0, %v3901_v27 }
 0x1f6   :  { %v3905_v13 = vpop.eup %3904  ;;  %3924 = vrcp.f32 %v1510_v22  ;;  %v3054_v63 = vpack.c.bf16 %v1831_v28, %v1829_v62  ;;  %v1448_v43 = vadd.f32 1.0, %v3903_v12 }
 0x1f7   :  { %v3907_v17 = vpop.eup %3906  ;;  %3926 = vrcp.f32 %v1511_v54  ;;  %v1512_v25 = vadd.f32 1.0, %v3905_v13 }
 0x1f8   :  { %v3909_v37 = vpop.eup %3908  ;;  %3314 = vst [vmem:[%s5508_s4 + $0x70] sm:$0xff] %v3054_v63   ;;  %3928 = vrcp.f32 %v1448_v43  ;;  %v1449_v15 = vadd.f32 1.0, %v3907_v17 }
 0x1f9   :  { %v3911_v7 = vpop.eup %3910  ;;  %3930 = vrcp.f32 %v1512_v25  ;;  %v1513_v36 = vadd.f32 1.0, %v3909_v37 }
 0x1fa   :  { %v3913_v32 = vpop.eup %3912  ;;  %3932 = vrcp.f32 %v1449_v15  ;;  %v1450_v6 = vadd.f32 1.0, %v3911_v7 }
 0x1fb   :  { %v3915_v9 = vpop.eup %3914  ;;  %3934 = vrcp.f32 %v1513_v36  ;;  %v1514_v39 = vadd.f32 1.0, %v3913_v32 }
 0x1fc   :  { %v3917_v42 = vpop.eup %3916  ;;  %3936 = vrcp.f32 %v1450_v6  ;;  %v1451_v52 = vadd.f32 1.0, %v3915_v9 }
 0x1fd   :  { %v3919_v33 = vpop.eup %3918  ;;  %3938 = vrcp.f32 %v1514_v39  ;;  %v1515_v1 = vadd.f32 1.0, %v3917_v42 }
 0x1fe   :  { %v3921_v57 = vpop.eup %3920  ;;  %3940 = vrcp.f32 %v1451_v52  ;;  %v1452_v2 = vadd.f32 1.0, %v3919_v33 }
 0x1ff   :  { %v3923_v23 = vpop.eup %3922  ;;  %3942 = vrcp.f32 %v1515_v1  ;;  %v1516_v16 = vadd.f32 1.0, %v3921_v57 }
 0x200   :  { %v3925_v56 = vpop.eup %3924  ;;  %3944 = vrcp.f32 %v1452_v2  ;;  %v1830_v61 = vmul.f32 %v3923_v23, %v5334_v20 }
 0x201   :  { %v3927_v47 = vpop.eup %3926  ;;  %3946 = vrcp.f32 %v1516_v16  ;;  %v1894_v0 = vmul.f32 %v3925_v56, %v5363_v48 }
 0x202   :  { %v3929_v3 = vpop.eup %3928  ;;  %v1895_v45 = vmul.f32 %v3927_v47, %v5383_v18 }
 0x203   :  { %v3931_v30 = vpop.eup %3930  ;;  %v1832_v40 = vmul.f32 %v3929_v3, %v5386_v5 }
 0x204   :  { %v3933_v10 = vpop.eup %3932  ;;  %v3134_v51 = vpack.c.bf16 %v1895_v45, %v1893_v26  ;;  %v1896_v11 = vmul.f32 %v3931_v30, %v5403_v29 }
 0x205   :  { %v3935_v53 = vpop.eup %3934  ;;  %v3214_v50 = vpack.c.bf16 %v1832_v40, %v1830_v61  ;;  %v1833_v5 = vmul.f32 %v3933_v10, %v5407_v14 }
 0x206   :  { %v3937_v60 = vpop.eup %3936  ;;  %3330 = vst [vmem:[%s5508_s4 + $0xf0] sm:$0xff] %v3134_v51   ;;  %v3294_v58 = vpack.c.bf16 %v1896_v11, %v1894_v0  ;;  %v1897_v34 = vmul.f32 %v3935_v53, %v5413_v55 }
 0x207   :  { %v3939_v18 = vpop.eup %3938  ;;  %3345 = vst [vmem:[%s5509_s5 + $0x70] sm:$0xff] %v3214_v50   ;;  %v1834_v38 = vmul.f32 %v3937_v60, %v5416_v21 }
 0x208   :  { %v3941_v20 = vpop.eup %3940  ;;  %3361 = vst [vmem:[%s5509_s5 + $0xf0] sm:$0xff] %v3294_v58   ;;  %v1898_v22 = vmul.f32 %v3939_v18, %v5419_v19 }
 0x209   :  { %v3943_v48 = vpop.eup %3942  ;;  %v1835_v29 = vmul.f32 %v3941_v20, %v5422_v35 }
 0x20a   :  { %v3945_v4 = vpop.eup %3944  ;;  %v1899_v31 = vmul.f32 %v3943_v48, %v5425_v24 }
 0x20b   :  { %v3947_v41 = vpop.eup %3946  ;;  %v3059_v8 = vpack.c.bf16 %v1835_v29, %v1833_v5  ;;  %v1836_v49 = vmul.f32 %v3945_v4, %v5432_v46 }
 0x20c   :  { %v3139_v59 = vpack.c.bf16 %v1899_v31, %v1897_v34  ;;  %v1900_v27 = vmul.f32 %v3947_v41, %v5442_v44 }
 0x20d   :  { %3315 = vst [vmem:[%s5508_s4 + $0x78] sm:$0xff] %v3059_v8   ;;  %v3219_v14 = vpack.c.bf16 %v1836_v49, %v1834_v38 }
 0x20e   :  { %3331 = vst [vmem:[%s5508_s4 + $0xf8] sm:$0xff] %v3139_v59   ;;  %v3299_v55 = vpack.c.bf16 %v1900_v27, %v1898_v22 }
 0x20f   :  { %3346 = vst [vmem:[%s5509_s5 + $0x78] sm:$0xff] %v3219_v14  }
 0x210   :  { %3362 = vst [vmem:[%s5509_s5 + $0xf8] sm:$0xff] %v3299_v55  }

// kernel: _lambda_.8
= control target key start
LH: loop header
LB: loop body
LE: loop exit
PB: predicated region body
PF: predicated region fallthrough
CT: control target
= control target key end

     0   :  { %s2678_s12 = smov 0   ;;  %s2680_s13 = smov 0   ;;  %s4504_s0 = inlined_call_operand.vmem [shape: bf16[2,16,16,128], index: 0, kind: input, shape index: {}]   ;;  %s4505_s1 = inlined_call_operand.vmem [shape: f32[27,27,128], index: 1, kind: input, shape index: {}]   ;;  %s4506_s2 = inlined_call_operand.vmem [shape: f32[1,128], index: 2, kind: input, shape index: {}]   ;;  %s4507_s3 = inlined_call_operand.vmem [shape: bf16[2,16,16,128], index: 3, kind: output, shape index: {}]  }
   0x1   :  { %s2682_s14 = smov 0  }
   0x2 LB: > { %s22_s15 = sadd.s32 1, %s2579_s13  ;;  %p2146_p0 = scmp.ge.s32.totalorder %s2583_s14, 1  ;;  %s2583_s14 = sphi %s2682_s14, %s13_s14   ;;  %s2579_s13 = sphi %s2680_s13, %s4919_s13   ;;  %s2575_s12 = sphi %s2678_s12, %s4918_s12  }
   0x3   : > { %p23_p1 = scmp.ge.s32.totalorder %s22_s15, 2  ;;  %p173_p2 = scmp.lt.s32.totalorder %s2583_s14, 3 }
   0x5   : > { %s4921_s15 = smov (%p23_p1, %s22_s15), 0  ;;  %p174_p3 = pnand %p2146_p0, %p173_p2 }
   0x6   : > { %v2701_v0 = vld [vmem:[%s4506_s2] ss:$0 sm:$0xff] (!%p174_p3)  ;;  %p210_p4 = scmp.lt.s32.totalorder (!%p174_p3), %s2575_s12, 1  ;;  %v2657_v1 = vmov (!%p174_p3), 0.0   ;;  %s2953_s25 = smov (!%p174_p3), 0  }
   0x7   : > { %177 = sbr.rel (%p174_p3) target bundleno = 393 (0x189), region = 32  ;;  %4642 = vst [vmem:[#allocation3_spill] sm:$0xff] (!%p174_p3), %v2701_v0  ;;  %233 = vst [vmem:[#allocation2] sm:$0xff] (!%p174_p3), %v2657_v1 }
   0x8   : > { %234 = vst [vmem:[#allocation2 + $0x8] sm:$0xff] (!%p174_p3), %v2657_v1  ;;  %235 = vst [vmem:[#allocation2 + $0x10] sm:$0xff] (!%p174_p3), %v2657_v1 }
   0x9   : > { %236 = vst [vmem:[#allocation2 + $0x18] sm:$0xff] (!%p174_p3), %v2657_v1  ;;  %237 = vst [vmem:[#allocation2 + $0x20] sm:$0xff] (!%p174_p3), %v2657_v1 }
   0xa   : > { %238 = vst [vmem:[#allocation2 + $0x28] sm:$0x3] (!%p174_p3), %v2657_v1  ;;  %239 = vst [vmem:[#allocation2 + $0x30] sm:$0xff] (!%p174_p3), %v2657_v1 }
   0xb   : > { %240 = vst [vmem:[#allocation2 + $0x38] sm:$0xff] (!%p174_p3), %v2657_v1  ;;  %241 = vst [vmem:[#allocation2 + $0x40] sm:$0xff] (!%p174_p3), %v2657_v1 }
   0xc   : > { %242 = vst [vmem:[#allocation2 + $0x48] sm:$0xff] (!%p174_p3), %v2657_v1  ;;  %243 = vst [vmem:[#allocation2 + $0x50] sm:$0xff] (!%p174_p3), %v2657_v1 }
   0xd   : > { %244 = vst [vmem:[#allocation2 + $0x58] sm:$0x3] (!%p174_p3), %v2657_v1  ;;  %245 = vst [vmem:[#allocation2 + $0x60] sm:$0xff] (!%p174_p3), %v2657_v1 }
   0xe   : > { %246 = vst [vmem:[#allocation2 + $0x68] sm:$0xff] %v2657_v1  ;;  %247 = vst [vmem:[#allocation2 + $0x70] sm:$0xff] %v2657_v1  ;;  %s4923_s12 = smov (!%p210_p4, %s2575_s12), 1 }
   0xf   : > { %248 = vst [vmem:[#allocation2 + $0x78] sm:$0xff] %v2657_v1  ;;  %249 = vst [vmem:[#allocation2 + $0x80] sm:$0xff] %v2657_v1  ;;  %s2174_s18 = sshll.u32 %s4923_s12, 7 }
  0x10   : > { %250 = vst [vmem:[#allocation2 + $0x88] sm:$0x3] %v2657_v1  ;;  %251 = vst [vmem:[#allocation2 + $0x90] sm:$0xff] %v2657_v1  ;;  %s2930_s21 = scalar_lea.vmem %s4504_s0, %s2174_s18  ;;  %s2935_s24 = scalar_lea.vmem %s4507_s3, %s2174_s18 }
  0x11   : > { %252 = vst [vmem:[#allocation2 + $0x98] sm:$0xff] %v2657_v1  ;;  %253 = vst [vmem:[#allocation2 + $0xa0] sm:$0xff] %v2657_v1  ;;  %v2195_v2 = vld [vmem:[%s2930_s21] sm:$0xff]   ;;  %v2298_v3 = vld [vmem:[%s2930_s21 + $0x8] sm:$0xff]  }
  0x12   : > { %254 = vst [vmem:[#allocation2 + $0xa8] sm:$0xff] %v2657_v1  ;;  %255 = vst [vmem:[#allocation2 + $0xb0] sm:$0xff] %v2657_v1  ;;  %v2299_v4 = vld [vmem:[%s2930_s21 + $0x10] sm:$0xff]   ;;  %v2196_v5 = vunpack.c.l.bf16 %v2195_v2  ;;  %v2197_v6 = vunpack.c.h.bf16 %v2195_v2  ;;  %v2200_v7 = vunpack.c.l.bf16 %v2298_v3  ;;  %v2201_v8 = vunpack.c.h.bf16 %v2298_v3  ;;  %v2300_v9 = vld [vmem:[%s2930_s21 + $0x18] sm:$0xff]  }
  0x13   : > { %256 = vst [vmem:[#allocation2 + $0xb8] sm:$0x3] %v2657_v1  ;;  %257 = vst [vmem:[#allocation2 + $0xc0] sm:$0xff] %v2657_v1  ;;  %v2301_v10 = vld [vmem:[%s2930_s21 + $0x20] sm:$0xff]   ;;  %v2302_v11 = vld [vmem:[%s2930_s21 + $0x28] sm:$0xff]   ;;  %v2204_v12 = vunpack.c.l.bf16 %v2299_v4  ;;  %v2205_v13 = vunpack.c.h.bf16 %v2299_v4  ;;  %v2208_v14 = vunpack.c.l.bf16 %v2300_v9  ;;  %v2209_v15 = vunpack.c.h.bf16 %v2300_v9 }
  0x14   : > { %258 = vst [vmem:[#allocation2 + $0xc8] sm:$0xff] %v2657_v1  ;;  %259 = vst [vmem:[#allocation2 + $0xd0] sm:$0xff] %v2657_v1  ;;  %v2303_v16 = vld [vmem:[%s2930_s21 + $0x30] sm:$0xff]   ;;  %v2304_v17 = vld [vmem:[%s2930_s21 + $0x38] sm:$0xff]   ;;  %v2212_v19 = vunpack.c.l.bf16 %v2301_v10  ;;  %v2213_v20 = vunpack.c.h.bf16 %v2301_v10  ;;  %v2216_v21 = vunpack.c.l.bf16 %v2302_v11  ;;  %v2217_v22 = vunpack.c.h.bf16 %v2302_v11 }
  0x15   : > { %260 = vst [vmem:[#allocation2 + $0xd8] sm:$0xff] %v2657_v1  ;;  %261 = vst [vmem:[#allocation2 + $0xe0] sm:$0xff] %v2657_v1  ;;  %v2305_v18 = vld [vmem:[%s2930_s21 + $0x40] sm:$0xff]   ;;  %v2306_v23 = vld [vmem:[%s2930_s21 + $0x48] sm:$0xff]   ;;  %v2220_v26 = vunpack.c.l.bf16 %v2303_v16  ;;  %v2221_v27 = vunpack.c.h.bf16 %v2303_v16  ;;  %v2224_v28 = vunpack.c.l.bf16 %v2304_v17  ;;  %v2225_v29 = vunpack.c.h.bf16 %v2304_v17 }
  0x16   : > { %262 = vst [vmem:[#allocation2 + $0xe8] sm:$0x3] %v2657_v1  ;;  %263 = vst [vmem:[#allocation2 + $0xf0] sm:$0xff] %v2657_v1  ;;  %v2307_v24 = vld [vmem:[%s2930_s21 + $0x50] sm:$0xff]   ;;  %v2308_v25 = vld [vmem:[%s2930_s21 + $0x58] sm:$0xff]   ;;  %v2228_v32 = vunpack.c.l.bf16 %v2305_v18  ;;  %v2229_v33 = vunpack.c.h.bf16 %v2305_v18  ;;  %v2232_v34 = vunpack.c.l.bf16 %v2306_v23  ;;  %v2233_v35 = vunpack.c.h.bf16 %v2306_v23 }
  0x17   : > { %264 = vst [vmem:[#allocation2 + $0xf8] sm:$0xff] %v2657_v1  ;;  %265 = vst [vmem:[#allocation2 + $0x100] sm:$0xff] %v2657_v1  ;;  %v2309_v30 = vld [vmem:[%s2930_s21 + $0x60] sm:$0xff]   ;;  %v2310_v31 = vld [vmem:[%s2930_s21 + $0x68] sm:$0xff]   ;;  %v2236_v38 = vunpack.c.l.bf16 %v2307_v24  ;;  %v2237_v39 = vunpack.c.h.bf16 %v2307_v24  ;;  %v2240_v40 = vunpack.c.l.bf16 %v2308_v25  ;;  %v2241_v41 = vunpack.c.h.bf16 %v2308_v25 }
  0x18   : > { %266 = vst [vmem:[#allocation2 + $0x108] sm:$0xff] %v2657_v1  ;;  %267 = vst [vmem:[#allocation2 + $0x110] sm:$0xff] %v2657_v1  ;;  %v2311_v36 = vld [vmem:[%s2930_s21 + $0x70] sm:$0xff]   ;;  %v2312_v37 = vld [vmem:[%s2930_s21 + $0x78] sm:$0xff]   ;;  %v2244_v42 = vunpack.c.l.bf16 %v2309_v30  ;;  %v2245_v43 = vunpack.c.h.bf16 %v2309_v30  ;;  %v2248_v44 = vunpack.c.l.bf16 %v2310_v31  ;;  %v2249_v45 = vunpack.c.h.bf16 %v2310_v31 }
  0x19   : > { %268 = vst [vmem:[#allocation2 + $0x118] sm:$0x3] %v2657_v1  ;;  %269 = vst [vmem:[#allocation2 + $0x120] sm:$0xff] %v2657_v1  ;;  %v2252_v46 = vunpack.c.l.bf16 %v2311_v36  ;;  %v2253_v47 = vunpack.c.h.bf16 %v2311_v36  ;;  %v2256_v48 = vunpack.c.l.bf16 %v2312_v37  ;;  %v2257_v49 = vunpack.c.h.bf16 %v2312_v37 }
  0x1a   : > { %270 = vst [vmem:[#allocation2 + $0x128] sm:$0xff] %v2657_v1  ;;  %271 = vst [vmem:[#allocation2 + $0x130] sm:$0xff] %v2657_v1 }
  0x1b   : > { %272 = vst [vmem:[#allocation2 + $0x138] sm:$0xff] %v2657_v1  ;;  %273 = vst [vmem:[#allocation2 + $0x140] sm:$0xff] %v2657_v1 }
  0x1c   : > { %274 = vst [vmem:[#allocation2 + $0x148] sm:$0x3] %v2657_v1  ;;  %275 = vst [vmem:[#allocation2 + $0x150] sm:$0xff] %v2657_v1 }
  0x1d   : > { %276 = vst [vmem:[#allocation2 + $0x158] sm:$0xff] %v2657_v1  ;;  %277 = vst [vmem:[#allocation2 + $0x160] sm:$0xff] %v2657_v1 }
  0x1e   : > { %278 = vst [vmem:[#allocation2 + $0x168] sm:$0xff] %v2657_v1  ;;  %279 = vst [vmem:[#allocation2 + $0x170] sm:$0xff] %v2657_v1 }
  0x1f   : > { %280 = vst [vmem:[#allocation2 + $0x178] sm:$0x3] %v2657_v1  ;;  %281 = vst [vmem:[#allocation2 + $0x180] sm:$0xff] %v2657_v1 }
  0x20   : > { %282 = vst [vmem:[#allocation2 + $0x188] sm:$0xff] %v2657_v1  ;;  %283 = vst [vmem:[#allocation2 + $0x190] sm:$0xff] %v2657_v1 }
  0x21   : > { %284 = vst [vmem:[#allocation2 + $0x198] sm:$0xff] %v2657_v1  ;;  %285 = vst [vmem:[#allocation2 + $0x1a0] sm:$0xff] %v2657_v1 }
  0x22   : > { %286 = vst [vmem:[#allocation2 + $0x1a8] sm:$0x3] %v2657_v1  ;;  %287 = vst [vmem:[#allocation2 + $0x1b0] sm:$0xff] %v2657_v1 }
  0x23   : > { %288 = vst [vmem:[#allocation2 + $0x1b8] sm:$0xff] %v2657_v1  ;;  %289 = vst [vmem:[#allocation2 + $0x1c0] sm:$0xff] %v2657_v1 }
  0x24   : > { %290 = vst [vmem:[#allocation2 + $0x1c8] sm:$0xff] %v2657_v1  ;;  %291 = vst [vmem:[#allocation2 + $0x1d0] sm:$0xff] %v2657_v1 }
  0x25   : > { %292 = vst [vmem:[#allocation2 + $0x1d8] sm:$0x3] %v2657_v1  ;;  %293 = vst [vmem:[#allocation2 + $0x1e0] sm:$0xff] %v2657_v1 }
  0x26   : > { %294 = vst [vmem:[#allocation2 + $0x1e8] sm:$0xff] %v2657_v1  ;;  %295 = vst [vmem:[#allocation2 + $0x1f0] sm:$0xff] %v2657_v1 }
  0x27   : > { %296 = vst [vmem:[#allocation2 + $0x1f8] sm:$0xff] %v2657_v1  ;;  %297 = vst [vmem:[#allocation2 + $0x200] sm:$0xff] %v2657_v1 }
  0x28   : > { %298 = vst [vmem:[#allocation2 + $0x208] sm:$0x3] %v2657_v1  ;;  %299 = vst [vmem:[#allocation2 + $0x210] sm:$0xff] %v2657_v1 }
  0x29   : > { %300 = vst [vmem:[#allocation2 + $0x218] sm:$0xff] %v2657_v1  ;;  %301 = vst [vmem:[#allocation2 + $0x220] sm:$0xff] %v2657_v1 }
  0x2a   : > { %302 = vst [vmem:[#allocation2 + $0x228] sm:$0xff] %v2657_v1  ;;  %303 = vst [vmem:[#allocation2 + $0x230] sm:$0xff] %v2657_v1 }
  0x2b   : > { %304 = vst [vmem:[#allocation2 + $0x238] sm:$0x3] %v2657_v1  ;;  %305 = vst [vmem:[#allocation2 + $0x240] sm:$0xff] %v2657_v1 }
  0x2c   : > { %306 = vst [vmem:[#allocation2 + $0x248] sm:$0xff] %v2657_v1  ;;  %307 = vst [vmem:[#allocation2 + $0x250] sm:$0xff] %v2657_v1 }
  0x2d   : > { %308 = vst [vmem:[#allocation2 + $0x258] sm:$0xff] %v2657_v1  ;;  %309 = vst [vmem:[#allocation2 + $0x260] sm:$0xff] %v2657_v1 }
  0x2e   : > { %310 = vst [vmem:[#allocation2 + $0x268] sm:$0x3] %v2657_v1  ;;  %312 = vst [vmem:[#allocation2 + $0x570] sm:$0xff] %v2657_v1 }
  0x2f   : > { %313 = vst [vmem:[#allocation2 + $0x578] sm:$0xff] %v2657_v1  ;;  %314 = vst [vmem:[#allocation2 + $0x580] sm:$0xff] %v2657_v1 }
  0x30   : > { %315 = vst [vmem:[#allocation2 + $0x588] sm:$0xff] %v2657_v1  ;;  %316 = vst [vmem:[#allocation2 + $0x590] sm:$0xff] %v2657_v1 }
  0x31   : > { %317 = vst [vmem:[#allocation2 + $0x598] sm:$0x3] %v2657_v1  ;;  %318 = vst [vmem:[#allocation2 + $0x5a0] sm:$0xff] %v2657_v1 }
  0x32   : > { %319 = vst [vmem:[#allocation2 + $0x5a8] sm:$0xff] %v2657_v1  ;;  %320 = vst [vmem:[#allocation2 + $0x5b0] sm:$0xff] %v2657_v1 }
  0x33   : > { %321 = vst [vmem:[#allocation2 + $0x5b8] sm:$0xff] %v2657_v1  ;;  %322 = vst [vmem:[#allocation2 + $0x5c0] sm:$0xff] %v2657_v1 }
  0x34   : > { %323 = vst [vmem:[#allocation2 + $0x5c8] sm:$0x3] %v2657_v1  ;;  %324 = vst [vmem:[#allocation2 + $0x5d0] sm:$0xff] %v2657_v1 }
  0x35   : > { %325 = vst [vmem:[#allocation2 + $0x5d8] sm:$0xff] %v2657_v1  ;;  %326 = vst [vmem:[#allocation2 + $0x5e0] sm:$0xff] %v2657_v1 }
  0x36   : > { %327 = vst [vmem:[#allocation2 + $0x5e8] sm:$0xff] %v2657_v1  ;;  %328 = vst [vmem:[#allocation2 + $0x5f0] sm:$0xff] %v2657_v1 }
  0x37   : > { %329 = vst [vmem:[#allocation2 + $0x5f8] sm:$0x3] %v2657_v1  ;;  %330 = vst [vmem:[#allocation2 + $0x600] sm:$0xff] %v2657_v1 }
  0x38   : > { %331 = vst [vmem:[#allocation2 + $0x608] sm:$0xff] %v2657_v1  ;;  %332 = vst [vmem:[#allocation2 + $0x610] sm:$0xff] %v2657_v1 }
  0x39   : > { %333 = vst [vmem:[#allocation2 + $0x618] sm:$0xff] %v2657_v1  ;;  %334 = vst [vmem:[#allocation2 + $0x620] sm:$0xff] %v2657_v1 }
  0x3a   : > { %335 = vst [vmem:[#allocation2 + $0x628] sm:$0x3] %v2657_v1  ;;  %336 = vst [vmem:[#allocation2 + $0x630] sm:$0xff] %v2657_v1 }
  0x3b   : > { %337 = vst [vmem:[#allocation2 + $0x638] sm:$0xff] %v2657_v1  ;;  %338 = vst [vmem:[#allocation2 + $0x640] sm:$0xff] %v2657_v1 }
  0x3c   : > { %339 = vst [vmem:[#allocation2 + $0x648] sm:$0xff] %v2657_v1  ;;  %340 = vst [vmem:[#allocation2 + $0x650] sm:$0xff] %v2657_v1 }
  0x3d   : > { %341 = vst [vmem:[#allocation2 + $0x658] sm:$0x3] %v2657_v1  ;;  %342 = vst [vmem:[#allocation2 + $0x660] sm:$0xff] %v2657_v1 }
  0x3e   : > { %343 = vst [vmem:[#allocation2 + $0x668] sm:$0xff] %v2657_v1  ;;  %344 = vst [vmem:[#allocation2 + $0x670] sm:$0xff] %v2657_v1 }
  0x3f   : > { %345 = vst [vmem:[#allocation2 + $0x678] sm:$0xff] %v2657_v1  ;;  %346 = vst [vmem:[#allocation2 + $0x680] sm:$0xff] %v2657_v1 }
  0x40   : > { %347 = vst [vmem:[#allocation2 + $0x688] sm:$0x3] %v2657_v1  ;;  %348 = vst [vmem:[#allocation2 + $0x690] sm:$0xff] %v2657_v1 }
  0x41   : > { %349 = vst [vmem:[#allocation2 + $0x698] sm:$0xff] %v2657_v1  ;;  %350 = vst [vmem:[#allocation2 + $0x6a0] sm:$0xff] %v2657_v1 }
  0x42   : > { %351 = vst [vmem:[#allocation2 + $0x6a8] sm:$0xff] %v2657_v1  ;;  %352 = vst [vmem:[#allocation2 + $0x6b0] sm:$0xff] %v2657_v1 }
  0x43   : > { %353 = vst [vmem:[#allocation2 + $0x6b8] sm:$0x3] %v2657_v1  ;;  %354 = vst [vmem:[#allocation2 + $0x6c0] sm:$0xff] %v2657_v1 }
  0x44   : > { %355 = vst [vmem:[#allocation2 + $0x6c8] sm:$0xff] %v2657_v1  ;;  %356 = vst [vmem:[#allocation2 + $0x6d0] sm:$0xff] %v2657_v1 }
  0x45   : > { %357 = vst [vmem:[#allocation2 + $0x6d8] sm:$0xff] %v2657_v1  ;;  %358 = vst [vmem:[#allocation2 + $0x6e0] sm:$0xff] %v2657_v1 }
  0x46   : > { %359 = vst [vmem:[#allocation2 + $0x6e8] sm:$0x3] %v2657_v1  ;;  %360 = vst [vmem:[#allocation2 + $0x6f0] sm:$0xff] %v2657_v1 }
  0x47   : > { %361 = vst [vmem:[#allocation2 + $0x6f8] sm:$0xff] %v2657_v1  ;;  %362 = vst [vmem:[#allocation2 + $0x700] sm:$0xff] %v2657_v1 }
  0x48   : > { %363 = vst [vmem:[#allocation2 + $0x708] sm:$0xff] %v2657_v1  ;;  %364 = vst [vmem:[#allocation2 + $0x710] sm:$0xff] %v2657_v1 }
  0x49   : > { %365 = vst [vmem:[#allocation2 + $0x718] sm:$0x3] %v2657_v1  ;;  %366 = vst [vmem:[#allocation2 + $0x720] sm:$0xff] %v2657_v1 }
  0x4a   : > { %367 = vst [vmem:[#allocation2 + $0x728] sm:$0xff] %v2657_v1  ;;  %368 = vst [vmem:[#allocation2 + $0x730] sm:$0xff] %v2657_v1 }
  0x4b   : > { %369 = vst [vmem:[#allocation2 + $0x738] sm:$0xff] %v2657_v1  ;;  %370 = vst [vmem:[#allocation2 + $0x740] sm:$0xff] %v2657_v1 }
  0x4c   : > { %371 = vst [vmem:[#allocation2 + $0x748] sm:$0x3] %v2657_v1  ;;  %372 = vst [vmem:[#allocation2 + $0x750] sm:$0xff] %v2657_v1 }
  0x4d   : > { %373 = vst [vmem:[#allocation2 + $0x758] sm:$0xff] %v2657_v1  ;;  %374 = vst [vmem:[#allocation2 + $0x760] sm:$0xff] %v2657_v1 }
  0x4e   : > { %375 = vst [vmem:[#allocation2 + $0x768] sm:$0xff] %v2657_v1  ;;  %376 = vst [vmem:[#allocation2 + $0x770] sm:$0xff] %v2657_v1 }
  0x4f   : > { %377 = vst [vmem:[#allocation2 + $0x778] sm:$0x3] %v2657_v1  ;;  %378 = vst [vmem:[#allocation2 + $0x780] sm:$0xff] %v2657_v1 }
  0x50   : > { %379 = vst [vmem:[#allocation2 + $0x788] sm:$0xff] %v2657_v1  ;;  %380 = vst [vmem:[#allocation2 + $0x790] sm:$0xff] %v2657_v1 }
  0x51   : > { %381 = vst [vmem:[#allocation2 + $0x798] sm:$0xff] %v2657_v1  ;;  %382 = vst [vmem:[#allocation2 + $0x7a0] sm:$0xff] %v2657_v1 }
  0x52   : > { %383 = vst [vmem:[#allocation2 + $0x7a8] sm:$0x3] %v2657_v1  ;;  %384 = vst [vmem:[#allocation2 + $0x7b0] sm:$0xff] %v2657_v1 }
  0x53   : > { %385 = vst [vmem:[#allocation2 + $0x7b8] sm:$0xff] %v2657_v1  ;;  %386 = vst [vmem:[#allocation2 + $0x7c0] sm:$0xff] %v2657_v1 }
  0x54   : > { %387 = vst [vmem:[#allocation2 + $0x7c8] sm:$0xff] %v2657_v1  ;;  %388 = vst [vmem:[#allocation2 + $0x7d0] sm:$0xff] %v2657_v1 }
  0x55   : > { %389 = vst [vmem:[#allocation2 + $0x7d8] sm:$0x3] %v2657_v1  ;;  %391 = vst [vmem:[#allocation2 + $0x270] sm:$0xff] %v2657_v1 }
  0x56   : > { %392 = vst [vmem:[#allocation2 + $0x278] sm:$0x1f] %v2657_v1  ;;  %393 = vst [vmem:[#allocation2 + $0x2a0] sm:$0xff] %v2657_v1 }
  0x57   : > { %394 = vst [vmem:[#allocation2 + $0x2a8] sm:$0x1f] %v2657_v1  ;;  %395 = vst [vmem:[#allocation2 + $0x2d0] sm:$0xff] %v2657_v1 }
  0x58   : > { %396 = vst [vmem:[#allocation2 + $0x2d8] sm:$0x1f] %v2657_v1  ;;  %397 = vst [vmem:[#allocation2 + $0x300] sm:$0xff] %v2657_v1 }
  0x59   : > { %398 = vst [vmem:[#allocation2 + $0x308] sm:$0x1f] %v2657_v1  ;;  %399 = vst [vmem:[#allocation2 + $0x330] sm:$0xff] %v2657_v1 }
  0x5a   : > { %400 = vst [vmem:[#allocation2 + $0x338] sm:$0x1f] %v2657_v1  ;;  %401 = vst [vmem:[#allocation2 + $0x360] sm:$0xff] %v2657_v1 }
  0x5b   : > { %402 = vst [vmem:[#allocation2 + $0x368] sm:$0x1f] %v2657_v1  ;;  %403 = vst [vmem:[#allocation2 + $0x390] sm:$0xff] %v2657_v1 }
  0x5c   : > { %404 = vst [vmem:[#allocation2 + $0x398] sm:$0x1f] %v2657_v1  ;;  %405 = vst [vmem:[#allocation2 + $0x3c0] sm:$0xff] %v2657_v1 }
  0x5d   : > { %406 = vst [vmem:[#allocation2 + $0x3c8] sm:$0x1f] %v2657_v1  ;;  %407 = vst [vmem:[#allocation2 + $0x3f0] sm:$0xff] %v2657_v1 }
  0x5e   : > { %408 = vst [vmem:[#allocation2 + $0x3f8] sm:$0x1f] %v2657_v1  ;;  %409 = vst [vmem:[#allocation2 + $0x420] sm:$0xff] %v2657_v1 }
  0x5f   : > { %410 = vst [vmem:[#allocation2 + $0x428] sm:$0x1f] %v2657_v1  ;;  %411 = vst [vmem:[#allocation2 + $0x450] sm:$0xff] %v2657_v1 }
  0x60   : > { %412 = vst [vmem:[#allocation2 + $0x458] sm:$0x1f] %v2657_v1  ;;  %413 = vst [vmem:[#allocation2 + $0x480] sm:$0xff] %v2657_v1 }
  0x61   : > { %414 = vst [vmem:[#allocation2 + $0x488] sm:$0x1f] %v2657_v1  ;;  %415 = vst [vmem:[#allocation2 + $0x4b0] sm:$0xff] %v2657_v1 }
  0x62   : > { %416 = vst [vmem:[#allocation2 + $0x4b8] sm:$0x1f] %v2657_v1  ;;  %417 = vst [vmem:[#allocation2 + $0x4e0] sm:$0xff] %v2657_v1 }
  0x63   : > { %418 = vst [vmem:[#allocation2 + $0x4e8] sm:$0x1f] %v2657_v1  ;;  %419 = vst [vmem:[#allocation2 + $0x510] sm:$0xff] %v2657_v1 }
  0x64   : > { %420 = vst [vmem:[#allocation2 + $0x518] sm:$0x1f] %v2657_v1  ;;  %421 = vst [vmem:[#allocation2 + $0x540] sm:$0xff] %v2657_v1 }
  0x65   : > { %422 = vst [vmem:[#allocation2 + $0x548] sm:$0x1f] %v2657_v1  ;;  %423 = vst [vmem:[#allocation2 + $0x28d] sm:$0xff] %v2657_v1 }
  0x66   : > { %424 = vst [vmem:[#allocation2 + $0x295] sm:$0x1f] %v2657_v1  ;;  %425 = vst [vmem:[#allocation2 + $0x2bd] sm:$0xff] %v2657_v1 }
  0x67   : > { %426 = vst [vmem:[#allocation2 + $0x2c5] sm:$0x1f] %v2657_v1  ;;  %427 = vst [vmem:[#allocation2 + $0x2ed] sm:$0xff] %v2657_v1 }
  0x68   : > { %428 = vst [vmem:[#allocation2 + $0x2f5] sm:$0x1f] %v2657_v1  ;;  %429 = vst [vmem:[#allocation2 + $0x31d] sm:$0xff] %v2657_v1 }
  0x69   : > { %430 = vst [vmem:[#allocation2 + $0x325] sm:$0x1f] %v2657_v1  ;;  %431 = vst [vmem:[#allocation2 + $0x34d] sm:$0xff] %v2657_v1 }
  0x6a   : > { %432 = vst [vmem:[#allocation2 + $0x355] sm:$0x1f] %v2657_v1  ;;  %433 = vst [vmem:[#allocation2 + $0x37d] sm:$0xff] %v2657_v1 }
  0x6b   : > { %434 = vst [vmem:[#allocation2 + $0x385] sm:$0x1f] %v2657_v1  ;;  %435 = vst [vmem:[#allocation2 + $0x3ad] sm:$0xff] %v2657_v1 }
  0x6c   : > { %436 = vst [vmem:[#allocation2 + $0x3b5] sm:$0x1f] %v2657_v1  ;;  %437 = vst [vmem:[#allocation2 + $0x3dd] sm:$0xff] %v2657_v1 }
  0x6d   : > { %438 = vst [vmem:[#allocation2 + $0x3e5] sm:$0x1f] %v2657_v1  ;;  %439 = vst [vmem:[#allocation2 + $0x40d] sm:$0xff] %v2657_v1 }
  0x6e   : > { %440 = vst [vmem:[#allocation2 + $0x415] sm:$0x1f] %v2657_v1  ;;  %441 = vst [vmem:[#allocation2 + $0x43d] sm:$0xff] %v2657_v1 }
  0x6f   : > { %442 = vst [vmem:[#allocation2 + $0x445] sm:$0x1f] %v2657_v1  ;;  %443 = vst [vmem:[#allocation2 + $0x46d] sm:$0xff] %v2657_v1 }
  0x70   : > { %444 = vst [vmem:[#allocation2 + $0x475] sm:$0x1f] %v2657_v1  ;;  %445 = vst [vmem:[#allocation2 + $0x49d] sm:$0xff] %v2657_v1 }
  0x71   : > { %446 = vst [vmem:[#allocation2 + $0x4a5] sm:$0x1f] %v2657_v1  ;;  %447 = vst [vmem:[#allocation2 + $0x4cd] sm:$0xff] %v2657_v1 }
  0x72   : > { %448 = vst [vmem:[#allocation2 + $0x4d5] sm:$0x1f] %v2657_v1  ;;  %449 = vst [vmem:[#allocation2 + $0x4fd] sm:$0xff] %v2657_v1 }
  0x73   : > { %450 = vst [vmem:[#allocation2 + $0x505] sm:$0x1f] %v2657_v1  ;;  %451 = vst [vmem:[#allocation2 + $0x52d] sm:$0xff] %v2657_v1 }
  0x74   : > { %452 = vst [vmem:[#allocation2 + $0x535] sm:$0x1f] %v2657_v1  ;;  %453 = vst [vmem:[#allocation2 + $0x55d] sm:$0xff] %v2657_v1 }
  0x75   : > { %454 = vst [vmem:[#allocation2 + $0x565] sm:$0x1f] %v2657_v1  ;;  %519 = vst [vmem:[#allocation2 + $0x27d] sm:$0xff] %v2196_v5 }
  0x76   : > { %520 = vst [vmem:[#allocation2 + $0x285] sm:$0xff] %v2197_v6  ;;  %521 = vst [vmem:[#allocation2 + $0x2ad] sm:$0xff] %v2200_v7 }
  0x77   : > { %522 = vst [vmem:[#allocation2 + $0x2b5] sm:$0xff] %v2201_v8  ;;  %523 = vst [vmem:[#allocation2 + $0x2dd] sm:$0xff] %v2204_v12 }
  0x78   : > { %524 = vst [vmem:[#allocation2 + $0x2e5] sm:$0xff] %v2205_v13  ;;  %525 = vst [vmem:[#allocation2 + $0x30d] sm:$0xff] %v2208_v14 }
  0x79   : > { %526 = vst [vmem:[#allocation2 + $0x315] sm:$0xff] %v2209_v15  ;;  %527 = vst [vmem:[#allocation2 + $0x33d] sm:$0xff] %v2212_v19 }
  0x7a   : > { %528 = vst [vmem:[#allocation2 + $0x345] sm:$0xff] %v2213_v20  ;;  %529 = vst [vmem:[#allocation2 + $0x36d] sm:$0xff] %v2216_v21 }
  0x7b   : > { %530 = vst [vmem:[#allocation2 + $0x375] sm:$0xff] %v2217_v22  ;;  %531 = vst [vmem:[#allocation2 + $0x39d] sm:$0xff] %v2220_v26 }
  0x7c   : > { %532 = vst [vmem:[#allocation2 + $0x3a5] sm:$0xff] %v2221_v27  ;;  %533 = vst [vmem:[#allocation2 + $0x3cd] sm:$0xff] %v2224_v28 }
  0x7d   : > { %534 = vst [vmem:[#allocation2 + $0x3d5] sm:$0xff] %v2225_v29  ;;  %535 = vst [vmem:[#allocation2 + $0x3fd] sm:$0xff] %v2228_v32 }
  0x7e   : > { %536 = vst [vmem:[#allocation2 + $0x405] sm:$0xff] %v2229_v33  ;;  %537 = vst [vmem:[#allocation2 + $0x42d] sm:$0xff] %v2232_v34 }
  0x7f   : > { %538 = vst [vmem:[#allocation2 + $0x435] sm:$0xff] %v2233_v35  ;;  %539 = vst [vmem:[#allocation2 + $0x45d] sm:$0xff] %v2236_v38 }
  0x80   : > { %540 = vst [vmem:[#allocation2 + $0x465] sm:$0xff] %v2237_v39  ;;  %541 = vst [vmem:[#allocation2 + $0x48d] sm:$0xff] %v2240_v40 }
  0x81   : > { %542 = vst [vmem:[#allocation2 + $0x495] sm:$0xff] %v2241_v41  ;;  %543 = vst [vmem:[#allocation2 + $0x4bd] sm:$0xff] %v2244_v42 }
  0x82   : > { %544 = vst [vmem:[#allocation2 + $0x4c5] sm:$0xff] %v2245_v43  ;;  %545 = vst [vmem:[#allocation2 + $0x4ed] sm:$0xff] %v2248_v44 }
  0x83   : > { %546 = vst [vmem:[#allocation2 + $0x4f5] sm:$0xff] %v2249_v45  ;;  %547 = vst [vmem:[#allocation2 + $0x51d] sm:$0xff] %v2252_v46 }
  0x84   : > { %548 = vst [vmem:[#allocation2 + $0x525] sm:$0xff] %v2253_v47  ;;  %549 = vst [vmem:[#allocation2 + $0x54d] sm:$0xff] %v2256_v48 }
  0x85   : > { %550 = vst [vmem:[#allocation2 + $0x555] sm:$0xff] %v2257_v49 }
  0x86 LB: >> { %s2151_s26 = sshll.u32 %s2587_s25, 3  ;;  %v2959_v50 = vmov 0.0   ;;  %v2961_v51 = vmov 0.0   ;;  %v2963_v52 = vmov 0.0   ;;  %v2965_v53 = vmov 0.0   ;;  %s2991_s27 = smov 0   ;;  %s2587_s25 = sphi %s2953_s25, %s557_s25  }
  0x87   : >> { %v2967_v54 = vmov 0.0   ;;  %v2969_v55 = vmov 0.0   ;;  %v2971_v56 = vmov 0.0   ;;  %v2973_v57 = vmov 0.0  }
  0x88   : >> { %v2975_v58 = vmov 0.0   ;;  %v2977_v59 = vmov 0.0   ;;  %v2979_v60 = vmov 0.0   ;;  %v2981_v61 = vmov 0.0  }
  0x89   : >> { %v2983_v62 = vmov 0.0   ;;  %v2985_v63 = vmov 0.0   ;;  %v2987_v1 = vmov 0.0   ;;  %v2989_v2 = vmov 0.0  }
  0x8a LB: >>> { %s587_s28 = sadd.s32 %s2655_s27, %s2151_s26  ;;  %s2152_s29 = sshll.u32 %s2655_s27, 5  ;;  %v606_v3 = vlaneseq  ;;  %s2655_s27 = sphi %s2991_s27, %s564_s27   ;;  %v2651_v2 = vphi %v2989_v2, %v4916_v2   ;;  %v2647_v1 = vphi %v2987_v1, %v4915_v1   ;;  %v2643_v63 = vphi %v2985_v63, %v4914_v63   ;;  %v2639_v62 = vphi %v2983_v62, %v4913_v62   ;;  %v2635_v61 = vphi %v2981_v61, %v4912_v61   ;;  %v2631_v60 = vphi %v2979_v60, %v4911_v60   ;;  %v2627_v59 = vphi %v2977_v59, %v4910_v59   ;;  %v2623_v58 = vphi %v2975_v58, %v4909_v58   ;;  %v2619_v57 = vphi %v2973_v57, %v4908_v57   ;;  %v2615_v56 = vphi %v2971_v56, %v4907_v56   ;;  %v2611_v55 = vphi %v2969_v55, %v4906_v55   ;;  %v2607_v54 = vphi %v2967_v54, %v4905_v54   ;;  %v2603_v53 = vphi %v2965_v53, %v4904_v53   ;;  %v2599_v52 = vphi %v2963_v52, %v4903_v52   ;;  %v2595_v51 = vphi %v2961_v51, %v4902_v51   ;;  %v2591_v50 = vphi %v2959_v50, %v4901_v50  }
  0x8b   : >>> { %s588_s30 = smul.u32 48, %s587_s28  ;;  %s3045_s6 = scalar_lea.vmem %s4505_s1, %s2152_s29 }
  0x8c   : >>> { %v607_v4 = vshrl.u32 %v606_v3, 7  ;;  %v3048_v5 = vld [vmem:[%s3045_s6] sm:$0xff]  ;;  %s564_s27 = sadd.s32 1, %s2655_s27  }
  0x8d   : >>> { %s3050_s7 = scalar_lea.vmem [#allocation2], %s588_s30  ;;  %p4424_p5 = scmp.ge.s32.totalorder %s564_s27, 27  }
  0x8e   : >>> { %v590_v6 = vld [vmem:[%s3050_s7] sm:$0xff]  ;;  %v3053_v7 = vsub.s32 0, %v607_v4  ;;  %v3055_v8 = vsub.s32 1, %v607_v4  ;;  %v3057_v9 = vsub.s32 2, %v607_v4  ;;  %v3060_v10 = vld [vmem:[%s3050_s7 + $0x8] sm:$0xff]  ;;  %v592_v11 = vld [vmem:[%s3050_s7 + $0x30] sm:$0xff] }
  0x8f   : >>> { %v3064_v12 = vld [vmem:[%s3050_s7 + $0x38] sm:$0xff]  ;;  %v3066_v13 = vsub.s32 3, %v607_v4  ;;  %v3068_v14 = vsub.s32 4, %v607_v4  ;;  %v3070_v15 = vsub.s32 5, %v607_v4  ;;  %v594_v16 = vld [vmem:[%s3050_s7 + $0x60] sm:$0xff]  ;;  %v3074_v17 = vld [vmem:[%s3050_s7 + $0x68] sm:$0xff] }
  0x90   : >>> { %4643 = vst [vmem:[#allocation4_spill] sm:$0xff] %v3053_v7  ;;  %4644 = vst [vmem:[#allocation5_spill] sm:$0xff] %v3055_v8  ;;  %v596_v18 = vld [vmem:[%s3050_s7 + $0x90] sm:$0xff]  ;;  %v609_v19 = vrot.slane %v3048_v5, %v3053_v7  ;;  %v3080_v20 = vld [vmem:[%s3050_s7 + $0x98] sm:$0xff]  ;;  %v3088_v23 = vrot.slane %v3048_v5, %v3055_v8  ;;  %v3092_v24 = vrot.slane %v3048_v5, %v3057_v9  ;;  %v3098_v26 = vsub.s32 6, %v607_v4  ;;  %s2193_s9 = sshll.u32 (%p4424_p5), %s2587_s25, 6 }
  0x91   : >>> { %4645 = vst [vmem:[#allocation6_spill] sm:$0xff] %v3057_v9  ;;  %4646 = vst [vmem:[#allocation7_spill] sm:$0xff] %v3066_v13  ;;  %v598_v21 = vld [vmem:[%s3050_s7 + $0xc0] sm:$0xff]  ;;  %v3084_v22 = vld [vmem:[%s3050_s7 + $0xc8] sm:$0xff]  ;;  %v3096_v25 = vrot.slane %v3048_v5, %v3066_v13  ;;  %v3107_v31 = vrot.slane %v3048_v5, %v3068_v14  ;;  %v3111_v32 = vrot.slane %v3048_v5, %v3070_v15  ;;  %v3113_v33 = vsub.s32 7, %v607_v4  ;;  %s4474_s10 = scalar_lea.vmem (%p4424_p5), %s2935_s24, %s2193_s9  ;;  %s557_s25 = sadd.s32 (%p4424_p5), 1, %s2587_s25  }
  0x92   : >>> { %4647 = vst [vmem:[#allocation8_spill] sm:$0xff] %v3068_v14  ;;  %4648 = vst [vmem:[#allocation9_spill] sm:$0xff] %v3070_v15  ;;  %v600_v27 = vld [vmem:[%s3050_s7 + $0xf0] sm:$0xff]  ;;  %v3102_v28 = vld [vmem:[%s3050_s7 + $0xf8] sm:$0xff]  ;;  %v610_v30 = vmul.f32 %v609_v19, %v590_v6  ;;  %v611_v37 = vmul.f32 %v609_v19, %v3060_v10  ;;  %v612_v38 = vmul.f32 %v609_v19, %v592_v11  ;;  %p554_p6 = scmp.ge.s32.totalorder (%p4424_p5), %s557_s25, 2  }
  0x93   : >>> { %4649 = vst [vmem:[#allocation10_spill] sm:$0xff] %v3098_v26  ;;  %4650 = vst [vmem:[#allocation11_spill] sm:$0xff] %v3102_v28  ;;  %v602_v29 = vld [vmem:[%s3050_s7 + $0x120] sm:$0xff]  ;;  %v3116_v34 = vld [vmem:[%s3050_s7 + $0x128] sm:$0xff]  ;;  %v613_v39 = vmul.f32 %v609_v19, %v3064_v12  ;;  %v614_v40 = vmul.f32 %v609_v19, %v594_v16  ;;  %v615_v41 = vmul.f32 %v609_v19, %v3074_v17 }
  0x94   : >>> { %4651 = vst [vmem:[#allocation12_spill] sm:$0xff] %v3113_v33  ;;  %4652 = vst [vmem:[#allocation13_spill] sm:$0xff] %v3116_v34  ;;  %v604_v35 = vld [vmem:[%s3050_s7 + $0x150] sm:$0xff]  ;;  %v3120_v36 = vld [vmem:[%s3050_s7 + $0x158] sm:$0xff]  ;;  %v616_v42 = vmul.f32 %v609_v19, %v596_v18  ;;  %v617_v43 = vmul.f32 %v609_v19, %v3080_v20  ;;  %v618_v44 = vmul.f32 %v609_v19, %v598_v21 }
  0x95   : >>> { %4653 = vst [vmem:[#allocation14_spill] sm:$0xff] %v3120_v36  ;;  %v619_v45 = vmul.f32 %v609_v19, %v3084_v22  ;;  %v620_v46 = vmul.f32 %v609_v19, %v600_v27  ;;  %v621_v47 = vmul.f32 %v609_v19, %v3102_v28  ;;  %v622_v48 = vmul.f32 %v609_v19, %v602_v29  ;;  %v642_v11 = vld [vmem:[%s3050_s7 + $0x1] sm:$0xff]  ;;  %v3134_v0 = vld [vmem:[%s3050_s7 + $0x9] sm:$0xff]  ;;  %v644_v29 = vld [vmem:[%s3050_s7 + $0x31] sm:$0xff] }
  0x96   : >>> { %v623_v49 = vmul.f32 %v609_v19, %v3116_v34  ;;  %v624_v3 = vmul.f32 %v609_v19, %v604_v35  ;;  %v625_v4 = vmul.f32 %v609_v19, %v3120_v36  ;;  %v626_v6 = vadd.f32 %v2651_v2, %v610_v30  ;;  %4654 = vst [vmem:[#allocation15_spill] sm:$0xff] %v3134_v0  ;;  %v3138_v34 = vld [vmem:[%s3050_s7 + $0x39] sm:$0xff]  ;;  %v648_v2 = vld [vmem:[%s3050_s7 + $0x91] sm:$0xff] }
  0x97   : >>> { %v627_v16 = vadd.f32 %v2647_v1, %v611_v37  ;;  %v628_v18 = vadd.f32 %v2643_v63, %v612_v38  ;;  %v629_v21 = vadd.f32 %v2639_v62, %v613_v39  ;;  %v630_v27 = vadd.f32 %v2635_v61, %v614_v40  ;;  %4655 = vst [vmem:[#allocation16_spill] sm:$0xff] %v3138_v34  ;;  %v646_v63 = vld [vmem:[%s3050_s7 + $0x61] sm:$0xff]  ;;  %v3146_v61 = vld [vmem:[%s3050_s7 + $0x69] sm:$0xff] }
  0x98   : >>> { %v631_v35 = vadd.f32 %v2631_v60, %v615_v41  ;;  %v632_v19 = vadd.f32 %v2627_v59, %v616_v42  ;;  %v633_v1 = vadd.f32 %v2623_v58, %v617_v43  ;;  %v634_v62 = vadd.f32 %v2619_v57, %v618_v44  ;;  %4656 = vst [vmem:[#allocation17_spill] sm:$0xff] %v3146_v61  ;;  %v3154_v58 = vld [vmem:[%s3050_s7 + $0x99] sm:$0xff]  ;;  %v650_v38 = vld [vmem:[%s3050_s7 + $0xc1] sm:$0xff]  ;;  %v3158_v57 = vld [vmem:[%s3050_s7 + $0xc9] sm:$0xff] }
  0x99   : >>> { %v635_v30 = vadd.f32 %v2615_v56, %v619_v45  ;;  %v636_v60 = vadd.f32 %v2611_v55, %v620_v46  ;;  %v637_v59 = vadd.f32 %v2607_v54, %v621_v47  ;;  %v638_v37 = vadd.f32 %v2603_v53, %v622_v48  ;;  %4657 = vst [vmem:[#allocation18_spill] sm:$0xff] %v3154_v58  ;;  %v652_v42 = vld [vmem:[%s3050_s7 + $0xf1] sm:$0xff]  ;;  %v3165_v56 = vld [vmem:[%s3050_s7 + $0xf9] sm:$0xff]  ;;  %v654_v43 = vld [vmem:[%s3050_s7 + $0x121] sm:$0xff] }
  0x9a   : >>> { %4658 = vst [vmem:[#allocation19_spill] sm:$0xff] %v3158_v57  ;;  %v639_v39 = vadd.f32 %v2599_v52, %v623_v49  ;;  %v640_v40 = vadd.f32 %v2595_v51, %v624_v3  ;;  %v641_v41 = vadd.f32 %v2591_v50, %v625_v4  ;;  %4659 = vst [vmem:[#allocation20_spill] sm:$0xff] %v3165_v56  ;;  %v3170_v54 = vld [vmem:[%s3050_s7 + $0x129] sm:$0xff]  ;;  %v656_v53 = vld [vmem:[%s3050_s7 + $0x151] sm:$0xff] }
  0x9b   : >>> { %v662_v55 = vmul.f32 %v3088_v23, %v642_v11  ;;  %4660 = vst [vmem:[#allocation21_spill] sm:$0xff] %v3170_v54  ;;  %v3174_v44 = vld [vmem:[%s3050_s7 + $0x159] sm:$0xff]  ;;  %v663_v45 = vmul.f32 %v3088_v23, %v3134_v0  ;;  %v664_v52 = vmul.f32 %v3088_v23, %v644_v29  ;;  %v665_v50 = vmul.f32 %v3088_v23, %v3138_v34 }
  0x9c   : >>> { %v666_v51 = vmul.f32 %v3088_v23, %v646_v63  ;;  %v667_v46 = vmul.f32 %v3088_v23, %v3146_v61  ;;  %v668_v47 = vmul.f32 %v3088_v23, %v648_v2  ;;  %v669_v48 = vmul.f32 %v3088_v23, %v3154_v58  ;;  %v3205_v0 = vld [vmem:[%s3050_s7 + $0x3a] sm:$0xff] }
  0x9d   : >>> { %v670_v49 = vmul.f32 %v3088_v23, %v650_v38  ;;  %v671_v3 = vmul.f32 %v3088_v23, %v3158_v57  ;;  %v672_v4 = vmul.f32 %v3088_v23, %v652_v42  ;;  %v673_v11 = vmul.f32 %v3088_v23, %v3165_v56  ;;  %v694_v57 = vld [vmem:[%s3050_s7 + $0x2] sm:$0xff]  ;;  %4662 = vst [vmem:[#allocation23_spill] sm:$0xff] %v3205_v0 }
  0x9e   : >>> { %v674_v29 = vmul.f32 %v3088_v23, %v654_v43  ;;  %v675_v63 = vmul.f32 %v3088_v23, %v3170_v54  ;;  %v676_v2 = vmul.f32 %v3088_v23, %v656_v53  ;;  %v677_v38 = vmul.f32 %v3088_v23, %v3174_v44  ;;  %v3201_v43 = vld [vmem:[%s3050_s7 + $0xa] sm:$0xff]  ;;  %v696_v54 = vld [vmem:[%s3050_s7 + $0x32] sm:$0xff] }
  0x9f   : >>> { %v678_v58 = vadd.f32 %v662_v55, %v626_v6  ;;  %v679_v61 = vadd.f32 %v663_v45, %v627_v16  ;;  %v680_v42 = vadd.f32 %v664_v52, %v628_v18  ;;  %v681_v34 = vadd.f32 %v665_v50, %v629_v21  ;;  %4661 = vst [vmem:[#allocation22_spill] sm:$0xff] %v3201_v43  ;;  %v698_v6 = vld [vmem:[%s3050_s7 + $0x62] sm:$0xff]  ;;  %v3209_v16 = vld [vmem:[%s3050_s7 + $0x6a] sm:$0xff]  ;;  %v700_v18 = vld [vmem:[%s3050_s7 + $0x92] sm:$0xff] }
  0xa0   : >>> { %v682_v56 = vadd.f32 %v666_v51, %v630_v27  ;;  %v683_v53 = vadd.f32 %v667_v46, %v631_v35  ;;  %v684_v36 = vadd.f32 %v668_v47, %v632_v19  ;;  %v685_v28 = vadd.f32 %v669_v48, %v633_v1  ;;  %4663 = vst [vmem:[#allocation24_spill] sm:$0xff] %v3209_v16  ;;  %v3213_v52 = vld [vmem:[%s3050_s7 + $0x9a] sm:$0xff]  ;;  %v702_v35 = vld [vmem:[%s3050_s7 + $0xc2] sm:$0xff]  ;;  %v3217_v19 = vld [vmem:[%s3050_s7 + $0xca] sm:$0xff] }
  0xa1   : >>> { %v686_v23 = vadd.f32 %v670_v49, %v634_v62  ;;  %v687_v21 = vadd.f32 %v671_v3, %v635_v30  ;;  %v688_v27 = vadd.f32 %v672_v4, %v636_v60  ;;  %v689_v55 = vadd.f32 %v673_v11, %v637_v59  ;;  %4664 = vst [vmem:[#allocation25_spill] sm:$0xff] %v3213_v52  ;;  %v704_v51 = vld [vmem:[%s3050_s7 + $0xf2] sm:$0xff]  ;;  %v3221_v46 = vld [vmem:[%s3050_s7 + $0xfa] sm:$0xff]  ;;  %v706_v47 = vld [vmem:[%s3050_s7 + $0x122] sm:$0xff] }
  0xa2   : >>> { %v690_v45 = vadd.f32 %v674_v29, %v638_v37  ;;  %4665 = vst [vmem:[#allocation26_spill] sm:$0xff] %v3217_v19  ;;  %v691_v1 = vadd.f32 %v675_v63, %v639_v39  ;;  %v692_v50 = vadd.f32 %v676_v2, %v640_v40  ;;  %v693_v62 = vadd.f32 %v677_v38, %v641_v41  ;;  %v3226_v49 = vld [vmem:[%s3050_s7 + $0x12a] sm:$0xff]  ;;  %v708_v30 = vld [vmem:[%s3050_s7 + $0x152] sm:$0xff]  ;;  %v3230_v60 = vld [vmem:[%s3050_s7 + $0x15a] sm:$0xff] }
  0xa3   : >>> { %4666 = vst [vmem:[#allocation27_spill] sm:$0xff] %v3221_v46  ;;  %v714_v48 = vmul.f32 %v3092_v24, %v694_v57  ;;  %4667 = vst [vmem:[#allocation28_spill] sm:$0xff] %v3226_v49  ;;  %v715_v59 = vmul.f32 %v3092_v24, %v3201_v43  ;;  %v716_v37 = vmul.f32 %v3092_v24, %v696_v54 }
  0xa4   : >>> { %v717_v39 = vmul.f32 %v3092_v24, %v3205_v0  ;;  %v718_v40 = vmul.f32 %v3092_v24, %v698_v6  ;;  %v719_v41 = vmul.f32 %v3092_v24, %v3209_v16  ;;  %v720_v57 = vmul.f32 %v3092_v24, %v700_v18  ;;  %v3261_v16 = vld [vmem:[%s3050_s7 + $0x3b] sm:$0xff] }
  0xa5   : >>> { %v721_v3 = vmul.f32 %v3092_v24, %v3213_v52  ;;  %v722_v4 = vmul.f32 %v3092_v24, %v702_v35  ;;  %v723_v54 = vmul.f32 %v3092_v24, %v3217_v19  ;;  %v724_v11 = vmul.f32 %v3092_v24, %v704_v51  ;;  %v746_v35 = vld [vmem:[%s3050_s7 + $0x3] sm:$0xff]  ;;  %4669 = vst [vmem:[#allocation30_spill] sm:$0xff] %v3261_v16 }
  0xa6   : >>> { %v725_v29 = vmul.f32 %v3092_v24, %v3221_v46  ;;  %v726_v63 = vmul.f32 %v3092_v24, %v706_v47  ;;  %v727_v2 = vmul.f32 %v3092_v24, %v3226_v49  ;;  %v728_v38 = vmul.f32 %v3092_v24, %v708_v30  ;;  %v3257_v47 = vld [vmem:[%s3050_s7 + $0xb] sm:$0xff]  ;;  %v748_v49 = vld [vmem:[%s3050_s7 + $0x33] sm:$0xff] }
  0xa7   : >>> { %v729_v6 = vmul.f32 %v3092_v24, %v3230_v60  ;;  %v730_v18 = vadd.f32 %v714_v48, %v678_v58  ;;  %v731_v19 = vadd.f32 %v715_v59, %v679_v61  ;;  %v732_v51 = vadd.f32 %v716_v37, %v680_v42  ;;  %4668 = vst [vmem:[#allocation29_spill] sm:$0xff] %v3257_v47  ;;  %v750_v58 = vld [vmem:[%s3050_s7 + $0x63] sm:$0xff]  ;;  %v3265_v61 = vld [vmem:[%s3050_s7 + $0x6b] sm:$0xff]  ;;  %v3269_v37 = vld [vmem:[%s3050_s7 + $0x9b] sm:$0xff] }
  0xa8   : >>> { %v733_v52 = vadd.f32 %v717_v39, %v681_v34  ;;  %v734_v46 = vadd.f32 %v718_v40, %v682_v56  ;;  %v735_v30 = vadd.f32 %v719_v41, %v683_v53  ;;  %v736_v0 = vadd.f32 %v720_v57, %v684_v36  ;;  %4670 = vst [vmem:[#allocation31_spill] sm:$0xff] %v3265_v61  ;;  %v752_v34 = vld [vmem:[%s3050_s7 + $0x93] sm:$0xff]  ;;  %v754_v53 = vld [vmem:[%s3050_s7 + $0xc3] sm:$0xff]  ;;  %v3273_v36 = vld [vmem:[%s3050_s7 + $0xcb] sm:$0xff] }
  0xa9   : >>> { %v737_v43 = vadd.f32 %v721_v3, %v685_v28  ;;  %v738_v24 = vadd.f32 %v722_v4, %v686_v23  ;;  %v739_v56 = vadd.f32 %v723_v54, %v687_v21  ;;  %v740_v42 = vadd.f32 %v724_v11, %v688_v27  ;;  %4671 = vst [vmem:[#allocation32_spill] sm:$0xff] %v3269_v37  ;;  %v756_v40 = vld [vmem:[%s3050_s7 + $0xf3] sm:$0xff]  ;;  %v3277_v41 = vld [vmem:[%s3050_s7 + $0xfb] sm:$0xff]  ;;  %v758_v57 = vld [vmem:[%s3050_s7 + $0x123] sm:$0xff] }
  0xaa   : >>> { %v741_v48 = vadd.f32 %v725_v29, %v689_v55  ;;  %v742_v59 = vadd.f32 %v726_v63, %v690_v45  ;;  %4672 = vst [vmem:[#allocation33_spill] sm:$0xff] %v3273_v36  ;;  %v743_v28 = vadd.f32 %v727_v2, %v691_v1  ;;  %v744_v39 = vadd.f32 %v728_v38, %v692_v50  ;;  %v3282_v4 = vld [vmem:[%s3050_s7 + $0x12b] sm:$0xff]  ;;  %v760_v21 = vld [vmem:[%s3050_s7 + $0x153] sm:$0xff]  ;;  %v3286_v27 = vld [vmem:[%s3050_s7 + $0x15b] sm:$0xff] }
  0xab   : >>> { %v745_v23 = vadd.f32 %v729_v6, %v693_v62  ;;  %4673 = vst [vmem:[#allocation34_spill] sm:$0xff] %v3277_v41  ;;  %v766_v3 = vmul.f32 %v3096_v25, %v746_v35  ;;  %4674 = vst [vmem:[#allocation35_spill] sm:$0xff] %v3282_v4  ;;  %v767_v55 = vmul.f32 %v3096_v25, %v3257_v47 }
  0xac   : >>> { %v768_v45 = vmul.f32 %v3096_v25, %v748_v49  ;;  %v769_v1 = vmul.f32 %v3096_v25, %v3261_v16  ;;  %v770_v50 = vmul.f32 %v3096_v25, %v750_v58  ;;  %v771_v62 = vmul.f32 %v3096_v25, %v3265_v61  ;;  %v3317_v61 = vld [vmem:[%s3050_s7 + $0x3c] sm:$0xff] }
  0xad   : >>> { %v772_v54 = vmul.f32 %v3096_v25, %v752_v34  ;;  %v773_v11 = vmul.f32 %v3096_v25, %v3269_v37  ;;  %v774_v29 = vmul.f32 %v3096_v25, %v754_v53  ;;  %v775_v49 = vmul.f32 %v3096_v25, %v3273_v36  ;;  %v798_v53 = vld [vmem:[%s3050_s7 + $0x4] sm:$0xff]  ;;  %4676 = vst [vmem:[#allocation37_spill] sm:$0xff] %v3317_v61 }
  0xae   : >>> { %v776_v63 = vmul.f32 %v3096_v25, %v756_v40  ;;  %v777_v2 = vmul.f32 %v3096_v25, %v3277_v41  ;;  %v778_v38 = vmul.f32 %v3096_v25, %v758_v57  ;;  %v779_v6 = vmul.f32 %v3096_v25, %v3282_v4  ;;  %v3313_v57 = vld [vmem:[%s3050_s7 + $0xc] sm:$0xff]  ;;  %v800_v4 = vld [vmem:[%s3050_s7 + $0x34] sm:$0xff] }
  0xaf   : >>> { %v780_v35 = vmul.f32 %v3096_v25, %v760_v21  ;;  %v781_v58 = vmul.f32 %v3096_v25, %v3286_v27  ;;  %v782_v34 = vadd.f32 %v766_v3, %v730_v18  ;;  %v783_v36 = vadd.f32 %v767_v55, %v731_v19  ;;  %4675 = vst [vmem:[#allocation36_spill] sm:$0xff] %v3313_v57  ;;  %v802_v18 = vld [vmem:[%s3050_s7 + $0x64] sm:$0xff]  ;;  %v3321_v19 = vld [vmem:[%s3050_s7 + $0x6c] sm:$0xff] }
  0xb0   : >>> { %v784_v40 = vadd.f32 %v768_v45, %v732_v51  ;;  %v785_v37 = vadd.f32 %v769_v1, %v733_v52  ;;  %v786_v41 = vadd.f32 %v770_v50, %v734_v46  ;;  %v787_v21 = vadd.f32 %v771_v62, %v735_v30  ;;  %4677 = vst [vmem:[#allocation38_spill] sm:$0xff] %v3321_v19  ;;  %v804_v52 = vld [vmem:[%s3050_s7 + $0x94] sm:$0xff]  ;;  %v3325_v45 = vld [vmem:[%s3050_s7 + $0x9c] sm:$0xff]  ;;  %v806_v30 = vld [vmem:[%s3050_s7 + $0xc4] sm:$0xff] }
  0xb1   : >>> { %v788_v16 = vadd.f32 %v772_v54, %v736_v0  ;;  %v789_v47 = vadd.f32 %v773_v11, %v737_v43  ;;  %v790_v25 = vadd.f32 %v774_v29, %v738_v24  ;;  %v791_v46 = vadd.f32 %v775_v49, %v739_v56  ;;  %4678 = vst [vmem:[#allocation39_spill] sm:$0xff] %v3325_v45  ;;  %v3329_v0 = vld [vmem:[%s3050_s7 + $0xcc] sm:$0xff]  ;;  %v808_v50 = vld [vmem:[%s3050_s7 + $0xf4] sm:$0xff]  ;;  %v3333_v62 = vld [vmem:[%s3050_s7 + $0xfc] sm:$0xff] }
  0xb2   : >>> { %v792_v51 = vadd.f32 %v776_v63, %v740_v42  ;;  %v793_v3 = vadd.f32 %v777_v2, %v741_v48  ;;  %v794_v55 = vadd.f32 %v778_v38, %v742_v59  ;;  %4679 = vst [vmem:[#allocation40_spill] sm:$0xff] %v3329_v0  ;;  %v795_v43 = vadd.f32 %v779_v6, %v743_v28  ;;  %v810_v54 = vld [vmem:[%s3050_s7 + $0x124] sm:$0xff]  ;;  %v3338_v29 = vld [vmem:[%s3050_s7 + $0x12c] sm:$0xff]  ;;  %v812_v56 = vld [vmem:[%s3050_s7 + $0x154] sm:$0xff] }
  0xb3   : >>> { %v796_v1 = vadd.f32 %v780_v35, %v744_v39  ;;  %v797_v24 = vadd.f32 %v781_v58, %v745_v23  ;;  %4680 = vst [vmem:[#allocation41_spill] sm:$0xff] %v3333_v62  ;;  %v818_v11 = vmul.f32 %v3107_v31, %v798_v53  ;;  %4681 = vst [vmem:[#allocation42_spill] sm:$0xff] %v3338_v29  ;;  %v3342_v42 = vld [vmem:[%s3050_s7 + $0x15c] sm:$0xff] }
  0xb4   : >>> { %v819_v48 = vmul.f32 %v3107_v31, %v3313_v57  ;;  %v820_v59 = vmul.f32 %v3107_v31, %v800_v4  ;;  %v821_v28 = vmul.f32 %v3107_v31, %v3317_v61  ;;  %v822_v39 = vmul.f32 %v3107_v31, %v802_v18 }
  0xb5   : >>> { %v823_v23 = vmul.f32 %v3107_v31, %v3321_v19  ;;  %v824_v49 = vmul.f32 %v3107_v31, %v804_v52  ;;  %v825_v63 = vmul.f32 %v3107_v31, %v3325_v45  ;;  %v826_v2 = vmul.f32 %v3107_v31, %v806_v30  ;;  %v850_v30 = vld [vmem:[%s3050_s7 + $0x5] sm:$0xff]  ;;  %v3373_v19 = vld [vmem:[%s3050_s7 + $0x3d] sm:$0xff] }
  0xb6   : >>> { %v827_v4 = vmul.f32 %v3107_v31, %v3329_v0  ;;  %v828_v38 = vmul.f32 %v3107_v31, %v808_v50  ;;  %v829_v6 = vmul.f32 %v3107_v31, %v3333_v62  ;;  %v830_v35 = vmul.f32 %v3107_v31, %v810_v54  ;;  %v3369_v54 = vld [vmem:[%s3050_s7 + $0xd] sm:$0xff]  ;;  %4682 = vst [vmem:[#allocation43_spill] sm:$0xff] %v3373_v19 }
  0xb7   : >>> { %v831_v58 = vmul.f32 %v3107_v31, %v3338_v29  ;;  %v832_v53 = vmul.f32 %v3107_v31, %v812_v56  ;;  %v833_v18 = vmul.f32 %v3107_v31, %v3342_v42  ;;  %v834_v52 = vadd.f32 %v818_v11, %v782_v34  ;;  %v852_v29 = vld [vmem:[%s3050_s7 + $0x35] sm:$0xff]  ;;  %v854_v34 = vld [vmem:[%s3050_s7 + $0x65] sm:$0xff] }
  0xb8   : >>> { %v835_v0 = vadd.f32 %v819_v48, %v783_v36  ;;  %v836_v50 = vadd.f32 %v820_v59, %v784_v40  ;;  %v837_v45 = vadd.f32 %v821_v28, %v785_v37  ;;  %v838_v62 = vadd.f32 %v822_v39, %v786_v41  ;;  %v3377_v36 = vld [vmem:[%s3050_s7 + $0x6d] sm:$0xff]  ;;  %v856_v37 = vld [vmem:[%s3050_s7 + $0x95] sm:$0xff]  ;;  %v3381_v59 = vld [vmem:[%s3050_s7 + $0x9d] sm:$0xff] }
  0xb9   : >>> { %v839_v56 = vadd.f32 %v823_v23, %v787_v21  ;;  %v840_v61 = vadd.f32 %v824_v49, %v788_v16  ;;  %v841_v57 = vadd.f32 %v825_v63, %v789_v47  ;;  %v842_v31 = vadd.f32 %v826_v2, %v790_v25  ;;  %4683 = vst [vmem:[#allocation44_spill] sm:$0xff] %v3377_v36  ;;  %v858_v21 = vld [vmem:[%s3050_s7 + $0xc5] sm:$0xff]  ;;  %v3385_v16 = vld [vmem:[%s3050_s7 + $0xcd] sm:$0xff]  ;;  %v860_v39 = vld [vmem:[%s3050_s7 + $0xf5] sm:$0xff] }
  0xba   : >>> { %v843_v41 = vadd.f32 %v827_v4, %v791_v46  ;;  %v844_v40 = vadd.f32 %v828_v38, %v792_v51  ;;  %v845_v11 = vadd.f32 %v829_v6, %v793_v3  ;;  %v846_v48 = vadd.f32 %v830_v35, %v794_v55  ;;  %4684 = vst [vmem:[#allocation45_spill] sm:$0xff] %v3381_v59  ;;  %v3389_v23 = vld [vmem:[%s3050_s7 + $0xfd] sm:$0xff]  ;;  %v862_v49 = vld [vmem:[%s3050_s7 + $0x125] sm:$0xff]  ;;  %v3394_v2 = vld [vmem:[%s3050_s7 + $0x12d] sm:$0xff] }
  0xbb   : >>> { %4685 = vst [vmem:[#allocation46_spill] sm:$0xff] %v3385_v16  ;;  %v847_v47 = vadd.f32 %v831_v58, %v795_v43  ;;  %v848_v28 = vadd.f32 %v832_v53, %v796_v1  ;;  %v849_v25 = vadd.f32 %v833_v18, %v797_v24  ;;  %4686 = vst [vmem:[#allocation47_spill] sm:$0xff] %v3389_v23  ;;  %v864_v46 = vld [vmem:[%s3050_s7 + $0x155] sm:$0xff]  ;;  %v3398_v51 = vld [vmem:[%s3050_s7 + $0x15d] sm:$0xff] }
  0xbc   : >>> { %v870_v63 = vmul.f32 %v3111_v32, %v850_v30  ;;  %4687 = vst [vmem:[#allocation48_spill] sm:$0xff] %v3394_v2  ;;  %v871_v3 = vmul.f32 %v3111_v32, %v3369_v54  ;;  %v872_v55 = vmul.f32 %v3111_v32, %v852_v29  ;;  %v873_v43 = vmul.f32 %v3111_v32, %v3373_v19  ;;  %v902_v19 = vld [vmem:[%s3050_s7 + $0x6] sm:$0xff] }
  0xbd   : >>> { %v874_v1 = vmul.f32 %v3111_v32, %v854_v34  ;;  %v875_v24 = vmul.f32 %v3111_v32, %v3377_v36  ;;  %v876_v4 = vmul.f32 %v3111_v32, %v856_v37  ;;  %v877_v38 = vmul.f32 %v3111_v32, %v3381_v59  ;;  %v3424_v36 = vld [vmem:[%s3045_s6 + $0x8] sm:$0xff] }
  0xbe   : >>> { %v878_v6 = vmul.f32 %v3111_v32, %v858_v21  ;;  %v879_v35 = vmul.f32 %v3111_v32, %v3385_v16  ;;  %v880_v29 = vmul.f32 %v3111_v32, %v860_v39  ;;  %v881_v58 = vmul.f32 %v3111_v32, %v3389_v23  ;;  %4688 = vst [vmem:[#allocation49_spill] sm:$0xff] %v3424_v36 }
  0xbf   : >>> { %v882_v53 = vmul.f32 %v3111_v32, %v862_v49  ;;  %v883_v18 = vmul.f32 %v3111_v32, %v3394_v2  ;;  %v884_v30 = vmul.f32 %v3111_v32, %v864_v46  ;;  %v885_v34 = vmul.f32 %v3111_v32, %v3398_v51 }
  0xc0   : >>> { %v886_v37 = vadd.f32 %v870_v63, %v834_v52  ;;  %v887_v21 = vadd.f32 %v871_v3, %v835_v0  ;;  %v888_v39 = vadd.f32 %v872_v55, %v836_v50  ;;  %v889_v16 = vadd.f32 %v873_v43, %v837_v45  ;;  %v3428_v50 = vld [vmem:[%s3050_s7 + $0xe] sm:$0xff]  ;;  %v904_v45 = vld [vmem:[%s3050_s7 + $0x36] sm:$0xff] }
  0xc1   : >>> { %v890_v59 = vadd.f32 %v874_v1, %v838_v62  ;;  %v891_v49 = vadd.f32 %v875_v24, %v839_v56  ;;  %v892_v23 = vadd.f32 %v876_v4, %v840_v61  ;;  %v893_v2 = vadd.f32 %v877_v38, %v841_v57  ;;  %4689 = vst [vmem:[#allocation50_spill] sm:$0xff] %v3428_v50  ;;  %v3432_v62 = vld [vmem:[%s3050_s7 + $0x3e] sm:$0xff]  ;;  %v3436_v3 = vld [vmem:[%s3050_s7 + $0x6e] sm:$0xff]  ;;  %v908_v55 = vld [vmem:[%s3050_s7 + $0x96] sm:$0xff] }
  0xc2   : >>> { %v894_v46 = vadd.f32 %v878_v6, %v842_v31  ;;  %v895_v32 = vadd.f32 %v879_v35, %v843_v41  ;;  %v896_v52 = vadd.f32 %v880_v29, %v844_v40  ;;  %v897_v0 = vadd.f32 %v881_v58, %v845_v11  ;;  %4690 = vst [vmem:[#allocation51_spill] sm:$0xff] %v3432_v62  ;;  %v906_v31 = vld [vmem:[%s3050_s7 + $0x66] sm:$0xff]  ;;  %v3442_v40 = vld [vmem:[%s3050_s7 + $0x9e] sm:$0xff]  ;;  %v912_v1 = vld [vmem:[%s3050_s7 + $0xf6] sm:$0xff] }
  0xc3   : >>> { %v898_v63 = vadd.f32 %v882_v53, %v846_v48  ;;  %v899_v56 = vadd.f32 %v883_v18, %v847_v47  ;;  %v900_v61 = vadd.f32 %v884_v30, %v848_v28  ;;  %v901_v57 = vadd.f32 %v885_v34, %v849_v25  ;;  %4691 = vst [vmem:[#allocation52_spill] sm:$0xff] %v3436_v3  ;;  %v910_v11 = vld [vmem:[%s3050_s7 + $0xc6] sm:$0xff]  ;;  %v3446_v48 = vld [vmem:[%s3050_s7 + $0xce] sm:$0xff]  ;;  %v3466_v24 = vld [vmem:[%s3050_s7 + $0xfe] sm:$0xff] }
  0xc4   : >>> { %v921_v41 = vrot.slane %v3048_v5, %v3098_v26  ;;  %4692 = vst [vmem:[#allocation53_spill] sm:$0xff] %v3442_v40  ;;  %4693 = vst [vmem:[#allocation54_spill] sm:$0xff] %v3446_v48  ;;  %v3450_v47 = vrot.slane %v3048_v5, %v3113_v33  ;;  %v3454_v28 = vrot.slane %v3424_v36, %v3053_v7  ;;  %v914_v4 = vld [vmem:[%s3050_s7 + $0x126] sm:$0xff]  ;;  %v3482_v29 = vld [vmem:[%s3050_s7 + $0x12e] sm:$0xff] }
  0xc5   : >>> { %v3458_v25 = vrot.slane %v3424_v36, %v3055_v8  ;;  %v3462_v43 = vrot.slane %v3424_v36, %v3057_v9  ;;  %4694 = vst [vmem:[#allocation55_spill] sm:$0xff] %v3466_v24  ;;  %v3471_v5 = vrot.slane %v3424_v36, %v3066_v13  ;;  %v3475_v6 = vrot.slane %v3424_v36, %v3068_v14  ;;  %v916_v58 = vld [vmem:[%s3050_s7 + $0x156] sm:$0xff]  ;;  %v3486_v53 = vld [vmem:[%s3050_s7 + $0x15e] sm:$0xff] }
  0xc6   : >>> { %v922_v38 = vmul.f32 %v921_v41, %v902_v19  ;;  %v3479_v35 = vrot.slane %v3424_v36, %v3070_v15  ;;  %4695 = vst [vmem:[#allocation56_spill] sm:$0xff] %v3482_v29  ;;  %v923_v18 = vmul.f32 %v921_v41, %v3428_v50  ;;  %v924_v19 = vmul.f32 %v921_v41, %v904_v45 }
  0xc7   : >>> { %v925_v30 = vmul.f32 %v921_v41, %v3432_v62  ;;  %v926_v34 = vmul.f32 %v921_v41, %v906_v31  ;;  %v927_v13 = vmul.f32 %v921_v41, %v3436_v3  ;;  %v928_v14 = vmul.f32 %v921_v41, %v908_v55  ;;  %v954_v3 = vld [vmem:[%s3050_s7 + $0x7] sm:$0xff] }
  0xc8   : >>> { %v929_v9 = vmul.f32 %v921_v41, %v3442_v40  ;;  %v930_v15 = vmul.f32 %v921_v41, %v910_v11  ;;  %v931_v8 = vmul.f32 %v921_v41, %v3446_v48  ;;  %v932_v7 = vmul.f32 %v921_v41, %v912_v1  ;;  %v3498_v1 = vld [vmem:[%s3050_s7 + $0xf] sm:$0xff] }
  0xc9   : >>> { %v933_v33 = vmul.f32 %v921_v41, %v3466_v24  ;;  %v934_v50 = vmul.f32 %v921_v41, %v914_v4  ;;  %v935_v45 = vmul.f32 %v921_v41, %v3482_v29  ;;  %v936_v62 = vmul.f32 %v921_v41, %v916_v58  ;;  %v956_v4 = vld [vmem:[%s3050_s7 + $0x37] sm:$0xff]  ;;  %v3502_v24 = vld [vmem:[%s3050_s7 + $0x3f] sm:$0xff] }
  0xca   : >>> { %v937_v31 = vmul.f32 %v921_v41, %v3486_v53  ;;  %v938_v55 = vadd.f32 %v922_v38, %v886_v37  ;;  %v939_v40 = vadd.f32 %v923_v18, %v887_v21  ;;  %v940_v36 = vadd.f32 %v924_v19, %v888_v39  ;;  %4696 = vst [vmem:[#allocation57_spill] sm:$0xff] %v3502_v24  ;;  %v958_v37 = vld [vmem:[%s3050_s7 + $0x67] sm:$0xff]  ;;  %v3506_v21 = vld [vmem:[%s3050_s7 + $0x6f] sm:$0xff]  ;;  %v3510_v19 = vld [vmem:[%s3050_s7 + $0x9f] sm:$0xff] }
  0xcb   : >>> { %v941_v11 = vadd.f32 %v925_v30, %v889_v16  ;;  %v942_v26 = vadd.f32 %v926_v34, %v890_v59  ;;  %v943_v29 = vadd.f32 %v927_v13, %v891_v49  ;;  %v944_v58 = vadd.f32 %v928_v14, %v892_v23  ;;  %4697 = vst [vmem:[#allocation58_spill] sm:$0xff] %v3506_v21  ;;  %v960_v16 = vld [vmem:[%s3050_s7 + $0x97] sm:$0xff]  ;;  %v962_v13 = vld [vmem:[%s3050_s7 + $0xc7] sm:$0xff]  ;;  %v3514_v14 = vld [vmem:[%s3050_s7 + $0xcf] sm:$0xff] }
  0xcc   : >>> { %v945_v48 = vadd.f32 %v929_v9, %v893_v2  ;;  %v946_v41 = vadd.f32 %v930_v15, %v894_v46  ;;  %v947_v59 = vadd.f32 %v931_v8, %v895_v32  ;;  %v948_v39 = vadd.f32 %v932_v7, %v896_v52  ;;  %4698 = vst [vmem:[#allocation59_spill] sm:$0xff] %v3510_v19  ;;  %v964_v2 = vld [vmem:[%s3050_s7 + $0xf7] sm:$0xff]  ;;  %v3518_v49 = vld [vmem:[%s3050_s7 + $0xff] sm:$0xff]  ;;  %v966_v46 = vld [vmem:[%s3050_s7 + $0x127] sm:$0xff] }
  0xcd   : >>> { %v949_v38 = vadd.f32 %v933_v33, %v897_v0  ;;  %v950_v18 = vadd.f32 %v934_v50, %v898_v63  ;;  %4699 = vst [vmem:[#allocation60_spill] sm:$0xff] %v3514_v14  ;;  %v951_v9 = vadd.f32 %v935_v45, %v899_v56  ;;  %v952_v23 = vadd.f32 %v936_v62, %v900_v61  ;;  %v3523_v34 = vld [vmem:[%s3050_s7 + $0x12f] sm:$0xff]  ;;  %v968_v8 = vld [vmem:[%s3050_s7 + $0x157] sm:$0xff]  ;;  %v3527_v7 = vld [vmem:[%s3050_s7 + $0x15f] sm:$0xff] }
  0xce   : >>> { %v953_v15 = vadd.f32 %v937_v31, %v901_v57  ;;  %4700 = vst [vmem:[#allocation61_spill] sm:$0xff] %v3518_v49  ;;  %v974_v30 = vmul.f32 %v3450_v47, %v954_v3  ;;  %4701 = vst [vmem:[#allocation62_spill] sm:$0xff] %v3523_v34  ;;  %v975_v33 = vmul.f32 %v3450_v47, %v3498_v1 }
  0xcf   : >>> { %4702 = vst [vmem:[#allocation63_spill] sm:$0xff] %v3527_v7  ;;  %v976_v32 = vmul.f32 %v3450_v47, %v956_v4  ;;  %v977_v52 = vmul.f32 %v3450_v47, %v3502_v24  ;;  %v978_v0 = vmul.f32 %v3450_v47, %v958_v37  ;;  %v979_v63 = vmul.f32 %v3450_v47, %v3506_v21 }
  0xd0   : >>> { %v980_v50 = vmul.f32 %v3450_v47, %v960_v16  ;;  %v981_v62 = vmul.f32 %v3450_v47, %v3510_v19  ;;  %v982_v56 = vmul.f32 %v3450_v47, %v962_v13  ;;  %v983_v61 = vmul.f32 %v3450_v47, %v3514_v14 }
  0xd1   : >>> { %v984_v57 = vmul.f32 %v3450_v47, %v964_v2  ;;  %v985_v3 = vmul.f32 %v3450_v47, %v3518_v49  ;;  %v986_v45 = vmul.f32 %v3450_v47, %v966_v46  ;;  %v987_v31 = vmul.f32 %v3450_v47, %v3523_v34  ;;  %v3553_v34 = vld [vmem:[%s3050_s7 + $0x10] sm:$0xff] }
  0xd2   : >>> { %v988_v4 = vmul.f32 %v3450_v47, %v968_v8  ;;  %v989_v37 = vmul.f32 %v3450_v47, %v3527_v7  ;;  %v990_v16 = vadd.f32 %v974_v30, %v938_v55  ;;  %v991_v13 = vadd.f32 %v975_v33, %v939_v40  ;;  %v3556_v8 = vld [vmem:[%s3050_s7 + $0x40] sm:$0xff]  ;;  %v3559_v40 = vld [vmem:[%s3050_s7 + $0x70] sm:$0xff] }
  0xd3   : >>> { %v992_v14 = vadd.f32 %v976_v32, %v940_v36  ;;  %v993_v2 = vadd.f32 %v977_v52, %v941_v11  ;;  %v994_v19 = vadd.f32 %v978_v0, %v942_v26  ;;  %v995_v21 = vadd.f32 %v979_v63, %v943_v29  ;;  %v3562_v36 = vld [vmem:[%s3050_s7 + $0xa0] sm:$0xff]  ;;  %v3573_v33 = vld [vmem:[%s3050_s7 + $0x130] sm:$0xff] }
  0xd4   : >>> { %v996_v49 = vadd.f32 %v980_v50, %v944_v58  ;;  %v997_v46 = vadd.f32 %v981_v62, %v945_v48  ;;  %v998_v24 = vadd.f32 %v982_v56, %v946_v41  ;;  %v999_v47 = vadd.f32 %v983_v61, %v947_v59  ;;  %v3565_v58 = vld [vmem:[%s3050_s7 + $0xd0] sm:$0xff]  ;;  %v3568_v48 = vld [vmem:[%s3050_s7 + $0x100] sm:$0xff]  ;;  %4703 = vst [vmem:[#allocation64_spill] sm:$0xff] %v3573_v33  ;;  %v4707_v62 = vld [vmem:[#allocation14_spill] sm:$0xff] }
  0xd5   : >>> { %v1000_v7 = vadd.f32 %v984_v57, %v948_v39  ;;  %v1001_v55 = vadd.f32 %v985_v3, %v949_v38  ;;  %v1002_v30 = vadd.f32 %v986_v45, %v950_v18  ;;  %v1003_v26 = vadd.f32 %v987_v31, %v951_v9  ;;  %v3576_v59 = vld [vmem:[%s3050_s7 + $0x160] sm:$0xff]  ;;  %v4706_v63 = vld [vmem:[#allocation13_spill] sm:$0xff] }
  0xd6   : >>> { %v1004_v29 = vadd.f32 %v988_v4, %v952_v23  ;;  %v1005_v11 = vadd.f32 %v989_v37, %v953_v15  ;;  %v1018_v41 = vmul.f32 %v3454_v28, %v3060_v10  ;;  %4704 = vst [vmem:[#allocation65_spill] sm:$0xff] %v3576_v59  ;;  %v1019_v39 = vmul.f32 %v3454_v28, %v3553_v34  ;;  %v4705_v52 = vld [vmem:[#allocation11_spill] sm:$0xff] }
  0xd7   : >>> { %v1020_v38 = vmul.f32 %v3454_v28, %v3064_v12  ;;  %v1021_v18 = vmul.f32 %v3454_v28, %v3556_v8  ;;  %v1022_v9 = vmul.f32 %v3454_v28, %v3074_v17  ;;  %v1023_v23 = vmul.f32 %v3454_v28, %v3559_v40 }
  0xd8   : >>> { %v1024_v10 = vmul.f32 %v3454_v28, %v3080_v20  ;;  %v1025_v15 = vmul.f32 %v3454_v28, %v3562_v36  ;;  %v1026_v32 = vmul.f32 %v3454_v28, %v3084_v22  ;;  %v1027_v12 = vmul.f32 %v3454_v28, %v3565_v58 }
  0xd9   : >>> { %v1028_v0 = vmul.f32 %v3454_v28, %v4705_v52  ;;  %v1029_v17 = vmul.f32 %v3454_v28, %v3568_v48  ;;  %v1030_v20 = vmul.f32 %v3454_v28, %v4706_v63  ;;  %v1031_v50 = vmul.f32 %v3454_v28, %v3573_v33  ;;  %v3609_v33 = vld [vmem:[%s3050_s7 + $0x11] sm:$0xff] }
  0xda   : >>> { %v1032_v22 = vmul.f32 %v3454_v28, %v4707_v62  ;;  %v1033_v56 = vmul.f32 %v3454_v28, %v3576_v59  ;;  %v1034_v61 = vadd.f32 %v1018_v41, %v990_v16  ;;  %v1035_v57 = vadd.f32 %v1019_v39, %v991_v13  ;;  %v3612_v62 = vld [vmem:[%s3050_s7 + $0x41] sm:$0xff]  ;;  %v3615_v13 = vld [vmem:[%s3050_s7 + $0x71] sm:$0xff] }
  0xdb   : >>> { %v1036_v3 = vadd.f32 %v1020_v38, %v992_v14  ;;  %v1037_v45 = vadd.f32 %v1021_v18, %v993_v2  ;;  %v1038_v31 = vadd.f32 %v1022_v9, %v994_v19  ;;  %v1039_v4 = vadd.f32 %v1023_v23, %v995_v21  ;;  %4708 = vst [vmem:[#allocation11_spill] sm:$0xff] %v3615_v13  ;;  %v3618_v14 = vld [vmem:[%s3050_s7 + $0xa1] sm:$0xff]  ;;  %v3629_v38 = vld [vmem:[%s3050_s7 + $0x131] sm:$0xff] }
  0xdc   : >>> { %v1040_v37 = vadd.f32 %v1024_v10, %v996_v49  ;;  %v1041_v52 = vadd.f32 %v1025_v15, %v997_v46  ;;  %v1042_v63 = vadd.f32 %v1026_v32, %v998_v24  ;;  %v1043_v28 = vadd.f32 %v1027_v12, %v999_v47  ;;  %4709 = vst [vmem:[#allocation13_spill] sm:$0xff] %v3618_v14  ;;  %v3621_v49 = vld [vmem:[%s3050_s7 + $0xd1] sm:$0xff]  ;;  %v3624_v46 = vld [vmem:[%s3050_s7 + $0x101] sm:$0xff] }
  0xdd   : >>> { %v1044_v59 = vadd.f32 %v1028_v0, %v1000_v7  ;;  %v1045_v16 = vadd.f32 %v1029_v17, %v1001_v55  ;;  %v1046_v41 = vadd.f32 %v1030_v20, %v1002_v30  ;;  %v1047_v19 = vadd.f32 %v1031_v50, %v1003_v26  ;;  %4710 = vst [vmem:[#allocation14_spill] sm:$0xff] %v3621_v49  ;;  %v4712_v24 = vld [vmem:[#allocation15_spill] sm:$0xff]  ;;  %v4715_v55 = vld [vmem:[#allocation16_spill] sm:$0xff]  ;;  %v4717_v9 = vld [vmem:[#allocation18_spill] sm:$0xff] }
  0xde   : >>> { %v1048_v21 = vadd.f32 %v1032_v22, %v1004_v29  ;;  %v1049_v2 = vadd.f32 %v1033_v56, %v1005_v11  ;;  %4711 = vst [vmem:[#allocation66_spill] sm:$0xff] %v3624_v46  ;;  %v1062_v39 = vmul.f32 %v3458_v25, %v4712_v24  ;;  %4713 = vst [vmem:[#allocation15_spill] sm:$0xff] %v3629_v38  ;;  %v3632_v47 = vld [vmem:[%s3050_s7 + $0x161] sm:$0xff]  ;;  %v4716_v29 = vld [vmem:[#allocation17_spill] sm:$0xff] }
  0xdf   : >>> { %4714 = vst [vmem:[#allocation67_spill] sm:$0xff] %v3632_v47  ;;  %v1063_v7 = vmul.f32 %v3458_v25, %v3609_v33  ;;  %v1064_v30 = vmul.f32 %v3458_v25, %v4715_v55  ;;  %v1065_v26 = vmul.f32 %v3458_v25, %v3612_v62  ;;  %v1066_v11 = vmul.f32 %v3458_v25, %v4716_v29  ;;  %v4718_v15 = vld [vmem:[#allocation19_spill] sm:$0xff]  ;;  %v4719_v0 = vld [vmem:[#allocation20_spill] sm:$0xff]  ;;  %v4720_v50 = vld [vmem:[#allocation21_spill] sm:$0xff] }
  0xe0   : >>> { %v1067_v18 = vmul.f32 %v3458_v25, %v3615_v13  ;;  %v1068_v23 = vmul.f32 %v3458_v25, %v4717_v9  ;;  %v1069_v10 = vmul.f32 %v3458_v25, %v3618_v14  ;;  %v1070_v32 = vmul.f32 %v3458_v25, %v4718_v15  ;;  %v3665_v13 = vld [vmem:[%s3050_s7 + $0x12] sm:$0xff] }
  0xe1   : >>> { %v1071_v12 = vmul.f32 %v3458_v25, %v3621_v49  ;;  %v1072_v17 = vmul.f32 %v3458_v25, %v4719_v0  ;;  %v1073_v20 = vmul.f32 %v3458_v25, %v3624_v46  ;;  %v1074_v22 = vmul.f32 %v3458_v25, %v4720_v50 }
  0xe2   : >>> { %v1075_v56 = vmul.f32 %v3458_v25, %v3629_v38  ;;  %v1076_v24 = vmul.f32 %v3458_v25, %v3174_v44  ;;  %v1077_v55 = vmul.f32 %v3458_v25, %v3632_v47  ;;  %v1078_v29 = vadd.f32 %v1062_v39, %v1034_v61  ;;  %v3668_v44 = vld [vmem:[%s3050_s7 + $0x42] sm:$0xff] }
  0xe3   : >>> { %v1079_v9 = vadd.f32 %v1063_v7, %v1035_v57  ;;  %v1080_v15 = vadd.f32 %v1064_v30, %v1036_v3  ;;  %v1081_v0 = vadd.f32 %v1065_v26, %v1037_v45  ;;  %v1082_v49 = vadd.f32 %v1066_v11, %v1038_v31  ;;  %v3671_v57 = vld [vmem:[%s3050_s7 + $0x72] sm:$0xff]  ;;  %v3674_v3 = vld [vmem:[%s3050_s7 + $0xa2] sm:$0xff] }
  0xe4   : >>> { %v1083_v46 = vadd.f32 %v1067_v18, %v1039_v4  ;;  %v1084_v50 = vadd.f32 %v1068_v23, %v1040_v37  ;;  %v1085_v14 = vadd.f32 %v1069_v10, %v1041_v52  ;;  %v1086_v38 = vadd.f32 %v1070_v32, %v1042_v63  ;;  %4721 = vst [vmem:[#allocation16_spill] sm:$0xff] %v3671_v57  ;;  %v3677_v37 = vld [vmem:[%s3050_s7 + $0xd2] sm:$0xff]  ;;  %v3680_v52 = vld [vmem:[%s3050_s7 + $0x102] sm:$0xff] }
  0xe5   : >>> { %v1087_v25 = vadd.f32 %v1071_v12, %v1043_v28  ;;  %v1088_v47 = vadd.f32 %v1072_v17, %v1044_v59  ;;  %v1089_v61 = vadd.f32 %v1073_v20, %v1045_v16  ;;  %v1090_v39 = vadd.f32 %v1074_v22, %v1046_v41  ;;  %4722 = vst [vmem:[#allocation17_spill] sm:$0xff] %v3674_v3  ;;  %v4725_v63 = vld [vmem:[#allocation22_spill] sm:$0xff]  ;;  %v3688_v28 = vld [vmem:[%s3050_s7 + $0x162] sm:$0xff]  ;;  %v4730_v11 = vld [vmem:[#allocation25_spill] sm:$0xff] }
  0xe6   : >>> { %v1091_v45 = vadd.f32 %v1075_v56, %v1047_v19  ;;  %v1092_v31 = vadd.f32 %v1076_v24, %v1048_v21  ;;  %v1093_v4 = vadd.f32 %v1077_v55, %v1049_v2  ;;  %4723 = vst [vmem:[#allocation18_spill] sm:$0xff] %v3677_v37  ;;  %4724 = vst [vmem:[#allocation19_spill] sm:$0xff] %v3680_v52  ;;  %v3685_v30 = vld [vmem:[%s3050_s7 + $0x132] sm:$0xff]  ;;  %v4728_v16 = vld [vmem:[#allocation23_spill] sm:$0xff] }
  0xe7   : >>> { %v1106_v7 = vmul.f32 %v3462_v43, %v4725_v63  ;;  %4726 = vst [vmem:[#allocation20_spill] sm:$0xff] %v3685_v30  ;;  %4727 = vst [vmem:[#allocation21_spill] sm:$0xff] %v3688_v28  ;;  %v1107_v59 = vmul.f32 %v3462_v43, %v3665_v13  ;;  %v1108_v41 = vmul.f32 %v3462_v43, %v4728_v16  ;;  %v4729_v21 = vld [vmem:[#allocation24_spill] sm:$0xff]  ;;  %v4731_v10 = vld [vmem:[#allocation26_spill] sm:$0xff] }
  0xe8   : >>> { %v1109_v19 = vmul.f32 %v3462_v43, %v3668_v44  ;;  %v1110_v2 = vmul.f32 %v3462_v43, %v4729_v21  ;;  %v1111_v26 = vmul.f32 %v3462_v43, %v3671_v57  ;;  %v1112_v18 = vmul.f32 %v3462_v43, %v4730_v11  ;;  %v4732_v17 = vld [vmem:[#allocation27_spill] sm:$0xff]  ;;  %v4733_v56 = vld [vmem:[#allocation28_spill] sm:$0xff]  ;;  %v3721_v57 = vld [vmem:[%s3050_s7 + $0x13] sm:$0xff] }
  0xe9   : >>> { %v1113_v23 = vmul.f32 %v3462_v43, %v3674_v3  ;;  %v1114_v32 = vmul.f32 %v3462_v43, %v4731_v10  ;;  %v1115_v12 = vmul.f32 %v3462_v43, %v3677_v37  ;;  %v1116_v20 = vmul.f32 %v3462_v43, %v4732_v17 }
  0xea   : >>> { %v1117_v22 = vmul.f32 %v3462_v43, %v3680_v52  ;;  %v1118_v24 = vmul.f32 %v3462_v43, %v4733_v56  ;;  %v1119_v55 = vmul.f32 %v3462_v43, %v3685_v30  ;;  %v1120_v63 = vmul.f32 %v3462_v43, %v3230_v60  ;;  %v3724_v60 = vld [vmem:[%s3050_s7 + $0x43] sm:$0xff] }
  0xeb   : >>> { %v1121_v16 = vmul.f32 %v3462_v43, %v3688_v28  ;;  %v1122_v21 = vadd.f32 %v1106_v7, %v1078_v29  ;;  %v1123_v11 = vadd.f32 %v1107_v59, %v1079_v9  ;;  %v1124_v10 = vadd.f32 %v1108_v41, %v1080_v15  ;;  %v3727_v9 = vld [vmem:[%s3050_s7 + $0x73] sm:$0xff]  ;;  %v3730_v15 = vld [vmem:[%s3050_s7 + $0xa3] sm:$0xff] }
  0xec   : >>> { %v1125_v17 = vadd.f32 %v1109_v19, %v1081_v0  ;;  %v1126_v37 = vadd.f32 %v1110_v2, %v1082_v49  ;;  %v1127_v52 = vadd.f32 %v1111_v26, %v1083_v46  ;;  %v1128_v56 = vadd.f32 %v1112_v18, %v1084_v50  ;;  %4734 = vst [vmem:[#allocation22_spill] sm:$0xff] %v3727_v9  ;;  %v3733_v50 = vld [vmem:[%s3050_s7 + $0xd3] sm:$0xff]  ;;  %v4743_v2 = vld [vmem:[#allocation32_spill] sm:$0xff] }
  0xed   : >>> { %v1129_v3 = vadd.f32 %v1113_v23, %v1085_v14  ;;  %v1130_v30 = vadd.f32 %v1114_v32, %v1086_v38  ;;  %v1131_v43 = vadd.f32 %v1115_v12, %v1087_v25  ;;  %v1132_v28 = vadd.f32 %v1116_v20, %v1088_v47  ;;  %4735 = vst [vmem:[#allocation23_spill] sm:$0xff] %v3730_v15  ;;  %v3736_v14 = vld [vmem:[%s3050_s7 + $0x103] sm:$0xff]  ;;  %v4738_v38 = vld [vmem:[#allocation29_spill] sm:$0xff]  ;;  %v4745_v20 = vld [vmem:[#allocation34_spill] sm:$0xff] }
  0xee   : >>> { %v1133_v29 = vadd.f32 %v1117_v22, %v1089_v61  ;;  %v1134_v7 = vadd.f32 %v1118_v24, %v1090_v39  ;;  %v1135_v49 = vadd.f32 %v1119_v55, %v1091_v45  ;;  %v1136_v46 = vadd.f32 %v1120_v63, %v1092_v31  ;;  %4736 = vst [vmem:[#allocation24_spill] sm:$0xff] %v3733_v50  ;;  %v3741_v41 = vld [vmem:[%s3050_s7 + $0x133] sm:$0xff]  ;;  %v3744_v25 = vld [vmem:[%s3050_s7 + $0x163] sm:$0xff] }
  0xef   : >>> { %v1137_v0 = vadd.f32 %v1121_v16, %v1093_v4  ;;  %4737 = vst [vmem:[#allocation25_spill] sm:$0xff] %v3736_v14  ;;  %v1150_v59 = vmul.f32 %v3471_v5, %v4738_v38  ;;  %4739 = vst [vmem:[#allocation26_spill] sm:$0xff] %v3741_v41  ;;  %v1151_v47 = vmul.f32 %v3471_v5, %v3721_v57  ;;  %v4741_v61 = vld [vmem:[#allocation30_spill] sm:$0xff]  ;;  %v4742_v31 = vld [vmem:[#allocation31_spill] sm:$0xff] }
  0xf0   : >>> { %4740 = vst [vmem:[#allocation27_spill] sm:$0xff] %v3744_v25  ;;  %v1152_v39 = vmul.f32 %v3471_v5, %v4741_v61  ;;  %v1153_v45 = vmul.f32 %v3471_v5, %v3724_v60  ;;  %v1154_v4 = vmul.f32 %v3471_v5, %v4742_v31  ;;  %v1155_v19 = vmul.f32 %v3471_v5, %v3727_v9  ;;  %v4744_v23 = vld [vmem:[#allocation33_spill] sm:$0xff]  ;;  %v4746_v55 = vld [vmem:[#allocation35_spill] sm:$0xff] }
  0xf1   : >>> { %v1156_v26 = vmul.f32 %v3471_v5, %v4743_v2  ;;  %v1157_v18 = vmul.f32 %v3471_v5, %v3730_v15  ;;  %v1158_v32 = vmul.f32 %v3471_v5, %v4744_v23  ;;  %v1159_v12 = vmul.f32 %v3471_v5, %v3733_v50  ;;  %v3777_v9 = vld [vmem:[%s3050_s7 + $0x14] sm:$0xff] }
  0xf2   : >>> { %v1160_v22 = vmul.f32 %v3471_v5, %v4745_v20  ;;  %v1161_v24 = vmul.f32 %v3471_v5, %v3736_v14  ;;  %v1162_v63 = vmul.f32 %v3471_v5, %v4746_v55  ;;  %v1163_v16 = vmul.f32 %v3471_v5, %v3741_v41 }
  0xf3   : >>> { %v1164_v38 = vmul.f32 %v3471_v5, %v3286_v27  ;;  %v1165_v61 = vmul.f32 %v3471_v5, %v3744_v25  ;;  %v1166_v31 = vadd.f32 %v1150_v59, %v1122_v21  ;;  %v1167_v2 = vadd.f32 %v1151_v47, %v1123_v11  ;;  %v3780_v27 = vld [vmem:[%s3050_s7 + $0x44] sm:$0xff]  ;;  %v3783_v11 = vld [vmem:[%s3050_s7 + $0x74] sm:$0xff] }
  0xf4   : >>> { %v1168_v23 = vadd.f32 %v1152_v39, %v1124_v10  ;;  %v1169_v20 = vadd.f32 %v1153_v45, %v1125_v17  ;;  %v1170_v50 = vadd.f32 %v1154_v4, %v1126_v37  ;;  %v1171_v14 = vadd.f32 %v1155_v19, %v1127_v52  ;;  %4747 = vst [vmem:[#allocation28_spill] sm:$0xff] %v3780_v27  ;;  %v3786_v10 = vld [vmem:[%s3050_s7 + $0xa4] sm:$0xff]  ;;  %v3797_v39 = vld [vmem:[%s3050_s7 + $0x134] sm:$0xff] }
  0xf5   : >>> { %v1172_v55 = vadd.f32 %v1156_v26, %v1128_v56  ;;  %v1173_v15 = vadd.f32 %v1157_v18, %v1129_v3  ;;  %v1174_v41 = vadd.f32 %v1158_v32, %v1130_v30  ;;  %v1175_v5 = vadd.f32 %v1159_v12, %v1131_v43  ;;  %4748 = vst [vmem:[#allocation29_spill] sm:$0xff] %v3783_v11  ;;  %v3789_v56 = vld [vmem:[%s3050_s7 + $0xd4] sm:$0xff]  ;;  %v3792_v3 = vld [vmem:[%s3050_s7 + $0x104] sm:$0xff] }
  0xf6   : >>> { %v1176_v25 = vadd.f32 %v1160_v22, %v1132_v28  ;;  %v1177_v21 = vadd.f32 %v1161_v24, %v1133_v29  ;;  %v1178_v59 = vadd.f32 %v1162_v63, %v1134_v7  ;;  %4749 = vst [vmem:[#allocation30_spill] sm:$0xff] %v3786_v10  ;;  %v1179_v37 = vadd.f32 %v1163_v16, %v1135_v49  ;;  %v4752_v30 = vld [vmem:[#allocation36_spill] sm:$0xff]  ;;  %v4755_v29 = vld [vmem:[#allocation37_spill] sm:$0xff]  ;;  %v4757_v4 = vld [vmem:[#allocation39_spill] sm:$0xff] }
  0xf7   : >>> { %v1180_v52 = vadd.f32 %v1164_v38, %v1136_v46  ;;  %v1181_v17 = vadd.f32 %v1165_v61, %v1137_v0  ;;  %4750 = vst [vmem:[#allocation31_spill] sm:$0xff] %v3789_v56  ;;  %4751 = vst [vmem:[#allocation32_spill] sm:$0xff] %v3792_v3  ;;  %v1194_v47 = vmul.f32 %v3475_v6, %v4752_v30  ;;  %v3800_v43 = vld [vmem:[%s3050_s7 + $0x164] sm:$0xff]  ;;  %v4756_v46 = vld [vmem:[#allocation38_spill] sm:$0xff] }
  0xf8   : >>> { %4753 = vst [vmem:[#allocation33_spill] sm:$0xff] %v3797_v39  ;;  %4754 = vst [vmem:[#allocation34_spill] sm:$0xff] %v3800_v43  ;;  %v1195_v28 = vmul.f32 %v3475_v6, %v3777_v9  ;;  %v1196_v7 = vmul.f32 %v3475_v6, %v4755_v29  ;;  %v1197_v49 = vmul.f32 %v3475_v6, %v3780_v27  ;;  %v4758_v18 = vld [vmem:[#allocation40_spill] sm:$0xff]  ;;  %v4759_v22 = vld [vmem:[#allocation41_spill] sm:$0xff] }
  0xf9   : >>> { %v1198_v0 = vmul.f32 %v3475_v6, %v4756_v46  ;;  %v1199_v45 = vmul.f32 %v3475_v6, %v3783_v11  ;;  %v1200_v19 = vmul.f32 %v3475_v6, %v4757_v4  ;;  %v1201_v26 = vmul.f32 %v3475_v6, %v3786_v10  ;;  %v4760_v16 = vld [vmem:[#allocation42_spill] sm:$0xff] }
  0xfa   : >>> { %v1202_v32 = vmul.f32 %v3475_v6, %v4758_v18  ;;  %v1203_v12 = vmul.f32 %v3475_v6, %v3789_v56  ;;  %v1204_v24 = vmul.f32 %v3475_v6, %v4759_v22  ;;  %v1205_v63 = vmul.f32 %v3475_v6, %v3792_v3  ;;  %v3833_v11 = vld [vmem:[%s3050_s7 + $0x15] sm:$0xff] }
  0xfb   : >>> { %v1206_v38 = vmul.f32 %v3475_v6, %v4760_v16  ;;  %v1207_v61 = vmul.f32 %v3475_v6, %v3797_v39  ;;  %v1208_v30 = vmul.f32 %v3475_v6, %v3342_v42  ;;  %v1209_v29 = vmul.f32 %v3475_v6, %v3800_v43  ;;  %4761 = vst [vmem:[#allocation35_spill] sm:$0xff] %v3833_v11  ;;  %v3836_v42 = vld [vmem:[%s3050_s7 + $0x45] sm:$0xff] }
  0xfc   : >>> { %v1210_v46 = vadd.f32 %v1194_v47, %v1166_v31  ;;  %v1211_v4 = vadd.f32 %v1195_v28, %v1167_v2  ;;  %v1212_v18 = vadd.f32 %v1196_v7, %v1168_v23  ;;  %v1213_v22 = vadd.f32 %v1197_v49, %v1169_v20  ;;  %4762 = vst [vmem:[#allocation36_spill] sm:$0xff] %v3836_v42  ;;  %v3839_v2 = vld [vmem:[%s3050_s7 + $0x75] sm:$0xff]  ;;  %v3842_v23 = vld [vmem:[%s3050_s7 + $0xa5] sm:$0xff] }
  0xfd   : >>> { %v1214_v56 = vadd.f32 %v1198_v0, %v1170_v50  ;;  %v1215_v3 = vadd.f32 %v1199_v45, %v1171_v14  ;;  %v1216_v16 = vadd.f32 %v1200_v19, %v1172_v55  ;;  %v1217_v10 = vadd.f32 %v1201_v26, %v1173_v15  ;;  %4763 = vst [vmem:[#allocation37_spill] sm:$0xff] %v3839_v2  ;;  %v3845_v55 = vld [vmem:[%s3050_s7 + $0xd5] sm:$0xff]  ;;  %v3848_v15 = vld [vmem:[%s3050_s7 + $0x105] sm:$0xff] }
  0xfe   : >>> { %v1218_v39 = vadd.f32 %v1202_v32, %v1174_v41  ;;  %v1219_v6 = vadd.f32 %v1203_v12, %v1175_v5  ;;  %v1220_v43 = vadd.f32 %v1204_v24, %v1176_v25  ;;  %v1221_v31 = vadd.f32 %v1205_v63, %v1177_v21  ;;  %4764 = vst [vmem:[#allocation38_spill] sm:$0xff] %v3842_v23  ;;  %v3853_v28 = vld [vmem:[%s3050_s7 + $0x135] sm:$0xff]  ;;  %v3856_v5 = vld [vmem:[%s3050_s7 + $0x165] sm:$0xff] }
  0xff   : >>> { %v1222_v47 = vadd.f32 %v1206_v38, %v1178_v59  ;;  %v1223_v50 = vadd.f32 %v1207_v61, %v1179_v37  ;;  %v1224_v14 = vadd.f32 %v1208_v30, %v1180_v52  ;;  %v1225_v20 = vadd.f32 %v1209_v29, %v1181_v17  ;;  %4765 = vst [vmem:[#allocation39_spill] sm:$0xff] %v3845_v55  ;;  %v4769_v21 = vld [vmem:[#allocation43_spill] sm:$0xff]  ;;  %v4770_v52 = vld [vmem:[#allocation44_spill] sm:$0xff]  ;;  %v4772_v45 = vld [vmem:[#allocation46_spill] sm:$0xff] }
 0x100   : >>> { %4766 = vst [vmem:[#allocation40_spill] sm:$0xff] %v3848_v15  ;;  %v1238_v41 = vmul.f32 %v3479_v35, %v3369_v54  ;;  %4767 = vst [vmem:[#allocation41_spill] sm:$0xff] %v3853_v28  ;;  %v1239_v25 = vmul.f32 %v3479_v35, %v3833_v11  ;;  %v1240_v59 = vmul.f32 %v3479_v35, %v4769_v21  ;;  %v4771_v54 = vld [vmem:[#allocation45_spill] sm:$0xff]  ;;  %v4773_v32 = vld [vmem:[#allocation47_spill] sm:$0xff] }
 0x101   : >>> { %4768 = vst [vmem:[#allocation42_spill] sm:$0xff] %v3856_v5  ;;  %v1241_v37 = vmul.f32 %v3479_v35, %v3836_v42  ;;  %v1242_v17 = vmul.f32 %v3479_v35, %v4770_v52  ;;  %v1243_v7 = vmul.f32 %v3479_v35, %v3839_v2  ;;  %v1244_v49 = vmul.f32 %v3479_v35, %v4771_v54  ;;  %v4774_v63 = vld [vmem:[#allocation48_spill] sm:$0xff]  ;;  %v4800_v42 = vld [vmem:[#allocation55_spill] sm:$0xff] }
 0x102   : >>> { %v1245_v0 = vmul.f32 %v3479_v35, %v3842_v23  ;;  %v1246_v19 = vmul.f32 %v3479_v35, %v4772_v45  ;;  %v1247_v26 = vmul.f32 %v3479_v35, %v3845_v55  ;;  %v1248_v12 = vmul.f32 %v3479_v35, %v4773_v32 }
 0x103   : >>> { %v1249_v24 = vmul.f32 %v3479_v35, %v3848_v15  ;;  %v1250_v38 = vmul.f32 %v3479_v35, %v4774_v63  ;;  %v1251_v61 = vmul.f32 %v3479_v35, %v3853_v28  ;;  %v1252_v30 = vmul.f32 %v3479_v35, %v3398_v51  ;;  %v3889_v15 = vld [vmem:[%s3045_s6 + $0x10] sm:$0xff] }
 0x104   : >>> { %v1253_v29 = vmul.f32 %v3479_v35, %v3856_v5  ;;  %v1254_v21 = vadd.f32 %v1238_v41, %v1210_v46  ;;  %v1255_v52 = vadd.f32 %v1239_v25, %v1211_v4  ;;  %v1256_v54 = vadd.f32 %v1240_v59, %v1212_v18  ;;  %4775 = vst [vmem:[#allocation43_spill] sm:$0xff] %v3889_v15  ;;  %v4778_v25 = vld [vmem:[#allocation10_spill] sm:$0xff] }
 0x105   : >>> { %v1257_v45 = vadd.f32 %v1241_v37, %v1213_v22  ;;  %v1258_v32 = vadd.f32 %v1242_v17, %v1214_v56  ;;  %v1259_v63 = vadd.f32 %v1243_v7, %v1215_v3  ;;  %v1260_v55 = vadd.f32 %v1244_v49, %v1216_v16  ;;  %v3892_v22 = vld [vmem:[%s3050_s7 + $0x16] sm:$0xff]  ;;  %v3895_v56 = vld [vmem:[%s3050_s7 + $0x46] sm:$0xff] }
 0x106   : >>> { %v1261_v28 = vadd.f32 %v1245_v0, %v1217_v10  ;;  %v1262_v23 = vadd.f32 %v1246_v19, %v1218_v39  ;;  %v1263_v2 = vadd.f32 %v1247_v26, %v1219_v6  ;;  %v1264_v51 = vadd.f32 %v1248_v12, %v1220_v43  ;;  %4776 = vst [vmem:[#allocation44_spill] sm:$0xff] %v3892_v22  ;;  %v4779_v3 = vld [vmem:[#allocation49_spill] sm:$0xff]  ;;  %v3903_v39 = vld [vmem:[%s3050_s7 + $0xa6] sm:$0xff]  ;;  %v4788_v7 = vld [vmem:[#allocation50_spill] sm:$0xff] }
 0x107   : >>> { %v1265_v35 = vadd.f32 %v1249_v24, %v1221_v31  ;;  %v1266_v46 = vadd.f32 %v1250_v38, %v1222_v47  ;;  %v1267_v4 = vadd.f32 %v1251_v61, %v1223_v50  ;;  %v1268_v41 = vadd.f32 %v1252_v30, %v1224_v14  ;;  %4777 = vst [vmem:[#allocation45_spill] sm:$0xff] %v3895_v56  ;;  %v3900_v10 = vld [vmem:[%s3050_s7 + $0x76] sm:$0xff]  ;;  %v4782_v43 = vld [vmem:[#allocation12_spill] sm:$0xff]  ;;  %v4789_v0 = vld [vmem:[#allocation7_spill] sm:$0xff] }
 0x108   : >>> { %v1269_v18 = vadd.f32 %v1253_v29, %v1225_v20  ;;  %v1281_v16 = vrot.slane %v4779_v3, %v4778_v25  ;;  %4780 = vst [vmem:[#allocation46_spill] sm:$0xff] %v3900_v10  ;;  %4781 = vst [vmem:[#allocation47_spill] sm:$0xff] %v3903_v39  ;;  %v3907_v6 = vrot.slane %v4779_v3, %v4782_v43  ;;  %v4783_v31 = vld [vmem:[#allocation4_spill] sm:$0xff]  ;;  %v4784_v50 = vld [vmem:[#allocation5_spill] sm:$0xff] }
 0x109   : >>> { %v3911_v47 = vrot.slane %v3889_v15, %v4783_v31  ;;  %v3915_v14 = vrot.slane %v3889_v15, %v4784_v50  ;;  %v4785_v20 = vld [vmem:[#allocation6_spill] sm:$0xff]  ;;  %v3925_v17 = vld [vmem:[%s3050_s7 + $0x106] sm:$0xff]  ;;  %v3930_v19 = vrot.slane %v3889_v15, %v4789_v0  ;;  %v4792_v24 = vld [vmem:[#allocation9_spill] sm:$0xff] }
 0x10a   : >>> { %v3919_v59 = vrot.slane %v3889_v15, %v4785_v20  ;;  %v3922_v37 = vld [vmem:[%s3050_s7 + $0xd6] sm:$0xff]  ;;  %4787 = vst [vmem:[#allocation49_spill] sm:$0xff] %v3925_v17  ;;  %v1282_v49 = vmul.f32 %v1281_v16, %v4788_v7  ;;  %v4790_v26 = vld [vmem:[#allocation8_spill] sm:$0xff]  ;;  %v3938_v38 = vrot.slane %v3889_v15, %v4792_v24  ;;  %v1283_v29 = vmul.f32 %v1281_v16, %v3892_v22  ;;  %v4796_v3 = vld [vmem:[#allocation51_spill] sm:$0xff] }
 0x10b   : >>> { %4786 = vst [vmem:[#allocation48_spill] sm:$0xff] %v3922_v37  ;;  %v3934_v12 = vrot.slane %v3889_v15, %v4790_v26  ;;  %v3941_v61 = vld [vmem:[%s3050_s7 + $0x136] sm:$0xff]  ;;  %v3944_v30 = vld [vmem:[%s3050_s7 + $0x166] sm:$0xff]  ;;  %v1284_v7 = vmul.f32 %v1281_v16, %v4796_v3  ;;  %v1285_v20 = vmul.f32 %v1281_v16, %v3895_v56  ;;  %v1287_v31 = vmul.f32 %v1281_v16, %v3900_v10 }
 0x10c   : >>> { %4793 = vst [vmem:[#allocation7_spill] sm:$0xff] %v3938_v38  ;;  %4794 = vst [vmem:[#allocation8_spill] sm:$0xff] %v3941_v61  ;;  %v4797_v0 = vld [vmem:[#allocation52_spill] sm:$0xff]  ;;  %v4798_v26 = vld [vmem:[#allocation53_spill] sm:$0xff]  ;;  %v1289_v25 = vmul.f32 %v1281_v16, %v3903_v39  ;;  %v1291_v5 = vmul.f32 %v1281_v16, %v3922_v37  ;;  %v1292_v38 = vmul.f32 %v1281_v16, %v4800_v42 }
 0x10d   : >>> { %4791 = vst [vmem:[#allocation50_spill] sm:$0xff] %v3934_v12  ;;  %4795 = vst [vmem:[#allocation9_spill] sm:$0xff] %v3944_v30  ;;  %v1286_v50 = vmul.f32 %v1281_v16, %v4797_v0  ;;  %v1288_v43 = vmul.f32 %v1281_v16, %v4798_v26  ;;  %v4799_v24 = vld [vmem:[#allocation54_spill] sm:$0xff]  ;;  %v1293_v3 = vmul.f32 %v1281_v16, %v3925_v17  ;;  %v4801_v22 = vld [vmem:[#allocation56_spill] sm:$0xff] }
 0x10e   : >>> { %v1290_v15 = vmul.f32 %v1281_v16, %v4799_v24  ;;  %v1294_v56 = vmul.f32 %v1281_v16, %v4801_v22  ;;  %v1295_v0 = vmul.f32 %v1281_v16, %v3941_v61  ;;  %v1296_v10 = vmul.f32 %v1281_v16, %v3486_v53  ;;  %v3962_v61 = vld [vmem:[%s3050_s7 + $0x17] sm:$0xff]  ;;  %v3965_v53 = vld [vmem:[%s3050_s7 + $0x47] sm:$0xff] }
 0x10f   : >>> { %v1297_v26 = vmul.f32 %v1281_v16, %v3944_v30  ;;  %v1298_v39 = vadd.f32 %v1282_v49, %v1254_v21  ;;  %v1299_v24 = vadd.f32 %v1283_v29, %v1255_v52  ;;  %v1300_v11 = vadd.f32 %v1284_v7, %v1256_v54  ;;  %v3968_v52 = vld [vmem:[%s3050_s7 + $0x77] sm:$0xff]  ;;  %v3971_v54 = vld [vmem:[%s3050_s7 + $0xa7] sm:$0xff] }
 0x110   : >>> { %v1301_v37 = vadd.f32 %v1285_v20, %v1257_v45  ;;  %v1302_v27 = vadd.f32 %v1286_v50, %v1258_v32  ;;  %v1303_v42 = vadd.f32 %v1287_v31, %v1259_v63  ;;  %v1304_v12 = vadd.f32 %v1288_v43, %v1260_v55  ;;  %4802 = vst [vmem:[#allocation51_spill] sm:$0xff] %v3968_v52  ;;  %v3974_v55 = vld [vmem:[%s3050_s7 + $0xd7] sm:$0xff] }
 0x111   : >>> { %v1305_v17 = vadd.f32 %v1289_v25, %v1261_v28  ;;  %v1306_v22 = vadd.f32 %v1290_v15, %v1262_v23  ;;  %v1307_v16 = vadd.f32 %v1291_v5, %v1263_v2  ;;  %v1308_v30 = vadd.f32 %v1292_v38, %v1264_v51  ;;  %4803 = vst [vmem:[#allocation52_spill] sm:$0xff] %v3971_v54  ;;  %v3977_v28 = vld [vmem:[%s3050_s7 + $0x107] sm:$0xff]  ;;  %v3982_v15 = vld [vmem:[%s3050_s7 + $0x137] sm:$0xff] }
 0x112   : >>> { %v1309_v21 = vadd.f32 %v1293_v3, %v1265_v35  ;;  %v1310_v49 = vadd.f32 %v1294_v56, %v1266_v46  ;;  %v1311_v45 = vadd.f32 %v1295_v0, %v1267_v4  ;;  %v1312_v32 = vadd.f32 %v1296_v10, %v1268_v41  ;;  %4804 = vst [vmem:[#allocation53_spill] sm:$0xff] %v3974_v55  ;;  %v3985_v2 = vld [vmem:[%s3050_s7 + $0x167] sm:$0xff]  ;;  %v4808_v51 = vld [vmem:[#allocation57_spill] sm:$0xff]  ;;  %v4809_v4 = vld [vmem:[#allocation58_spill] sm:$0xff] }
 0x113   : >>> { %v1313_v63 = vadd.f32 %v1297_v26, %v1269_v18  ;;  %4805 = vst [vmem:[#allocation54_spill] sm:$0xff] %v3977_v28  ;;  %v1326_v23 = vmul.f32 %v3907_v6, %v3498_v1  ;;  %4806 = vst [vmem:[#allocation55_spill] sm:$0xff] %v3982_v15  ;;  %v1327_v5 = vmul.f32 %v3907_v6, %v3962_v61  ;;  %v4810_v1 = vld [vmem:[#allocation59_spill] sm:$0xff]  ;;  %v4811_v10 = vld [vmem:[#allocation60_spill] sm:$0xff] }
 0x114   : >>> { %4807 = vst [vmem:[#allocation56_spill] sm:$0xff] %v3985_v2  ;;  %v1328_v35 = vmul.f32 %v3907_v6, %v4808_v51  ;;  %v1329_v46 = vmul.f32 %v3907_v6, %v3965_v53  ;;  %v1330_v41 = vmul.f32 %v3907_v6, %v4809_v4  ;;  %v1331_v18 = vmul.f32 %v3907_v6, %v3968_v52  ;;  %v4812_v50 = vld [vmem:[#allocation61_spill] sm:$0xff]  ;;  %v4813_v29 = vld [vmem:[#allocation62_spill] sm:$0xff]  ;;  %v4814_v0 = vld [vmem:[#allocation63_spill] sm:$0xff] }
 0x115   : >>> { %v1332_v56 = vmul.f32 %v3907_v6, %v4810_v1  ;;  %v1333_v25 = vmul.f32 %v3907_v6, %v3971_v54  ;;  %v1334_v43 = vmul.f32 %v3907_v6, %v4811_v10  ;;  %v1335_v31 = vmul.f32 %v3907_v6, %v3974_v55  ;;  %v4018_v52 = vld [vmem:[%s3050_s7 + $0x18] sm:$0xff] }
 0x116   : >>> { %v1336_v20 = vmul.f32 %v3907_v6, %v4812_v50  ;;  %v1337_v38 = vmul.f32 %v3907_v6, %v3977_v28  ;;  %v1338_v7 = vmul.f32 %v3907_v6, %v4813_v29  ;;  %v1339_v3 = vmul.f32 %v3907_v6, %v3982_v15 }
 0x117   : >>> { %v1340_v26 = vmul.f32 %v3907_v6, %v4814_v0  ;;  %v1341_v51 = vmul.f32 %v3907_v6, %v3985_v2  ;;  %v1342_v4 = vadd.f32 %v1326_v23, %v1298_v39  ;;  %v1343_v1 = vadd.f32 %v1327_v5, %v1299_v24  ;;  %v4021_v0 = vld [vmem:[%s3050_s7 + $0x48] sm:$0xff]  ;;  %v4024_v24 = vld [vmem:[%s3050_s7 + $0x78] sm:$0xff] }
 0x118   : >>> { %v1344_v10 = vadd.f32 %v1328_v35, %v1300_v11  ;;  %v1345_v50 = vadd.f32 %v1329_v46, %v1301_v37  ;;  %v1346_v55 = vadd.f32 %v1330_v41, %v1302_v27  ;;  %v1347_v28 = vadd.f32 %v1331_v18, %v1303_v42  ;;  %v4027_v11 = vld [vmem:[%s3050_s7 + $0xa8] sm:$0xff]  ;;  %v4038_v5 = vld [vmem:[%s3050_s7 + $0x138] sm:$0xff] }
 0x119   : >>> { %v1348_v29 = vadd.f32 %v1332_v56, %v1304_v12  ;;  %v1349_v54 = vadd.f32 %v1333_v25, %v1305_v17  ;;  %v1350_v15 = vadd.f32 %v1334_v43, %v1306_v22  ;;  %v1351_v6 = vadd.f32 %v1335_v31, %v1307_v16  ;;  %v4030_v12 = vld [vmem:[%s3050_s7 + $0xd8] sm:$0xff]  ;;  %v4033_v17 = vld [vmem:[%s3050_s7 + $0x108] sm:$0xff]  ;;  %v4817_v56 = vld [vmem:[#allocation65_spill] sm:$0xff] }
 0x11a   : >>> { %v1352_v2 = vadd.f32 %v1336_v20, %v1308_v30  ;;  %v1353_v39 = vadd.f32 %v1337_v38, %v1309_v21  ;;  %v1354_v23 = vadd.f32 %v1338_v7, %v1310_v49  ;;  %v1355_v27 = vadd.f32 %v1339_v3, %v1311_v45  ;;  %v4041_v16 = vld [vmem:[%s3050_s7 + $0x168] sm:$0xff] }
 0x11b   : >>> { %v1356_v37 = vadd.f32 %v1340_v26, %v1312_v32  ;;  %v1357_v42 = vadd.f32 %v1341_v51, %v1313_v63  ;;  %v1370_v22 = vmul.f32 %v3911_v47, %v3553_v34  ;;  %4815 = vst [vmem:[#allocation57_spill] sm:$0xff] %v4041_v16  ;;  %v1371_v30 = vmul.f32 %v3911_v47, %v4018_v52  ;;  %v4816_v41 = vld [vmem:[#allocation64_spill] sm:$0xff] }
 0x11c   : >>> { %v1372_v21 = vmul.f32 %v3911_v47, %v3556_v8  ;;  %v1373_v49 = vmul.f32 %v3911_v47, %v4021_v0  ;;  %v1374_v45 = vmul.f32 %v3911_v47, %v3559_v40  ;;  %v1375_v32 = vmul.f32 %v3911_v47, %v4024_v24 }
 0x11d   : >>> { %v1376_v34 = vmul.f32 %v3911_v47, %v3562_v36  ;;  %v1377_v63 = vmul.f32 %v3911_v47, %v4027_v11  ;;  %v1378_v35 = vmul.f32 %v3911_v47, %v3565_v58  ;;  %v1379_v8 = vmul.f32 %v3911_v47, %v4030_v12 }
 0x11e   : >>> { %v1380_v46 = vmul.f32 %v3911_v47, %v3568_v48  ;;  %v1381_v40 = vmul.f32 %v3911_v47, %v4033_v17  ;;  %v1382_v36 = vmul.f32 %v3911_v47, %v4816_v41  ;;  %v1383_v18 = vmul.f32 %v3911_v47, %v4038_v5  ;;  %v4074_v41 = vld [vmem:[%s3050_s7 + $0x19] sm:$0xff] }
 0x11f   : >>> { %v1384_v58 = vmul.f32 %v3911_v47, %v4817_v56  ;;  %v1385_v25 = vmul.f32 %v3911_v47, %v4041_v16  ;;  %v1386_v43 = vadd.f32 %v1370_v22, %v1342_v4  ;;  %v1387_v48 = vadd.f32 %v1371_v30, %v1343_v1  ;;  %v4077_v56 = vld [vmem:[%s3050_s7 + $0x49] sm:$0xff]  ;;  %v4080_v1 = vld [vmem:[%s3050_s7 + $0x79] sm:$0xff] }
 0x120   : >>> { %v1388_v31 = vadd.f32 %v1372_v21, %v1344_v10  ;;  %v1389_v20 = vadd.f32 %v1373_v49, %v1345_v50  ;;  %v1390_v38 = vadd.f32 %v1374_v45, %v1346_v55  ;;  %v1391_v7 = vadd.f32 %v1375_v32, %v1347_v28  ;;  %v4083_v10 = vld [vmem:[%s3050_s7 + $0xa9] sm:$0xff]  ;;  %v4094_v30 = vld [vmem:[%s3050_s7 + $0x139] sm:$0xff] }
 0x121   : >>> { %v1392_v3 = vadd.f32 %v1376_v34, %v1348_v29  ;;  %v1393_v26 = vadd.f32 %v1377_v63, %v1349_v54  ;;  %v1394_v51 = vadd.f32 %v1378_v35, %v1350_v15  ;;  %v1395_v47 = vadd.f32 %v1379_v8, %v1351_v6  ;;  %4818 = vst [vmem:[#allocation58_spill] sm:$0xff] %v4083_v10  ;;  %v4086_v29 = vld [vmem:[%s3050_s7 + $0xd9] sm:$0xff]  ;;  %v4089_v54 = vld [vmem:[%s3050_s7 + $0x109] sm:$0xff] }
 0x122   : >>> { %v1396_v16 = vadd.f32 %v1380_v46, %v1352_v2  ;;  %v1397_v4 = vadd.f32 %v1381_v40, %v1353_v39  ;;  %v1398_v22 = vadd.f32 %v1382_v36, %v1354_v23  ;;  %v1399_v55 = vadd.f32 %v1383_v18, %v1355_v27  ;;  %4819 = vst [vmem:[#allocation59_spill] sm:$0xff] %v4086_v29  ;;  %v4097_v6 = vld [vmem:[%s3050_s7 + $0x169] sm:$0xff]  ;;  %v4823_v27 = vld [vmem:[#allocation11_spill] sm:$0xff]  ;;  %v4825_v45 = vld [vmem:[#allocation14_spill] sm:$0xff] }
 0x123   : >>> { %v1400_v28 = vadd.f32 %v1384_v58, %v1356_v37  ;;  %v1401_v50 = vadd.f32 %v1385_v25, %v1357_v42  ;;  %4820 = vst [vmem:[#allocation60_spill] sm:$0xff] %v4089_v54  ;;  %v1414_v15 = vmul.f32 %v3915_v14, %v3609_v33  ;;  %4821 = vst [vmem:[#allocation61_spill] sm:$0xff] %v4094_v30  ;;  %v4824_v33 = vld [vmem:[#allocation13_spill] sm:$0xff]  ;;  %v4826_v34 = vld [vmem:[#allocation66_spill] sm:$0xff] }
 0x124   : >>> { %4822 = vst [vmem:[#allocation62_spill] sm:$0xff] %v4097_v6  ;;  %v1415_v2 = vmul.f32 %v3915_v14, %v4074_v41  ;;  %v1416_v39 = vmul.f32 %v3915_v14, %v3612_v62  ;;  %v1417_v23 = vmul.f32 %v3915_v14, %v4077_v56  ;;  %v1418_v37 = vmul.f32 %v3915_v14, %v4823_v27  ;;  %v4827_v8 = vld [vmem:[#allocation15_spill] sm:$0xff] }
 0x125   : >>> { %v1419_v42 = vmul.f32 %v3915_v14, %v4080_v1  ;;  %v1420_v21 = vmul.f32 %v3915_v14, %v4824_v33  ;;  %v1421_v49 = vmul.f32 %v3915_v14, %v4083_v10  ;;  %v1422_v32 = vmul.f32 %v3915_v14, %v4825_v45  ;;  %v4828_v36 = vld [vmem:[#allocation67_spill] sm:$0xff] }
 0x126   : >>> { %v1423_v62 = vmul.f32 %v3915_v14, %v4086_v29  ;;  %v1424_v63 = vmul.f32 %v3915_v14, %v4826_v34  ;;  %v1425_v35 = vmul.f32 %v3915_v14, %v4089_v54  ;;  %v1426_v46 = vmul.f32 %v3915_v14, %v4827_v8  ;;  %v4130_v10 = vld [vmem:[%s3050_s7 + $0x1a] sm:$0xff] }
 0x127   : >>> { %v1427_v40 = vmul.f32 %v3915_v14, %v4094_v30  ;;  %v1428_v18 = vmul.f32 %v3915_v14, %v4828_v36  ;;  %v1429_v58 = vmul.f32 %v3915_v14, %v4097_v6  ;;  %v1430_v25 = vadd.f32 %v1414_v15, %v1386_v43  ;;  %v4133_v36 = vld [vmem:[%s3050_s7 + $0x4a] sm:$0xff] }
 0x128   : >>> { %v1431_v27 = vadd.f32 %v1415_v2, %v1387_v48  ;;  %v1432_v33 = vadd.f32 %v1416_v39, %v1388_v31  ;;  %v1433_v45 = vadd.f32 %v1417_v23, %v1389_v20  ;;  %v1434_v34 = vadd.f32 %v1418_v37, %v1390_v38  ;;  %4829 = vst [vmem:[#allocation63_spill] sm:$0xff] %v4133_v36  ;;  %v4136_v48 = vld [vmem:[%s3050_s7 + $0x7a] sm:$0xff]  ;;  %v4139_v31 = vld [vmem:[%s3050_s7 + $0xaa] sm:$0xff] }
 0x129   : >>> { %v1435_v54 = vadd.f32 %v1419_v42, %v1391_v7  ;;  %v1436_v8 = vadd.f32 %v1420_v21, %v1392_v3  ;;  %v1437_v29 = vadd.f32 %v1421_v49, %v1393_v26  ;;  %v1438_v30 = vadd.f32 %v1422_v32, %v1394_v51  ;;  %4830 = vst [vmem:[#allocation64_spill] sm:$0xff] %v4136_v48  ;;  %v4142_v3 = vld [vmem:[%s3050_s7 + $0xda] sm:$0xff]  ;;  %v4145_v26 = vld [vmem:[%s3050_s7 + $0x10a] sm:$0xff] }
 0x12a   : >>> { %v1439_v14 = vadd.f32 %v1423_v62, %v1395_v47  ;;  %v1440_v6 = vadd.f32 %v1424_v63, %v1396_v16  ;;  %v1441_v43 = vadd.f32 %v1425_v35, %v1397_v4  ;;  %v1442_v15 = vadd.f32 %v1426_v46, %v1398_v22  ;;  %4831 = vst [vmem:[#allocation65_spill] sm:$0xff] %v4139_v31  ;;  %v4150_v2 = vld [vmem:[%s3050_s7 + $0x13a] sm:$0xff]  ;;  %v4153_v47 = vld [vmem:[%s3050_s7 + $0x16a] sm:$0xff] }
 0x12b   : >>> { %v1443_v20 = vadd.f32 %v1427_v40, %v1399_v55  ;;  %v1444_v38 = vadd.f32 %v1428_v18, %v1400_v28  ;;  %v1445_v7 = vadd.f32 %v1429_v58, %v1401_v50  ;;  %4832 = vst [vmem:[#allocation11_spill] sm:$0xff] %v4142_v3  ;;  %4833 = vst [vmem:[#allocation13_spill] sm:$0xff] %v4145_v26  ;;  %v4836_v55 = vld [vmem:[#allocation16_spill] sm:$0xff]  ;;  %v4838_v37 = vld [vmem:[#allocation18_spill] sm:$0xff] }
 0x12c   : >>> { %v1458_v51 = vmul.f32 %v3919_v59, %v3665_v13  ;;  %4834 = vst [vmem:[#allocation14_spill] sm:$0xff] %v4150_v2  ;;  %4835 = vst [vmem:[#allocation66_spill] sm:$0xff] %v4153_v47  ;;  %v1459_v16 = vmul.f32 %v3919_v59, %v4130_v10  ;;  %v1460_v4 = vmul.f32 %v3919_v59, %v3668_v44  ;;  %v4837_v13 = vld [vmem:[#allocation17_spill] sm:$0xff]  ;;  %v4839_v21 = vld [vmem:[#allocation19_spill] sm:$0xff] }
 0x12d   : >>> { %v1461_v22 = vmul.f32 %v3919_v59, %v4133_v36  ;;  %v1462_v28 = vmul.f32 %v3919_v59, %v4836_v55  ;;  %v1463_v50 = vmul.f32 %v3919_v59, %v4136_v48  ;;  %v1464_v39 = vmul.f32 %v3919_v59, %v4837_v13  ;;  %v4840_v62 = vld [vmem:[#allocation20_spill] sm:$0xff]  ;;  %v4841_v46 = vld [vmem:[#allocation21_spill] sm:$0xff] }
 0x12e   : >>> { %v1465_v23 = vmul.f32 %v3919_v59, %v4139_v31  ;;  %v1466_v42 = vmul.f32 %v3919_v59, %v4838_v37  ;;  %v1467_v44 = vmul.f32 %v3919_v59, %v4142_v3  ;;  %v1468_v49 = vmul.f32 %v3919_v59, %v4839_v21  ;;  %v1490_v31 = vld [vmem:[%s3050_s7 + $0x1b] sm:$0xff] }
 0x12f   : >>> { %v1469_v32 = vmul.f32 %v3919_v59, %v4145_v26  ;;  %v1470_v63 = vmul.f32 %v3919_v59, %v4840_v62  ;;  %v1471_v35 = vmul.f32 %v3919_v59, %v4150_v2  ;;  %v1472_v40 = vmul.f32 %v3919_v59, %v4841_v46  ;;  %v1491_v46 = vld [vmem:[%s3050_s7 + $0x4b] sm:$0xff] }
 0x130   : >>> { %v1473_v18 = vmul.f32 %v3919_v59, %v4153_v47  ;;  %v1474_v58 = vadd.f32 %v1458_v51, %v1430_v25  ;;  %v1475_v55 = vadd.f32 %v1459_v16, %v1431_v27  ;;  %v1476_v13 = vadd.f32 %v1460_v4, %v1432_v33  ;;  %v1492_v25 = vld [vmem:[%s3050_s7 + $0x7b] sm:$0xff]  ;;  %v1493_v51 = vld [vmem:[%s3050_s7 + $0xab] sm:$0xff] }
 0x131   : >>> { %v1477_v37 = vadd.f32 %v1461_v22, %v1433_v45  ;;  %v1478_v21 = vadd.f32 %v1462_v28, %v1434_v34  ;;  %v1479_v26 = vadd.f32 %v1463_v50, %v1435_v54  ;;  %v1480_v62 = vadd.f32 %v1464_v39, %v1436_v8  ;;  %v1494_v34 = vld [vmem:[%s3050_s7 + $0xdb] sm:$0xff]  ;;  %v1495_v16 = vld [vmem:[%s3050_s7 + $0x10b] sm:$0xff] }
 0x132   : >>> { %v1481_v3 = vadd.f32 %v1465_v23, %v1437_v29  ;;  %v1482_v2 = vadd.f32 %v1466_v42, %v1438_v30  ;;  %v1483_v48 = vadd.f32 %v1467_v44, %v1439_v14  ;;  %v1484_v36 = vadd.f32 %v1468_v49, %v1440_v6  ;;  %v1496_v29 = vld [vmem:[%s3050_s7 + $0x13b] sm:$0xff]  ;;  %v1497_v8 = vld [vmem:[%s3050_s7 + $0x16b] sm:$0xff] }
 0x133   : >>> { %v1485_v59 = vadd.f32 %v1469_v32, %v1441_v43  ;;  %v1486_v47 = vadd.f32 %v1470_v63, %v1442_v15  ;;  %v1487_v27 = vadd.f32 %v1471_v35, %v1443_v20  ;;  %v1488_v33 = vadd.f32 %v1472_v40, %v1444_v38  ;;  %v4842_v43 = vld [vmem:[#allocation22_spill] sm:$0xff]  ;;  %v4843_v38 = vld [vmem:[#allocation23_spill] sm:$0xff]  ;;  %v4845_v28 = vld [vmem:[#allocation25_spill] sm:$0xff] }
 0x134   : >>> { %v1489_v45 = vadd.f32 %v1473_v18, %v1445_v7  ;;  %v1502_v54 = vmul.f32 %v3930_v19, %v3721_v57  ;;  %v1503_v30 = vmul.f32 %v3930_v19, %v1490_v31  ;;  %v1504_v14 = vmul.f32 %v3930_v19, %v3724_v60  ;;  %v4844_v57 = vld [vmem:[#allocation24_spill] sm:$0xff]  ;;  %v4846_v39 = vld [vmem:[#allocation26_spill] sm:$0xff]  ;;  %v4847_v44 = vld [vmem:[#allocation27_spill] sm:$0xff] }
 0x135   : >>> { %v1505_v6 = vmul.f32 %v3930_v19, %v1491_v46  ;;  %v1506_v15 = vmul.f32 %v3930_v19, %v4842_v43  ;;  %v1507_v20 = vmul.f32 %v3930_v19, %v1492_v25  ;;  %v1508_v7 = vmul.f32 %v3930_v19, %v4843_v38  ;;  %v1535_v43 = vld [vmem:[%s3050_s7 + $0x4c] sm:$0xff] }
 0x136   : >>> { %v1509_v4 = vmul.f32 %v3930_v19, %v1493_v51  ;;  %v1510_v22 = vmul.f32 %v3930_v19, %v4844_v57  ;;  %v1511_v31 = vmul.f32 %v3930_v19, %v1494_v34  ;;  %v1512_v60 = vmul.f32 %v3930_v19, %v4845_v28  ;;  %v4854_v28 = vld [vmem:[#allocation33_spill] sm:$0xff] }
 0x137   : >>> { %v1513_v50 = vmul.f32 %v3930_v19, %v1495_v16  ;;  %v1514_v23 = vmul.f32 %v3930_v19, %v4846_v39  ;;  %v1515_v42 = vmul.f32 %v3930_v19, %v1496_v29  ;;  %v1516_v49 = vmul.f32 %v3930_v19, %v4847_v44  ;;  %v1534_v29 = vld [vmem:[%s3050_s7 + $0x1c] sm:$0xff] }
 0x138   : >>> { %v1517_v32 = vmul.f32 %v3930_v19, %v1497_v8  ;;  %v1518_v63 = vadd.f32 %v1502_v54, %v1474_v58  ;;  %v1519_v35 = vadd.f32 %v1503_v30, %v1475_v55  ;;  %v1520_v40 = vadd.f32 %v1504_v14, %v1476_v13  ;;  %v1536_v58 = vld [vmem:[%s3050_s7 + $0x7c] sm:$0xff]  ;;  %v1537_v54 = vld [vmem:[%s3050_s7 + $0xac] sm:$0xff] }
 0x139   : >>> { %v1521_v18 = vadd.f32 %v1505_v6, %v1477_v37  ;;  %v1522_v46 = vadd.f32 %v1506_v15, %v1478_v21  ;;  %v1523_v25 = vadd.f32 %v1507_v20, %v1479_v26  ;;  %v1524_v51 = vadd.f32 %v1508_v7, %v1480_v62  ;;  %v1538_v21 = vld [vmem:[%s3050_s7 + $0xdc] sm:$0xff]  ;;  %v1539_v30 = vld [vmem:[%s3050_s7 + $0x10c] sm:$0xff] }
 0x13a   : >>> { %v1525_v34 = vadd.f32 %v1509_v4, %v1481_v3  ;;  %v1526_v16 = vadd.f32 %v1510_v22, %v1482_v2  ;;  %v1527_v38 = vadd.f32 %v1511_v31, %v1483_v48  ;;  %v1528_v57 = vadd.f32 %v1512_v60, %v1484_v36  ;;  %v4848_v26 = vld [vmem:[#allocation50_spill] sm:$0xff]  ;;  %v1541_v14 = vld [vmem:[%s3050_s7 + $0x16c] sm:$0xff] }
 0x13b   : >>> { %v1529_v19 = vadd.f32 %v1513_v50, %v1485_v59  ;;  %v1530_v8 = vadd.f32 %v1514_v23, %v1486_v47  ;;  %v1531_v55 = vadd.f32 %v1515_v42, %v1487_v27  ;;  %v1532_v13 = vadd.f32 %v1516_v49, %v1488_v33  ;;  %v1540_v3 = vld [vmem:[%s3050_s7 + $0x13c] sm:$0xff]  ;;  %v4849_v6 = vld [vmem:[#allocation28_spill] sm:$0xff]  ;;  %v4850_v47 = vld [vmem:[#allocation29_spill] sm:$0xff] }
 0x13c   : >>> { %v1533_v37 = vadd.f32 %v1517_v32, %v1489_v45  ;;  %v1546_v62 = vmul.f32 %v4848_v26, %v3777_v9  ;;  %v1547_v2 = vmul.f32 %v4848_v26, %v1534_v29  ;;  %v1548_v48 = vmul.f32 %v4848_v26, %v4849_v6  ;;  %v4851_v33 = vld [vmem:[#allocation30_spill] sm:$0xff]  ;;  %v4852_v9 = vld [vmem:[#allocation31_spill] sm:$0xff]  ;;  %v4853_v4 = vld [vmem:[#allocation32_spill] sm:$0xff] }
 0x13d   : >>> { %v1549_v36 = vmul.f32 %v4848_v26, %v1535_v43  ;;  %v1550_v59 = vmul.f32 %v4848_v26, %v4850_v47  ;;  %v1551_v27 = vmul.f32 %v4848_v26, %v1536_v58  ;;  %v1552_v45 = vmul.f32 %v4848_v26, %v4851_v33  ;;  %v4855_v39 = vld [vmem:[#allocation34_spill] sm:$0xff]  ;;  %v1579_v6 = vld [vmem:[%s3050_s7 + $0x4d] sm:$0xff] }
 0x13e   : >>> { %v1553_v15 = vmul.f32 %v4848_v26, %v1537_v54  ;;  %v1554_v20 = vmul.f32 %v4848_v26, %v4852_v9  ;;  %v1555_v7 = vmul.f32 %v4848_v26, %v1538_v21  ;;  %v1556_v22 = vmul.f32 %v4848_v26, %v4853_v4 }
 0x13f   : >>> { %v1557_v31 = vmul.f32 %v4848_v26, %v1539_v30  ;;  %v1558_v60 = vmul.f32 %v4848_v26, %v4854_v28  ;;  %v1559_v50 = vmul.f32 %v4848_v26, %v1540_v3  ;;  %v1560_v23 = vmul.f32 %v4848_v26, %v4855_v39  ;;  %v1578_v3 = vld [vmem:[%s3050_s7 + $0x1d] sm:$0xff] }
 0x140   : >>> { %v1561_v42 = vmul.f32 %v4848_v26, %v1541_v14  ;;  %v1562_v44 = vadd.f32 %v1546_v62, %v1518_v63  ;;  %v1563_v49 = vadd.f32 %v1547_v2, %v1519_v35  ;;  %v1564_v32 = vadd.f32 %v1548_v48, %v1520_v40  ;;  %v1580_v63 = vld [vmem:[%s3050_s7 + $0x7d] sm:$0xff]  ;;  %v1581_v62 = vld [vmem:[%s3050_s7 + $0xad] sm:$0xff] }
 0x141   : >>> { %v1565_v29 = vadd.f32 %v1549_v36, %v1521_v18  ;;  %v1566_v43 = vadd.f32 %v1550_v59, %v1522_v46  ;;  %v1567_v58 = vadd.f32 %v1551_v27, %v1523_v25  ;;  %v1568_v54 = vadd.f32 %v1552_v45, %v1524_v51  ;;  %v1582_v46 = vld [vmem:[%s3050_s7 + $0xdd] sm:$0xff]  ;;  %v1583_v2 = vld [vmem:[%s3050_s7 + $0x10d] sm:$0xff] }
 0x142   : >>> { %v1569_v21 = vadd.f32 %v1553_v15, %v1525_v34  ;;  %v1570_v30 = vadd.f32 %v1554_v20, %v1526_v16  ;;  %v1571_v47 = vadd.f32 %v1555_v7, %v1527_v38  ;;  %v1572_v33 = vadd.f32 %v1556_v22, %v1528_v57  ;;  %v4856_v25 = vld [vmem:[#allocation35_spill] sm:$0xff]  ;;  %v1585_v36 = vld [vmem:[%s3050_s7 + $0x16d] sm:$0xff] }
 0x143   : >>> { %v1573_v26 = vadd.f32 %v1557_v31, %v1529_v19  ;;  %v1574_v14 = vadd.f32 %v1558_v60, %v1530_v8  ;;  %v1575_v35 = vadd.f32 %v1559_v50, %v1531_v55  ;;  %v1576_v40 = vadd.f32 %v1560_v23, %v1532_v13  ;;  %v4857_v48 = vld [vmem:[#allocation7_spill] sm:$0xff]  ;;  %v4858_v59 = vld [vmem:[#allocation36_spill] sm:$0xff]  ;;  %v4859_v19 = vld [vmem:[#allocation37_spill] sm:$0xff] }
 0x144   : >>> { %v1577_v18 = vadd.f32 %v1561_v42, %v1533_v37  ;;  %v1590_v51 = vmul.f32 %v4857_v48, %v4856_v25  ;;  %v1584_v34 = vld [vmem:[%s3050_s7 + $0x13d] sm:$0xff]  ;;  %v1591_v16 = vmul.f32 %v4857_v48, %v1578_v3  ;;  %v1592_v38 = vmul.f32 %v4857_v48, %v4858_v59  ;;  %v4862_v20 = vld [vmem:[#allocation40_spill] sm:$0xff]  ;;  %v4863_v22 = vld [vmem:[#allocation41_spill] sm:$0xff] }
 0x145   : >>> { %v1593_v57 = vmul.f32 %v4857_v48, %v1579_v6  ;;  %v1594_v8 = vmul.f32 %v4857_v48, %v4859_v19  ;;  %v1595_v55 = vmul.f32 %v4857_v48, %v1580_v63  ;;  %v4860_v13 = vld [vmem:[#allocation38_spill] sm:$0xff]  ;;  %v1597_v27 = vmul.f32 %v4857_v48, %v1581_v62  ;;  %v4861_v45 = vld [vmem:[#allocation39_spill] sm:$0xff] }
 0x146   : >>> { %v1596_v37 = vmul.f32 %v4857_v48, %v4860_v13  ;;  %v1598_v15 = vmul.f32 %v4857_v48, %v4861_v45  ;;  %v1599_v9 = vmul.f32 %v4857_v48, %v1582_v46  ;;  %v1600_v7 = vmul.f32 %v4857_v48, %v4862_v20  ;;  %v4864_v60 = vld [vmem:[#allocation42_spill] sm:$0xff]  ;;  %v4873_v45 = vld [vmem:[#allocation45_spill] sm:$0xff] }
 0x147   : >>> { %v1601_v4 = vmul.f32 %v4857_v48, %v1583_v2  ;;  %v1602_v31 = vmul.f32 %v4857_v48, %v4863_v22  ;;  %v1603_v28 = vmul.f32 %v4857_v48, %v1584_v34  ;;  %v1604_v50 = vmul.f32 %v4857_v48, %v4864_v60  ;;  %v586_v62 = vld [vmem:[%s3045_s6 + $0x18] sm:$0x7]  ;;  %v4875_v22 = vld [vmem:[#allocation47_spill] sm:$0xff]  ;;  %v4876_v60 = vld [vmem:[#allocation48_spill] sm:$0xff] }
 0x148   : >>> { %v1605_v39 = vmul.f32 %v4857_v48, %v1585_v36  ;;  %v1606_v23 = vadd.f32 %v1590_v51, %v1562_v44  ;;  %v1607_v42 = vadd.f32 %v1591_v16, %v1563_v49  ;;  %v1608_v3 = vadd.f32 %v1592_v38, %v1564_v32  ;;  %v1622_v44 = vld [vmem:[%s3050_s7 + $0x1e] sm:$0xff]  ;;  %v1623_v49 = vld [vmem:[%s3050_s7 + $0x4e] sm:$0xff] }
 0x149   : >>> { %v1609_v6 = vadd.f32 %v1593_v57, %v1565_v29  ;;  %v1610_v63 = vadd.f32 %v1594_v8, %v1566_v43  ;;  %v1611_v46 = vadd.f32 %v1595_v55, %v1567_v58  ;;  %v1612_v2 = vadd.f32 %v1596_v37, %v1568_v54  ;;  %v1624_v43 = vld [vmem:[%s3050_s7 + $0x7e] sm:$0xff]  ;;  %v1625_v36 = vld [vmem:[%s3050_s7 + $0xae] sm:$0xff] }
 0x14a   : >>> { %v1613_v25 = vadd.f32 %v1597_v27, %v1569_v21  ;;  %v1614_v34 = vadd.f32 %v1598_v15, %v1570_v30  ;;  %v1615_v59 = vadd.f32 %v1599_v9, %v1571_v47  ;;  %v1616_v19 = vadd.f32 %v1600_v7, %v1572_v33  ;;  %v4865_v16 = vld [vmem:[#allocation10_spill] sm:$0xff]  ;;  %v4866_v58 = vld [vmem:[#allocation43_spill] sm:$0xff]  ;;  %v1627_v57 = vld [vmem:[%s3050_s7 + $0x10e] sm:$0xff] }
 0x14b   : >>> { %v1617_v13 = vadd.f32 %v1601_v4, %v1573_v26  ;;  %v1618_v48 = vadd.f32 %v1602_v31, %v1574_v14  ;;  %v1619_v32 = vadd.f32 %v1603_v28, %v1575_v35  ;;  %v1620_v29 = vadd.f32 %v1604_v50, %v1576_v40  ;;  %v1626_v54 = vld [vmem:[%s3050_s7 + $0xde] sm:$0xff]  ;;  %v4867_v21 = vld [vmem:[#allocation12_spill] sm:$0xff]  ;;  %v4869_v26 = vld [vmem:[#allocation5_spill] sm:$0xff] }
 0x14c   : >>> { %v1621_v51 = vadd.f32 %v1605_v39, %v1577_v18  ;;  %v1633_v38 = vrot.slane %v4866_v58, %v4865_v16  ;;  %v1677_v30 = vrot.slane %v4866_v58, %v4867_v21  ;;  %v4868_v47 = vld [vmem:[#allocation4_spill] sm:$0xff]  ;;  %v4296_v14 = vrot.slane %v586_v62, %v4869_v26  ;;  %v4870_v8 = vld [vmem:[#allocation6_spill] sm:$0xff]  ;;  %v4879_v26 = vld [vmem:[#allocation9_spill] sm:$0xff] }
 0x14d   : >>> { %v4293_v33 = vrot.slane %v586_v62, %v4868_v47  ;;  %v4299_v35 = vrot.slane %v586_v62, %v4870_v8  ;;  %v1628_v40 = vld [vmem:[%s3050_s7 + $0x13e] sm:$0xff]  ;;  %v1629_v18 = vld [vmem:[%s3050_s7 + $0x16e] sm:$0xff] }
 0x14e   : >>> { %v4872_v55 = vld [vmem:[#allocation44_spill] sm:$0xff]  ;;  %v1635_v27 = vmul.f32 %v1633_v38, %v1622_v44  ;;  %v1636_v15 = vmul.f32 %v1633_v38, %v4873_v45  ;;  %v1637_v9 = vmul.f32 %v1633_v38, %v1623_v49  ;;  %v4874_v20 = vld [vmem:[#allocation46_spill] sm:$0xff]  ;;  %v1639_v4 = vmul.f32 %v1633_v38, %v1624_v43  ;;  %v4877_v62 = vld [vmem:[#allocation49_spill] sm:$0xff] }
 0x14f   : >>> { %4871 = vst [vmem:[#allocation15_spill] sm:$0xff] %v4299_v35  ;;  %v1634_v37 = vmul.f32 %v1633_v38, %v4872_v55  ;;  %v1638_v7 = vmul.f32 %v1633_v38, %v4874_v20  ;;  %v1640_v31 = vmul.f32 %v1633_v38, %v4875_v22  ;;  %v1641_v28 = vmul.f32 %v1633_v38, %v1625_v36  ;;  %v4878_v21 = vld [vmem:[#allocation8_spill] sm:$0xff] }
 0x150   : >>> { %v1642_v50 = vmul.f32 %v1633_v38, %v4876_v60  ;;  %v1643_v39 = vmul.f32 %v1633_v38, %v1626_v54  ;;  %v1644_v16 = vmul.f32 %v1633_v38, %v4877_v62  ;;  %v1645_v58 = vmul.f32 %v1633_v38, %v1627_v57  ;;  %v1666_v57 = vld [vmem:[%s3050_s7 + $0x1f] sm:$0xff]  ;;  %v1667_v62 = vld [vmem:[%s3050_s7 + $0x4f] sm:$0xff] }
 0x151   : >>> { %v1646_v47 = vmul.f32 %v1633_v38, %v4878_v21  ;;  %v1647_v44 = vmul.f32 %v1633_v38, %v1628_v40  ;;  %v1648_v8 = vmul.f32 %v1633_v38, %v4879_v26  ;;  %v1649_v49 = vmul.f32 %v1633_v38, %v1629_v18  ;;  %v1668_v38 = vld [vmem:[%s3050_s7 + $0x7f] sm:$0xff]  ;;  %v1669_v18 = vld [vmem:[%s3050_s7 + $0xaf] sm:$0xff] }
 0x152   : >>> { %v1650_v43 = vadd.f32 %v1634_v37, %v1606_v23  ;;  %v1651_v55 = vadd.f32 %v1635_v27, %v1607_v42  ;;  %v1652_v45 = vadd.f32 %v1636_v15, %v1608_v3  ;;  %v1653_v36 = vadd.f32 %v1637_v9, %v1609_v6  ;;  %v1671_v37 = vld [vmem:[%s3050_s7 + $0x10f] sm:$0xff] }
 0x153   : >>> { %v1654_v20 = vadd.f32 %v1638_v7, %v1610_v63  ;;  %v1655_v22 = vadd.f32 %v1639_v4, %v1611_v46  ;;  %v1656_v54 = vadd.f32 %v1640_v31, %v1612_v2  ;;  %v1657_v60 = vadd.f32 %v1641_v28, %v1613_v25  ;;  %v1670_v63 = vld [vmem:[%s3050_s7 + $0xdf] sm:$0xff]  ;;  %v1673_v27 = vld [vmem:[%s3050_s7 + $0x16f] sm:$0xff] }
 0x154   : >>> { %v1658_v40 = vadd.f32 %v1642_v50, %v1614_v34  ;;  %v1659_v21 = vadd.f32 %v1643_v39, %v1615_v59  ;;  %v1660_v26 = vadd.f32 %v1644_v16, %v1616_v19  ;;  %v1661_v35 = vadd.f32 %v1645_v58, %v1617_v13  ;;  %v1672_v46 = vld [vmem:[%s3050_s7 + $0x13f] sm:$0xff]  ;;  %v4881_v13 = vld [vmem:[#allocation52_spill] sm:$0xff] }
 0x155   : >>> { %v1662_v23 = vadd.f32 %v1646_v47, %v1618_v48  ;;  %v1663_v42 = vadd.f32 %v1647_v44, %v1619_v32  ;;  %v1664_v3 = vadd.f32 %v1648_v8, %v1620_v29  ;;  %v1665_v6 = vadd.f32 %v1649_v49, %v1621_v51  ;;  %v4880_v34 = vld [vmem:[#allocation51_spill] sm:$0xff]  ;;  %v4882_v48 = vld [vmem:[#allocation53_spill] sm:$0xff]  ;;  %v4883_v51 = vld [vmem:[#allocation54_spill] sm:$0xff] }
 0x156   : >>> { %v1678_v2 = vmul.f32 %v1677_v30, %v3962_v61  ;;  %v1679_v25 = vmul.f32 %v1677_v30, %v1666_v57  ;;  %v1680_v15 = vmul.f32 %v1677_v30, %v3965_v53  ;;  %v1681_v9 = vmul.f32 %v1677_v30, %v1667_v62  ;;  %v4884_v50 = vld [vmem:[#allocation55_spill] sm:$0xff]  ;;  %v4885_v16 = vld [vmem:[#allocation56_spill] sm:$0xff] }
 0x157   : >>> { %v1682_v59 = vmul.f32 %v1677_v30, %v4880_v34  ;;  %v1683_v19 = vmul.f32 %v1677_v30, %v1668_v38  ;;  %v1684_v7 = vmul.f32 %v1677_v30, %v4881_v13  ;;  %v1685_v4 = vmul.f32 %v1677_v30, %v1669_v18 }
 0x158   : >>> { %v1686_v32 = vmul.f32 %v1677_v30, %v4882_v48  ;;  %v1687_v29 = vmul.f32 %v1677_v30, %v1670_v63  ;;  %v1688_v31 = vmul.f32 %v1677_v30, %v4883_v51  ;;  %v1689_v28 = vmul.f32 %v1677_v30, %v1671_v37  ;;  %v1710_v63 = vld [vmem:[%s3050_s7 + $0x20] sm:$0xff]  ;;  %v1711_v37 = vld [vmem:[%s3050_s7 + $0x50] sm:$0xff] }
 0x159   : >>> { %v1690_v61 = vmul.f32 %v1677_v30, %v4884_v50  ;;  %v1691_v39 = vmul.f32 %v1677_v30, %v1672_v46  ;;  %v1692_v53 = vmul.f32 %v1677_v30, %v4885_v16  ;;  %v1693_v58 = vmul.f32 %v1677_v30, %v1673_v27  ;;  %v1712_v30 = vld [vmem:[%s3050_s7 + $0x80] sm:$0xff]  ;;  %v1713_v27 = vld [vmem:[%s3050_s7 + $0xb0] sm:$0xff] }
 0x15a   : >>> { %v1694_v47 = vadd.f32 %v1678_v2, %v1650_v43  ;;  %v1695_v44 = vadd.f32 %v1679_v25, %v1651_v55  ;;  %v1696_v8 = vadd.f32 %v1680_v15, %v1652_v45  ;;  %v1697_v49 = vadd.f32 %v1681_v9, %v1653_v36  ;;  %v1715_v2 = vld [vmem:[%s3050_s7 + $0x110] sm:$0xff]  ;;  %v1754_v51 = vld [vmem:[%s3050_s7 + $0x21] sm:$0xff] }
 0x15b   : >>> { %v1698_v57 = vadd.f32 %v1682_v59, %v1654_v20  ;;  %v1699_v62 = vadd.f32 %v1683_v19, %v1655_v22  ;;  %v1700_v38 = vadd.f32 %v1684_v7, %v1656_v54  ;;  %v1701_v18 = vadd.f32 %v1685_v4, %v1657_v60  ;;  %v1714_v20 = vld [vmem:[%s3050_s7 + $0xe0] sm:$0xff]  ;;  %v1717_v25 = vld [vmem:[%s3050_s7 + $0x170] sm:$0xff] }
 0x15c   : >>> { %v1702_v46 = vadd.f32 %v1686_v32, %v1658_v40  ;;  %v1703_v34 = vadd.f32 %v1687_v29, %v1659_v21  ;;  %v1704_v13 = vadd.f32 %v1688_v31, %v1660_v26  ;;  %v1705_v48 = vadd.f32 %v1689_v28, %v1661_v35  ;;  %v1716_v22 = vld [vmem:[%s3050_s7 + $0x140] sm:$0xff]  ;;  %v1755_v31 = vld [vmem:[%s3050_s7 + $0x51] sm:$0xff] }
 0x15d   : >>> { %v1706_v43 = vadd.f32 %v1690_v61, %v1662_v23  ;;  %v1707_v55 = vadd.f32 %v1691_v39, %v1663_v42  ;;  %v1708_v45 = vadd.f32 %v1692_v53, %v1664_v3  ;;  %v1709_v36 = vadd.f32 %v1693_v58, %v1665_v6  ;;  %v1757_v16 = vld [vmem:[%s3050_s7 + $0xb1] sm:$0xff] }
 0x15e   : >>> { %v1722_v54 = vmul.f32 %v4293_v33, %v4018_v52  ;;  %v1723_v60 = vmul.f32 %v4293_v33, %v1710_v63  ;;  %v1724_v40 = vmul.f32 %v4293_v33, %v4021_v0  ;;  %v1725_v35 = vmul.f32 %v4293_v33, %v1711_v37 }
 0x15f   : >>> { %v1726_v21 = vmul.f32 %v4293_v33, %v4024_v24  ;;  %v1727_v26 = vmul.f32 %v4293_v33, %v1712_v30  ;;  %v1728_v23 = vmul.f32 %v4293_v33, %v4027_v11  ;;  %v1729_v42 = vmul.f32 %v4293_v33, %v1713_v27  ;;  %v4886_v11 = vld [vmem:[#allocation57_spill] sm:$0xff]  ;;  %v4888_v27 = vld [vmem:[#allocation59_spill] sm:$0xff] }
 0x160   : >>> { %v1730_v52 = vmul.f32 %v4293_v33, %v4030_v12  ;;  %v1731_v3 = vmul.f32 %v4293_v33, %v1714_v20  ;;  %v1732_v0 = vmul.f32 %v4293_v33, %v4033_v17  ;;  %v1733_v6 = vmul.f32 %v4293_v33, %v1715_v2  ;;  %v4891_v2 = vld [vmem:[#allocation62_spill] sm:$0xff] }
 0x161   : >>> { %v1734_v24 = vmul.f32 %v4293_v33, %v4038_v5  ;;  %v1735_v15 = vmul.f32 %v4293_v33, %v1716_v22  ;;  %v1736_v9 = vmul.f32 %v4293_v33, %v4886_v11  ;;  %v1737_v12 = vmul.f32 %v4293_v33, %v1717_v25  ;;  %v1756_v33 = vld [vmem:[%s3050_s7 + $0x81] sm:$0xff]  ;;  %v1801_v11 = vld [vmem:[%s3050_s7 + $0xb2] sm:$0xff] }
 0x162   : >>> { %v1738_v59 = vadd.f32 %v1722_v54, %v1694_v47  ;;  %v1739_v19 = vadd.f32 %v1723_v60, %v1695_v44  ;;  %v1740_v7 = vadd.f32 %v1724_v40, %v1696_v8  ;;  %v1741_v4 = vadd.f32 %v1725_v35, %v1697_v49  ;;  %v1758_v8 = vld [vmem:[%s3050_s7 + $0xe1] sm:$0xff]  ;;  %v1759_v49 = vld [vmem:[%s3050_s7 + $0x111] sm:$0xff] }
 0x163   : >>> { %v1742_v32 = vadd.f32 %v1726_v21, %v1698_v57  ;;  %v1743_v17 = vadd.f32 %v1727_v26, %v1699_v62  ;;  %v1744_v29 = vadd.f32 %v1728_v23, %v1700_v38  ;;  %v1745_v5 = vadd.f32 %v1729_v42, %v1701_v18  ;;  %v1760_v57 = vld [vmem:[%s3050_s7 + $0x141] sm:$0xff]  ;;  %v1761_v62 = vld [vmem:[%s3050_s7 + $0x171] sm:$0xff] }
 0x164   : >>> { %v1746_v28 = vadd.f32 %v1730_v52, %v1702_v46  ;;  %v1747_v50 = vadd.f32 %v1731_v3, %v1703_v34  ;;  %v1748_v61 = vadd.f32 %v1732_v0, %v1704_v13  ;;  %v1749_v39 = vadd.f32 %v1733_v6, %v1705_v48  ;;  %v4887_v13 = vld [vmem:[#allocation58_spill] sm:$0xff]  ;;  %v1798_v52 = vld [vmem:[%s3050_s7 + $0x22] sm:$0xff] }
 0x165   : >>> { %v1750_v53 = vadd.f32 %v1734_v24, %v1706_v43  ;;  %v1751_v58 = vadd.f32 %v1735_v15, %v1707_v55  ;;  %v1752_v47 = vadd.f32 %v1736_v9, %v1708_v45  ;;  %v1753_v44 = vadd.f32 %v1737_v12, %v1709_v36  ;;  %v4889_v55 = vld [vmem:[#allocation60_spill] sm:$0xff]  ;;  %v1799_v3 = vld [vmem:[%s3050_s7 + $0x52] sm:$0xff] }
 0x166   : >>> { %v1766_v38 = vmul.f32 %v4296_v14, %v4074_v41  ;;  %v1767_v18 = vmul.f32 %v4296_v14, %v1754_v51  ;;  %v1768_v63 = vmul.f32 %v4296_v14, %v4077_v56  ;;  %v1769_v37 = vmul.f32 %v4296_v14, %v1755_v31  ;;  %v4893_v31 = vld [vmem:[#allocation63_spill] sm:$0xff] }
 0x167   : >>> { %v1770_v46 = vmul.f32 %v4296_v14, %v4080_v1  ;;  %v1771_v34 = vmul.f32 %v4296_v14, %v1756_v33  ;;  %v1772_v48 = vmul.f32 %v4296_v14, %v4887_v13  ;;  %v1773_v30 = vmul.f32 %v4296_v14, %v1757_v16  ;;  %v4890_v1 = vld [vmem:[#allocation61_spill] sm:$0xff] }
 0x168   : >>> { %v1774_v41 = vmul.f32 %v4296_v14, %v4888_v27  ;;  %v1775_v43 = vmul.f32 %v4296_v14, %v1758_v8  ;;  %v1776_v56 = vmul.f32 %v4296_v14, %v4889_v55  ;;  %v1777_v45 = vmul.f32 %v4296_v14, %v1759_v49  ;;  %v4895_v16 = vld [vmem:[#allocation65_spill] sm:$0xff] }
 0x169   : >>> { %v1778_v36 = vmul.f32 %v4296_v14, %v4890_v1  ;;  %v1779_v20 = vmul.f32 %v4296_v14, %v1760_v57  ;;  %v1780_v22 = vmul.f32 %v4296_v14, %v4891_v2  ;;  %v1781_v25 = vmul.f32 %v4296_v14, %v1761_v62  ;;  %v1800_v14 = vld [vmem:[%s3050_s7 + $0x82] sm:$0xff]  ;;  %v4897_v8 = vld [vmem:[#allocation13_spill] sm:$0xff]  ;;  %v4898_v62 = vld [vmem:[#allocation14_spill] sm:$0xff] }
 0x16a   : >>> { %v1782_v54 = vadd.f32 %v1766_v38, %v1738_v59  ;;  %v1783_v60 = vadd.f32 %v1767_v18, %v1739_v19  ;;  %v1784_v40 = vadd.f32 %v1768_v63, %v1740_v7  ;;  %v1785_v35 = vadd.f32 %v1769_v37, %v1741_v4  ;;  %v1802_v7 = vld [vmem:[%s3050_s7 + $0xe2] sm:$0xff]  ;;  %v1803_v4 = vld [vmem:[%s3050_s7 + $0x112] sm:$0xff] }
 0x16b   : >>> { %v1786_v21 = vadd.f32 %v1770_v46, %v1742_v32  ;;  %v1787_v26 = vadd.f32 %v1771_v34, %v1743_v17  ;;  %v1788_v23 = vadd.f32 %v1772_v48, %v1744_v29  ;;  %v1789_v42 = vadd.f32 %v1773_v30, %v1745_v5  ;;  %v1804_v32 = vld [vmem:[%s3050_s7 + $0x142] sm:$0xff]  ;;  %v1805_v17 = vld [vmem:[%s3050_s7 + $0x172] sm:$0xff] }
 0x16c   : >>> { %v1790_v0 = vadd.f32 %v1774_v41, %v1746_v28  ;;  %v1791_v6 = vadd.f32 %v1775_v43, %v1747_v50  ;;  %v1792_v24 = vadd.f32 %v1776_v56, %v1748_v61  ;;  %v1793_v15 = vadd.f32 %v1777_v45, %v1749_v39  ;;  %v4892_v29 = vld [vmem:[#allocation15_spill] sm:$0xff]  ;;  %v4894_v61 = vld [vmem:[#allocation64_spill] sm:$0xff]  ;;  %v4899_v63 = vld [vmem:[#allocation66_spill] sm:$0xff] }
 0x16d   : >>> { %v1794_v9 = vadd.f32 %v1778_v36, %v1750_v53  ;;  %v1795_v12 = vadd.f32 %v1779_v20, %v1751_v58  ;;  %v1796_v59 = vadd.f32 %v1780_v22, %v1752_v47  ;;  %v1797_v19 = vadd.f32 %v1781_v25, %v1753_v44  ;;  %v4896_v47 = vld [vmem:[#allocation11_spill] sm:$0xff] }
 0x16e   : >>> { %v1810_v5 = vmul.f32 %v4892_v29, %v4130_v10  ;;  %v1811_v51 = vmul.f32 %v4892_v29, %v1798_v52  ;;  %v1812_v28 = vmul.f32 %v4892_v29, %v4893_v31  ;;  %v1813_v50 = vmul.f32 %v4892_v29, %v1799_v3 }
 0x16f   : >>> { %v1814_v39 = vmul.f32 %v4892_v29, %v4894_v61  ;;  %v1815_v33 = vmul.f32 %v4892_v29, %v1800_v14  ;;  %v1816_v53 = vmul.f32 %v4892_v29, %v4895_v16  ;;  %v1817_v58 = vmul.f32 %v4892_v29, %v1801_v11 }
 0x170   : >>> { %v1818_v10 = vmul.f32 %v4892_v29, %v4896_v47  ;;  %v1819_v44 = vmul.f32 %v4892_v29, %v1802_v7  ;;  %v1820_v49 = vmul.f32 %v4892_v29, %v4897_v8  ;;  %v1821_v57 = vmul.f32 %v4892_v29, %v1803_v4 }
 0x171   : >>> { %v1822_v38 = vmul.f32 %v4892_v29, %v4898_v62  ;;  %v1823_v18 = vmul.f32 %v4892_v29, %v1804_v32  ;;  %v1824_v37 = vmul.f32 %v4892_v29, %v4899_v63  ;;  %v1825_v46 = vmul.f32 %v4892_v29, %v1805_v17 }
 0x172   : >>> { %v1826_v34 = vadd.f32 %v1810_v5, %v1782_v54   ;;  %v1827_v13 = vadd.f32 %v1811_v51, %v1783_v60   ;;  %v1828_v48 = vadd.f32 %v1812_v28, %v1784_v40   ;;  %v1829_v30 = vadd.f32 %v1813_v50, %v1785_v35  }
 0x173   : >>> { %v1830_v27 = vadd.f32 %v1814_v39, %v1786_v21   ;;  %v1831_v41 = vadd.f32 %v1815_v33, %v1787_v26   ;;  %v1832_v43 = vadd.f32 %v1816_v53, %v1788_v23   ;;  %v1833_v45 = vadd.f32 %v1817_v58, %v1789_v42   ;;  %563 = sbr.rel (!%p4424_p5) target bundleno = 138 (0x8a), region = 87 }
 0x174   : >>> { %v1834_v36 = vadd.f32 %v1818_v10, %v1790_v0   ;;  %v1835_v20 = vadd.f32 %v1819_v44, %v1791_v6   ;;  %v1836_v22 = vadd.f32 %v1820_v49, %v1792_v24   ;;  %v1837_v25 = vadd.f32 %v1821_v57, %v1793_v15  }
 0x175   : >>> { %v1838_v3 = vadd.f32 %v1822_v38, %v1794_v9   ;;  %v1839_v14 = vadd.f32 %v1823_v18, %v1795_v12   ;;  %v1840_v11 = vadd.f32 %v1824_v37, %v1796_v59   ;;  %v1841_v7 = vadd.f32 %v1825_v46, %v1797_v19  }
 0x176   : >>> { %v4905_v54 = vmov %v1837_v25  ;;  %v4906_v55 = vmov %v1836_v22  ;;  %v4907_v56 = vmov %v1835_v20  ;;  %v4908_v57 = vmov %v1834_v36 }
 0x177   : >>> { %v4901_v50 = vmov %v1841_v7  ;;  %v4902_v51 = vmov %v1840_v11  ;;  %v4903_v52 = vmov %v1839_v14  ;;  %v4904_v53 = vmov %v1838_v3 }
 0x178   : >>> { %v4909_v58 = vmov %v1833_v45  ;;  %v4910_v59 = vmov %v1832_v43  ;;  %v4911_v60 = vmov %v1831_v41  ;;  %v4912_v61 = vmov %v1830_v27 }
 0x179   : >>> { %v4913_v62 = vmov %v1829_v30  ;;  %v4914_v63 = vmov %v1828_v48  ;;  %v4915_v1 = vmov %v1827_v13  ;;  %v4916_v2 = vmov %v1826_v34 }
 0x17a   : >> { %v4917_v2 = vld [vmem:[#allocation3_spill] sm:$0xff] }
 0x17b   : >> { %v1848_v40 = vadd.f32 %v4917_v2, %v1826_v34  ;;  %v1849_v35 = vadd.f32 %v4917_v2, %v1827_v13  ;;  %v1850_v21 = vadd.f32 %v4917_v2, %v1828_v48  ;;  %v1851_v26 = vadd.f32 %v4917_v2, %v1829_v30 }
 0x17c   : >> { %v1852_v23 = vadd.f32 %v4917_v2, %v1830_v27  ;;  %v1853_v42 = vadd.f32 %v4917_v2, %v1831_v41  ;;  %v1854_v0 = vadd.f32 %v4917_v2, %v1832_v43  ;;  %v1855_v6 = vadd.f32 %v4917_v2, %v1833_v45 }
 0x17d   : >> { %v1864_v24 = vmax.f32 %v1848_v40, 0.0  ;;  %v1865_v55 = vmax.f32 %v1849_v35, 0.0  ;;  %v1866_v56 = vmax.f32 %v1850_v21, 0.0  ;;  %v1867_v1 = vmax.f32 %v1851_v26, 0.0 }
 0x17e   : >> { %v1868_v54 = vmax.f32 %v1852_v23, 0.0  ;;  %v1869_v60 = vmax.f32 %v1853_v42, 0.0  ;;  %v1870_v52 = vmax.f32 %v1854_v0, 0.0  ;;  %v1871_v15 = vmax.f32 %v1855_v6, 0.0 }
 0x17f   : >> { %v2261_v9 = vpack.c.bf16 %v1865_v55, %v1864_v24  ;;  %v2266_v12 = vpack.c.bf16 %v1867_v1, %v1866_v56  ;;  %v1856_v59 = vadd.f32 %v4917_v2, %v1834_v36  ;;  %v1857_v19 = vadd.f32 %v4917_v2, %v1835_v20 }
 0x180   : >> { %v2271_v4 = vpack.c.bf16 %v1869_v60, %v1868_v54  ;;  %v2276_v32 = vpack.c.bf16 %v1871_v15, %v1870_v52  ;;  %v1858_v17 = vadd.f32 %v4917_v2, %v1836_v22  ;;  %v1859_v29 = vadd.f32 %v4917_v2, %v1837_v25 }
 0x181   : >> { %2262 = vst [vmem:[%s4474_s10] sm:$0xff] %v2261_v9   ;;  %2313 = vst [vmem:[%s4474_s10 + $0x8] sm:$0xff] %v2266_v12   ;;  %v1872_v5 = vmax.f32 %v1856_v59, 0.0  ;;  %v1873_v51 = vmax.f32 %v1857_v19, 0.0  ;;  %v1860_v31 = vadd.f32 %v4917_v2, %v1838_v3  ;;  %v1861_v28 = vadd.f32 %v4917_v2, %v1839_v14 }
 0x182   : >> { %2314 = vst [vmem:[%s4474_s10 + $0x10] sm:$0xff] %v2271_v4   ;;  %2315 = vst [vmem:[%s4474_s10 + $0x18] sm:$0xff] %v2276_v32   ;;  %v1874_v50 = vmax.f32 %v1858_v17, 0.0  ;;  %v1875_v61 = vmax.f32 %v1859_v29, 0.0  ;;  %v1862_v39 = vadd.f32 %v4917_v2, %v1840_v11  ;;  %v1863_v33 = vadd.f32 %v4917_v2, %v1841_v7  ;;  %556 = sbr.rel (!%p554_p6) target bundleno = 134 (0x86), region = 98 }
 0x183   : >> { %v2281_v16 = vpack.c.bf16 %v1873_v51, %v1872_v5  ;;  %v1876_v53 = vmax.f32 %v1860_v31, 0.0  ;;  %v1877_v58 = vmax.f32 %v1861_v28, 0.0 }
 0x184   : >> { %v2286_v47 = vpack.c.bf16 %v1875_v61, %v1874_v50  ;;  %v1878_v10 = vmax.f32 %v1862_v39, 0.0  ;;  %v1879_v44 = vmax.f32 %v1863_v33, 0.0 }
 0x185   : >> { %2316 = vst [vmem:[%s4474_s10 + $0x20] sm:$0xff] %v2281_v16   ;;  %v2291_v8 = vpack.c.bf16 %v1877_v58, %v1876_v53 }
 0x186   : >> { %2317 = vst [vmem:[%s4474_s10 + $0x28] sm:$0xff] %v2286_v47   ;;  %v2296_v49 = vpack.c.bf16 %v1879_v44, %v1878_v10 }
 0x187   : >> { %2318 = vst [vmem:[%s4474_s10 + $0x30] sm:$0xff] %v2291_v8  }
 0x188   : >> { %2319 = vst [vmem:[%s4474_s10 + $0x38] sm:$0xff] %v2296_v49  }
 0x189 PF: > { %s13_s14 = sadd.s32 1, %s2583_s14   ;;  %s4918_s12 = smov %s2579_s13 }
 0x18a   : > { %p10_p7 = scmp.ge.s32.totalorder %s13_s14, 4   ;;  %s4919_s13 = smov %s4921_s15 }
 0x18c   :  { %12 = sbr.rel (!%p10_p7) target bundleno = 2 (0x2), region = 109 }

// kernel: _lambda_.10
= control target key start
LH: loop header
LB: loop body
LE: loop exit
PB: predicated region body
PF: predicated region fallthrough
CT: control target
= control target key end

     0   :  { %s3168_s1 = inlined_call_operand.vmem [shape: bf16[128,128], index: 1, kind: input, shape index: {}]   ;;  %s3169_s0 = inlined_call_operand.vmem [shape: bf16[512,128], index: 0, kind: input, shape index: {}]   ;;  %s3170_s2 = inlined_call_operand.vmem [shape: f32[1,128], index: 2, kind: input, shape index: {}]   ;;  %s3171_s3 = inlined_call_operand.vmem [shape: f32[1,128], index: 3, kind: input, shape index: {}]   ;;  %s3172_s4 = inlined_call_operand.vmem [shape: bf16[512,128], index: 4, kind: output, shape index: {}]  }
   0x1   :  { %v2102_v0 = vld [vmem:[%s3168_s1] sm:$0xff]   ;;  %v2103_v1 = vld [vmem:[%s3168_s1 + $0x8] sm:$0xff]   ;;  %v2104_v2 = vld [vmem:[%s3168_s1 + $0x10] sm:$0xff]  }
   0x2   :  { %2006 = vmatprep.subr.bf16.mxu0 %v2102_v0  ;;  %2086 = vmatprep.subr.bf16.mxu1 %v2102_v0  ;;  %v2105_v3 = vld [vmem:[%s3168_s1 + $0x18] sm:$0xff]   ;;  %v2110_v4 = vld [vmem:[%s3169_s0] sm:$0xff]   ;;  %v2107_v7 = vld [vmem:[%s3168_s1 + $0x28] sm:$0xff]  }
   0x3   :  { %2007 = vmatpush3.bf16.msra.mxu0 %v2102_v0  ;;  %2094 = vmatpush3.bf16.msra.mxu1 %v2102_v0  ;;  %v2111_v5 = vld [vmem:[%s3169_s0 + $0x80] sm:$0xff]   ;;  %v2108_v8 = vld [vmem:[%s3168_s1 + $0x30] sm:$0xff]   ;;  %v2109_v9 = vld [vmem:[%s3168_s1 + $0x38] sm:$0xff]  }
   0x4   :  { %2008 = vmatprep.subr.bf16.mxu0 %v2103_v1  ;;  %2087 = vmatprep.subr.bf16.mxu1 %v2103_v1  ;;  %v2106_v6 = vld [vmem:[%s3168_s1 + $0x20] sm:$0xff]   ;;  %v2112_v10 = vld [vmem:[%s3169_s0 + $0x8] sm:$0xff]   ;;  %v2114_v12 = vld [vmem:[%s3169_s0 + $0x10] sm:$0xff]  }
   0x5   :  { %2022 = vmatprep.mubr.bf16.mxu0 %v2110_v4  ;;  %2054 = vmatprep.mubr.bf16.mxu1 %v2111_v5  ;;  %v2113_v11 = vld [vmem:[%s3169_s0 + $0x88] sm:$0xff]   ;;  %v2115_v13 = vld [vmem:[%s3169_s0 + $0x90] sm:$0xff]   ;;  %v2116_v14 = vld [vmem:[%s3169_s0 + $0x18] sm:$0xff]  }
   0x6   :  { %v2117_v15 = vld [vmem:[%s3169_s0 + $0x98] sm:$0xff]   ;;  %v2118_v16 = vld [vmem:[%s3169_s0 + $0x20] sm:$0xff]   ;;  %v2120_v18 = vld [vmem:[%s3169_s0 + $0x28] sm:$0xff]  }
   0x7   :  { %2009 = vmatpush3.bf16.msra.mxu0 %v2103_v1  ;;  %2095 = vmatpush3.bf16.msra.mxu1 %v2103_v1  ;;  %v2119_v17 = vld [vmem:[%s3169_s0 + $0xa0] sm:$0xff]   ;;  %v2121_v19 = vld [vmem:[%s3169_s0 + $0xa8] sm:$0xff]   ;;  %v2122_v20 = vld [vmem:[%s3169_s0 + $0x30] sm:$0xff]  }
   0x8   :  { %2010 = vmatprep.subr.bf16.mxu0 %v2104_v2  ;;  %2088 = vmatprep.subr.bf16.mxu1 %v2104_v2  ;;  %v2123_v21 = vld [vmem:[%s3169_s0 + $0xb0] sm:$0xff]   ;;  %v2124_v22 = vld [vmem:[%s3169_s0 + $0x38] sm:$0xff]   ;;  %v2126_v24 = vld [vmem:[%s3169_s0 + $0x40] sm:$0xff]  }
   0x9   :  { %v2125_v23 = vld [vmem:[%s3169_s0 + $0xb8] sm:$0xff]   ;;  %v2127_v25 = vld [vmem:[%s3169_s0 + $0xc0] sm:$0xff]   ;;  %v2128_v26 = vld [vmem:[%s3169_s0 + $0x48] sm:$0xff]  }
   0xa   :  { %v2129_v27 = vld [vmem:[%s3169_s0 + $0xc8] sm:$0xff]   ;;  %v2130_v28 = vld [vmem:[%s3169_s0 + $0x50] sm:$0xff]   ;;  %v2132_v30 = vld [vmem:[%s3169_s0 + $0x58] sm:$0xff]  }
   0xb   :  { %2011 = vmatpush3.bf16.msra.mxu0 %v2104_v2  ;;  %2096 = vmatpush3.bf16.msra.mxu1 %v2104_v2  ;;  %v2131_v29 = vld [vmem:[%s3169_s0 + $0xd0] sm:$0xff]   ;;  %v2133_v31 = vld [vmem:[%s3169_s0 + $0xd8] sm:$0xff]   ;;  %v2134_v32 = vld [vmem:[%s3169_s0 + $0x60] sm:$0xff]  }
   0xc   :  { %2012 = vmatprep.subr.bf16.mxu0 %v2105_v3  ;;  %2089 = vmatprep.subr.bf16.mxu1 %v2105_v3  ;;  %v2135_v33 = vld [vmem:[%s3169_s0 + $0xe0] sm:$0xff]   ;;  %v2136_v34 = vld [vmem:[%s3169_s0 + $0x68] sm:$0xff]   ;;  %v2138_v36 = vld [vmem:[%s3169_s0 + $0x70] sm:$0xff]  }
   0xd   :  { %v2137_v35 = vld [vmem:[%s3169_s0 + $0xe8] sm:$0xff]   ;;  %v2139_v37 = vld [vmem:[%s3169_s0 + $0xf0] sm:$0xff]   ;;  %v2140_v38 = vld [vmem:[%s3169_s0 + $0x78] sm:$0xff]  }
   0xe   :  { %v2141_v39 = vld [vmem:[%s3169_s0 + $0xf8] sm:$0xff]   ;;  %v2548_v40 = vld [vmem:[%s3170_s2] ss:$0 sm:$0xff] }
   0xf   :  { %2013 = vmatpush3.bf16.msra.mxu0 %v2105_v3  ;;  %2097 = vmatpush3.bf16.msra.mxu1 %v2105_v3  ;;  %v2553_v42 = vld [vmem:[%s3171_s3] ss:$0 sm:$0xff] }
  0x10   :  { %2014 = vmatprep.subr.bf16.mxu0 %v2106_v6  ;;  %2090 = vmatprep.subr.bf16.mxu1 %v2106_v6 }
  0x13   :  { %2015 = vmatpush3.bf16.msra.mxu0 %v2106_v6  ;;  %2098 = vmatpush3.bf16.msra.mxu1 %v2106_v6 }
  0x14   :  { %2016 = vmatprep.subr.bf16.mxu0 %v2107_v7  ;;  %2091 = vmatprep.subr.bf16.mxu1 %v2107_v7 }
  0x17   :  { %2017 = vmatpush3.bf16.msra.mxu0 %v2107_v7  ;;  %2099 = vmatpush3.bf16.msra.mxu1 %v2107_v7 }
  0x18   :  { %2018 = vmatprep.subr.bf16.mxu0 %v2108_v8  ;;  %2092 = vmatprep.subr.bf16.mxu1 %v2108_v8 }
  0x1b   :  { %2019 = vmatpush3.bf16.msra.mxu0 %v2108_v8  ;;  %2100 = vmatpush3.bf16.msra.mxu1 %v2108_v8 }
  0x1c   :  { %2020 = vmatprep.subr.bf16.mxu0 %v2109_v9  ;;  %2093 = vmatprep.subr.bf16.mxu1 %v2109_v9 }
  0x1f   :  { %2021 = vmatpush3.bf16.msra.mxu0 %v2109_v9  ;;  %2101 = vmatpush3.bf16.msra.mxu1 %v2109_v9 }
  0x22   :  { %2023 = vmatmul.mubr.bf16.vlgmr.msra.gmra.mrb[0].mxu0 %v2112_v10  ;;  %2055 = vmatmul.mubr.bf16.vlgmr.msra.gmra.mrb[0].mxu1 %v2113_v11 }
  0x23   :  { %2026 = vmatprep.mubr.bf16.mxu0 %v2114_v12  ;;  %2058 = vmatprep.mubr.bf16.mxu1 %v2115_v13 }
  0x2a   :  { %2027 = vmatmul.mubr.bf16.gmra.mrb[4].mxu0 %v2116_v14  ;;  %2059 = vmatmul.mubr.bf16.gmra.mrb[4].mxu1 %v2117_v15 }
  0x2b   :  { %2030 = vmatprep.mubr.bf16.mxu0 %v2118_v16  ;;  %2062 = vmatprep.mubr.bf16.mxu1 %v2119_v17 }
  0x32   :  { %2031 = vmatmul.mubr.bf16.gmra.mrb[8].mxu0 %v2120_v18  ;;  %2063 = vmatmul.mubr.bf16.gmra.mrb[8].mxu1 %v2121_v19 }
  0x33   :  { %2034 = vmatprep.mubr.bf16.mxu0 %v2122_v20  ;;  %2066 = vmatprep.mubr.bf16.mxu1 %v2123_v21 }
  0x3a   :  { %2035 = vmatmul.mubr.bf16.gmra.mrb[12].mxu0 %v2124_v22  ;;  %2067 = vmatmul.mubr.bf16.gmra.mrb[12].mxu1 %v2125_v23 }
  0x3b   :  { %2038 = vmatprep.mubr.bf16.mxu0 %v2126_v24  ;;  %2070 = vmatprep.mubr.bf16.mxu1 %v2127_v25 }
  0x42   :  { %2039 = vmatmul.mubr.bf16.gmra.mrb[16].mxu0 %v2128_v26  ;;  %2071 = vmatmul.mubr.bf16.gmra.mrb[16].mxu1 %v2129_v27 }
  0x43   :  { %2042 = vmatprep.mubr.bf16.mxu0 %v2130_v28  ;;  %2074 = vmatprep.mubr.bf16.mxu1 %v2131_v29 }
  0x4a   :  { %2043 = vmatmul.mubr.bf16.gmra.mrb[20].mxu0 %v2132_v30  ;;  %2075 = vmatmul.mubr.bf16.gmra.mrb[20].mxu1 %v2133_v31 }
  0x4b   :  { %2046 = vmatprep.mubr.bf16.mxu0 %v2134_v32  ;;  %2078 = vmatprep.mubr.bf16.mxu1 %v2135_v33 }
  0x52   :  { %2047 = vmatmul.mubr.bf16.gmra.mrb[24].mxu0 %v2136_v34  ;;  %2079 = vmatmul.mubr.bf16.gmra.mrb[24].mxu1 %v2137_v35 }
  0x53   :  { %2050 = vmatprep.mubr.bf16.mxu0 %v2138_v36  ;;  %2082 = vmatprep.mubr.bf16.mxu1 %v2139_v37 }
  0x5a   :  { %2051 = vmatmul.mubr.bf16.gmra.mrb[28].mxu0 %v2140_v38  ;;  %2083 = vmatmul.mubr.bf16.gmra.mrb[28].mxu1 %v2141_v39 }
  0xf5   :  { %v2024_v41 = vpop.f32.mrb[0].mxu0  ;;  %v2056_v43 = vpop.f32.mrb[0].mxu1 }
  0xf6   :  { %v636_v44 = vmul.f32 %v2024_v41, %v2548_v40  ;;  %v668_v45 = vmul.f32 %v2056_v43, %v2548_v40  ;;  %v372_v46 = vpop.f32.mrb[1].mxu0  ;;  %v500_v47 = vpop.f32.mrb[1].mxu1 }
  0xf7   :  { %v634_v48 = vmul.f32 %v2548_v40, %v372_v46  ;;  %v666_v49 = vmul.f32 %v2548_v40, %v500_v47  ;;  %v2025_v50 = vpop.f32.mrb[2].mxu0  ;;  %v2057_v51 = vpop.f32.mrb[2].mxu1 }
  0xf8   :  { %v2560_v52 = vadd.f32 %v2553_v42, %v636_v44  ;;  %v2563_v53 = vadd.f32 %v2553_v42, %v668_v45  ;;  %v637_v54 = vmul.f32 %v2025_v50, %v2548_v40  ;;  %v669_v55 = vmul.f32 %v2057_v51, %v2548_v40  ;;  %v375_v56 = vpop.f32.mrb[3].mxu0  ;;  %v503_v57 = vpop.f32.mrb[3].mxu1 }
  0xf9   :  { %v2568_v58 = vadd.f32 %v2553_v42, %v634_v48  ;;  %v2571_v59 = vadd.f32 %v2553_v42, %v666_v49  ;;  %v635_v60 = vmul.f32 %v2548_v40, %v375_v56  ;;  %v667_v61 = vmul.f32 %v2548_v40, %v503_v57 }
  0xfa   :  { %v1585_v62 = vmul.f32 -1.442695, %v2560_v52  ;;  %v1617_v63 = vmul.f32 -1.442695, %v2563_v53  ;;  %v2578_v0 = vadd.f32 %v2553_v42, %v637_v54  ;;  %v2581_v1 = vadd.f32 %v2553_v42, %v669_v55 }
  0xfb   :  { %v1583_v2 = vmul.f32 -1.442695, %v2568_v58  ;;  %v1615_v3 = vmul.f32 -1.442695, %v2571_v59  ;;  %v2586_v4 = vadd.f32 %v2553_v42, %v635_v60  ;;  %v2589_v5 = vadd.f32 %v2553_v42, %v667_v61 }
  0xfc   :  { %2142 = vpow2.f32 %v1585_v62  ;;  %v1586_v6 = vmul.f32 -1.442695, %v2578_v0  ;;  %v1618_v7 = vmul.f32 -1.442695, %v2581_v1 }
  0xfd   :  { %2144 = vpow2.f32 %v1617_v63  ;;  %v2028_v8 = vpop.f32.mrb[4].mxu0  ;;  %v2060_v9 = vpop.f32.mrb[4].mxu1  ;;  %v1584_v10 = vmul.f32 -1.442695, %v2586_v4  ;;  %v1616_v15 = vmul.f32 -1.442695, %v2589_v5 }
  0xfe   :  { %2146 = vpow2.f32 %v1583_v2  ;;  %v640_v11 = vmul.f32 %v2028_v8, %v2548_v40  ;;  %v672_v12 = vmul.f32 %v2060_v9, %v2548_v40  ;;  %v388_v13 = vpop.f32.mrb[5].mxu0  ;;  %v516_v14 = vpop.f32.mrb[5].mxu1 }
  0xff   :  { %2148 = vpow2.f32 %v1615_v3  ;;  %v638_v16 = vmul.f32 %v2548_v40, %v388_v13  ;;  %v670_v17 = vmul.f32 %v2548_v40, %v516_v14  ;;  %v2029_v18 = vpop.f32.mrb[6].mxu0  ;;  %v2061_v19 = vpop.f32.mrb[6].mxu1 }
 0x100   :  { %2150 = vpow2.f32 %v1586_v6  ;;  %v2600_v20 = vadd.f32 %v2553_v42, %v640_v11  ;;  %v2603_v21 = vadd.f32 %v2553_v42, %v672_v12  ;;  %v641_v22 = vmul.f32 %v2029_v18, %v2548_v40  ;;  %v391_v23 = vpop.f32.mrb[7].mxu0  ;;  %v519_v24 = vpop.f32.mrb[7].mxu1 }
 0x101   :  { %2152 = vpow2.f32 %v1618_v7  ;;  %v2607_v25 = vadd.f32 %v2553_v42, %v638_v16  ;;  %v2610_v26 = vadd.f32 %v2553_v42, %v670_v17  ;;  %v673_v27 = vmul.f32 %v2061_v19, %v2548_v40 }
 0x102   :  { %2154 = vpow2.f32 %v1584_v10  ;;  %v1589_v28 = vmul.f32 -1.442695, %v2600_v20  ;;  %v1621_v29 = vmul.f32 -1.442695, %v2603_v21  ;;  %v2616_v30 = vadd.f32 %v2553_v42, %v641_v22 }
 0x103   :  { %2156 = vpow2.f32 %v1616_v15  ;;  %v1587_v31 = vmul.f32 -1.442695, %v2607_v25  ;;  %v1619_v32 = vmul.f32 -1.442695, %v2610_v26  ;;  %v639_v34 = vmul.f32 %v2548_v40, %v391_v23 }
 0x104   :  { %2158 = vpow2.f32 %v1589_v28  ;;  %v1590_v33 = vmul.f32 -1.442695, %v2616_v30  ;;  %v2623_v38 = vadd.f32 %v2553_v42, %v673_v27  ;;  %v671_v45 = vmul.f32 %v2548_v40, %v519_v24 }
 0x105   :  { %2160 = vpow2.f32 %v1621_v29  ;;  %v2032_v35 = vpop.f32.mrb[8].mxu0  ;;  %v2064_v36 = vpop.f32.mrb[8].mxu1  ;;  %v2627_v55 = vadd.f32 %v2553_v42, %v639_v34 }
 0x106   :  { %v2143_v37 = vpop.eup %2142  ;;  %2162 = vpow2.f32 %v1587_v31  ;;  %v404_v39 = vpop.f32.mrb[9].mxu0  ;;  %v2630_v61 = vmul.f32 -1.442695, %v2623_v38  ;;  %v2633_v2 = vadd.f32 %v2553_v42, %v671_v45  ;;  %v644_v3 = vmul.f32 %v2032_v35, %v2548_v40 }
 0x107   :  { %v532_v41 = vpop.f32.mrb[9].mxu1  ;;  %v2145_v43 = vpop.eup %2144  ;;  %v963_v44 = vadd.f32 1.0, %v2143_v37  ;;  %2164 = vpow2.f32 %v1619_v32  ;;  %v676_v8 = vmul.f32 %v2064_v36, %v2548_v40  ;;  %v642_v9 = vmul.f32 %v2548_v40, %v404_v39 }
 0x108   :  { %v2033_v46 = vpop.f32.mrb[10].mxu0  ;;  %v2065_v47 = vpop.f32.mrb[10].mxu1  ;;  %v995_v49 = vadd.f32 1.0, %v2145_v43  ;;  %2166 = vpow2.f32 %v1590_v33  ;;  %v1588_v12 = vmul.f32 -1.442695, %v2627_v55  ;;  %v674_v13 = vmul.f32 %v2548_v40, %v532_v41 }
 0x109   :  { %v2147_v48 = vpop.eup %2146  ;;  %v407_v50 = vpop.f32.mrb[11].mxu0  ;;  %2168 = vrcp.f32 %v963_v44  ;;  %v645_v18 = vmul.f32 %v2033_v46, %v2548_v40  ;;  %v677_v19 = vmul.f32 %v2065_v47, %v2548_v40  ;;  %v2645_v28 = vadd.f32 %v2553_v42, %v644_v3 }
 0x10a   :  { %v2149_v51 = vpop.eup %2148  ;;  %v961_v54 = vadd.f32 1.0, %v2147_v48  ;;  %v535_v56 = vpop.f32.mrb[11].mxu1  ;;  %2170 = vrcp.f32 %v995_v49  ;;  %v643_v29 = vmul.f32 %v2548_v40, %v407_v50  ;;  %v2653_v35 = vadd.f32 %v2553_v42, %v676_v8 }
 0x10b   :  { %v2151_v57 = vpop.eup %2150  ;;  %v993_v60 = vadd.f32 1.0, %v2149_v51  ;;  %v2656_v36 = vadd.f32 %v2553_v42, %v642_v9  ;;  %v1620_v44 = vmul.f32 -1.442695, %v2633_v2  ;;  %v2664_v45 = vadd.f32 %v2553_v42, %v674_v13 }
 0x10c   :  { %v2153_v62 = vpop.eup %2152  ;;  %2172 = vrcp.f32 %v961_v54  ;;  %v964_v63 = vadd.f32 1.0, %v2151_v57  ;;  %v2667_v48 = vadd.f32 %v2553_v42, %v645_v18  ;;  %v2670_v49 = vadd.f32 %v2553_v42, %v677_v19 }
 0x10d   :  { %v2155_v6 = vpop.eup %2154  ;;  %2174 = vrcp.f32 %v993_v60  ;;  %v996_v7 = vadd.f32 1.0, %v2153_v62  ;;  %v2036_v14 = vpop.f32.mrb[12].mxu0  ;;  %v2673_v54 = vadd.f32 %v2553_v42, %v643_v29  ;;  %v675_v57 = vmul.f32 %v2548_v40, %v535_v56 }
 0x10e   :  { %v2157_v10 = vpop.eup %2156  ;;  %2176 = vrcp.f32 %v964_v63  ;;  %v962_v11 = vadd.f32 1.0, %v2155_v6  ;;  %v2068_v15 = vpop.f32.mrb[12].mxu1  ;;  %v1593_v62 = vmul.f32 -1.442695, %v2645_v28  ;;  %v1625_v63 = vmul.f32 -1.442695, %v2653_v35 }
 0x10f   :  { %v2159_v16 = vpop.eup %2158  ;;  %2178 = vrcp.f32 %v996_v7  ;;  %v994_v17 = vadd.f32 1.0, %v2157_v10  ;;  %v420_v22 = vpop.f32.mrb[13].mxu0  ;;  %v1591_v3 = vmul.f32 -1.442695, %v2656_v36  ;;  %v1623_v7 = vmul.f32 -1.442695, %v2664_v45 }
 0x110   :  { %v2642_v23 = vpop.f32.mrb[13].mxu1  ;;  %v2161_v24 = vpop.eup %2160  ;;  %2180 = vrcp.f32 %v962_v11  ;;  %v967_v27 = vadd.f32 1.0, %v2159_v16  ;;  %v648_v8 = vmul.f32 %v2036_v14, %v2548_v40  ;;  %v680_v9 = vmul.f32 %v2068_v15, %v2548_v40 }
 0x111   :  { %v2648_v31 = vpop.f32.mrb[14].mxu0  ;;  %v2650_v32 = vpop.f32.mrb[14].mxu1  ;;  %2182 = vrcp.f32 %v994_v17  ;;  %v999_v34 = vadd.f32 1.0, %v2161_v24  ;;  %v1594_v13 = vmul.f32 -1.442695, %v2667_v48  ;;  %v2696_v24 = vadd.f32 %v2553_v42, %v675_v57 }
 0x112   :  { %v2163_v33 = vpop.eup %2162  ;;  %v2658_v37 = vpop.f32.mrb[15].mxu0  ;;  %2184 = vrcp.f32 %v967_v27  ;;  %v1626_v16 = vmul.f32 -1.442695, %v2670_v49  ;;  %v1592_v15 = vmul.f32 -1.442695, %v2673_v54 }
 0x113   :  { %v2660_v39 = vpop.f32.mrb[15].mxu1  ;;  %v2165_v41 = vpop.eup %2164  ;;  %v965_v43 = vadd.f32 1.0, %v2163_v33  ;;  %2186 = vrcp.f32 %v999_v34 }
 0x114   :  { %v2167_v46 = vpop.eup %2166  ;;  %v997_v47 = vadd.f32 1.0, %v2165_v41  ;;  %v646_v41 = vmul.f32 %v2548_v40, %v420_v22 }
 0x115   :  { %v2169_v50 = vpop.eup %2168  ;;  %2188 = vrcp.f32 %v965_v43  ;;  %v968_v51 = vadd.f32 1.0, %v2167_v46  ;;  %v2682_v10 = vpop.f32.mrb[16].mxu0 }
 0x116   :  { %v2171_v60 = vpop.eup %2170  ;;  %2190 = vrcp.f32 %v997_v47  ;;  %v2684_v11 = vpop.f32.mrb[16].mxu1  ;;  %v1155_v14 = vmul.f32 %v2169_v50, %v2560_v52  ;;  %v2711_v47 = vadd.f32 %v2553_v42, %v648_v8  ;;  %v2714_v50 = vadd.f32 %v2553_v42, %v680_v9 }
 0x117   :  { %v2173_v6 = vpop.eup %2172  ;;  %2192 = vrcp.f32 %v968_v51  ;;  %v2689_v17 = vpop.f32.mrb[17].mxu0  ;;  %v1187_v33 = vmul.f32 %v2171_v60, %v2563_v53 }
 0x118   :  { %v2175_v56 = vpop.eup %2174  ;;  %2194 = vpow2.f32 %v2630_v61  ;;  %v2691_v18 = vpop.f32.mrb[17].mxu1 }
 0x119   :  { %v2177_v19 = vpop.eup %2176  ;;  %2196 = vpow2.f32 %v1588_v12  ;;  %v2698_v27 = vpop.f32.mrb[18].mxu0  ;;  %v1185_v57 = vmul.f32 %v2175_v56, %v2571_v59  ;;  %v1597_v59 = vmul.f32 -1.442695, %v2711_v47 }
 0x11a   :  { %v2700_v61 = vpop.f32.mrb[18].mxu1  ;;  %v2179_v29 = vpop.eup %2178  ;;  %v1156_v34 = vmul.f32 %v2177_v19, %v2578_v0  ;;  %2198 = vpow2.f32 %v1620_v44  ;;  %v1153_v0 = vmul.f32 %v2173_v6, %v2568_v58  ;;  %v1624_v58 = vmul.f32 -1.442695, %v2696_v24 }
 0x11b   :  { %v2705_v43 = vpop.f32.mrb[19].mxu0  ;;  %v2707_v52 = vpop.f32.mrb[19].mxu1  ;;  %v1188_v46 = vmul.f32 %v2179_v29, %v2581_v1  ;;  %2200 = vpow2.f32 %v1593_v62 }
 0x11c   :  { %v2181_v12 = vpop.eup %2180  ;;  %v1783_v44 = vpack.c.bf16 %v1156_v34, %v1155_v14  ;;  %2202 = vpow2.f32 %v1625_v63  ;;  %v649_v14 = vmul.f32 %v2648_v31, %v2548_v40 }
 0x11d   :  { %v2183_v53 = vpop.eup %2182  ;;  %v1154_v22 = vmul.f32 %v2181_v12, %v2586_v4  ;;  %v1863_v60 = vpack.c.bf16 %v1188_v46, %v1187_v33  ;;  %2204 = vpow2.f32 %v1591_v3  ;;  %v2730_v63 = vpop.f32.mrb[20].mxu0  ;;  %v681_v46 = vmul.f32 %v2650_v32, %v2548_v40 }
 0x11e   :  { %v2185_v51 = vpop.eup %2184  ;;  %v1186_v1 = vmul.f32 %v2183_v53, %v2589_v5  ;;  %1935 = vst [vmem:[%s3172_s4 + $0x8] sm:$0xff] %v1783_v44   ;;  %2206 = vpow2.f32 %v1623_v7  ;;  %v678_v5 = vmul.f32 %v2548_v40, %v2642_v23  ;;  %v2732_v3 = vpop.f32.mrb[20].mxu1  ;;  %v1629_v7 = vmul.f32 -1.442695, %v2714_v50 }
 0x11f   :  { %v2187_v62 = vpop.eup %2186  ;;  %v1778_v8 = vpack.c.bf16 %v1154_v22, %v1153_v0  ;;  %1951 = vst [vmem:[%s3172_s4 + $0x88] sm:$0xff] %v1863_v60   ;;  %2208 = vpow2.f32 %v1594_v13  ;;  %v2740_v56 = vpop.f32.mrb[21].mxu0  ;;  %v2748_v23 = vadd.f32 %v2553_v42, %v646_v41  ;;  %v1159_v34 = vmul.f32 %v2185_v51, %v2600_v20 }
 0x120   :  { %v2189_v6 = vpop.eup %2188  ;;  %v1858_v4 = vpack.c.bf16 %v1186_v1, %v1185_v57  ;;  %2210 = vpow2.f32 %v1626_v16  ;;  %v2742_v13 = vpop.f32.mrb[21].mxu1  ;;  %v2765_v31 = vadd.f32 %v2553_v42, %v678_v5  ;;  %v2768_v51 = vadd.f32 %v2553_v42, %v649_v14 }
 0x121   :  { %v2734_v9 = vpop.eup %2190  ;;  %1779 = vst [vmem:[%s3172_s4] sm:$0xff] %v1778_v8   ;;  %2212 = vpow2.f32 %v1592_v15  ;;  %v2752_v29 = vpop.f32.mrb[22].mxu0  ;;  %v2774_v1 = vmul.f32 -1.442695, %v2748_v23  ;;  %v2777_v8 = vadd.f32 %v2553_v42, %v681_v46  ;;  %v647_v5 = vmul.f32 %v2548_v40, %v2658_v37 }
 0x122   :  { %v2193_v19 = vpop.eup %2192  ;;  %1950 = vst [vmem:[%s3172_s4 + $0x80] sm:$0xff] %v1858_v4   ;;  %v2754_v16 = vpop.f32.mrb[22].mxu1  ;;  %2214 = vpow2.f32 %v1624_v58  ;;  %v2798_v37 = vmul.f32 %v2189_v6, %v2607_v25 }
 0x123   :  { %v2195_v33 = vpop.eup %2194  ;;  %v1160_v12 = vmul.f32 %v2193_v19, %v2616_v30  ;;  %v2760_v15 = vpop.f32.mrb[23].mxu0  ;;  %2216 = vpow2.f32 %v1597_v59  ;;  %v2780_v59 = vmul.f32 -1.442695, %v2765_v31 }
 0x124   :  { %v2762_v41 = vpop.f32.mrb[23].mxu1  ;;  %v2197_v53 = vpop.eup %2196  ;;  %v1000_v0 = vadd.f32 1.0, %v2195_v33  ;;  %2218 = vpow2.f32 %v1629_v7  ;;  %v2789_v33 = vmul.f32 %v2187_v62, %v2603_v21 }
 0x125   :  { %v2199_v44 = vpop.eup %2198  ;;  %v1793_v22 = vpack.c.bf16 %v1160_v12, %v1159_v34  ;;  %v966_v57 = vadd.f32 1.0, %v2197_v53  ;;  %v2784_v7 = vpop.f32.mrb[24].mxu0  ;;  %v679_v12 = vmul.f32 %v2548_v40, %v2660_v39 }
 0x126   :  { %v2201_v20 = vpop.eup %2200  ;;  %2220 = vrcp.f32 %v1000_v0  ;;  %v998_v30 = vadd.f32 1.0, %v2199_v44  ;;  %v2786_v19 = vpop.f32.mrb[24].mxu1 }
 0x127   :  { %v2203_v32 = vpop.eup %2202  ;;  %1937 = vst [vmem:[%s3172_s4 + $0x18] sm:$0xff] %v1793_v22   ;;  %2222 = vrcp.f32 %v966_v57  ;;  %v971_v60 = vadd.f32 1.0, %v2201_v20  ;;  %v2793_v46 = vpop.f32.mrb[25].mxu0  ;;  %v2801_v22 = vmul.f32 -1.442695, %v2768_v51 }
 0x128   :  { %v2205_v58 = vpop.eup %2204  ;;  %2224 = vrcp.f32 %v998_v30  ;;  %v1003_v4 = vadd.f32 1.0, %v2203_v32  ;;  %v2795_v53 = vpop.f32.mrb[25].mxu1  ;;  %v2808_v20 = vmul.f32 -1.442695, %v2777_v8  ;;  %v652_v30 = vmul.f32 %v2682_v10, %v2548_v40 }
 0x129   :  { %v2207_v14 = vpop.eup %2206  ;;  %2226 = vrcp.f32 %v971_v60  ;;  %v969_v34 = vadd.f32 1.0, %v2205_v58  ;;  %v2803_v21 = vpop.f32.mrb[26].mxu0  ;;  %v2818_v60 = vmul.f32 %v2734_v9, %v2610_v26  ;;  %v684_v10 = vmul.f32 %v2684_v11, %v2548_v40 }
 0x12a   :  { %v2209_v0 = vpop.eup %2208  ;;  %2228 = vrcp.f32 %v1003_v4  ;;  %v1001_v44 = vadd.f32 1.0, %v2207_v14  ;;  %v2805_v62 = vpop.f32.mrb[26].mxu1  ;;  %v2821_v4 = vadd.f32 %v2553_v42, %v647_v5  ;;  %v650_v26 = vmul.f32 %v2548_v40, %v2689_v17 }
 0x12b   :  { %v2211_v57 = vpop.eup %2210  ;;  %2230 = vrcp.f32 %v969_v34  ;;  %v972_v39 = vadd.f32 1.0, %v2209_v0  ;;  %v2812_v25 = vpop.f32.mrb[27].mxu0  ;;  %v2824_v0 = vadd.f32 %v2553_v42, %v679_v12  ;;  %v682_v9 = vmul.f32 %v2548_v40, %v2691_v18 }
 0x12c   :  { %3174 = vst [vmem:[#allocation2_spill] sm:$0xff] %v2812_v25  ;;  %v2814_v6 = vpop.f32.mrb[27].mxu1  ;;  %v2213_v32 = vpop.eup %2212  ;;  %2232 = vrcp.f32 %v1001_v44  ;;  %v1004_v58 = vadd.f32 1.0, %v2211_v57  ;;  %v2833_v57 = vadd.f32 %v2553_v42, %v652_v30  ;;  %v653_v12 = vmul.f32 %v2698_v27, %v2548_v40 }
 0x12d   :  { %3175 = vst [vmem:[#allocation3_spill] sm:$0xff] %v2814_v6  ;;  %v2215_v14 = vpop.eup %2214  ;;  %2234 = vrcp.f32 %v972_v39  ;;  %v970_v34 = vadd.f32 1.0, %v2213_v32  ;;  %v1596_v32 = vmul.f32 -1.442695, %v2821_v4  ;;  %v685_v17 = vmul.f32 %v2700_v61, %v2548_v40  ;;  %v2842_v18 = vpop.f32.mrb[28].mxu1 }
 0x12e   :  { %v2217_v6 = vpop.eup %2216  ;;  %2236 = vrcp.f32 %v1004_v58  ;;  %v1002_v25 = vadd.f32 1.0, %v2215_v14  ;;  %v2840_v58 = vpop.f32.mrb[28].mxu0  ;;  %3176 = vst [vmem:[#allocation4_spill] sm:$0xff] %v2842_v18  ;;  %v2846_v30 = vadd.f32 %v2553_v42, %v684_v10  ;;  %v651_v27 = vmul.f32 %v2548_v40, %v2705_v43 }
 0x12f   :  { %v2219_v5 = vpop.eup %2218  ;;  %2238 = vrcp.f32 %v970_v34  ;;  %v975_v44 = vadd.f32 1.0, %v2217_v6  ;;  %v2852_v34 = vpop.f32.mrb[29].mxu1  ;;  %v2856_v18 = vadd.f32 %v2553_v42, %v650_v26 }
 0x130   :  { %v2221_v39 = vpop.eup %2220  ;;  %2240 = vrcp.f32 %v1002_v25  ;;  %v1007_v11 = vadd.f32 1.0, %v2219_v5  ;;  %v2850_v25 = vpop.f32.mrb[29].mxu0 }
 0x131   :  { %v2223_v14 = vpop.eup %2222  ;;  %v1192_v6 = vmul.f32 %v2221_v39, %v2623_v38  ;;  %2242 = vrcp.f32 %v975_v44  ;;  %3177 = vst [vmem:[#allocation5_spill] sm:$0xff] %v2850_v25  ;;  %v2859_v38 = vadd.f32 %v2553_v42, %v682_v9  ;;  %v2861_v44 = vpop.f32.mrb[30].mxu0 }
 0x132   :  { %v2225_v5 = vpop.eup %2224  ;;  %v1158_v61 = vmul.f32 %v2223_v14, %v2627_v55  ;;  %2244 = vrcp.f32 %v1007_v11  ;;  %3179 = vst [vmem:[#allocation7_spill] sm:$0xff] %v2861_v44  ;;  %v2863_v10 = vpop.f32.mrb[30].mxu1  ;;  %v2869_v55 = vadd.f32 %v2553_v42, %v653_v12  ;;  %v1601_v12 = vmul.f32 -1.442695, %v2833_v57 }
 0x133   :  { %3178 = vst [vmem:[#allocation6_spill] sm:$0xff] %v2859_v38  ;;  %3180 = vst [vmem:[#allocation8_spill] sm:$0xff] %v2863_v10  ;;  %v2227_v39 = vpop.eup %2226  ;;  %v1873_v43 = vpack.c.bf16 %v1192_v6, %v2789_v33  ;;  %v1190_v25 = vmul.f32 %v2225_v5, %v2633_v2  ;;  %2246 = vpow2.f32 %v2774_v1  ;;  %v2871_v11 = vpop.f32.mrb[31].mxu0  ;;  %v1628_v10 = vmul.f32 -1.442695, %v2824_v0 }
 0x134   :  { %3181 = vst [vmem:[#allocation9_spill] sm:$0xff] %v2871_v11  ;;  %v2873_v26 = vpop.f32.mrb[31].mxu1  ;;  %v2229_v9 = vpop.eup %2228  ;;  %v1788_v14 = vpack.c.bf16 %v1158_v61, %v2798_v37  ;;  %2248 = vpow2.f32 %v2780_v59  ;;  %v2879_v33 = vadd.f32 %v2553_v42, %v685_v17  ;;  %v2888_v37 = vadd.f32 %v2553_v42, %v651_v27 }
 0x135   :  { %3182 = vst [vmem:[#allocation10_spill] sm:$0xff] %v2873_v26  ;;  %v2231_v2 = vpop.eup %2230  ;;  %1953 = vst [vmem:[%s3172_s4 + $0x98] sm:$0xff] %v1873_v43   ;;  %v1868_v1 = vpack.c.bf16 %v1190_v25, %v2818_v60  ;;  %2250 = vpow2.f32 %v2801_v22  ;;  %v1633_v17 = vmul.f32 -1.442695, %v2846_v30  ;;  %v1599_v22 = vmul.f32 -1.442695, %v2856_v18 }
 0x136   :  { %v2233_v59 = vpop.eup %2232  ;;  %1936 = vst [vmem:[%s3172_s4 + $0x10] sm:$0xff] %v1788_v14   ;;  %2252 = vpow2.f32 %v2808_v20  ;;  %v1631_v60 = vmul.f32 -1.442695, %v2859_v38  ;;  %v1602_v27 = vmul.f32 -1.442695, %v2869_v55  ;;  %v1163_v5 = vmul.f32 %v2227_v39, %v2645_v28 }
 0x137   :  { %v2235_v6 = vpop.eup %2234  ;;  %1952 = vst [vmem:[%s3172_s4 + $0x90] sm:$0xff] %v1868_v1   ;;  %2254 = vpow2.f32 %v1596_v32  ;;  %v1634_v20 = vmul.f32 -1.442695, %v2879_v33  ;;  %v1195_v14 = vmul.f32 %v2229_v9, %v2653_v35  ;;  %v1600_v32 = vmul.f32 -1.442695, %v2888_v37 }
 0x138   :  { %v2237_v25 = vpop.eup %2236  ;;  %v1164_v61 = vmul.f32 %v2235_v6, %v2667_v48  ;;  %2256 = vpow2.f32 %v1628_v10  ;;  %v1161_v38 = vmul.f32 %v2231_v2, %v2656_v36  ;;  %v1193_v48 = vmul.f32 %v2233_v59, %v2664_v45 }
 0x139   :  { %v2239_v43 = vpop.eup %2238  ;;  %v1196_v1 = vmul.f32 %v2237_v25, %v2670_v49  ;;  %2258 = vpow2.f32 %v1601_v12  ;;  %v683_v36 = vmul.f32 %v2548_v40, %v2707_v52  ;;  %v688_v52 = vmul.f32 %v2732_v3, %v2548_v40 }
 0x13a   :  { %v2241_v26 = vpop.eup %2240  ;;  %v1803_v11 = vpack.c.bf16 %v1164_v61, %v1163_v5  ;;  %v1162_v44 = vmul.f32 %v2239_v43, %v2673_v54  ;;  %2260 = vpow2.f32 %v1633_v17  ;;  %v656_v54 = vmul.f32 %v2730_v63, %v2548_v40 }
 0x13b   :  { %v2909_v28 = vpop.eup %2242  ;;  %v1883_v10 = vpack.c.bf16 %v1196_v1, %v1195_v14  ;;  %v1194_v39 = vmul.f32 %v2241_v26, %v2696_v24  ;;  %2262 = vpow2.f32 %v1599_v22  ;;  %v654_v63 = vmul.f32 %v2548_v40, %v2740_v56 }
 0x13c   :  { %v2913_v35 = vpop.eup %2244  ;;  %1939 = vst [vmem:[%s3172_s4 + $0x28] sm:$0xff] %v1803_v11   ;;  %v1798_v49 = vpack.c.bf16 %v1162_v44, %v1161_v38  ;;  %2264 = vpow2.f32 %v1631_v60  ;;  %v2936_v12 = vadd.f32 %v2553_v42, %v683_v36  ;;  %v2939_v59 = vadd.f32 %v2553_v42, %v656_v54 }
 0x13d   :  { %v2247_v9 = vpop.eup %2246  ;;  %1955 = vst [vmem:[%s3172_s4 + $0xa8] sm:$0xff] %v1883_v10   ;;  %v1878_v45 = vpack.c.bf16 %v1194_v39, %v1193_v48  ;;  %2266 = vpow2.f32 %v1602_v27  ;;  %v686_v56 = vmul.f32 %v2548_v40, %v2742_v13  ;;  %v2944_v60 = vadd.f32 %v2553_v42, %v688_v52 }
 0x13e   :  { %v2249_v24 = vpop.eup %2248  ;;  %1938 = vst [vmem:[%s3172_s4 + $0x20] sm:$0xff] %v1798_v49   ;;  %v973_v38 = vadd.f32 1.0, %v2247_v9  ;;  %2268 = vpow2.f32 %v1634_v20  ;;  %v2947_v27 = vadd.f32 %v2553_v42, %v654_v63  ;;  %v657_v61 = vmul.f32 %v2752_v29, %v2548_v40 }
 0x13f   :  { %v2251_v44 = vpop.eup %2250  ;;  %1954 = vst [vmem:[%s3172_s4 + $0xa0] sm:$0xff] %v1878_v45   ;;  %v1005_v11 = vadd.f32 1.0, %v2249_v24  ;;  %2270 = vpow2.f32 %v1600_v32  ;;  %v689_v20 = vmul.f32 %v2754_v16, %v2548_v40  ;;  %v1632_v14 = vmul.f32 -1.442695, %v2936_v12 }
 0x140   :  { %v2253_v26 = vpop.eup %2252  ;;  %2272 = vrcp.f32 %v973_v38  ;;  %v976_v2 = vadd.f32 1.0, %v2251_v44  ;;  %v1605_v1 = vmul.f32 -1.442695, %v2939_v59  ;;  %v2956_v10 = vadd.f32 %v2553_v42, %v686_v56 }
 0x141   :  { %v2255_v3 = vpop.eup %2254  ;;  %2274 = vrcp.f32 %v1005_v11  ;;  %v1008_v17 = vadd.f32 1.0, %v2253_v26  ;;  %v655_v39 = vmul.f32 %v2548_v40, %v2760_v15  ;;  %v1637_v16 = vmul.f32 -1.442695, %v2944_v60 }
 0x142   :  { %v2257_v6 = vpop.eup %2256  ;;  %2276 = vrcp.f32 %v976_v2  ;;  %v974_v22 = vadd.f32 1.0, %v2255_v3  ;;  %v1603_v36 = vmul.f32 -1.442695, %v2947_v27  ;;  %v2963_v45 = vadd.f32 %v2553_v42, %v657_v61 }
 0x143   :  { %v2259_v25 = vpop.eup %2258  ;;  %2278 = vrcp.f32 %v1008_v17  ;;  %v1006_v5 = vadd.f32 1.0, %v2257_v6  ;;  %v2966_v24 = vadd.f32 %v2553_v42, %v689_v20  ;;  %v687_v15 = vmul.f32 %v2548_v40, %v2762_v41 }
 0x144   :  { %v2261_v43 = vpop.eup %2260  ;;  %2280 = vrcp.f32 %v974_v22  ;;  %v979_v13 = vadd.f32 1.0, %v2259_v25  ;;  %v660_v63 = vmul.f32 %v2784_v7, %v2548_v40  ;;  %v1635_v26 = vmul.f32 -1.442695, %v2956_v10 }
 0x145   :  { %v2263_v32 = vpop.eup %2262  ;;  %2282 = vrcp.f32 %v1006_v5  ;;  %v1011_v48 = vadd.f32 1.0, %v2261_v43  ;;  %v2974_v2 = vadd.f32 %v2553_v42, %v655_v39  ;;  %v692_v56 = vmul.f32 %v2786_v19, %v2548_v40 }
 0x146   :  { %v2265_v29 = vpop.eup %2264  ;;  %2284 = vrcp.f32 %v979_v13  ;;  %v977_v49 = vadd.f32 1.0, %v2263_v32  ;;  %v658_v41 = vmul.f32 %v2548_v40, %v2793_v46  ;;  %v1167_v7 = vmul.f32 %v2909_v28, %v2711_v47 }
 0x147   :  { %v2267_v54 = vpop.eup %2266  ;;  %2286 = vrcp.f32 %v1011_v48  ;;  %v1009_v9 = vadd.f32 1.0, %v2265_v29  ;;  %v1606_v22 = vmul.f32 -1.442695, %v2963_v45  ;;  %v1638_v25 = vmul.f32 -1.442695, %v2966_v24 }
 0x148   :  { %v2269_v38 = vpop.eup %2268  ;;  %2288 = vrcp.f32 %v977_v49  ;;  %v980_v52 = vadd.f32 1.0, %v2267_v54  ;;  %v1199_v61 = vmul.f32 %v2913_v35, %v2714_v50  ;;  %v2987_v20 = vadd.f32 %v2553_v42, %v687_v15 }
 0x149   :  { %v2271_v44 = vpop.eup %2270  ;;  %2290 = vrcp.f32 %v1009_v9  ;;  %v1012_v11 = vadd.f32 1.0, %v2269_v38  ;;  %v2990_v19 = vadd.f32 %v2553_v42, %v660_v63  ;;  %v1604_v47 = vmul.f32 -1.442695, %v2974_v2 }
 0x14a   :  { %v2273_v3 = vpop.eup %2272  ;;  %2292 = vrcp.f32 %v980_v52  ;;  %v978_v17 = vadd.f32 1.0, %v2271_v44  ;;  %v690_v28 = vmul.f32 %v2548_v40, %v2795_v53  ;;  %v2998_v50 = vadd.f32 %v2553_v42, %v692_v56 }
 0x14b   :  { %v2275_v6 = vpop.eup %2274  ;;  %2294 = vrcp.f32 %v1012_v11  ;;  %v3001_v35 = vadd.f32 %v2553_v42, %v658_v41  ;;  %v1165_v39 = vmul.f32 %v2273_v3, %v2748_v23  ;;  %v1636_v23 = vmul.f32 -1.442695, %v2987_v20 }
 0x14c   :  { %v2277_v5 = vpop.eup %2276  ;;  %2296 = vrcp.f32 %v978_v17  ;;  %v1197_v53 = vmul.f32 %v2275_v6, %v2765_v31  ;;  %v3012_v9 = vadd.f32 %v2553_v42, %v690_v28  ;;  %v661_v15 = vmul.f32 %v2803_v21, %v2548_v40 }
 0x14d   :  { %v2279_v46 = vpop.eup %2278  ;;  %v1168_v43 = vmul.f32 %v2277_v5, %v2768_v51  ;;  %2298 = vpow2.f32 %v1632_v14  ;;  %v1607_v52 = vmul.f32 -1.442695, %v3001_v35  ;;  %v693_v63 = vmul.f32 %v2805_v62, %v2548_v40 }
 0x14e   :  { %v2281_v13 = vpop.eup %2280  ;;  %v1200_v32 = vmul.f32 %v2279_v46, %v2777_v8  ;;  %2300 = vpow2.f32 %v1605_v1  ;;  %v1639_v3 = vmul.f32 -1.442695, %v3012_v9 }
 0x14f   :  { %v2283_v48 = vpop.eup %2282  ;;  %v1813_v51 = vpack.c.bf16 %v1168_v43, %v1167_v7  ;;  %v1166_v14 = vmul.f32 %v2281_v13, %v2821_v4  ;;  %2302 = vpow2.f32 %v1637_v16  ;;  %v2398_v43 = vld [vmem:[%s3170_s2] ss:$0 sm:$0xff] }
 0x150   :  { %v2285_v29 = vpop.eup %2284  ;;  %v1893_v49 = vpack.c.bf16 %v1200_v32, %v1199_v61  ;;  %v1198_v8 = vmul.f32 %v2283_v48, %v2824_v0  ;;  %2304 = vpow2.f32 %v1603_v36  ;;  %v1609_v0 = vmul.f32 -1.442695, %v2990_v19 }
 0x151   :  { %v2287_v1 = vpop.eup %2286  ;;  %1941 = vst [vmem:[%s3172_s4 + $0x38] sm:$0xff] %v1813_v51   ;;  %v1808_v54 = vpack.c.bf16 %v1166_v14, %v1165_v39  ;;  %2306 = vpow2.f32 %v1635_v26  ;;  %v1641_v36 = vmul.f32 -1.442695, %v2998_v50  ;;  %v1171_v11 = vmul.f32 %v2285_v29, %v2833_v57 }
 0x152   :  { %v2289_v4 = vpop.eup %2288  ;;  %1957 = vst [vmem:[%s3172_s4 + $0xb8] sm:$0xff] %v1893_v49   ;;  %v1888_v31 = vpack.c.bf16 %v1198_v8, %v1197_v53  ;;  %2308 = vpow2.f32 %v1606_v22  ;;  %v1203_v56 = vmul.f32 %v2287_v1, %v2846_v30  ;;  %v3184_v53 = vld [vmem:[#allocation3_spill] sm:$0xff]  ;;  %v664_v8 = vmul.f32 %v2398_v43, %v2840_v58 }
 0x153   :  { %v3018_v16 = vpop.eup %2290  ;;  %1940 = vst [vmem:[%s3172_s4 + $0x30] sm:$0xff] %v1808_v54   ;;  %2310 = vpow2.f32 %v1638_v25  ;;  %v1169_v21 = vmul.f32 %v2289_v4, %v2856_v18  ;;  %v3046_v18 = vadd.f32 %v2553_v42, %v693_v63  ;;  %v691_v49 = vmul.f32 %v2398_v43, %v3184_v53 }
 0x154   :  { %v2293_v38 = vpop.eup %2292  ;;  %1956 = vst [vmem:[%s3172_s4 + $0xb0] sm:$0xff] %v1888_v31   ;;  %2312 = vpow2.f32 %v1604_v47  ;;  %v3185_v31 = vld [vmem:[#allocation4_spill] sm:$0xff]  ;;  %v694_v63 = vmul.f32 %v2398_v43, %v2852_v34  ;;  %v3189_v34 = vld [vmem:[#allocation9_spill] sm:$0xff] }
 0x155   :  { %v2295_v44 = vpop.eup %2294  ;;  %v1172_v26 = vmul.f32 %v2293_v38, %v2869_v55  ;;  %2314 = vpow2.f32 %v1636_v23  ;;  %v3040_v55 = vadd.f32 %v2553_v42, %v661_v15  ;;  %v3183_v42 = vld [vmem:[#allocation2_spill] sm:$0xff]  ;;  %v1642_v51 = vmul.f32 -1.442695, %v3046_v18 }
 0x156   :  { %v2297_v17 = vpop.eup %2296  ;;  %v1204_v41 = vmul.f32 %v2295_v44, %v2879_v33  ;;  %2316 = vpow2.f32 %v1609_v0  ;;  %v659_v47 = vmul.f32 %v2398_v43, %v3183_v42  ;;  %v2399_v23 = vld [vmem:[%s3171_s3] ss:$0 sm:$0xff]  ;;  %v696_v0 = vmul.f32 %v2398_v43, %v3185_v31 }
 0x157   :  { %v2299_v6 = vpop.eup %2298  ;;  %v1823_v7 = vpack.c.bf16 %v1172_v26, %v1171_v11  ;;  %v1170_v40 = vmul.f32 %v2297_v17, %v2888_v37  ;;  %2318 = vpow2.f32 %v1641_v36  ;;  %v1610_v39 = vmul.f32 -1.442695, %v3040_v55  ;;  %v3187_v11 = vld [vmem:[#allocation7_spill] sm:$0xff] }
 0x158   :  { %v2301_v62 = vpop.eup %2300  ;;  %v1903_v57 = vpack.c.bf16 %v1204_v41, %v1203_v56  ;;  %v1010_v22 = vadd.f32 1.0, %v2299_v6  ;;  %2320 = vpow2.f32 %v1607_v52  ;;  %v3065_v4 = vadd.f32 %v2399_v23, %v659_v47  ;;  %v3186_v52 = vld [vmem:[#allocation5_spill] sm:$0xff] }
 0x159   :  { %v2303_v25 = vpop.eup %2302  ;;  %1943 = vst [vmem:[%s3172_s4 + $0x48] sm:$0xff] %v1823_v7   ;;  %v1818_v30 = vpack.c.bf16 %v1170_v40, %v1169_v21  ;;  %v983_v33 = vadd.f32 1.0, %v2301_v62  ;;  %2322 = vpow2.f32 %v1639_v3  ;;  %v662_v15 = vmul.f32 %v2398_v43, %v3186_v52  ;;  %v3188_v3 = vld [vmem:[#allocation8_spill] sm:$0xff] }
 0x15a   :  { %v2305_v37 = vpop.eup %2304  ;;  %1959 = vst [vmem:[%s3172_s4 + $0xc8] sm:$0xff] %v1903_v57   ;;  %2324 = vrcp.f32 %v1010_v22  ;;  %v1015_v5 = vadd.f32 1.0, %v2303_v25  ;;  %v665_v26 = vmul.f32 %v2398_v43, %v3187_v11  ;;  %v697_v17 = vmul.f32 %v2398_v43, %v3188_v3 }
 0x15b   :  { %v2307_v61 = vpop.eup %2306  ;;  %1942 = vst [vmem:[%s3172_s4 + $0x40] sm:$0xff] %v1818_v30   ;;  %2326 = vrcp.f32 %v983_v33  ;;  %v981_v46 = vadd.f32 1.0, %v2305_v37  ;;  %v3072_v6 = vadd.f32 %v2399_v23, %v691_v49  ;;  %v3074_v21 = vadd.f32 %v2399_v23, %v664_v8  ;;  %v3190_v30 = vld [vmem:[#allocation6_spill] sm:$0xff] }
 0x15c   :  { %v2309_v28 = vpop.eup %2308  ;;  %2328 = vrcp.f32 %v1015_v5  ;;  %v1013_v13 = vadd.f32 1.0, %v2307_v61  ;;  %v1608_v62 = vmul.f32 -1.442695, %v3065_v4  ;;  %v3077_v57 = vadd.f32 %v2399_v23, %v696_v0 }
 0x15d   :  { %v2311_v32 = vpop.eup %2310  ;;  %2330 = vrcp.f32 %v981_v46  ;;  %v984_v48 = vadd.f32 1.0, %v2309_v28  ;;  %v663_v22 = vmul.f32 %v2398_v43, %v3189_v34  ;;  %v1201_v33 = vmul.f32 %v3018_v16, %v3190_v30 }
 0x15e   :  { %v2313_v14 = vpop.eup %2312  ;;  %2332 = vrcp.f32 %v1013_v13  ;;  %v1016_v29 = vadd.f32 1.0, %v2311_v32  ;;  %v3082_v37 = vadd.f32 %v2399_v23, %v662_v15  ;;  %v3084_v5 = vadd.f32 %v2399_v23, %v694_v63  ;;  %v3191_v32 = vld [vmem:[#allocation10_spill] sm:$0xff] }
 0x15f   :  { %v2315_v1 = vpop.eup %2314  ;;  %2334 = vrcp.f32 %v984_v48  ;;  %v982_v54 = vadd.f32 1.0, %v2313_v14  ;;  %v3087_v42 = vadd.f32 %v2399_v23, %v665_v26  ;;  %v3089_v47 = vadd.f32 %v2399_v23, %v697_v17 }
 0x160   :  { %v2317_v36 = vpop.eup %2316  ;;  %2336 = vrcp.f32 %v1016_v29  ;;  %v1014_v38 = vadd.f32 1.0, %v2315_v1  ;;  %v1640_v13 = vmul.f32 -1.442695, %v3072_v6  ;;  %v695_v48 = vmul.f32 %v2398_v43, %v3191_v32 }
 0x161   :  { %v2319_v44 = vpop.eup %2318  ;;  %2338 = vrcp.f32 %v982_v54  ;;  %v987_v58 = vadd.f32 1.0, %v2317_v36  ;;  %v1613_v29 = vmul.f32 -1.442695, %v3074_v21  ;;  %v3094_v53 = vadd.f32 %v2399_v23, %v663_v22 }
 0x162   :  { %v2321_v56 = vpop.eup %2320  ;;  %2340 = vrcp.f32 %v1014_v38  ;;  %v1019_v41 = vadd.f32 1.0, %v2319_v44  ;;  %v1611_v8 = vmul.f32 -1.442695, %v3082_v37  ;;  %v1643_v43 = vmul.f32 -1.442695, %v3084_v5 }
 0x163   :  { %v2323_v7 = vpop.eup %2322  ;;  %v985_v40 = vadd.f32 1.0, %v2321_v56  ;;  %2342 = vrcp.f32 %v987_v58  ;;  %v1646_v54 = vmul.f32 -1.442695, %v3089_v47  ;;  %v3106_v36 = vadd.f32 %v2399_v23, %v695_v48 }
 0x164   :  { %v2325_v25 = vpop.eup %2324  ;;  %2344 = vrcp.f32 %v1019_v41  ;;  %v1612_v63 = vmul.f32 -1.442695, %v3094_v53 }
 0x165   :  { %v2327_v61 = vpop.eup %2326  ;;  %v1202_v46 = vmul.f32 %v2325_v25, %v2936_v12  ;;  %2346 = vrcp.f32 %v985_v40  ;;  %v1645_v12 = vmul.f32 -1.442695, %v3077_v57 }
 0x166   :  { %v2329_v28 = vpop.eup %2328  ;;  %2348 = vpow2.f32 %v1610_v39  ;;  %v1614_v39 = vmul.f32 -1.442695, %v3087_v42  ;;  %v1175_v0 = vmul.f32 %v2327_v61, %v2939_v59 }
 0x167   :  { %v2331_v16 = vpop.eup %2330  ;;  %v1898_v14 = vpack.c.bf16 %v1202_v46, %v1201_v33  ;;  %2350 = vpow2.f32 %v1642_v51  ;;  %v1207_v52 = vmul.f32 %v2329_v28, %v2944_v60 }
 0x168   :  { %v2333_v49 = vpop.eup %2332  ;;  %2352 = vpow2.f32 %v1608_v62  ;;  %v1173_v58 = vmul.f32 %v2331_v16, %v2947_v27 }
 0x169   :  { %v2335_v1 = vpop.eup %2334  ;;  %1958 = vst [vmem:[%s3172_s4 + $0xc0] sm:$0xff] %v1898_v14   ;;  %2354 = vpow2.f32 %v1640_v13  ;;  %v1205_v59 = vmul.f32 %v2333_v49, %v2956_v10  ;;  %v1017_v10 = vadd.f32 1.0, %v2323_v7 }
 0x16a   :  { %v2337_v31 = vpop.eup %2336  ;;  %v1176_v51 = vmul.f32 %v2335_v1, %v2963_v45  ;;  %2356 = vpow2.f32 %v1613_v29 }
 0x16b   :  { %v2339_v38 = vpop.eup %2338  ;;  %v1208_v15 = vmul.f32 %v2337_v31, %v2966_v24  ;;  %2358 = vpow2.f32 %v1645_v12  ;;  %v1644_v24 = vmul.f32 -1.442695, %v3106_v36 }
 0x16c   :  { %v2341_v44 = vpop.eup %2340  ;;  %v1833_v11 = vpack.c.bf16 %v1176_v51, %v1175_v0  ;;  %v1174_v26 = vmul.f32 %v2339_v38, %v2974_v2  ;;  %2360 = vpow2.f32 %v1611_v8 }
 0x16d   :  { %v1913_v45 = vpack.c.bf16 %v1208_v15, %v1207_v52  ;;  %v1206_v23 = vmul.f32 %v2341_v44, %v2987_v20  ;;  %v2343_v3 = vpop.eup %2342  ;;  %2362 = vpow2.f32 %v1643_v43 }
 0x16e   :  { %1945 = vst [vmem:[%s3172_s4 + $0x58] sm:$0xff] %v1833_v11   ;;  %v1828_v60 = vpack.c.bf16 %v1174_v26, %v1173_v58  ;;  %v2345_v27 = vpop.eup %2344  ;;  %2364 = vpow2.f32 %v1614_v39  ;;  %v1179_v31 = vmul.f32 %v2343_v3, %v2990_v19 }
 0x16f   :  { %1961 = vst [vmem:[%s3172_s4 + $0xd8] sm:$0xff] %v1913_v45   ;;  %v1908_v2 = vpack.c.bf16 %v1206_v23, %v1205_v59  ;;  %v2347_v17 = vpop.eup %2346  ;;  %2366 = vpow2.f32 %v1646_v54  ;;  %v1211_v38 = vmul.f32 %v2345_v27, %v2998_v50 }
 0x170   :  { %1944 = vst [vmem:[%s3172_s4 + $0x50] sm:$0xff] %v1828_v60   ;;  %v2349_v20 = vpop.eup %2348  ;;  %2368 = vpow2.f32 %v1612_v63  ;;  %v1177_v63 = vmul.f32 %v2347_v17, %v3001_v35 }
 0x171   :  { %1960 = vst [vmem:[%s3172_s4 + $0xd0] sm:$0xff] %v1908_v2   ;;  %v2351_v56 = vpop.eup %2350  ;;  %v988_v41 = vadd.f32 1.0, %v2349_v20  ;;  %2370 = vpow2.f32 %v1644_v24 }
 0x172   :  { %v2353_v40 = vpop.eup %2352  ;;  %2372 = vrcp.f32 %v1017_v10  ;;  %v1020_v62 = vadd.f32 1.0, %v2351_v56 }
 0x173   :  { %v2355_v7 = vpop.eup %2354  ;;  %2374 = vrcp.f32 %v988_v41  ;;  %v986_v34 = vadd.f32 1.0, %v2353_v40 }
 0x174   :  { %v2357_v22 = vpop.eup %2356  ;;  %2376 = vrcp.f32 %v1020_v62  ;;  %v1018_v25 = vadd.f32 1.0, %v2355_v7 }
 0x175   :  { %v2359_v30 = vpop.eup %2358  ;;  %2378 = vrcp.f32 %v986_v34  ;;  %v991_v33 = vadd.f32 1.0, %v2357_v22 }
 0x176   :  { %v2361_v61 = vpop.eup %2360  ;;  %2380 = vrcp.f32 %v1018_v25  ;;  %v1023_v46 = vadd.f32 1.0, %v2359_v30 }
 0x177   :  { %v2363_v28 = vpop.eup %2362  ;;  %2382 = vrcp.f32 %v991_v33  ;;  %v989_v13 = vadd.f32 1.0, %v2361_v61 }
 0x178   :  { %v2365_v32 = vpop.eup %2364  ;;  %2384 = vrcp.f32 %v1023_v46  ;;  %v1021_v48 = vadd.f32 1.0, %v2363_v28 }
 0x179   :  { %v2367_v16 = vpop.eup %2366  ;;  %2386 = vrcp.f32 %v989_v13  ;;  %v992_v14 = vadd.f32 1.0, %v2365_v32 }
 0x17a   :  { %v2369_v29 = vpop.eup %2368  ;;  %2388 = vrcp.f32 %v1021_v48  ;;  %v1024_v49 = vadd.f32 1.0, %v2367_v16 }
 0x17b   :  { %v2371_v12 = vpop.eup %2370  ;;  %2390 = vrcp.f32 %v992_v14  ;;  %v990_v8 = vadd.f32 1.0, %v2369_v29 }
 0x17c   :  { %v2373_v1 = vpop.eup %2372  ;;  %2392 = vrcp.f32 %v1024_v49  ;;  %v1022_v43 = vadd.f32 1.0, %v2371_v12 }
 0x17d   :  { %v2375_v39 = vpop.eup %2374  ;;  %2394 = vrcp.f32 %v990_v8  ;;  %v1209_v26 = vmul.f32 %v2373_v1, %v3012_v9 }
 0x17e   :  { %v2377_v54 = vpop.eup %2376  ;;  %v1180_v0 = vmul.f32 %v2375_v39, %v3040_v55  ;;  %2396 = vrcp.f32 %v1022_v43 }
 0x17f   :  { %v2379_v51 = vpop.eup %2378  ;;  %v1212_v52 = vmul.f32 %v2377_v54, %v3046_v18 }
 0x180   :  { %v2381_v15 = vpop.eup %2380  ;;  %v1843_v44 = vpack.c.bf16 %v1180_v0, %v1179_v31  ;;  %v1178_v58 = vmul.f32 %v2379_v51, %v3065_v4 }
 0x181   :  { %v2383_v11 = vpop.eup %2382  ;;  %v1923_v59 = vpack.c.bf16 %v1212_v52, %v1211_v38  ;;  %v1210_v19 = vmul.f32 %v2381_v15, %v3072_v6 }
 0x182   :  { %v2385_v45 = vpop.eup %2384  ;;  %1947 = vst [vmem:[%s3172_s4 + $0x68] sm:$0xff] %v1843_v44   ;;  %v1838_v50 = vpack.c.bf16 %v1178_v58, %v1177_v63  ;;  %v1183_v6 = vmul.f32 %v2383_v11, %v3074_v21 }
 0x183   :  { %v2387_v55 = vpop.eup %2386  ;;  %1963 = vst [vmem:[%s3172_s4 + $0xe8] sm:$0xff] %v1923_v59   ;;  %v1918_v35 = vpack.c.bf16 %v1210_v19, %v1209_v26  ;;  %v1215_v60 = vmul.f32 %v2385_v45, %v3077_v57 }
 0x184   :  { %v2389_v18 = vpop.eup %2388  ;;  %1946 = vst [vmem:[%s3172_s4 + $0x60] sm:$0xff] %v1838_v50   ;;  %v1181_v2 = vmul.f32 %v2387_v55, %v3082_v37 }
 0x185   :  { %v2391_v9 = vpop.eup %2390  ;;  %1962 = vst [vmem:[%s3172_s4 + $0xe0] sm:$0xff] %v1918_v35   ;;  %v1213_v20 = vmul.f32 %v2389_v18, %v3084_v5 }
 0x186   :  { %v2393_v4 = vpop.eup %2392  ;;  %v1184_v23 = vmul.f32 %v2391_v9, %v3087_v42 }
 0x187   :  { %v2395_v3 = vpop.eup %2394  ;;  %v1216_v24 = vmul.f32 %v2393_v4, %v3089_v47 }
 0x188   :  { %v2397_v27 = vpop.eup %2396  ;;  %v1853_v10 = vpack.c.bf16 %v1184_v23, %v1183_v6  ;;  %v1182_v17 = vmul.f32 %v2395_v3, %v3094_v53 }
 0x189   :  { %v1933_v56 = vpack.c.bf16 %v1216_v24, %v1215_v60  ;;  %v1214_v41 = vmul.f32 %v2397_v27, %v3106_v36 }
 0x18a   :  { %1949 = vst [vmem:[%s3172_s4 + $0x78] sm:$0xff] %v1853_v10   ;;  %v1848_v21 = vpack.c.bf16 %v1182_v17, %v1181_v2 }
 0x18b   :  { %1965 = vst [vmem:[%s3172_s4 + $0xf8] sm:$0xff] %v1933_v56   ;;  %v1928_v57 = vpack.c.bf16 %v1214_v41, %v1213_v20 }
 0x18c   :  { %1948 = vst [vmem:[%s3172_s4 + $0x70] sm:$0xff] %v1848_v21  }
 0x18d   :  { %1964 = vst [vmem:[%s3172_s4 + $0xf0] sm:$0xff] %v1928_v57  }

// kernel: _lambda_.11
= control target key start
LH: loop header
LB: loop body
LE: loop exit
PB: predicated region body
PF: predicated region fallthrough
CT: control target
= control target key end

     0   :  { %s3559_s3 = inlined_call_operand.vmem [shape: bf16[128,128], index: 3, kind: input, shape index: {}]   ;;  %s3560_s2 = inlined_call_operand.vmem [shape: bf16[128,128], index: 2, kind: input, shape index: {}]   ;;  %s3561_s1 = inlined_call_operand.vmem [shape: bf16[512,128], index: 1, kind: input, shape index: {}]   ;;  %s3562_s0 = inlined_call_operand.vmem [shape: bf16[512,128], index: 0, kind: input, shape index: {}]   ;;  %s3563_s4 = inlined_call_operand.vmem [shape: f32[1,128], index: 4, kind: input, shape index: {}]   ;;  %s3564_s5 = inlined_call_operand.vmem [shape: f32[1,128], index: 5, kind: input, shape index: {}]   ;;  %s3565_s6 = inlined_call_operand.vmem [shape: f32[512,128], index: 6, kind: output, shape index: {}]  }
   0x1   :  { %v2350_v0 = vld [vmem:[%s3559_s3] sm:$0xff]   ;;  %v2352_v2 = vld [vmem:[%s3559_s3 + $0x8] sm:$0xff]   ;;  %v2354_v4 = vld [vmem:[%s3559_s3 + $0x10] sm:$0xff]  }
   0x2   :  { %v2351_v1 = vld [vmem:[%s3560_s2] sm:$0xff]   ;;  %2126 = vmatprep.subr.bf16.mxu1 %v2350_v0  ;;  %v2353_v3 = vld [vmem:[%s3560_s2 + $0x8] sm:$0xff]   ;;  %v2355_v5 = vld [vmem:[%s3560_s2 + $0x10] sm:$0xff]  }
   0x3   :  { %2206 = vmatprep.subr.bf16.mxu0 %v2351_v1  ;;  %2127 = vmatpush3.bf16.msra.mxu1 %v2350_v0  ;;  %v2356_v6 = vld [vmem:[%s3559_s3 + $0x18] sm:$0xff]   ;;  %v2358_v8 = vld [vmem:[%s3559_s3 + $0x20] sm:$0xff]   ;;  %v2360_v10 = vld [vmem:[%s3559_s3 + $0x28] sm:$0xff]  }
   0x4   :  { %2207 = vmatpush3.bf16.msra.mxu0 %v2351_v1  ;;  %2128 = vmatprep.subr.bf16.mxu1 %v2352_v2  ;;  %v2357_v7 = vld [vmem:[%s3560_s2 + $0x18] sm:$0xff]   ;;  %v2359_v9 = vld [vmem:[%s3560_s2 + $0x20] sm:$0xff]   ;;  %v2361_v11 = vld [vmem:[%s3560_s2 + $0x28] sm:$0xff]  }
   0x5   :  { %2208 = vmatprep.subr.bf16.mxu0 %v2353_v3  ;;  %v2366_v12 = vld [vmem:[%s3561_s1] sm:$0xff]   ;;  %v2362_v14 = vld [vmem:[%s3559_s3 + $0x30] sm:$0xff]   ;;  %v2364_v16 = vld [vmem:[%s3559_s3 + $0x38] sm:$0xff]  }
   0x6   :  { %v2367_v13 = vld [vmem:[%s3562_s0] sm:$0xff]   ;;  %2142 = vmatprep.mubr.bf16.mxu1 %v2366_v12  ;;  %v2363_v15 = vld [vmem:[%s3560_s2 + $0x30] sm:$0xff]   ;;  %v2365_v17 = vld [vmem:[%s3560_s2 + $0x38] sm:$0xff]  }
   0x7   :  { %2129 = vmatpush3.bf16.msra.mxu1 %v2352_v2  ;;  %2222 = vmatprep.mubr.bf16.mxu0 %v2367_v13  ;;  %v2368_v18 = vld [vmem:[%s3561_s1 + $0x8] sm:$0xff]   ;;  %v2370_v20 = vld [vmem:[%s3561_s1 + $0x10] sm:$0xff]   ;;  %v2372_v22 = vld [vmem:[%s3561_s1 + $0x18] sm:$0xff]  }
   0x8   :  { %2209 = vmatpush3.bf16.msra.mxu0 %v2353_v3  ;;  %2130 = vmatprep.subr.bf16.mxu1 %v2354_v4  ;;  %v2369_v19 = vld [vmem:[%s3562_s0 + $0x8] sm:$0xff]   ;;  %v2371_v21 = vld [vmem:[%s3562_s0 + $0x10] sm:$0xff]   ;;  %v2373_v23 = vld [vmem:[%s3562_s0 + $0x18] sm:$0xff]  }
   0x9   :  { %2210 = vmatprep.subr.bf16.mxu0 %v2355_v5  ;;  %v2374_v24 = vld [vmem:[%s3561_s1 + $0x20] sm:$0xff]   ;;  %v2376_v26 = vld [vmem:[%s3561_s1 + $0x28] sm:$0xff]   ;;  %v2378_v28 = vld [vmem:[%s3561_s1 + $0x30] sm:$0xff]  }
   0xa   :  { %v2375_v25 = vld [vmem:[%s3562_s0 + $0x20] sm:$0xff]   ;;  %v2377_v27 = vld [vmem:[%s3562_s0 + $0x28] sm:$0xff]   ;;  %v2379_v29 = vld [vmem:[%s3562_s0 + $0x30] sm:$0xff]  }
   0xb   :  { %2131 = vmatpush3.bf16.msra.mxu1 %v2354_v4  ;;  %v2380_v30 = vld [vmem:[%s3561_s1 + $0x38] sm:$0xff]   ;;  %v2382_v32 = vld [vmem:[%s3561_s1 + $0x40] sm:$0xff]   ;;  %v2384_v34 = vld [vmem:[%s3561_s1 + $0x48] sm:$0xff]  }
   0xc   :  { %2211 = vmatpush3.bf16.msra.mxu0 %v2355_v5  ;;  %2132 = vmatprep.subr.bf16.mxu1 %v2356_v6  ;;  %v2381_v31 = vld [vmem:[%s3562_s0 + $0x38] sm:$0xff]   ;;  %v2383_v33 = vld [vmem:[%s3562_s0 + $0x40] sm:$0xff]   ;;  %v2385_v35 = vld [vmem:[%s3562_s0 + $0x48] sm:$0xff]  }
   0xd   :  { %2212 = vmatprep.subr.bf16.mxu0 %v2357_v7  ;;  %v2386_v36 = vld [vmem:[%s3561_s1 + $0x50] sm:$0xff]   ;;  %v2388_v38 = vld [vmem:[%s3561_s1 + $0x58] sm:$0xff]   ;;  %v2390_v40 = vld [vmem:[%s3561_s1 + $0x60] sm:$0xff]  }
   0xe   :  { %v2387_v37 = vld [vmem:[%s3562_s0 + $0x50] sm:$0xff]   ;;  %v2389_v39 = vld [vmem:[%s3562_s0 + $0x58] sm:$0xff]   ;;  %v2391_v41 = vld [vmem:[%s3562_s0 + $0x60] sm:$0xff]  }
   0xf   :  { %2133 = vmatpush3.bf16.msra.mxu1 %v2356_v6  ;;  %v2392_v42 = vld [vmem:[%s3561_s1 + $0x68] sm:$0xff]   ;;  %v2394_v44 = vld [vmem:[%s3561_s1 + $0x70] sm:$0xff]   ;;  %v2396_v46 = vld [vmem:[%s3561_s1 + $0x78] sm:$0xff]  }
  0x10   :  { %2213 = vmatpush3.bf16.msra.mxu0 %v2357_v7  ;;  %2134 = vmatprep.subr.bf16.mxu1 %v2358_v8  ;;  %v2393_v43 = vld [vmem:[%s3562_s0 + $0x68] sm:$0xff]   ;;  %v2395_v45 = vld [vmem:[%s3562_s0 + $0x70] sm:$0xff]   ;;  %v2397_v47 = vld [vmem:[%s3562_s0 + $0x78] sm:$0xff]  }
  0x11   :  { %2214 = vmatprep.subr.bf16.mxu0 %v2359_v9  ;;  %v2398_v48 = vld [vmem:[%s3561_s1 + $0x80] sm:$0xff]   ;;  %v2400_v50 = vld [vmem:[%s3561_s1 + $0x88] sm:$0xff]   ;;  %v2402_v52 = vld [vmem:[%s3561_s1 + $0x90] sm:$0xff]  }
  0x12   :  { %v2399_v49 = vld [vmem:[%s3562_s0 + $0x80] sm:$0xff]   ;;  %v2401_v51 = vld [vmem:[%s3562_s0 + $0x88] sm:$0xff]   ;;  %v2403_v53 = vld [vmem:[%s3562_s0 + $0x90] sm:$0xff]  }
  0x13   :  { %2135 = vmatpush3.bf16.msra.mxu1 %v2358_v8  ;;  %v2404_v54 = vld [vmem:[%s3561_s1 + $0x98] sm:$0xff]   ;;  %v2406_v56 = vld [vmem:[%s3561_s1 + $0xa0] sm:$0xff]   ;;  %v2408_v58 = vld [vmem:[%s3561_s1 + $0xa8] sm:$0xff]  }
  0x14   :  { %2215 = vmatpush3.bf16.msra.mxu0 %v2359_v9  ;;  %2136 = vmatprep.subr.bf16.mxu1 %v2360_v10  ;;  %v2405_v55 = vld [vmem:[%s3562_s0 + $0x98] sm:$0xff]   ;;  %v2407_v57 = vld [vmem:[%s3562_s0 + $0xa0] sm:$0xff]   ;;  %v2409_v59 = vld [vmem:[%s3562_s0 + $0xa8] sm:$0xff]  }
  0x15   :  { %2216 = vmatprep.subr.bf16.mxu0 %v2361_v11  ;;  %v2410_v60 = vld [vmem:[%s3561_s1 + $0xb0] sm:$0xff]   ;;  %v2412_v62 = vld [vmem:[%s3561_s1 + $0xb8] sm:$0xff]   ;;  %v2414_v0 = vld [vmem:[%s3561_s1 + $0xc0] sm:$0xff]  }
  0x16   :  { %v2411_v61 = vld [vmem:[%s3562_s0 + $0xb0] sm:$0xff]   ;;  %v2413_v63 = vld [vmem:[%s3562_s0 + $0xb8] sm:$0xff]   ;;  %v2415_v1 = vld [vmem:[%s3562_s0 + $0xc0] sm:$0xff]  }
  0x17   :  { %2137 = vmatpush3.bf16.msra.mxu1 %v2360_v10  ;;  %v2416_v2 = vld [vmem:[%s3561_s1 + $0xc8] sm:$0xff]   ;;  %v2418_v4 = vld [vmem:[%s3561_s1 + $0xd0] sm:$0xff]   ;;  %v2420_v6 = vld [vmem:[%s3561_s1 + $0xd8] sm:$0xff]  }
  0x18   :  { %2217 = vmatpush3.bf16.msra.mxu0 %v2361_v11  ;;  %2138 = vmatprep.subr.bf16.mxu1 %v2362_v14  ;;  %v2417_v3 = vld [vmem:[%s3562_s0 + $0xc8] sm:$0xff]   ;;  %v2419_v5 = vld [vmem:[%s3562_s0 + $0xd0] sm:$0xff]   ;;  %v2421_v7 = vld [vmem:[%s3562_s0 + $0xd8] sm:$0xff]  }
  0x19   :  { %2218 = vmatprep.subr.bf16.mxu0 %v2363_v15  ;;  %v2422_v8 = vld [vmem:[%s3561_s1 + $0xe0] sm:$0xff]   ;;  %v2424_v10 = vld [vmem:[%s3561_s1 + $0xe8] sm:$0xff]   ;;  %v2426_v12 = vld [vmem:[%s3561_s1 + $0xf0] sm:$0xff]  }
  0x1a   :  { %v2423_v9 = vld [vmem:[%s3562_s0 + $0xe0] sm:$0xff]   ;;  %v2425_v11 = vld [vmem:[%s3562_s0 + $0xe8] sm:$0xff]   ;;  %v2427_v13 = vld [vmem:[%s3562_s0 + $0xf0] sm:$0xff]  }
  0x1b   :  { %2139 = vmatpush3.bf16.msra.mxu1 %v2362_v14  ;;  %v2428_v14 = vld [vmem:[%s3561_s1 + $0xf8] sm:$0xff]  }
  0x1c   :  { %2219 = vmatpush3.bf16.msra.mxu0 %v2363_v15  ;;  %2140 = vmatprep.subr.bf16.mxu1 %v2364_v16  ;;  %v2429_v15 = vld [vmem:[%s3562_s0 + $0xf8] sm:$0xff]  }
  0x1d   :  { %2220 = vmatprep.subr.bf16.mxu0 %v2365_v17 }
  0x1f   :  { %2141 = vmatpush3.bf16.msra.mxu1 %v2364_v16 }
  0x20   :  { %2221 = vmatpush3.bf16.msra.mxu0 %v2365_v17 }
  0x22   :  { %2143 = vmatmul.mubr.bf16.vlgmr.msra.gmra.mrb[0].mxu1 %v2368_v18  ;;  %v2966_v18 = vld [vmem:[%s3563_s4] ss:$0 sm:$0xff] }
  0x23   :  { %2223 = vmatmul.mubr.bf16.vlgmr.msra.gmra.mrb[0].mxu0 %v2369_v19  ;;  %2146 = vmatprep.mubr.bf16.mxu1 %v2370_v20 }
  0x24   :  { %2226 = vmatprep.mubr.bf16.mxu0 %v2371_v21 }
  0x2a   :  { %2147 = vmatmul.mubr.bf16.gmra.mrb[4].mxu1 %v2372_v22 }
  0x2b   :  { %2227 = vmatmul.mubr.bf16.gmra.mrb[4].mxu0 %v2373_v23  ;;  %2150 = vmatprep.mubr.bf16.mxu1 %v2374_v24  ;;  %v2971_v23 = vld [vmem:[%s3564_s5] ss:$0 sm:$0xff] }
  0x2c   :  { %2230 = vmatprep.mubr.bf16.mxu0 %v2375_v25 }
  0x32   :  { %2151 = vmatmul.mubr.bf16.gmra.mrb[8].mxu1 %v2376_v26 }
  0x33   :  { %2231 = vmatmul.mubr.bf16.gmra.mrb[8].mxu0 %v2377_v27  ;;  %2154 = vmatprep.mubr.bf16.mxu1 %v2378_v28 }
  0x34   :  { %2234 = vmatprep.mubr.bf16.mxu0 %v2379_v29 }
  0x3a   :  { %2155 = vmatmul.mubr.bf16.gmra.mrb[12].mxu1 %v2380_v30 }
  0x3b   :  { %2235 = vmatmul.mubr.bf16.gmra.mrb[12].mxu0 %v2381_v31  ;;  %2158 = vmatprep.mubr.bf16.mxu1 %v2382_v32 }
  0x3c   :  { %2238 = vmatprep.mubr.bf16.mxu0 %v2383_v33 }
  0x42   :  { %2159 = vmatmul.mubr.bf16.gmra.mrb[16].mxu1 %v2384_v34 }
  0x43   :  { %2239 = vmatmul.mubr.bf16.gmra.mrb[16].mxu0 %v2385_v35  ;;  %2162 = vmatprep.mubr.bf16.mxu1 %v2386_v36 }
  0x44   :  { %2242 = vmatprep.mubr.bf16.mxu0 %v2387_v37 }
  0x4a   :  { %2163 = vmatmul.mubr.bf16.gmra.mrb[20].mxu1 %v2388_v38 }
  0x4b   :  { %2243 = vmatmul.mubr.bf16.gmra.mrb[20].mxu0 %v2389_v39  ;;  %2166 = vmatprep.mubr.bf16.mxu1 %v2390_v40 }
  0x4c   :  { %2246 = vmatprep.mubr.bf16.mxu0 %v2391_v41 }
  0x52   :  { %2167 = vmatmul.mubr.bf16.gmra.mrb[24].mxu1 %v2392_v42 }
  0x53   :  { %2247 = vmatmul.mubr.bf16.gmra.mrb[24].mxu0 %v2393_v43  ;;  %2170 = vmatprep.mubr.bf16.mxu1 %v2394_v44 }
  0x54   :  { %2250 = vmatprep.mubr.bf16.mxu0 %v2395_v45 }
  0x5a   :  { %2171 = vmatmul.mubr.bf16.gmra.mrb[28].mxu1 %v2396_v46 }
  0x5b   :  { %2251 = vmatmul.mubr.bf16.gmra.mrb[28].mxu0 %v2397_v47  ;;  %2174 = vmatprep.mubr.bf16.mxu1 %v2398_v48 }
  0x5c   :  { %2254 = vmatprep.mubr.bf16.mxu0 %v2399_v49 }
  0x62   :  { %2175 = vmatmul.mubr.bf16.gmra.mrb[32].mxu1 %v2400_v50 }
  0x63   :  { %2255 = vmatmul.mubr.bf16.gmra.mrb[32].mxu0 %v2401_v51  ;;  %2178 = vmatprep.mubr.bf16.mxu1 %v2402_v52 }
  0x64   :  { %2258 = vmatprep.mubr.bf16.mxu0 %v2403_v53 }
  0x6a   :  { %2179 = vmatmul.mubr.bf16.gmra.mrb[36].mxu1 %v2404_v54 }
  0x6b   :  { %2259 = vmatmul.mubr.bf16.gmra.mrb[36].mxu0 %v2405_v55  ;;  %2182 = vmatprep.mubr.bf16.mxu1 %v2406_v56 }
  0x6c   :  { %2262 = vmatprep.mubr.bf16.mxu0 %v2407_v57 }
  0x72   :  { %2183 = vmatmul.mubr.bf16.gmra.mrb[40].mxu1 %v2408_v58 }
  0x73   :  { %2263 = vmatmul.mubr.bf16.gmra.mrb[40].mxu0 %v2409_v59  ;;  %2186 = vmatprep.mubr.bf16.mxu1 %v2410_v60 }
  0x74   :  { %2266 = vmatprep.mubr.bf16.mxu0 %v2411_v61 }
  0x7a   :  { %2187 = vmatmul.mubr.bf16.gmra.mrb[44].mxu1 %v2412_v62 }
  0x7b   :  { %2267 = vmatmul.mubr.bf16.gmra.mrb[44].mxu0 %v2413_v63  ;;  %2190 = vmatprep.mubr.bf16.mxu1 %v2414_v0 }
  0x7c   :  { %2270 = vmatprep.mubr.bf16.mxu0 %v2415_v1 }
  0x82   :  { %2191 = vmatmul.mubr.bf16.gmra.mrb[48].mxu1 %v2416_v2 }
  0x83   :  { %2271 = vmatmul.mubr.bf16.gmra.mrb[48].mxu0 %v2417_v3  ;;  %2194 = vmatprep.mubr.bf16.mxu1 %v2418_v4 }
  0x84   :  { %2274 = vmatprep.mubr.bf16.mxu0 %v2419_v5 }
  0x8a   :  { %2195 = vmatmul.mubr.bf16.gmra.mrb[52].mxu1 %v2420_v6 }
  0x8b   :  { %2275 = vmatmul.mubr.bf16.gmra.mrb[52].mxu0 %v2421_v7  ;;  %2198 = vmatprep.mubr.bf16.mxu1 %v2422_v8 }
  0x8c   :  { %2278 = vmatprep.mubr.bf16.mxu0 %v2423_v9 }
  0x92   :  { %2199 = vmatmul.mubr.bf16.gmra.mrb[56].mxu1 %v2424_v10 }
  0x93   :  { %2279 = vmatmul.mubr.bf16.gmra.mrb[56].mxu0 %v2425_v11  ;;  %2202 = vmatprep.mubr.bf16.mxu1 %v2426_v12 }
  0x94   :  { %2282 = vmatprep.mubr.bf16.mxu0 %v2427_v13 }
  0x9a   :  { %2203 = vmatmul.mubr.bf16.gmra.mrb[60].mxu1 %v2428_v14 }
  0x9b   :  { %2283 = vmatmul.mubr.bf16.gmra.mrb[60].mxu0 %v2429_v15 }
  0xf5   :  { %v2144_v16 = vpop.f32.mrb[0].mxu1 }
  0xf6   :  { %v2224_v17 = vpop.f32.mrb[0].mxu0  ;;  %v458_v19 = vpop.f32.mrb[1].mxu1 }
  0xf7   :  { %v996_v20 = vadd.f32 %v2224_v17, %v2144_v16  ;;  %v987_v21 = vpop.f32.mrb[1].mxu0  ;;  %v2145_v22 = vpop.f32.mrb[2].mxu1 }
  0xf8   :  { %v988_v24 = vadd.f32 %v987_v21, %v458_v19  ;;  %v2225_v25 = vpop.f32.mrb[2].mxu0  ;;  %v461_v26 = vpop.f32.mrb[3].mxu1 }
  0xf9   :  { %v1251_v27 = vmul.f32 %v2966_v18, %v996_v20  ;;  %v999_v28 = vadd.f32 %v2225_v25, %v2145_v22  ;;  %v990_v29 = vpop.f32.mrb[3].mxu0 }
  0xfa   :  { %v1249_v30 = vmul.f32 %v2966_v18, %v988_v24  ;;  %v991_v31 = vadd.f32 %v990_v29, %v461_v26 }
  0xfb   :  { %v2976_v32 = vadd.f32 %v2971_v23, %v1251_v27  ;;  %v1252_v33 = vmul.f32 %v2966_v18, %v999_v28 }
  0xfc   :  { %v2980_v34 = vadd.f32 %v2971_v23, %v1249_v30  ;;  %v1250_v35 = vmul.f32 %v2966_v18, %v991_v31 }
  0xfd   :  { %v1984_v36 = vmul.f32 -1.442695, %v2976_v32  ;;  %v2985_v37 = vadd.f32 %v2971_v23, %v1252_v33  ;;  %v2148_v38 = vpop.f32.mrb[4].mxu1 }
  0xfe   :  { %v1982_v39 = vmul.f32 -1.442695, %v2980_v34  ;;  %v2989_v40 = vadd.f32 %v2971_v23, %v1250_v35  ;;  %v2228_v41 = vpop.f32.mrb[4].mxu0  ;;  %v474_v42 = vpop.f32.mrb[5].mxu1 }
  0xff   :  { %2430 = vpow2.f32 %v1984_v36  ;;  %v1985_v43 = vmul.f32 -1.442695, %v2985_v37  ;;  %v1012_v44 = vadd.f32 %v2228_v41, %v2148_v38  ;;  %v1003_v45 = vpop.f32.mrb[5].mxu0  ;;  %v2149_v46 = vpop.f32.mrb[6].mxu1 }
 0x100   :  { %2432 = vpow2.f32 %v1982_v39  ;;  %v1983_v47 = vmul.f32 -1.442695, %v2989_v40  ;;  %v1004_v48 = vadd.f32 %v1003_v45, %v474_v42  ;;  %v2229_v49 = vpop.f32.mrb[6].mxu0  ;;  %v477_v50 = vpop.f32.mrb[7].mxu1 }
 0x101   :  { %2434 = vpow2.f32 %v1985_v43  ;;  %v1255_v51 = vmul.f32 %v2966_v18, %v1012_v44  ;;  %v1015_v52 = vadd.f32 %v2229_v49, %v2149_v46  ;;  %v1006_v53 = vpop.f32.mrb[7].mxu0 }
 0x102   :  { %2436 = vpow2.f32 %v1983_v47  ;;  %v1253_v54 = vmul.f32 %v2966_v18, %v1004_v48  ;;  %v1007_v55 = vadd.f32 %v1006_v53, %v477_v50 }
 0x103   :  { %v2996_v56 = vadd.f32 %v2971_v23, %v1255_v51  ;;  %v1256_v57 = vmul.f32 %v2966_v18, %v1015_v52 }
 0x104   :  { %v3000_v58 = vadd.f32 %v2971_v23, %v1253_v54  ;;  %v1254_v59 = vmul.f32 %v2966_v18, %v1007_v55 }
 0x105   :  { %v1988_v60 = vmul.f32 -1.442695, %v2996_v56  ;;  %v3005_v61 = vadd.f32 %v2971_v23, %v1256_v57  ;;  %v2152_v62 = vpop.f32.mrb[8].mxu1 }
 0x106   :  { %v1986_v63 = vmul.f32 -1.442695, %v3000_v58  ;;  %v3009_v0 = vadd.f32 %v2971_v23, %v1254_v59  ;;  %v2232_v1 = vpop.f32.mrb[8].mxu0  ;;  %v490_v2 = vpop.f32.mrb[9].mxu1 }
 0x107   :  { %2438 = vpow2.f32 %v1988_v60  ;;  %v1989_v3 = vmul.f32 -1.442695, %v3005_v61  ;;  %v1028_v4 = vadd.f32 %v2232_v1, %v2152_v62  ;;  %v1019_v5 = vpop.f32.mrb[9].mxu0  ;;  %v2153_v6 = vpop.f32.mrb[10].mxu1 }
 0x108   :  { %2440 = vpow2.f32 %v1986_v63  ;;  %v1987_v7 = vmul.f32 -1.442695, %v3009_v0  ;;  %v1020_v8 = vadd.f32 %v1019_v5, %v490_v2  ;;  %v2233_v9 = vpop.f32.mrb[10].mxu0  ;;  %v493_v10 = vpop.f32.mrb[11].mxu1 }
 0x109   :  { %v2431_v11 = vpop.eup %2430  ;;  %2442 = vpow2.f32 %v1989_v3  ;;  %v1259_v12 = vmul.f32 %v2966_v18, %v1028_v4  ;;  %v1031_v13 = vadd.f32 %v2233_v9, %v2153_v6  ;;  %v1022_v14 = vpop.f32.mrb[11].mxu0 }
 0x10a   :  { %v2433_v15 = vpop.eup %2432  ;;  %v1578_v16 = vadd.f32 1.0, %v2431_v11  ;;  %2444 = vpow2.f32 %v1987_v7  ;;  %v1257_v17 = vmul.f32 %v2966_v18, %v1020_v8  ;;  %v1023_v19 = vadd.f32 %v1022_v14, %v493_v10 }
 0x10b   :  { %v2435_v20 = vpop.eup %2434  ;;  %v1576_v21 = vadd.f32 1.0, %v2433_v15  ;;  %v3016_v22 = vadd.f32 %v2971_v23, %v1259_v12  ;;  %v1260_v24 = vmul.f32 %v2966_v18, %v1031_v13 }
 0x10c   :  { %v2437_v25 = vpop.eup %2436  ;;  %2446 = vrcp.f32 %v1578_v16  ;;  %v1579_v26 = vadd.f32 1.0, %v2435_v20  ;;  %v3020_v27 = vadd.f32 %v2971_v23, %v1257_v17  ;;  %v1258_v28 = vmul.f32 %v2966_v18, %v1023_v19 }
 0x10d   :  { %2448 = vrcp.f32 %v1576_v21  ;;  %v1577_v29 = vadd.f32 1.0, %v2437_v25  ;;  %v1992_v30 = vmul.f32 -1.442695, %v3016_v22  ;;  %v3025_v31 = vadd.f32 %v2971_v23, %v1260_v24  ;;  %v2156_v33 = vpop.f32.mrb[12].mxu1 }
 0x10e   :  { %2450 = vrcp.f32 %v1579_v26  ;;  %v1990_v35 = vmul.f32 -1.442695, %v3020_v27  ;;  %v3029_v36 = vadd.f32 %v2971_v23, %v1258_v28  ;;  %v2236_v38 = vpop.f32.mrb[12].mxu0  ;;  %v506_v39 = vpop.f32.mrb[13].mxu1 }
 0x10f   :  { %2452 = vrcp.f32 %v1577_v29  ;;  %v1993_v41 = vmul.f32 -1.442695, %v3025_v31  ;;  %v1044_v42 = vadd.f32 %v2236_v38, %v2156_v33  ;;  %v1035_v43 = vpop.f32.mrb[13].mxu0  ;;  %v2157_v44 = vpop.f32.mrb[14].mxu1 }
 0x110   :  { %2454 = vpow2.f32 %v1992_v30  ;;  %v1991_v45 = vmul.f32 -1.442695, %v3029_v36  ;;  %v1036_v46 = vadd.f32 %v1035_v43, %v506_v39  ;;  %v2237_v47 = vpop.f32.mrb[14].mxu0  ;;  %v509_v48 = vpop.f32.mrb[15].mxu1 }
 0x111   :  { %v2439_v49 = vpop.eup %2438  ;;  %2456 = vpow2.f32 %v1990_v35  ;;  %v1263_v50 = vmul.f32 %v2966_v18, %v1044_v42  ;;  %v1047_v51 = vadd.f32 %v2237_v47, %v2157_v44  ;;  %v1038_v52 = vpop.f32.mrb[15].mxu0 }
 0x112   :  { %v2441_v53 = vpop.eup %2440  ;;  %v1582_v54 = vadd.f32 1.0, %v2439_v49  ;;  %2458 = vpow2.f32 %v1993_v41  ;;  %v1261_v55 = vmul.f32 %v2966_v18, %v1036_v46  ;;  %v1039_v57 = vadd.f32 %v1038_v52, %v509_v48 }
 0x113   :  { %v2443_v59 = vpop.eup %2442  ;;  %v1580_v60 = vadd.f32 1.0, %v2441_v53  ;;  %2460 = vpow2.f32 %v1991_v45  ;;  %v3036_v62 = vadd.f32 %v2971_v23, %v1263_v50  ;;  %v1264_v63 = vmul.f32 %v2966_v18, %v1047_v51 }
 0x114   :  { %v2445_v1 = vpop.eup %2444  ;;  %2462 = vrcp.f32 %v1582_v54  ;;  %v1583_v2 = vadd.f32 1.0, %v2443_v59  ;;  %v3040_v3 = vadd.f32 %v2971_v23, %v1261_v55  ;;  %v1262_v4 = vmul.f32 %v2966_v18, %v1039_v57 }
 0x115   :  { %2464 = vrcp.f32 %v1580_v60  ;;  %v1581_v5 = vadd.f32 1.0, %v2445_v1  ;;  %v1996_v6 = vmul.f32 -1.442695, %v3036_v62  ;;  %v3045_v7 = vadd.f32 %v2971_v23, %v1264_v63  ;;  %v2160_v8 = vpop.f32.mrb[16].mxu1 }
 0x116   :  { %v2447_v9 = vpop.eup %2446  ;;  %2466 = vrcp.f32 %v1583_v2  ;;  %v1994_v10 = vmul.f32 -1.442695, %v3040_v3  ;;  %v3049_v11 = vadd.f32 %v2971_v23, %v1262_v4  ;;  %v2240_v12 = vpop.f32.mrb[16].mxu0 }
 0x117   :  { %v522_v13 = vpop.f32.mrb[17].mxu1  ;;  %v2449_v14 = vpop.eup %2448  ;;  %v1770_v15 = vmul.f32 %v2447_v9, %v2976_v32  ;;  %2468 = vrcp.f32 %v1581_v5  ;;  %v1997_v16 = vmul.f32 -1.442695, %v3045_v7  ;;  %v1060_v17 = vadd.f32 %v2240_v12, %v2160_v8 }
 0x118   :  { %v1051_v19 = vpop.f32.mrb[17].mxu0  ;;  %v2161_v20 = vpop.f32.mrb[18].mxu1  ;;  %v1768_v24 = vmul.f32 %v2449_v14, %v2980_v34  ;;  %2470 = vpow2.f32 %v1996_v6  ;;  %v1995_v25 = vmul.f32 -1.442695, %v3049_v11 }
 0x119   :  { %v2451_v21 = vpop.eup %2450  ;;  %v1052_v26 = vadd.f32 %v1051_v19, %v522_v13  ;;  %v2241_v28 = vpop.f32.mrb[18].mxu0  ;;  %1834 = vst [vmem:[%s3565_s6 + $0x10] sm:$0xff] %v1770_v15  ;;  %2472 = vpow2.f32 %v1994_v10  ;;  %v1267_v33 = vmul.f32 %v2966_v18, %v1060_v17 }
 0x11a   :  { %v525_v29 = vpop.f32.mrb[19].mxu1  ;;  %v2453_v30 = vpop.eup %2452  ;;  %v1771_v32 = vmul.f32 %v2451_v21, %v2985_v37  ;;  %v1063_v35 = vadd.f32 %v2241_v28, %v2161_v20  ;;  %1832 = vst [vmem:[%s3565_s6] sm:$0xff] %v1768_v24  ;;  %2474 = vpow2.f32 %v1997_v16 }
 0x11b   :  { %v1054_v38 = vpop.f32.mrb[19].mxu0  ;;  %v2455_v39 = vpop.eup %2454  ;;  %v1769_v34 = vmul.f32 %v2453_v30, %v2989_v40  ;;  %v1265_v41 = vmul.f32 %v2966_v18, %v1052_v26  ;;  %2476 = vpow2.f32 %v1995_v25  ;;  %v3069_v44 = vadd.f32 %v2971_v23, %v1267_v33 }
 0x11c   :  { %v1055_v42 = vadd.f32 %v1054_v38, %v525_v29  ;;  %v2457_v43 = vpop.eup %2456  ;;  %1835 = vst [vmem:[%s3565_s6 + $0x18] sm:$0xff] %v1771_v32  ;;  %v1586_v37 = vadd.f32 1.0, %v2455_v39  ;;  %v1268_v45 = vmul.f32 %v2966_v18, %v1063_v35 }
 0x11d   :  { %v2459_v46 = vpop.eup %2458  ;;  %1833 = vst [vmem:[%s3565_s6 + $0x8] sm:$0xff] %v1769_v34  ;;  %v1584_v40 = vadd.f32 1.0, %v2457_v43  ;;  %v3076_v47 = vadd.f32 %v2971_v23, %v1265_v41  ;;  %v2000_v51 = vmul.f32 -1.442695, %v3069_v44  ;;  %v2164_v53 = vpop.f32.mrb[20].mxu1 }
 0x11e   :  { %v1266_v48 = vmul.f32 %v2966_v18, %v1055_v42  ;;  %v2461_v49 = vpop.eup %2460  ;;  %2478 = vrcp.f32 %v1586_v37  ;;  %v1587_v50 = vadd.f32 1.0, %v2459_v46  ;;  %v3081_v52 = vadd.f32 %v2971_v23, %v1268_v45  ;;  %v2244_v60 = vpop.f32.mrb[20].mxu0 }
 0x11f   :  { %v2463_v54 = vpop.eup %2462  ;;  %2480 = vrcp.f32 %v1584_v40  ;;  %v1585_v55 = vadd.f32 1.0, %v2461_v49  ;;  %v1998_v57 = vmul.f32 -1.442695, %v3076_v47  ;;  %v538_v63 = vpop.f32.mrb[21].mxu1  ;;  %v1076_v5 = vadd.f32 %v2244_v60, %v2164_v53 }
 0x120   :  { %v3085_v59 = vadd.f32 %v2971_v23, %v1266_v48  ;;  %v2465_v1 = vpop.eup %2464  ;;  %v1774_v2 = vmul.f32 %v2463_v54, %v2996_v56  ;;  %2482 = vrcp.f32 %v1587_v50  ;;  %v2001_v4 = vmul.f32 -1.442695, %v3081_v52  ;;  %v1067_v6 = vpop.f32.mrb[21].mxu0 }
 0x121   :  { %v2165_v8 = vpop.f32.mrb[22].mxu1  ;;  %v2467_v9 = vpop.eup %2466  ;;  %v1772_v10 = vmul.f32 %v2465_v1, %v3000_v58  ;;  %2484 = vrcp.f32 %v1585_v55  ;;  %v1068_v13 = vadd.f32 %v1067_v6, %v538_v63  ;;  %v1271_v17 = vmul.f32 %v2966_v18, %v1076_v5 }
 0x122   :  { %v1999_v12 = vmul.f32 -1.442695, %v3085_v59  ;;  %v2245_v14 = vpop.f32.mrb[22].mxu0  ;;  %v541_v15 = vpop.f32.mrb[23].mxu1  ;;  %1838 = vst [vmem:[%s3565_s6 + $0x30] sm:$0xff] %v1774_v2  ;;  %v1775_v56 = vmul.f32 %v2467_v9, %v3005_v61  ;;  %2486 = vpow2.f32 %v2000_v51 }
 0x123   :  { %v2469_v16 = vpop.eup %2468  ;;  %v1079_v19 = vadd.f32 %v2245_v14, %v2165_v8  ;;  %v1070_v20 = vpop.f32.mrb[23].mxu0  ;;  %1836 = vst [vmem:[%s3565_s6 + $0x20] sm:$0xff] %v1772_v10  ;;  %2488 = vpow2.f32 %v1998_v57  ;;  %v1269_v24 = vmul.f32 %v2966_v18, %v1068_v13  ;;  %v3105_v28 = vadd.f32 %v2971_v23, %v1271_v17 }
 0x124   :  { %v2471_v21 = vpop.eup %2470  ;;  %v1773_v58 = vmul.f32 %v2469_v16, %v3009_v0  ;;  %v1071_v25 = vadd.f32 %v1070_v20, %v541_v15  ;;  %1839 = vst [vmem:[%s3565_s6 + $0x38] sm:$0xff] %v1775_v56  ;;  %2490 = vpow2.f32 %v2001_v4 }
 0x125   :  { %v2473_v26 = vpop.eup %2472  ;;  %v1590_v61 = vadd.f32 1.0, %v2471_v21  ;;  %v1272_v29 = vmul.f32 %v2966_v18, %v1079_v19  ;;  %2492 = vpow2.f32 %v1999_v12  ;;  %v3112_v32 = vadd.f32 %v2971_v23, %v1269_v24  ;;  %v2168_v41 = vpop.f32.mrb[24].mxu1 }
 0x126   :  { %v2475_v30 = vpop.eup %2474  ;;  %1837 = vst [vmem:[%s3565_s6 + $0x28] sm:$0xff] %v1773_v58  ;;  %v1588_v0 = vadd.f32 1.0, %v2473_v26  ;;  %v1270_v33 = vmul.f32 %v2966_v18, %v1071_v25  ;;  %v2004_v39 = vmul.f32 -1.442695, %v3105_v28  ;;  %v2248_v45 = vpop.f32.mrb[24].mxu0 }
 0x127   :  { %v2477_v35 = vpop.eup %2476  ;;  %2494 = vrcp.f32 %v1590_v61  ;;  %v1591_v38 = vadd.f32 1.0, %v2475_v30  ;;  %v3117_v34 = vadd.f32 %v2971_v23, %v1272_v29  ;;  %v2002_v43 = vmul.f32 -1.442695, %v3112_v32  ;;  %v554_v46 = vpop.f32.mrb[25].mxu1 }
 0x128   :  { %2496 = vrcp.f32 %v1588_v0  ;;  %v1589_v42 = vadd.f32 1.0, %v2477_v35  ;;  %v3121_v37 = vadd.f32 %v2971_v23, %v1270_v33  ;;  %v2479_v40 = vpop.eup %2478  ;;  %v1092_v49 = vadd.f32 %v2248_v45, %v2168_v41  ;;  %v1083_v50 = vpop.f32.mrb[25].mxu0 }
 0x129   :  { %2498 = vrcp.f32 %v1591_v38  ;;  %v2005_v48 = vmul.f32 -1.442695, %v3117_v34  ;;  %v2169_v51 = vpop.f32.mrb[26].mxu1  ;;  %v2481_v53 = vpop.eup %2480  ;;  %v1778_v54 = vmul.f32 %v2479_v40, %v3016_v22  ;;  %v1084_v57 = vadd.f32 %v1083_v50, %v554_v46 }
 0x12a   :  { %2500 = vrcp.f32 %v1589_v42  ;;  %v2003_v55 = vmul.f32 -1.442695, %v3121_v37  ;;  %v2249_v60 = vpop.f32.mrb[26].mxu0  ;;  %v557_v63 = vpop.f32.mrb[27].mxu1  ;;  %v1776_v2 = vmul.f32 %v2481_v53, %v3020_v27  ;;  %v1275_v4 = vmul.f32 %v2966_v18, %v1092_v49 }
 0x12b   :  { %v2483_v1 = vpop.eup %2482  ;;  %2502 = vpow2.f32 %v2004_v39  ;;  %v1095_v5 = vadd.f32 %v2249_v60, %v2169_v51  ;;  %v1086_v6 = vpop.f32.mrb[27].mxu0  ;;  %1842 = vst [vmem:[%s3565_s6 + $0x50] sm:$0xff] %v1778_v54  ;;  %v1273_v9 = vmul.f32 %v2966_v18, %v1084_v57 }
 0x12c   :  { %v2485_v8 = vpop.eup %2484  ;;  %v1779_v22 = vmul.f32 %v2483_v1, %v3025_v31  ;;  %2504 = vpow2.f32 %v2002_v43  ;;  %v1087_v10 = vadd.f32 %v1086_v6, %v557_v63  ;;  %1840 = vst [vmem:[%s3565_s6 + $0x40] sm:$0xff] %v1776_v2  ;;  %v3138_v13 = vadd.f32 %v2971_v23, %v1275_v4 }
 0x12d   :  { %v2487_v12 = vpop.eup %2486  ;;  %v1777_v27 = vmul.f32 %v2485_v8, %v3029_v36  ;;  %2506 = vpow2.f32 %v2005_v48  ;;  %v1276_v14 = vmul.f32 %v2966_v18, %v1095_v5  ;;  %v3145_v16 = vadd.f32 %v2971_v23, %v1273_v9  ;;  %v2172_v21 = vpop.f32.mrb[28].mxu1 }
 0x12e   :  { %v2489_v15 = vpop.eup %2488  ;;  %1843 = vst [vmem:[%s3565_s6 + $0x58] sm:$0xff] %v1779_v22  ;;  %v1594_v31 = vadd.f32 1.0, %v2487_v12  ;;  %2508 = vpow2.f32 %v2003_v55  ;;  %v1274_v56 = vmul.f32 %v2966_v18, %v1087_v10  ;;  %v2008_v19 = vmul.f32 -1.442695, %v3138_v13  ;;  %v2252_v61 = vpop.f32.mrb[28].mxu0 }
 0x12f   :  { %v2491_v17 = vpop.eup %2490  ;;  %1841 = vst [vmem:[%s3565_s6 + $0x48] sm:$0xff] %v1777_v27  ;;  %v1592_v36 = vadd.f32 1.0, %v2489_v15  ;;  %v3153_v20 = vadd.f32 %v2971_v23, %v1276_v14  ;;  %v2006_v25 = vmul.f32 -1.442695, %v3145_v16  ;;  %v570_v29 = vpop.f32.mrb[29].mxu1  ;;  %v1108_v35 = vadd.f32 %v2252_v61, %v2172_v21 }
 0x130   :  { %v2493_v58 = vpop.eup %2492  ;;  %2510 = vrcp.f32 %v1594_v31  ;;  %v1595_v24 = vadd.f32 1.0, %v2491_v17  ;;  %v3157_v26 = vadd.f32 %v2971_v23, %v1274_v56  ;;  %v1099_v38 = vpop.f32.mrb[29].mxu0 }
 0x131   :  { %v2495_v30 = vpop.eup %2494  ;;  %2512 = vrcp.f32 %v1592_v36  ;;  %v1593_v0 = vadd.f32 1.0, %v2493_v58  ;;  %v2009_v33 = vmul.f32 -1.442695, %v3153_v20  ;;  %v2173_v39 = vpop.f32.mrb[30].mxu1  ;;  %v1100_v45 = vadd.f32 %v1099_v38, %v570_v29 }
 0x132   :  { %v2497_v41 = vpop.eup %2496  ;;  %v1782_v42 = vmul.f32 %v2495_v30, %v3036_v62  ;;  %2514 = vrcp.f32 %v1595_v24  ;;  %v2007_v43 = vmul.f32 -1.442695, %v3157_v26  ;;  %v2253_v46 = vpop.f32.mrb[30].mxu0  ;;  %v1279_v50 = vmul.f32 %v2966_v18, %v1108_v35 }
 0x133   :  { %v573_v40 = vpop.f32.mrb[31].mxu1  ;;  %v2499_v48 = vpop.eup %2498  ;;  %v1780_v49 = vmul.f32 %v2497_v41, %v3040_v3  ;;  %2516 = vrcp.f32 %v1593_v0  ;;  %v1111_v51 = vadd.f32 %v2253_v46, %v2173_v39  ;;  %v1277_v55 = vmul.f32 %v2966_v18, %v1100_v45 }
 0x134   :  { %v1102_v53 = vpop.f32.mrb[31].mxu0  ;;  %v2501_v54 = vpop.eup %2500  ;;  %1846 = vst [vmem:[%s3565_s6 + $0x70] sm:$0xff] %v1782_v42  ;;  %v1783_v62 = vmul.f32 %v2499_v48, %v3045_v7  ;;  %2518 = vpow2.f32 %v2008_v19  ;;  %v3174_v63 = vadd.f32 %v2971_v23, %v1279_v50 }
 0x135   :  { %v1103_v57 = vadd.f32 %v1102_v53, %v573_v40  ;;  %v2503_v60 = vpop.eup %2502  ;;  %1844 = vst [vmem:[%s3565_s6 + $0x60] sm:$0xff] %v1780_v49  ;;  %v1781_v3 = vmul.f32 %v2501_v54, %v3049_v11  ;;  %2520 = vpow2.f32 %v2006_v25  ;;  %v1280_v1 = vmul.f32 %v2966_v18, %v1111_v51  ;;  %v2176_v22 = vpop.f32.mrb[32].mxu1 }
 0x136   :  { %v2505_v2 = vpop.eup %2504  ;;  %1847 = vst [vmem:[%s3565_s6 + $0x78] sm:$0xff] %v1783_v62  ;;  %v1598_v7 = vadd.f32 1.0, %v2503_v60  ;;  %2522 = vpow2.f32 %v2009_v33  ;;  %v3181_v4 = vadd.f32 %v2971_v23, %v1277_v55  ;;  %v2012_v12 = vmul.f32 -1.442695, %v3174_v63  ;;  %v2256_v14 = vpop.f32.mrb[32].mxu0 }
 0x137   :  { %v1278_v5 = vmul.f32 %v2966_v18, %v1103_v57  ;;  %v2507_v6 = vpop.eup %2506  ;;  %1845 = vst [vmem:[%s3565_s6 + $0x68] sm:$0xff] %v1781_v3  ;;  %v1596_v11 = vadd.f32 1.0, %v2505_v2  ;;  %2524 = vpow2.f32 %v2007_v43  ;;  %v3188_v8 = vadd.f32 %v2971_v23, %v1280_v1  ;;  %v586_v15 = vpop.f32.mrb[33].mxu1 }
 0x138   :  { %v2509_v9 = vpop.eup %2508  ;;  %2526 = vrcp.f32 %v1598_v7  ;;  %v1599_v10 = vadd.f32 1.0, %v2507_v6  ;;  %v2010_v56 = vmul.f32 -1.442695, %v3181_v4  ;;  %v1124_v17 = vadd.f32 %v2256_v14, %v2176_v22  ;;  %v1115_v36 = vpop.f32.mrb[33].mxu0 }
 0x139   :  { %v3192_v27 = vadd.f32 %v2971_v23, %v1278_v5  ;;  %2528 = vrcp.f32 %v1596_v11  ;;  %v1597_v31 = vadd.f32 1.0, %v2509_v9  ;;  %v2177_v19 = vpop.f32.mrb[34].mxu1  ;;  %v2013_v58 = vmul.f32 -1.442695, %v3188_v8  ;;  %v2257_v61 = vpop.f32.mrb[34].mxu0 }
 0x13a   :  { %v2511_v21 = vpop.eup %2510  ;;  %2530 = vrcp.f32 %v1599_v10  ;;  %v1116_v25 = vadd.f32 %v1115_v36, %v586_v15  ;;  %v589_v29 = vpop.f32.mrb[35].mxu1  ;;  %v1283_v33 = vmul.f32 %v2966_v18, %v1124_v17  ;;  %v1127_v35 = vadd.f32 %v2257_v61, %v2177_v19 }
 0x13b   :  { %v2011_v24 = vmul.f32 -1.442695, %v3192_v27  ;;  %v2513_v30 = vpop.eup %2512  ;;  %v1786_v0 = vmul.f32 %v2511_v21, %v3069_v44  ;;  %2532 = vrcp.f32 %v1597_v31  ;;  %v1118_v38 = vpop.f32.mrb[35].mxu0 }
 0x13c   :  { %v2515_v39 = vpop.eup %2514  ;;  %v1784_v41 = vmul.f32 %v2513_v30, %v3076_v47  ;;  %2534 = vpow2.f32 %v2012_v12  ;;  %v1281_v42 = vmul.f32 %v2966_v18, %v1116_v25  ;;  %v1119_v43 = vadd.f32 %v1118_v38, %v589_v29 }
 0x13d   :  { %v2517_v45 = vpop.eup %2516  ;;  %1850 = vst [vmem:[%s3565_s6 + $0x90] sm:$0xff] %v1786_v0  ;;  %v1787_v46 = vmul.f32 %v2515_v39, %v3081_v52  ;;  %2536 = vpow2.f32 %v2010_v56  ;;  %v3206_v44 = vadd.f32 %v2971_v23, %v1283_v33  ;;  %v1284_v40 = vmul.f32 %v2966_v18, %v1127_v35  ;;  %v2180_v62 = vpop.f32.mrb[36].mxu1 }
 0x13e   :  { %v2519_v48 = vpop.eup %2518  ;;  %1848 = vst [vmem:[%s3565_s6 + $0x80] sm:$0xff] %v1784_v41  ;;  %v1785_v47 = vmul.f32 %v2517_v45, %v3085_v59  ;;  %2538 = vpow2.f32 %v2013_v58  ;;  %v3214_v49 = vadd.f32 %v2971_v23, %v1281_v42  ;;  %v1282_v50 = vmul.f32 %v2966_v18, %v1119_v43  ;;  %v2260_v3 = vpop.f32.mrb[36].mxu0 }
 0x13f   :  { %v2521_v52 = vpop.eup %2520  ;;  %1851 = vst [vmem:[%s3565_s6 + $0x98] sm:$0xff] %v1787_v46  ;;  %v1602_v51 = vadd.f32 1.0, %v2519_v48  ;;  %2540 = vpow2.f32 %v2011_v24  ;;  %v2016_v53 = vmul.f32 -1.442695, %v3206_v44  ;;  %v3222_v54 = vadd.f32 %v2971_v23, %v1284_v40  ;;  %v602_v1 = vpop.f32.mrb[37].mxu1 }
 0x140   :  { %v2523_v59 = vpop.eup %2522  ;;  %1849 = vst [vmem:[%s3565_s6 + $0x88] sm:$0xff] %v1785_v47  ;;  %v1600_v55 = vadd.f32 1.0, %v2521_v52  ;;  %v2014_v57 = vmul.f32 -1.442695, %v3214_v49  ;;  %v3229_v60 = vadd.f32 %v2971_v23, %v1282_v50  ;;  %v1140_v6 = vadd.f32 %v2260_v3, %v2180_v62  ;;  %v1131_v11 = vpop.f32.mrb[37].mxu0 }
 0x141   :  { %v2525_v2 = vpop.eup %2524  ;;  %2542 = vrcp.f32 %v1602_v51  ;;  %v1603_v7 = vadd.f32 1.0, %v2523_v59  ;;  %v2017_v5 = vmul.f32 -1.442695, %v3222_v54  ;;  %v2181_v22 = vpop.f32.mrb[38].mxu1  ;;  %v1132_v14 = vadd.f32 %v1131_v11, %v602_v1 }
 0x142   :  { %v2527_v9 = vpop.eup %2526  ;;  %2544 = vrcp.f32 %v1600_v55  ;;  %v1601_v10 = vadd.f32 1.0, %v2525_v2  ;;  %v2015_v12 = vmul.f32 -1.442695, %v3229_v60  ;;  %v2261_v15 = vpop.f32.mrb[38].mxu0  ;;  %v1287_v36 = vmul.f32 %v2966_v18, %v1140_v6 }
 0x143   :  { %v605_v31 = vpop.f32.mrb[39].mxu1  ;;  %v2529_v56 = vpop.eup %2528  ;;  %v1790_v17 = vmul.f32 %v2527_v9, %v3105_v28  ;;  %2546 = vrcp.f32 %v1603_v7  ;;  %v1143_v19 = vadd.f32 %v2261_v15, %v2181_v22  ;;  %v1285_v25 = vmul.f32 %v2966_v18, %v1132_v14 }
 0x144   :  { %v1134_v21 = vpop.f32.mrb[39].mxu0  ;;  %v2531_v58 = vpop.eup %2530  ;;  %v1788_v24 = vmul.f32 %v2529_v56, %v3112_v32  ;;  %2548 = vrcp.f32 %v1601_v10  ;;  %v3242_v28 = vadd.f32 %v2971_v23, %v1287_v36 }
 0x145   :  { %v1135_v61 = vadd.f32 %v1134_v21, %v605_v31  ;;  %v2533_v29 = vpop.eup %2532  ;;  %1854 = vst [vmem:[%s3565_s6 + $0xb0] sm:$0xff] %v1790_v17  ;;  %v1791_v30 = vmul.f32 %v2531_v58, %v3117_v34  ;;  %2550 = vpow2.f32 %v2016_v53  ;;  %v1288_v0 = vmul.f32 %v2966_v18, %v1143_v19  ;;  %v2184_v42 = vpop.f32.mrb[40].mxu1 }
 0x146   :  { %v2535_v33 = vpop.eup %2534  ;;  %1852 = vst [vmem:[%s3565_s6 + $0xa0] sm:$0xff] %v1788_v24  ;;  %v1789_v32 = vmul.f32 %v2533_v29, %v3121_v37  ;;  %2552 = vpow2.f32 %v2014_v57  ;;  %v3250_v35 = vadd.f32 %v2971_v23, %v1285_v25  ;;  %v2020_v45 = vmul.f32 -1.442695, %v3242_v28  ;;  %v2264_v40 = vpop.f32.mrb[40].mxu0 }
 0x147   :  { %v1286_v38 = vmul.f32 %v2966_v18, %v1135_v61  ;;  %v2537_v34 = vpop.eup %2536  ;;  %1855 = vst [vmem:[%s3565_s6 + $0xb8] sm:$0xff] %v1791_v30  ;;  %v1606_v39 = vadd.f32 1.0, %v2535_v33  ;;  %2554 = vpow2.f32 %v2017_v5  ;;  %v3257_v41 = vadd.f32 %v2971_v23, %v1288_v0  ;;  %v618_v48 = vpop.f32.mrb[41].mxu1 }
 0x148   :  { %v2539_v43 = vpop.eup %2538  ;;  %1853 = vst [vmem:[%s3565_s6 + $0xa8] sm:$0xff] %v1789_v32  ;;  %v1604_v37 = vadd.f32 1.0, %v2537_v34  ;;  %2556 = vpow2.f32 %v2015_v12  ;;  %v2018_v52 = vmul.f32 -1.442695, %v3250_v35  ;;  %v1156_v51 = vadd.f32 %v2264_v40, %v2184_v42  ;;  %v1147_v53 = vpop.f32.mrb[41].mxu0 }
 0x149   :  { %v3264_v46 = vadd.f32 %v2971_v23, %v1286_v38  ;;  %v2541_v47 = vpop.eup %2540  ;;  %2558 = vrcp.f32 %v1606_v39  ;;  %v1607_v50 = vadd.f32 1.0, %v2539_v43  ;;  %v2185_v62 = vpop.f32.mrb[42].mxu1  ;;  %v2021_v55 = vmul.f32 -1.442695, %v3257_v41 }
 0x14a   :  { %2560 = vrcp.f32 %v1604_v37  ;;  %v1605_v59 = vadd.f32 1.0, %v2541_v47  ;;  %v1148_v57 = vadd.f32 %v1147_v53, %v618_v48  ;;  %v2265_v3 = vpop.f32.mrb[42].mxu0  ;;  %v621_v1 = vpop.f32.mrb[43].mxu1  ;;  %v1291_v5 = vmul.f32 %v2966_v18, %v1156_v51 }
 0x14b   :  { %v2543_v2 = vpop.eup %2542  ;;  %2562 = vrcp.f32 %v1607_v50  ;;  %v2019_v7 = vmul.f32 -1.442695, %v3264_v46  ;;  %v1159_v6 = vadd.f32 %v2265_v3, %v2185_v62  ;;  %v1150_v11 = vpop.f32.mrb[43].mxu0 }
 0x14c   :  { %v2545_v22 = vpop.eup %2544  ;;  %v1794_v9 = vmul.f32 %v2543_v2, %v3138_v13  ;;  %2564 = vrcp.f32 %v1605_v59  ;;  %v1289_v10 = vmul.f32 %v2966_v18, %v1148_v57  ;;  %v1151_v12 = vadd.f32 %v1150_v11, %v621_v1 }
 0x14d   :  { %v2547_v14 = vpop.eup %2546  ;;  %v1792_v15 = vmul.f32 %v2545_v22, %v3145_v16  ;;  %2566 = vpow2.f32 %v2020_v45  ;;  %v3274_v31 = vadd.f32 %v2971_v23, %v1291_v5  ;;  %v1292_v56 = vmul.f32 %v2966_v18, %v1159_v6 }
 0x14e   :  { %v2549_v17 = vpop.eup %2548  ;;  %1858 = vst [vmem:[%s3565_s6 + $0xd0] sm:$0xff] %v1794_v9  ;;  %v1795_v13 = vmul.f32 %v2547_v14, %v3153_v20  ;;  %2568 = vpow2.f32 %v2018_v52  ;;  %v3282_v36 = vadd.f32 %v2971_v23, %v1289_v10  ;;  %v1290_v19 = vmul.f32 %v2966_v18, %v1151_v12  ;;  %v2188_v20 = vpop.f32.mrb[44].mxu1 }
 0x14f   :  { %v2551_v16 = vpop.eup %2550  ;;  %1856 = vst [vmem:[%s3565_s6 + $0xc0] sm:$0xff] %v1792_v15  ;;  %v1793_v21 = vmul.f32 %v2549_v17, %v3157_v26  ;;  %2570 = vpow2.f32 %v2021_v55  ;;  %v2024_v58 = vmul.f32 -1.442695, %v3274_v31  ;;  %v3291_v24 = vadd.f32 %v2971_v23, %v1292_v56  ;;  %v2268_v26 = vpop.f32.mrb[44].mxu0  ;;  %v3310_v55 = vld [vmem:[%s3563_s4] ss:$0 sm:$0xff] }
 0x150   :  { %v2553_v25 = vpop.eup %2552  ;;  %1859 = vst [vmem:[%s3565_s6 + $0xd8] sm:$0xff] %v1795_v13  ;;  %v1610_v61 = vadd.f32 1.0, %v2551_v16  ;;  %2572 = vpow2.f32 %v2019_v7  ;;  %v2022_v29 = vmul.f32 -1.442695, %v3282_v36  ;;  %v3298_v30 = vadd.f32 %v2971_v23, %v1290_v19  ;;  %v634_v0 = vpop.f32.mrb[45].mxu1 }
 0x151   :  { %v2555_v33 = vpop.eup %2554  ;;  %1857 = vst [vmem:[%s3565_s6 + $0xc8] sm:$0xff] %v1793_v21  ;;  %v1608_v32 = vadd.f32 1.0, %v2553_v25  ;;  %2574 = vpow2.f32 %v2024_v58  ;;  %v2025_v38 = vmul.f32 -1.442695, %v3291_v24  ;;  %v1172_v34 = vadd.f32 %v2268_v26, %v2188_v20  ;;  %v1163_v39 = vpop.f32.mrb[45].mxu0 }
 0x152   :  { %v2189_v42 = vpop.f32.mrb[46].mxu1  ;;  %v2557_v43 = vpop.eup %2556  ;;  %2576 = vrcp.f32 %v1610_v61  ;;  %v1611_v37 = vadd.f32 1.0, %v2555_v33  ;;  %v2023_v23 = vmul.f32 -1.442695, %v3298_v30  ;;  %v1164_v45 = vadd.f32 %v1163_v39, %v634_v0 }
 0x153   :  { %v2269_v40 = vpop.f32.mrb[46].mxu0  ;;  %v637_v48 = vpop.f32.mrb[47].mxu1  ;;  %2578 = vrcp.f32 %v1608_v32  ;;  %v1609_v50 = vadd.f32 1.0, %v2557_v43  ;;  %v1295_v52 = vmul.f32 %v2966_v18, %v1172_v34  ;;  %v3317_v18 = vld [vmem:[%s3564_s5] ss:$0 sm:$0xff] }
 0x154   :  { %v2559_v47 = vpop.eup %2558  ;;  %v1175_v51 = vadd.f32 %v2269_v40, %v2189_v42  ;;  %v1166_v53 = vpop.f32.mrb[47].mxu0  ;;  %2580 = vrcp.f32 %v1611_v37  ;;  %v1293_v57 = vmul.f32 %v3310_v55, %v1164_v45 }
 0x155   :  { %v2561_v62 = vpop.eup %2560  ;;  %v1798_v59 = vmul.f32 %v2559_v47, %v3174_v63  ;;  %v1167_v3 = vadd.f32 %v1166_v53, %v637_v48  ;;  %2582 = vrcp.f32 %v1609_v50  ;;  %v3320_v63 = vadd.f32 %v3317_v18, %v1295_v52 }
 0x156   :  { %v2563_v1 = vpop.eup %2562  ;;  %v1796_v2 = vmul.f32 %v2561_v62, %v3181_v4  ;;  %v1296_v7 = vmul.f32 %v3310_v55, %v1175_v51  ;;  %2584 = vpow2.f32 %v2022_v29  ;;  %v3328_v4 = vadd.f32 %v3317_v18, %v1293_v57 }
 0x157   :  { %v2565_v5 = vpop.eup %2564  ;;  %1862 = vst [vmem:[%s3565_s6 + $0xf0] sm:$0xff] %v1798_v59  ;;  %v1799_v6 = vmul.f32 %v2563_v1, %v3188_v8  ;;  %v1294_v11 = vmul.f32 %v3310_v55, %v1167_v3  ;;  %2586 = vpow2.f32 %v2025_v38  ;;  %v2028_v10 = vmul.f32 -1.442695, %v3320_v63  ;;  %v2192_v8 = vpop.f32.mrb[48].mxu1 }
 0x158   :  { %v2567_v22 = vpop.eup %2566  ;;  %1860 = vst [vmem:[%s3565_s6 + $0xe0] sm:$0xff] %v1796_v2  ;;  %v1797_v9 = vmul.f32 %v2565_v5, %v3192_v27  ;;  %v3337_v12 = vadd.f32 %v3317_v18, %v1296_v7  ;;  %2588 = vpow2.f32 %v2023_v23  ;;  %v2026_v56 = vmul.f32 -1.442695, %v3328_v4  ;;  %v2272_v27 = vpop.f32.mrb[48].mxu0 }
 0x159   :  { %v2569_v14 = vpop.eup %2568  ;;  %1863 = vst [vmem:[%s3565_s6 + $0xf8] sm:$0xff] %v1799_v6  ;;  %v1614_v15 = vadd.f32 1.0, %v2567_v22  ;;  %v3344_v17 = vadd.f32 %v3317_v18, %v1294_v11  ;;  %v650_v13 = vpop.f32.mrb[49].mxu1  ;;  %2590 = vpow2.f32 %v2028_v10  ;;  %v1188_v58 = vadd.f32 %v2272_v27, %v2192_v8 }
 0x15a   :  { %v2571_v19 = vpop.eup %2570  ;;  %1861 = vst [vmem:[%s3565_s6 + $0xe8] sm:$0xff] %v1797_v9  ;;  %v1612_v16 = vadd.f32 1.0, %v2569_v14  ;;  %v2029_v21 = vmul.f32 -1.442695, %v3337_v12  ;;  %v1179_v20 = vpop.f32.mrb[49].mxu0 }
 0x15b   :  { %v2193_v25 = vpop.f32.mrb[50].mxu1  ;;  %v2573_v61 = vpop.eup %2572  ;;  %2592 = vrcp.f32 %v1614_v15  ;;  %v1615_v29 = vadd.f32 1.0, %v2571_v19  ;;  %v2027_v26 = vmul.f32 -1.442695, %v3344_v17  ;;  %v1180_v0 = vadd.f32 %v1179_v20, %v650_v13 }
 0x15c   :  { %v2273_v33 = vpop.f32.mrb[50].mxu0  ;;  %v653_v32 = vpop.f32.mrb[51].mxu1  ;;  %2594 = vrcp.f32 %v1612_v16  ;;  %v1613_v34 = vadd.f32 1.0, %v2573_v61  ;;  %v1299_v39 = vmul.f32 %v3310_v55, %v1188_v58 }
 0x15d   :  { %v2575_v38 = vpop.eup %2574  ;;  %v1191_v42 = vadd.f32 %v2273_v33, %v2193_v25  ;;  %v1182_v43 = vpop.f32.mrb[51].mxu0  ;;  %2596 = vrcp.f32 %v1615_v29  ;;  %v1297_v45 = vmul.f32 %v3310_v55, %v1180_v0 }
 0x15e   :  { %v2577_v37 = vpop.eup %2576  ;;  %v1618_v23 = vadd.f32 1.0, %v2575_v38  ;;  %v1183_v40 = vadd.f32 %v1182_v43, %v653_v32  ;;  %2598 = vrcp.f32 %v1613_v34  ;;  %v3355_v50 = vadd.f32 %v3317_v18, %v1299_v39 }
 0x15f   :  { %v2579_v48 = vpop.eup %2578  ;;  %v1802_v47 = vmul.f32 %v2577_v37, %v3206_v44  ;;  %v1300_v52 = vmul.f32 %v3310_v55, %v1191_v42  ;;  %v3360_v62 = vadd.f32 %v3317_v18, %v1297_v45 }
 0x160   :  { %v2581_v51 = vpop.eup %2580  ;;  %v1800_v53 = vmul.f32 %v2579_v48, %v3214_v49  ;;  %2600 = vrcp.f32 %v1618_v23  ;;  %v1298_v59 = vmul.f32 %v3310_v55, %v1183_v40  ;;  %v2032_v3 = vmul.f32 -1.442695, %v3355_v50  ;;  %v2196_v49 = vpop.f32.mrb[52].mxu1 }
 0x161   :  { %v2583_v57 = vpop.eup %2582  ;;  %1866 = vst [vmem:[%s3565_s6 + $0x110] sm:$0xff] %v1802_v47  ;;  %v1803_v44 = vmul.f32 %v2581_v51, %v3222_v54  ;;  %2602 = vpow2.f32 %v2026_v56  ;;  %v3369_v1 = vadd.f32 %v3317_v18, %v1300_v52  ;;  %v2030_v5 = vmul.f32 -1.442695, %v3360_v62  ;;  %v2276_v54 = vpop.f32.mrb[52].mxu0 }
 0x162   :  { %v2585_v2 = vpop.eup %2584  ;;  %1864 = vst [vmem:[%s3565_s6 + $0x100] sm:$0xff] %v1800_v53  ;;  %v1801_v7 = vmul.f32 %v2583_v57, %v3229_v60  ;;  %2604 = vpow2.f32 %v2029_v21  ;;  %v3377_v6 = vadd.f32 %v3317_v18, %v1298_v59  ;;  %v666_v11 = vpop.f32.mrb[53].mxu1  ;;  %v1204_v8 = vadd.f32 %v2276_v54, %v2196_v49 }
 0x163   :  { %v2587_v22 = vpop.eup %2586  ;;  %1867 = vst [vmem:[%s3565_s6 + $0x118] sm:$0xff] %v1803_v44  ;;  %v1616_v9 = vadd.f32 1.0, %v2585_v2  ;;  %2606 = vpow2.f32 %v2027_v26  ;;  %v2033_v10 = vmul.f32 -1.442695, %v3369_v1  ;;  %v1195_v14 = vpop.f32.mrb[53].mxu0 }
 0x164   :  { %v2197_v60 = vpop.f32.mrb[54].mxu1  ;;  %v2589_v15 = vpop.eup %2588  ;;  %1865 = vst [vmem:[%s3565_s6 + $0x108] sm:$0xff] %v1801_v7  ;;  %v1619_v56 = vadd.f32 1.0, %v2587_v22  ;;  %2608 = vpow2.f32 %v2032_v3  ;;  %v2031_v27 = vmul.f32 -1.442695, %v3377_v6  ;;  %v1196_v13 = vadd.f32 %v1195_v14, %v666_v11 }
 0x165   :  { %v2277_v19 = vpop.f32.mrb[54].mxu0  ;;  %v669_v16 = vpop.f32.mrb[55].mxu1  ;;  %2610 = vrcp.f32 %v1616_v9  ;;  %v1617_v58 = vadd.f32 1.0, %v2589_v15  ;;  %v1303_v20 = vmul.f32 %v3310_v55, %v1204_v8 }
 0x166   :  { %v2591_v21 = vpop.eup %2590  ;;  %v1207_v25 = vadd.f32 %v2277_v19, %v2197_v60  ;;  %v1198_v61 = vpop.f32.mrb[55].mxu0  ;;  %2612 = vrcp.f32 %v1619_v56  ;;  %v1301_v0 = vmul.f32 %v3310_v55, %v1196_v13 }
 0x167   :  { %v2593_v29 = vpop.eup %2592  ;;  %v1622_v26 = vadd.f32 1.0, %v2591_v21  ;;  %v1199_v33 = vadd.f32 %v1198_v61, %v669_v16  ;;  %2614 = vrcp.f32 %v1617_v58  ;;  %v3391_v34 = vadd.f32 %v3317_v18, %v1303_v20 }
 0x168   :  { %v2595_v32 = vpop.eup %2594  ;;  %v1806_v38 = vmul.f32 %v2593_v29, %v3242_v28  ;;  %v1304_v39 = vmul.f32 %v3310_v55, %v1207_v25  ;;  %v3396_v37 = vadd.f32 %v3317_v18, %v1301_v0 }
 0x169   :  { %v2597_v42 = vpop.eup %2596  ;;  %v1804_v43 = vmul.f32 %v2595_v32, %v3250_v35  ;;  %2616 = vrcp.f32 %v1622_v26  ;;  %v1302_v23 = vmul.f32 %v3310_v55, %v1199_v33  ;;  %v2036_v40 = vmul.f32 -1.442695, %v3391_v34  ;;  %v2200_v35 = vpop.f32.mrb[56].mxu1 }
 0x16a   :  { %v2599_v45 = vpop.eup %2598  ;;  %1870 = vst [vmem:[%s3565_s6 + $0x130] sm:$0xff] %v1806_v38  ;;  %v1807_v28 = vmul.f32 %v2597_v42, %v3257_v41  ;;  %2618 = vpow2.f32 %v2030_v5  ;;  %v3405_v48 = vadd.f32 %v3317_v18, %v1304_v39  ;;  %v2034_v51 = vmul.f32 -1.442695, %v3396_v37  ;;  %v2280_v41 = vpop.f32.mrb[56].mxu0 }
 0x16b   :  { %v2601_v47 = vpop.eup %2600  ;;  %1868 = vst [vmem:[%s3565_s6 + $0x120] sm:$0xff] %v1804_v43  ;;  %v1805_v52 = vmul.f32 %v2599_v45, %v3264_v46  ;;  %2620 = vpow2.f32 %v2033_v10  ;;  %v3413_v53 = vadd.f32 %v3317_v18, %v1302_v23  ;;  %v682_v59 = vpop.f32.mrb[57].mxu1  ;;  %v1220_v49 = vadd.f32 %v2280_v41, %v2200_v35 }
 0x16c   :  { %v2603_v57 = vpop.eup %2602  ;;  %1871 = vst [vmem:[%s3565_s6 + $0x138] sm:$0xff] %v1807_v28  ;;  %v1810_v44 = vmul.f32 %v2601_v47, %v3274_v31  ;;  %2622 = vpow2.f32 %v2031_v27  ;;  %v2037_v3 = vmul.f32 -1.442695, %v3405_v48  ;;  %v1211_v46 = vpop.f32.mrb[57].mxu0 }
 0x16d   :  { %v2201_v2 = vpop.f32.mrb[58].mxu1  ;;  %v2605_v7 = vpop.eup %2604  ;;  %1869 = vst [vmem:[%s3565_s6 + $0x128] sm:$0xff] %v1805_v52  ;;  %v1620_v5 = vadd.f32 1.0, %v2603_v57  ;;  %2624 = vpow2.f32 %v2036_v40  ;;  %v2035_v54 = vmul.f32 -1.442695, %v3413_v53  ;;  %v1212_v11 = vadd.f32 %v1211_v46, %v682_v59 }
 0x16e   :  { %v2281_v22 = vpop.f32.mrb[58].mxu0  ;;  %v685_v9 = vpop.f32.mrb[59].mxu1  ;;  %1874 = vst [vmem:[%s3565_s6 + $0x150] sm:$0xff] %v1810_v44  ;;  %v1623_v31 = vadd.f32 1.0, %v2605_v7  ;;  %2626 = vpow2.f32 %v2034_v51  ;;  %v1307_v8 = vmul.f32 %v3310_v55, %v1220_v49 }
 0x16f   :  { %v2607_v10 = vpop.eup %2606  ;;  %v1223_v14 = vadd.f32 %v2281_v22, %v2201_v2  ;;  %v1214_v60 = vpop.f32.mrb[59].mxu0  ;;  %2628 = vrcp.f32 %v1620_v5  ;;  %v1305_v27 = vmul.f32 %v3310_v55, %v1212_v11 }
 0x170   :  { %v2609_v15 = vpop.eup %2608  ;;  %v1621_v56 = vadd.f32 1.0, %v2607_v10  ;;  %v1215_v13 = vadd.f32 %v1214_v60, %v685_v9  ;;  %2630 = vrcp.f32 %v1623_v31  ;;  %v3430_v21 = vadd.f32 %v3317_v18, %v1307_v8  ;;  %v2204_v38 = vpop.f32.mrb[60].mxu1 }
 0x171   :  { %v2611_v19 = vpop.eup %2610  ;;  %v1626_v16 = vadd.f32 1.0, %v2609_v15  ;;  %v1308_v58 = vmul.f32 %v3310_v55, %v1223_v14  ;;  %v3435_v61 = vadd.f32 %v3317_v18, %v1305_v27  ;;  %v698_v23 = vpop.f32.mrb[61].mxu1 }
 0x172   :  { %v2613_v20 = vpop.eup %2612  ;;  %v1808_v25 = vmul.f32 %v2611_v19, %v3282_v36  ;;  %2632 = vrcp.f32 %v1621_v56  ;;  %v1306_v29 = vmul.f32 %v3310_v55, %v1215_v13  ;;  %v2040_v33 = vmul.f32 -1.442695, %v3430_v21  ;;  %v2205_v47 = vpop.f32.mrb[62].mxu1 }
 0x173   :  { %v2615_v26 = vpop.eup %2614  ;;  %v1811_v0 = vmul.f32 %v2613_v20, %v3291_v24  ;;  %2634 = vrcp.f32 %v1626_v16  ;;  %v3441_v32 = vadd.f32 %v3317_v18, %v1308_v58  ;;  %v2038_v42 = vmul.f32 -1.442695, %v3435_v61  ;;  %v2284_v24 = vpop.f32.mrb[60].mxu0 }
 0x174   :  { %v2617_v39 = vpop.eup %2616  ;;  %1872 = vst [vmem:[%s3565_s6 + $0x140] sm:$0xff] %v1808_v25  ;;  %v1809_v36 = vmul.f32 %v2615_v26, %v3298_v30  ;;  %2636 = vpow2.f32 %v2037_v3  ;;  %v3449_v43 = vadd.f32 %v3317_v18, %v1306_v29  ;;  %v1236_v35 = vadd.f32 %v2284_v24, %v2204_v38  ;;  %v1227_v30 = vpop.f32.mrb[61].mxu0 }
 0x175   :  { %v2619_v45 = vpop.eup %2618  ;;  %1875 = vst [vmem:[%s3565_s6 + $0x158] sm:$0xff] %v1811_v0  ;;  %v1814_v28 = vmul.f32 %v2617_v39, %v3320_v63  ;;  %2638 = vpow2.f32 %v2035_v54  ;;  %v2041_v40 = vmul.f32 -1.442695, %v3441_v32  ;;  %v1228_v59 = vadd.f32 %v1227_v30, %v698_v23  ;;  %v2285_v57 = vpop.f32.mrb[62].mxu0 }
 0x176   :  { %v2621_v52 = vpop.eup %2620  ;;  %1873 = vst [vmem:[%s3565_s6 + $0x148] sm:$0xff] %v1809_v36  ;;  %v1624_v51 = vadd.f32 1.0, %v2619_v45  ;;  %2640 = vpow2.f32 %v2040_v33  ;;  %v2039_v41 = vmul.f32 -1.442695, %v3449_v43  ;;  %v701_v44 = vpop.f32.mrb[63].mxu1  ;;  %v1311_v49 = vmul.f32 %v3310_v55, %v1236_v35 }
 0x177   :  { %v2623_v3 = vpop.eup %2622  ;;  %1878 = vst [vmem:[%s3565_s6 + $0x170] sm:$0xff] %v1814_v28  ;;  %v1627_v63 = vadd.f32 1.0, %v2621_v52  ;;  %2642 = vpow2.f32 %v2038_v42  ;;  %v1239_v46 = vadd.f32 %v2285_v57, %v2205_v47  ;;  %v1230_v2 = vpop.f32.mrb[63].mxu0  ;;  %v1309_v54 = vmul.f32 %v3310_v55, %v1228_v59 }
 0x178   :  { %v2625_v7 = vpop.eup %2624  ;;  %2644 = vrcp.f32 %v1624_v51  ;;  %v1625_v5 = vadd.f32 1.0, %v2623_v3  ;;  %v1231_v11 = vadd.f32 %v1230_v2, %v701_v44  ;;  %v3466_v10 = vadd.f32 %v3317_v18, %v1311_v49 }
 0x179   :  { %v2627_v22 = vpop.eup %2626  ;;  %2646 = vrcp.f32 %v1627_v63  ;;  %v1630_v9 = vadd.f32 1.0, %v2625_v7  ;;  %v1312_v31 = vmul.f32 %v3310_v55, %v1239_v46  ;;  %v3470_v60 = vadd.f32 %v3317_v18, %v1309_v54 }
 0x17a   :  { %v2629_v8 = vpop.eup %2628  ;;  %2648 = vrcp.f32 %v1625_v5  ;;  %v1628_v14 = vadd.f32 1.0, %v2627_v22  ;;  %v1310_v15 = vmul.f32 %v3310_v55, %v1231_v11  ;;  %v2044_v13 = vmul.f32 -1.442695, %v3466_v10 }
 0x17b   :  { %v2631_v56 = vpop.eup %2630  ;;  %v1812_v27 = vmul.f32 %v2629_v8, %v3328_v4  ;;  %2650 = vrcp.f32 %v1630_v9  ;;  %v2042_v58 = vmul.f32 -1.442695, %v3470_v60  ;;  %v3482_v55 = vadd.f32 %v3317_v18, %v1312_v31 }
 0x17c   :  { %v2633_v19 = vpop.eup %2632  ;;  %v1815_v16 = vmul.f32 %v2631_v56, %v3337_v12  ;;  %2652 = vrcp.f32 %v1628_v14  ;;  %v3489_v29 = vadd.f32 %v3317_v18, %v1310_v15 }
 0x17d   :  { %v2635_v20 = vpop.eup %2634  ;;  %1876 = vst [vmem:[%s3565_s6 + $0x160] sm:$0xff] %v1812_v27  ;;  %v1813_v25 = vmul.f32 %v2633_v19, %v3344_v17  ;;  %2654 = vpow2.f32 %v2041_v40  ;;  %v2045_v18 = vmul.f32 -1.442695, %v3482_v55 }
 0x17e   :  { %v2637_v4 = vpop.eup %2636  ;;  %1879 = vst [vmem:[%s3565_s6 + $0x178] sm:$0xff] %v1815_v16  ;;  %v1818_v12 = vmul.f32 %v2635_v20, %v3355_v50  ;;  %2656 = vpow2.f32 %v2039_v41  ;;  %v2043_v42 = vmul.f32 -1.442695, %v3489_v29 }
 0x17f   :  { %v2639_v26 = vpop.eup %2638  ;;  %1877 = vst [vmem:[%s3565_s6 + $0x168] sm:$0xff] %v1813_v25  ;;  %v1631_v17 = vadd.f32 1.0, %v2637_v4  ;;  %2658 = vpow2.f32 %v2044_v13 }
 0x180   :  { %v2641_v0 = vpop.eup %2640  ;;  %1882 = vst [vmem:[%s3565_s6 + $0x190] sm:$0xff] %v1818_v12  ;;  %v1629_v33 = vadd.f32 1.0, %v2639_v26  ;;  %2660 = vpow2.f32 %v2042_v58 }
 0x181   :  { %v2643_v38 = vpop.eup %2642  ;;  %2662 = vrcp.f32 %v1631_v17  ;;  %v1634_v50 = vadd.f32 1.0, %v2641_v0 }
 0x182   :  { %v2645_v39 = vpop.eup %2644  ;;  %2664 = vrcp.f32 %v1629_v33  ;;  %v1632_v36 = vadd.f32 1.0, %v2643_v38 }
 0x183   :  { %v2647_v24 = vpop.eup %2646  ;;  %v1816_v23 = vmul.f32 %v2645_v39, %v3360_v62  ;;  %2666 = vrcp.f32 %v1634_v50 }
 0x184   :  { %v2649_v45 = vpop.eup %2648  ;;  %v1819_v28 = vmul.f32 %v2647_v24, %v3369_v1  ;;  %2668 = vrcp.f32 %v1632_v36 }
 0x185   :  { %v2651_v40 = vpop.eup %2650  ;;  %1880 = vst [vmem:[%s3565_s6 + $0x180] sm:$0xff] %v1816_v23  ;;  %v1817_v35 = vmul.f32 %v2649_v45, %v3377_v6  ;;  %2670 = vpow2.f32 %v2045_v18 }
 0x186   :  { %v2653_v30 = vpop.eup %2652  ;;  %1883 = vst [vmem:[%s3565_s6 + $0x198] sm:$0xff] %v1819_v28  ;;  %v1822_v62 = vmul.f32 %v2651_v40, %v3391_v34  ;;  %2672 = vpow2.f32 %v2043_v42 }
 0x187   :  { %v2655_v47 = vpop.eup %2654  ;;  %1881 = vst [vmem:[%s3565_s6 + $0x188] sm:$0xff] %v1817_v35  ;;  %v1820_v1 = vmul.f32 %v2653_v30, %v3396_v37 }
 0x188   :  { %v2657_v52 = vpop.eup %2656  ;;  %1886 = vst [vmem:[%s3565_s6 + $0x1b0] sm:$0xff] %v1822_v62  ;;  %v1635_v6 = vadd.f32 1.0, %v2655_v47 }
 0x189   :  { %v2659_v51 = vpop.eup %2658  ;;  %1884 = vst [vmem:[%s3565_s6 + $0x1a0] sm:$0xff] %v1820_v1  ;;  %v1633_v34 = vadd.f32 1.0, %v2657_v52 }
 0x18a   :  { %v2661_v41 = vpop.eup %2660  ;;  %2674 = vrcp.f32 %v1635_v6  ;;  %v1638_v59 = vadd.f32 1.0, %v2659_v51 }
 0x18b   :  { %v2663_v57 = vpop.eup %2662  ;;  %2676 = vrcp.f32 %v1633_v34  ;;  %v1636_v44 = vadd.f32 1.0, %v2661_v41 }
 0x18c   :  { %v2665_v3 = vpop.eup %2664  ;;  %v1823_v37 = vmul.f32 %v2663_v57, %v3405_v48  ;;  %2678 = vrcp.f32 %v1638_v59 }
 0x18d   :  { %v2667_v63 = vpop.eup %2666  ;;  %v1821_v49 = vmul.f32 %v2665_v3, %v3413_v53  ;;  %2680 = vrcp.f32 %v1636_v44 }
 0x18e   :  { %v2669_v46 = vpop.eup %2668  ;;  %1887 = vst [vmem:[%s3565_s6 + $0x1b8] sm:$0xff] %v1823_v37  ;;  %v1826_v2 = vmul.f32 %v2667_v63, %v3430_v21 }
 0x18f   :  { %v2671_v7 = vpop.eup %2670  ;;  %1885 = vst [vmem:[%s3565_s6 + $0x1a8] sm:$0xff] %v1821_v49  ;;  %v1824_v5 = vmul.f32 %v2669_v46, %v3435_v61 }
 0x190   :  { %v2673_v48 = vpop.eup %2672  ;;  %1890 = vst [vmem:[%s3565_s6 + $0x1d0] sm:$0xff] %v1826_v2  ;;  %v1639_v53 = vadd.f32 1.0, %v2671_v7 }
 0x191   :  { %1888 = vst [vmem:[%s3565_s6 + $0x1c0] sm:$0xff] %v1824_v5  ;;  %v1637_v54 = vadd.f32 1.0, %v2673_v48 }
 0x192   :  { %2682 = vrcp.f32 %v1639_v53 }
 0x193   :  { %2684 = vrcp.f32 %v1637_v54 }
 0x194   :  { %v2675_v21 = vpop.eup %2674 }
 0x195   :  { %v2677_v11 = vpop.eup %2676  ;;  %v1827_v22 = vmul.f32 %v2675_v21, %v3441_v32 }
 0x196   :  { %v2679_v9 = vpop.eup %2678  ;;  %v1825_v61 = vmul.f32 %v2677_v11, %v3449_v43 }
 0x197   :  { %v2681_v31 = vpop.eup %2680  ;;  %1891 = vst [vmem:[%s3565_s6 + $0x1d8] sm:$0xff] %v1827_v22  ;;  %v1830_v8 = vmul.f32 %v2679_v9, %v3466_v10 }
 0x198   :  { %1889 = vst [vmem:[%s3565_s6 + $0x1c8] sm:$0xff] %v1825_v61  ;;  %v1828_v14 = vmul.f32 %v2681_v31, %v3470_v60 }
 0x199   :  { %1894 = vst [vmem:[%s3565_s6 + $0x1f0] sm:$0xff] %v1830_v8 }
 0x19a   :  { %1892 = vst [vmem:[%s3565_s6 + $0x1e0] sm:$0xff] %v1828_v14 }
 0x19c   :  { %v2683_v32 = vpop.eup %2682 }
 0x19d   :  { %v2685_v43 = vpop.eup %2684  ;;  %v1831_v15 = vmul.f32 %v2683_v32, %v3482_v55 }
 0x19e   :  { %v1829_v10 = vmul.f32 %v2685_v43, %v3489_v29 }
 0x19f   :  { %1895 = vst [vmem:[%s3565_s6 + $0x1f8] sm:$0xff] %v1831_v15 }
 0x1a0   :  { %1893 = vst [vmem:[%s3565_s6 + $0x1e8] sm:$0xff] %v1829_v10 }

</bundles_post_ra>
